<compile_context>
chip_gen: v5e
topology: v5e:2x2
jax: 0.10.0
libtpu: 0.0.40
codegen_flags: <defaults>
</compile_context>

<pallas_src>
import jax
import jax.numpy as jnp
from jax.experimental import pallas as pl
from jax.experimental.pallas import tpu as pltpu

_SELU_ALPHA = 1.6732632423543772
_SELU_SCALE = 1.0507009873554805
_BN_EPS = 1e-5


def _selu(x):
    return _SELU_SCALE * jnp.where(
        x > 0, x, _SELU_ALPHA * (jnp.exp(jnp.minimum(x, 0.0)) - 1.0))


def _apply_act(y, act):
    if act == "relu":
        return jnp.maximum(y, 0.0)
    if act == "selu":
        return _selu(y)
    if act == "sigmoid":
        return jax.nn.sigmoid(y)
    return y


# ---------------------------------------------------------------------------
# Kernel 1: fused Linear + activation with INT8 weight streaming.
#   grid = (N/tn [parallel], K/tk [arbitrary / reduction, last]).
#   Output block stays resident over k; zero at k==0, accumulate in f32,
#   apply dequant scale + bias + activation at k==last.
# ---------------------------------------------------------------------------
def _make_int8_linear_kernel(act):
    def kernel(a_ref, w_ref, s_ref, b_ref, o_ref):
        k = pl.program_id(1)

        @pl.when(k == 0)
        def _():
            o_ref[...] = jnp.zeros_like(o_ref)

        # int8 weight tile -> bf16 for the MXU.  Per-column dequant scale is
        # applied only at the finalize, so the per-step cost is one cast.
        w = w_ref[...].astype(jnp.bfloat16)
        o_ref[...] += jnp.dot(a_ref[...], w,
                              preferred_element_type=jnp.float32)

        @pl.when(k == pl.num_programs(1) - 1)
        def _():
            o_ref[...] = _apply_act(o_ref[...] * s_ref[...] + b_ref[...], act)

    return kernel


def quantize_weight_int8(w, tn):
    """(K, N) f32 -> ((N//tn, K, tn) int8 column-blocked, (1, N) f32 scales).

    Per-output-column symmetric max-abs quantization; column blocks are
    contiguous in HBM so every weight DMA is a single contiguous stream.
    """
    K, N = w.shape
    assert N % tn == 0, (N, tn)
    amax = jnp.max(jnp.abs(w), axis=0)
    scale = jnp.maximum(amax, 1e-30) / 127.0
    wq = jnp.clip(jnp.round(w / scale[None, :]), -127.0, 127.0).astype(jnp.int8)
    wq = wq.reshape(K, N // tn, tn).transpose(1, 0, 2)
    return wq, scale.reshape(1, N).astype(jnp.float32)


def pallas_linear_int8(a_bf16, w_q, scale, bias, act="none", tk=None):
    """y = act((a @ dequant(Wq)) + bias); Wq pre-blocked as (nn, K, tn) int8."""
    M, K = a_bf16.shape
    nn, Kw, tn = w_q.shape
    assert K == Kw, (K, Kw)
    N = nn * tn
    if tk is None or K % tk != 0:
        tk = K                     # NOTE: silently falls back to full-K tiles
    nk = K // tk

    # Working set: double-buffered int8 weight tile + bf16 activation tile +
    # the in-kernel bf16 dequantized tile.  Must stay well under scoped VMEM.
    tile_bytes = 2 * tk * tn * 1 + 2 * M * tk * 2 + tk * tn * 2
    assert tile_bytes < 24 * 1024 * 1024, (
        f"tile working set {tile_bytes} B too large; choose a smaller tk")

    bias2 = bias.reshape(1, N).astype(jnp.float32)
    return pl.pallas_call(
        _make_int8_linear_kernel(act),
        out_shape=jax.ShapeDtypeStruct((M, N), jnp.float32),
        grid_spec=pltpu.PrefetchScalarGridSpec(
            num_scalar_prefetch=0,
            grid=(nn, nk),
            in_specs=[
                pl.BlockSpec((M, tk), lambda n, k: (0, k)),
                pl.BlockSpec((None, tk, tn), lambda n, k: (n, k, 0)),
                pl.BlockSpec((1, tn), lambda n, k: (0, n)),
                pl.BlockSpec((1, tn), lambda n, k: (0, n)),
            ],
            out_specs=pl.BlockSpec((M, tn), lambda n, k: (0, n)),
        ),
        compiler_params=pltpu.CompilerParams(
            dimension_semantics=("parallel", "arbitrary"),
            vmem_limit_bytes=32 * 1024 * 1024),
    )(a_bf16, w_q, scale, bias2)


# ---------------------------------------------------------------------------
# Kernel 2: fused GraphConvolution + SELU exploiting the block-structured
# adjacency  adj = [[FC, diag(w)], [diag(w), SC]]:
#   support = x @ W
#   out[:, :80]  = SELU(FC @ S_top + w * S_bot + b)
#   out[:, 80:]  = SELU(w * S_top + SC @ S_bot + b)
# Whole batch (B=2) resident in VMEM; single invocation, no grid.
# ---------------------------------------------------------------------------
def _gcn_block_selu_kernel(x_ref, fc_ref, sc_ref, wv_ref, w_ref, b_ref, o_ref):
    B, N, F = x_ref.shape
    H = w_ref.shape[1]
    half = N // 2

    support = jnp.dot(x_ref[...].reshape(B * N, F), w_ref[...],
                      preferred_element_type=jnp.float32).reshape(B, N, H)
    s_top = support[:, :half, :]
    s_bot = support[:, half:, :]
    wv = wv_ref[...]                      # (B, half, 1) learned diagonal
    b = b_ref[...]                        # (1, H)

    top = jnp.einsum("bij,bjh->bih", fc_ref[...], s_top,
                     preferred_element_type=jnp.float32) + wv * s_bot
    bot = wv * s_top + jnp.einsum("bij,bjh->bih", sc_ref[...], s_bot,
                                  preferred_element_type=jnp.float32)

    o_ref[:, :half, :] = _selu(top + b)
    o_ref[:, half:, :] = _selu(bot + b)


def pallas_gcn_selu(x, fc, sc, wvec, w, bias):
    B, N, F = x.shape
    H = w.shape[1]
    return pl.pallas_call(
        _gcn_block_selu_kernel,
        out_shape=jax.ShapeDtypeStruct((B, N, H), jnp.float32),
    )(x.astype(jnp.float32),
      fc.astype(jnp.float32),
      sc.astype(jnp.float32),
      wvec[:, :, None].astype(jnp.float32),   # (B, 80, 1) — no in-kernel reshape
      w.astype(jnp.float32),
      bias.reshape(1, H).astype(jnp.float32))


# ---------------------------------------------------------------------------
# Parameter construction (deterministic, PyTorch-like shapes / init ranges),
# eval-mode BatchNorm folded into the following Linear, dominant weight
# quantized to int8 column blocks.
# ---------------------------------------------------------------------------
def _fold_bn_into_linear(w, b, gamma, beta, mean, var, eps=_BN_EPS):
    scale = gamma / jnp.sqrt(var + eps)
    shift = beta - mean * scale
    return w * scale[:, None], b + shift @ w


def init_params(key, input_dim, hidden_dim):
    half = input_dim // 2                       # 80
    c_num = half * half * 2                     # 12800
    fc1_in = half * hidden_dim // 2             # 80 * hidden/2 = 1280

    def linear(k, fan_in, fan_out):
        k1, k2 = jax.random.split(k)
        bound = 1.0 / jnp.sqrt(jnp.asarray(fan_in, jnp.float32))
        w = jax.random.uniform(k1, (fan_in, fan_out), jnp.float32, -bound, bound)
        b = jax.random.uniform(k2, (fan_out,), jnp.float32, -bound, bound)
        return w, b

    ks = jax.random.split(key, 4)
    lw1_w, lw1_b = linear(ks[0], c_num, c_num // 20)      # 12800 -> 640
    lw2_w, lw2_b = linear(ks[1], c_num // 20, half)       # 640 -> 80
    gc1_w, gc1_b = linear(ks[2], input_dim, hidden_dim)   # 160 -> H
    k3, k4 = jax.random.split(ks[3])
    fc1_w, fc1_b = linear(k3, fc1_in, 128)                # 1280 -> 128
    fc2_w, fc2_b = linear(k4, 129, 1)                     # 129 -> 1

    # BatchNorm1d at PyTorch eval defaults (gamma=1, beta=0, mean=0, var=1),
    # folded into the Linear that follows it.
    g0 = jnp.ones((c_num,), jnp.float32)
    z0 = jnp.zeros((c_num,), jnp.float32)
    lw1_w, lw1_b = _fold_bn_into_linear(lw1_w, lw1_b, g0, z0, z0, g0)
    g1 = jnp.ones((fc1_in,), jnp.float32)
    z1 = jnp.zeros((fc1_in,), jnp.float32)
    fc1_w, fc1_b = _fold_bn_into_linear(fc1_w, fc1_b, g1, z1, z1, g1)

    # Bandwidth-critical lw1 weight: int8 column blocks (tn=128) + f32 scales.
    lw1_wq, lw1_scale = quantize_weight_int8(lw1_w, tn=128)

    return dict(
        lw1_wq=lw1_wq, lw1_scale=lw1_scale, lw1_b=lw1_b,
        # microscopic weights stay f32 / plain XLA
        lw2_w=lw2_w, lw2_b=lw2_b,
        gc1_w=gc1_w, gc1_b=gc1_b,
        fc1_w=fc1_w, fc1_b=fc1_b,
        fc2_w=fc2_w, fc2_b=fc2_b,
    )


# ---------------------------------------------------------------------------
# Forward pass (mirrors GCN_specific_L_W.forward, eval-mode semantics).
# ---------------------------------------------------------------------------
def gcn_specific_l_w_forward(params, x, joint, scanner_machine,
                             task="sex_predict"):
    FC = joint[:, 0:80, 0:80]
    SC = joint[:, 80:160, 80:160]
    b = FC.shape[0]

    # Exactly reproduces torch.cat([FC, SC], dim=0).view(b, -1) semantics
    # (interleaves samples when b > 1 — preserved on purpose).
    flat = jnp.concatenate([FC, SC], axis=0).reshape(b, -1).astype(jnp.bfloat16)

    hidden = pallas_linear_int8(flat, params["lw1_wq"], params["lw1_scale"],
                                params["lw1_b"], act="relu")          # (b, 640)
    # lw2 / fc1 / fc2 are microscopic -> plain XLA dots (fuse under jit).
    weight = jax.nn.sigmoid(hidden @ params["lw2_w"] + params["lw2_b"])  # (b, 80)

    # Block-structured adjacency handled inside the GCN kernel (no adj
    # materialization): adj = [[FC, diag(weight)], [diag(weight), SC]].
    h = pallas_gcn_selu(x, FC, SC, weight,
                        params["gc1_w"], params["gc1_b"])             # (b, 160, H)
    # Dropout: eval-mode identity (see TODO at top).

    B, N, H = h.shape
    # AvgPool2d(kernel=2, stride=2) over the trailing (nodes, hidden) dims.
    l1 = h.reshape(B, N // 2, 2, H // 2, 2).mean(axis=(2, 4)).reshape(B, -1)

    # fc1 (1280 -> 128): plain XLA (fuses with pool / concat / fc2 tail).
    l2 = _selu(l1 @ params["fc1_w"] + params["fc1_b"])                # (b, 128)
    l2 = jnp.concatenate([l2, scanner_machine.astype(jnp.float32)], axis=1)

    logits = l2 @ params["fc2_w"] + params["fc2_b"]                   # (b, 1)
    out = jax.nn.sigmoid(logits) if task == "sex_predict" else logits
    return out.reshape(out.shape[0])


if __name__ == "__main__":
    INPUT_DIM = 160   # forward() hardcodes the 0:80 / 80:160 split => 160
    HIDDEN_DIM = 32
    B = 2

    key = jax.random.PRNGKey(0)
    kp, kx, kj, ks = jax.random.split(key, 4)

    params = init_params(kp, INPUT_DIM, HIDDEN_DIM)
    x = jax.random.normal(kx, (B, INPUT_DIM, INPUT_DIM), jnp.float32)
    joint = jax.random.normal(kj, (B, INPUT_DIM, INPUT_DIM), jnp.float32)
    scanner_machine = jax.random.normal(ks, (B, 1), jnp.float32)

    fwd = jax.jit(
        lambda p, xx, jj, sm: gcn_specific_l_w_forward(
            p, xx, jj, sm, task="sex_predict"))
    pred = jax.block_until_ready(fwd(params, x, joint, scanner_machine))

    assert pred.shape == (B,), pred.shape
    assert bool(jnp.all(jnp.isfinite(pred)))
    print("KERNEL_OK")
</pallas_src>

<mosaic_0001>
module attributes {stable_mosaic.version = 11 : i64} {
  func.func @kernel(%arg0: i32, %arg1: i32, %arg2: memref<2x12800xbf16, #tpu.memory_space<vmem>>, %arg3: memref<1x12800x128xi8, #tpu.memory_space<vmem>>, %arg4: memref<1x128xf32, #tpu.memory_space<vmem>>, %arg5: memref<1x128xf32, #tpu.memory_space<vmem>>, %arg6: memref<2x128xf32, #tpu.memory_space<vmem>>) attributes {dimension_semantics = [#tpu.dimension_semantics<parallel>, #tpu.dimension_semantics<arbitrary>], iteration_bounds = array<i64: 5, 1>, scalar_prefetch = 0 : i64, scratch_operands = 0 : i64, tpu.core_type = #tpu.core_type<tc>, window_params = [{transform_indices = @transform_0, window_bounds = array<i64: 2, 12800>}, {transform_indices = @transform_1, window_bounds = array<i64: 1, 12800, 128>}, {transform_indices = @transform_2, window_bounds = array<i64: 1, 128>}, {transform_indices = @transform_3, window_bounds = array<i64: 1, 128>}, {transform_indices = @transform_4, window_bounds = array<i64: 2, 128>}]} {
    %c0_i32 = arith.constant 0 : i32
    %0 = arith.cmpi eq, %arg1, %c0_i32 : i32
    %1 = arith.extui %0 : i1 to i32
    %c0_i32_0 = arith.constant 0 : i32
    %2 = arith.cmpi ne, %1, %c0_i32_0 : i32
    scf.if %2 {
      %cst_11 = arith.constant 0.000000e+00 : f32
      %14 = vector.broadcast %cst_11 : f32 to vector<2x128xf32>
      %c0_12 = arith.constant 0 : index
      %c0_13 = arith.constant 0 : index
      %15 = vector.load %arg6[%c0_12, %c0_13] : memref<2x128xf32, #tpu.memory_space<vmem>>, vector<2x128xf32>
      tpu.vector_store %arg6[%c0_12, %c0_13], %14 {strides = array<i32>} : memref<2x128xf32, #tpu.memory_space<vmem>>, vector<2x128xf32>,
    } else {
    }
    %c0 = arith.constant 0 : index
    %c0_1 = arith.constant 0 : index
    %c0_2 = arith.constant 0 : index
    %3 = vector.load %arg3[%c0, %c0_1, %c0_2] : memref<1x12800x128xi8, #tpu.memory_space<vmem>>, vector<1x12800x128xi8>
    %4 = vector.shape_cast %3 : vector<1x12800x128xi8> to vector<12800x128xi8>
    %5 = arith.sitofp %4 : vector<12800x128xi8> to vector<12800x128xbf16>
    %c0_3 = arith.constant 0 : index
    %c0_4 = arith.constant 0 : index
    %6 = vector.load %arg6[%c0_3, %c0_4] : memref<2x128xf32, #tpu.memory_space<vmem>>, vector<2x128xf32>
    %c0_5 = arith.constant 0 : index
    %c0_6 = arith.constant 0 : index
    %7 = vector.load %arg2[%c0_5, %c0_6] : memref<2x12800xbf16, #tpu.memory_space<vmem>>, vector<2x12800xbf16>
    %cst = arith.constant dense<0.000000e+00> : vector<2x128xf32>
    %8 = tpu.matmul %7, %5, %cst {dimension_numbers = #tpu.dot_dimension_numbers<[1], [0], [0], [1], [0, 0, 1, 1], [], []>} : vector<2x12800xbf16>, vector<12800x128xbf16>, vector<2x128xf32> -> vector<2x128xf32>
    %9 = arith.addf %6, %8 : vector<2x128xf32>
    %c0_7 = arith.constant 0 : index
    %c0_8 = arith.constant 0 : index
    %10 = vector.load %arg6[%c0_7, %c0_8] : memref<2x128xf32, #tpu.memory_space<vmem>>, vector<2x128xf32>
    tpu.vector_store %arg6[%c0_7, %c0_8], %9 {strides = array<i32>} : memref<2x128xf32, #tpu.memory_space<vmem>>, vector<2x128xf32>,
    %c0_i32_9 = arith.constant 0 : i32
    %11 = arith.cmpi eq, %arg1, %c0_i32_9 : i32
    %12 = arith.extui %11 : i1 to i32
    %c0_i32_10 = arith.constant 0 : i32
    %13 = arith.cmpi ne, %12, %c0_i32_10 : i32
    scf.if %13 {
      %c0_11 = arith.constant 0 : index
      %c0_12 = arith.constant 0 : index
      %14 = vector.load %arg6[%c0_11, %c0_12] : memref<2x128xf32, #tpu.memory_space<vmem>>, vector<2x128xf32>
      %c0_13 = arith.constant 0 : index
      %c0_14 = arith.constant 0 : index
      %15 = vector.load %arg4[%c0_13, %c0_14] : memref<1x128xf32, #tpu.memory_space<vmem>>, vector<1x128xf32>
      %16 = vector.broadcast %15 : vector<1x128xf32> to vector<2x128xf32>
      %17 = arith.mulf %14, %16 : vector<2x128xf32>
      %c0_15 = arith.constant 0 : index
      %c0_16 = arith.constant 0 : index
      %18 = vector.load %arg5[%c0_15, %c0_16] : memref<1x128xf32, #tpu.memory_space<vmem>>, vector<1x128xf32>
      %19 = vector.broadcast %18 : vector<1x128xf32> to vector<2x128xf32>
      %20 = arith.addf %17, %19 : vector<2x128xf32>
      %cst_17 = arith.constant 0.000000e+00 : f32
      %21 = vector.broadcast %cst_17 : f32 to vector<2x128xf32>
      %22 = arith.maximumf %20, %21 : vector<2x128xf32>
      %c0_18 = arith.constant 0 : index
      %c0_19 = arith.constant 0 : index
      %23 = vector.load %arg6[%c0_18, %c0_19] : memref<2x128xf32, #tpu.memory_space<vmem>>, vector<2x128xf32>
      tpu.vector_store %arg6[%c0_18, %c0_19], %22 {strides = array<i32>} : memref<2x128xf32, #tpu.memory_space<vmem>>, vector<2x128xf32>,
    } else {
    }
    return
  }
  func.func @transform_0(%arg0: i32, %arg1: i32) -> (i32, i32) {
    %c0_i32 = arith.constant 0 : i32
    %c0_i32_0 = arith.constant 0 : i32
    return %c0_i32, %arg1 : i32, i32
  }
  func.func @transform_1(%arg0: i32, %arg1: i32) -> (i32, i32, i32) {
    %c0_i32 = arith.constant 0 : i32
    %c0_i32_0 = arith.constant 0 : i32
    return %arg0, %arg1, %c0_i32 : i32, i32, i32
  }
  func.func @transform_2(%arg0: i32, %arg1: i32) -> (i32, i32) {
    %c0_i32 = arith.constant 0 : i32
    %c0_i32_0 = arith.constant 0 : i32
    return %c0_i32, %arg0 : i32, i32
  }
  func.func @transform_3(%arg0: i32, %arg1: i32) -> (i32, i32) {
    %c0_i32 = arith.constant 0 : i32
    %c0_i32_0 = arith.constant 0 : i32
    return %c0_i32, %arg0 : i32, i32
  }
  func.func @transform_4(%arg0: i32, %arg1: i32) -> (i32, i32) {
    %c0_i32 = arith.constant 0 : i32
    %c0_i32_0 = arith.constant 0 : i32
    return %c0_i32, %arg0 : i32, i32
  }
}

module attributes {stable_mosaic.version = 11 : i64} {
  func.func @_gcn_block_selu_kernel(%arg0: memref<2x160x160xf32, #tpu.memory_space<vmem>>, %arg1: memref<2x80x80xf32, #tpu.memory_space<vmem>>, %arg2: memref<2x80x80xf32, #tpu.memory_space<vmem>>, %arg3: memref<2x80x1xf32, #tpu.memory_space<vmem>>, %arg4: memref<160x32xf32, #tpu.memory_space<vmem>>, %arg5: memref<1x32xf32, #tpu.memory_space<vmem>>, %arg6: memref<2x160x32xf32, #tpu.memory_space<vmem>>) attributes {dimension_semantics = [], scalar_prefetch = 0 : i64, scratch_operands = 0 : i64, tpu.core_type = #tpu.core_type<tc>} {
    %c0 = arith.constant 0 : index
    %c0_0 = arith.constant 0 : index
    %c0_1 = arith.constant 0 : index
    %0 = vector.load %arg0[%c0, %c0_0, %c0_1] : memref<2x160x160xf32, #tpu.memory_space<vmem>>, vector<2x160x160xf32>
    %1 = vector.shape_cast %0 : vector<2x160x160xf32> to vector<320x160xf32>
    %c0_2 = arith.constant 0 : index
    %c0_3 = arith.constant 0 : index
    %2 = vector.load %arg4[%c0_2, %c0_3] : memref<160x32xf32, #tpu.memory_space<vmem>>, vector<160x32xf32>
    %cst = arith.constant dense<0.000000e+00> : vector<320x32xf32>
    %3 = tpu.matmul %1, %2, %cst {dimension_numbers = #tpu.dot_dimension_numbers<[1], [0], [0], [1], [0, 0, 1, 1], [], []>} : vector<320x160xf32>, vector<160x32xf32>, vector<320x32xf32> -> vector<320x32xf32>
    %4 = vector.shape_cast %3 : vector<320x32xf32> to vector<2x160x32xf32>
    %5 = vector.extract_strided_slice %4 {offsets = [0, 0, 0], sizes = [2, 80, 32], strides = [1, 1, 1]} : vector<2x160x32xf32> to vector<2x80x32xf32>
    %6 = vector.extract_strided_slice %4 {offsets = [0, 80, 0], sizes = [2, 80, 32], strides = [1, 1, 1]} : vector<2x160x32xf32> to vector<2x80x32xf32>
    %c0_4 = arith.constant 0 : index
    %c0_5 = arith.constant 0 : index
    %c0_6 = arith.constant 0 : index
    %7 = vector.load %arg3[%c0_4, %c0_5, %c0_6] : memref<2x80x1xf32, #tpu.memory_space<vmem>>, vector<2x80x1xf32>
    %c0_7 = arith.constant 0 : index
    %c0_8 = arith.constant 0 : index
    %8 = vector.load %arg5[%c0_7, %c0_8] : memref<1x32xf32, #tpu.memory_space<vmem>>, vector<1x32xf32>
    %c0_9 = arith.constant 0 : index
    %c0_10 = arith.constant 0 : index
    %c0_11 = arith.constant 0 : index
    %9 = vector.load %arg1[%c0_9, %c0_10, %c0_11] : memref<2x80x80xf32, #tpu.memory_space<vmem>>, vector<2x80x80xf32>
    "tpu.trace_start"() <{level = 10 : i32, message = "bij,bjh->bih"}> : () -> ()
    %cst_12 = arith.constant dense<0.000000e+00> : vector<2x80x32xf32>
    %10 = tpu.matmul %9, %5, %cst_12 {dimension_numbers = #tpu.dot_dimension_numbers<[2], [1], [1], [2], [0, 0, 0, 1, 1, 2], [0], [0]>} : vector<2x80x80xf32>, vector<2x80x32xf32>, vector<2x80x32xf32> -> vector<2x80x32xf32>
    "tpu.trace_stop"() : () -> ()
    %11 = vector.broadcast %7 : vector<2x80x1xf32> to vector<2x80x32xf32>
    %12 = arith.mulf %11, %6 : vector<2x80x32xf32>
    %13 = arith.addf %10, %12 : vector<2x80x32xf32>
    %14 = vector.broadcast %7 : vector<2x80x1xf32> to vector<2x80x32xf32>
    %15 = arith.mulf %14, %5 : vector<2x80x32xf32>
    %c0_13 = arith.constant 0 : index
    %c0_14 = arith.constant 0 : index
    %c0_15 = arith.constant 0 : index
    %16 = vector.load %arg2[%c0_13, %c0_14, %c0_15] : memref<2x80x80xf32, #tpu.memory_space<vmem>>, vector<2x80x80xf32>
    "tpu.trace_start"() <{level = 10 : i32, message = "bij,bjh->bih"}> : () -> ()
    %cst_16 = arith.constant dense<0.000000e+00> : vector<2x80x32xf32>
    %17 = tpu.matmul %16, %6, %cst_16 {dimension_numbers = #tpu.dot_dimension_numbers<[2], [1], [1], [2], [0, 0, 0, 1, 1, 2], [0], [0]>} : vector<2x80x80xf32>, vector<2x80x32xf32>, vector<2x80x32xf32> -> vector<2x80x32xf32>
    "tpu.trace_stop"() : () -> ()
    %18 = arith.addf %15, %17 : vector<2x80x32xf32>
    %19 = vector.shape_cast %8 : vector<1x32xf32> to vector<1x1x32xf32>
    %20 = vector.broadcast %19 : vector<1x1x32xf32> to vector<2x80x32xf32>
    %21 = arith.addf %13, %20 : vector<2x80x32xf32>
    %cst_17 = arith.constant 0.000000e+00 : f32
    %22 = vector.broadcast %cst_17 : f32 to vector<2x80x32xf32>
    %23 = arith.cmpf ogt, %21, %22 : vector<2x80x32xf32>
    %cst_18 = arith.constant 0.000000e+00 : f32
    %24 = vector.broadcast %cst_18 : f32 to vector<2x80x32xf32>
    %25 = arith.minimumf %21, %24 : vector<2x80x32xf32>
    %26 = math.exp %25 : vector<2x80x32xf32>
    %cst_19 = arith.constant 1.000000e+00 : f32
    %27 = vector.broadcast %cst_19 : f32 to vector<2x80x32xf32>
    %28 = arith.subf %26, %27 : vector<2x80x32xf32>
    %cst_20 = arith.constant 1.67326319 : f32
    %29 = vector.broadcast %cst_20 : f32 to vector<2x80x32xf32>
    %30 = arith.mulf %29, %28 : vector<2x80x32xf32>
    %31 = arith.select %23, %21, %30 : vector<2x80x32xi1>, vector<2x80x32xf32>
    %cst_21 = arith.constant 1.05070102 : f32
    %32 = vector.broadcast %cst_21 : f32 to vector<2x80x32xf32>
    %33 = arith.mulf %32, %31 : vector<2x80x32xf32>
    %c0_22 = arith.constant 0 : index
    %c0_23 = arith.constant 0 : index
    %c0_24 = arith.constant 0 : index
    %34 = vector.load %arg6[%c0_22, %c0_23, %c0_24] : memref<2x160x32xf32, #tpu.memory_space<vmem>>, vector<2x80x32xf32>
    tpu.vector_store %arg6[%c0_22, %c0_23, %c0_24], %33 {strides = array<i32>} : memref<2x160x32xf32, #tpu.memory_space<vmem>>, vector<2x80x32xf32>,
    %35 = vector.shape_cast %8 : vector<1x32xf32> to vector<1x1x32xf32>
    %36 = vector.broadcast %35 : vector<1x1x32xf32> to vector<2x80x32xf32>
    %37 = arith.addf %18, %36 : vector<2x80x32xf32>
    %cst_25 = arith.constant 0.000000e+00 : f32
    %38 = vector.broadcast %cst_25 : f32 to vector<2x80x32xf32>
    %39 = arith.cmpf ogt, %37, %38 : vector<2x80x32xf32>
    %cst_26 = arith.constant 0.000000e+00 : f32
    %40 = vector.broadcast %cst_26 : f32 to vector<2x80x32xf32>
    %41 = arith.minimumf %37, %40 : vector<2x80x32xf32>
    %42 = math.exp %41 : vector<2x80x32xf32>
    %cst_27 = arith.constant 1.000000e+00 : f32
    %43 = vector.broadcast %cst_27 : f32 to vector<2x80x32xf32>
    %44 = arith.subf %42, %43 : vector<2x80x32xf32>
    %cst_28 = arith.constant 1.67326319 : f32
    %45 = vector.broadcast %cst_28 : f32 to vector<2x80x32xf32>
    %46 = arith.mulf %45, %44 : vector<2x80x32xf32>
    %47 = arith.select %39, %37, %46 : vector<2x80x32xi1>, vector<2x80x32xf32>
    %cst_29 = arith.constant 1.05070102 : f32
    %48 = vector.broadcast %cst_29 : f32 to vector<2x80x32xf32>
    %49 = arith.mulf %48, %47 : vector<2x80x32xf32>
    %c0_30 = arith.constant 0 : index
    %c80 = arith.constant 80 : index
    %c0_31 = arith.constant 0 : index
    %50 = vector.load %arg6[%c0_30, %c80, %c0_31] : memref<2x160x32xf32, #tpu.memory_space<vmem>>, vector<2x80x32xf32>
    tpu.vector_store %arg6[%c0_30, %c80, %c0_31], %49 {strides = array<i32>} : memref<2x160x32xf32, #tpu.memory_space<vmem>>, vector<2x80x32xf32>,
    return
  }
}

</mosaic_0001>

<bundles_post_ra>
// kernel: _lambda_.3
= control target key start
LH: loop header
LB: loop body
LE: loop exit
PB: predicated region body
PF: predicated region fallthrough
CT: control target
= control target key end

     0   :  { %11 = vsyncpa [#allocation3], 0  ;;  %s2711_s0 = inlined_call_operand.hbm [shape: f32[2,160,160], index: 0, kind: input, shape index: {}]   ;;  %s2712_s1 = inlined_call_operand.vmem [shape: f32[2,80,80], index: 1, kind: input, shape index: {}]   ;;  %s2713_s2 = inlined_call_operand.vmem [shape: f32[2,80,80], index: 2, kind: input, shape index: {}]   ;;  %s2714_s3 = inlined_call_operand.vmem [shape: f32[2,80,1], index: 3, kind: input, shape index: {}]   ;;  %s2715_s4 = inlined_call_operand.vmem [shape: f32[160,32], index: 4, kind: input, shape index: {}]   ;;  %s2716_s5 = inlined_call_operand.hbm [shape: f32[1,32], index: 5, kind: input, shape index: {}]   ;;  %s2717_s6 = inlined_call_operand.vmem [shape: f32[2,160,32], index: 6, kind: output, shape index: {}]  }
   0x1   :  { %s17_s23 = sshll.u32 %s2711_s0, 4  ;;  %s18_s23 = int_to_ptr.hbm [resolvable:$true] %s17_s23 }
   0x2   :  { %12 = vsyncpa [#allocation5], 0  ;;  %s1779_s24 = smov [#allocation2]   ;;  %s39_s28 = sshll.u32 %s2716_s5, 4  ;;  %s40_s28 = int_to_ptr.hbm [resolvable:$true] %s39_s28 }
   0x3   :  { %s19_s25 = sshll.u32 %s1779_s24, 4  ;;  %s1780_s29 = smov 256   ;;  %s20_s25 = int_to_ptr.vmem [resolvable:$true] %s19_s25 }
   0x4   :  { %s1781_s30 = smov 16   ;;  %s1782_s7 = smov [#allocation4]  }
   0x5   :  { %25 = dma.hbm_to_vmem [thread:$0]  %s18_s23, 10240, %s20_s25, [#allocation3], %s1780_s29, %s1780_s29, %s1781_s30  }
   0x6   :  { %s41_s8 = sshll.u32 %s1782_s7, 4  ;;  %s42_s8 = int_to_ptr.vmem [resolvable:$true] %s41_s8 }
   0x7   :  { %44 = dma.hbm_to_vmem [thread:$0]  %s40_s28, 16, %s42_s8, [#allocation5]  }
   0x8   :  { %1775 = dma.done.wait [#allocation3], 10240  }
   0x9   :  { %1776 = vsyncadd [#allocation3], 4294957056 }
   0xa   :  { %1777 = dma.done.wait [#allocation5], 16  }
   0xb   :  { %1778 = vsyncadd [#allocation5], 4294967280  ;;  %v148_v0 = vld [vmem:[%s2715_s4 + $0x78] sm:$0xff]  ;;  %v147_v2 = vld [vmem:[%s2715_s4 + $0x70] sm:$0xff]  ;;  %vm153_vm0 = vcmask 261120   ;;  %v1783_v11 = vmov 0  }
   0xc   :  { %v152_v1 = vld [vmem:[%s2715_s4 + $0x98] sm:$0xff]  ;;  %274 = vmatpush.msra.mxu0 %v148_v0  ;;  %v151_v3 = vld [vmem:[%s2715_s4 + $0x90] sm:$0xff]  ;;  %v146_v4 = vld [vmem:[%s2715_s4 + $0x68] sm:$0xff]  ;;  %1607 = vmatpush.msra.mxu2 %v148_v0  ;;  %vm709_vm1 = vcmask 654336  }
   0xd   :  { %423 = vmatpush.msra.mxu1 %v152_v1  ;;  %v150_v5 = vld [vmem:[%s2715_s4 + $0x88] sm:$0xff]  ;;  %1623 = vmatpush.msra.mxu3 %v152_v1  ;;  %v145_v6 = vld [vmem:[%s2715_s4 + $0x60] sm:$0xff]  ;;  %v144_v9 = vld [vmem:[%s2715_s4 + $0x58] sm:$0xff] }
   0xe   :  { %275 = vmatpush.msra.mxu0 %v147_v2  ;;  %v149_v7 = vld [vmem:[%s2715_s4 + $0x80] sm:$0xff]  ;;  %1608 = vmatpush.msra.mxu2 %v147_v2  ;;  %v54_v8 = vld [vmem:[#allocation2 + $0x8] sm:$0xff]  ;;  %v143_v10 = vld [vmem:[%s2715_s4 + $0x50] sm:$0xff] }
   0xf   :  { %424 = vmatpush.msra.mxu1 %v151_v3  ;;  %1624 = vmatpush.msra.mxu3 %v151_v3  ;;  %v548_v12 = vld [vmem:[%s2714_s3] sm:$0xff]  ;;  %v142_v13 = vld [vmem:[%s2715_s4 + $0x48] sm:$0xff]  ;;  %v56_v15 = vld [vmem:[#allocation2 + $0x18] sm:$0xff] }
  0x10   :  { %276 = vmatpush.msra.mxu0 %v146_v4  ;;  %1609 = vmatpush.msra.mxu2 %v146_v4  ;;  %v141_v14 = vld [vmem:[%s2715_s4 + $0x40] sm:$0xff]  ;;  %v140_v16 = vld [vmem:[%s2715_s4 + $0x38] sm:$0xff]  ;;  %v139_v17 = vld [vmem:[%s2715_s4 + $0x30] sm:$0xff] }
  0x11   :  { %425 = vmatpush.msra.mxu1 %v150_v5  ;;  %1625 = vmatpush.msra.mxu3 %v150_v5  ;;  %v549_v18 = vld [vmem:[%s2714_s3 + $0x8] sm:$0xff]  ;;  %v137_v20 = vld [vmem:[%s2715_s4 + $0x20] sm:$0xff]  ;;  %v136_v22 = vld [vmem:[%s2715_s4 + $0x18] sm:$0xff] }
  0x12   :  { %277 = vmatpush.msra.mxu0 %v145_v6  ;;  %1610 = vmatpush.msra.mxu2 %v145_v6  ;;  %v138_v19 = vld [vmem:[%s2715_s4 + $0x28] sm:$0xff]  ;;  %v135_v23 = vld [vmem:[%s2715_s4 + $0x10] sm:$0xff]  ;;  %v133_v26 = vld [vmem:[%s2715_s4] sm:$0xff] }
  0x13   :  { %426 = vmatpush.msra.mxu1 %v149_v7  ;;  %1642 = vset.pattern.permute.xlu0 %v1783_v11  ;;  %v58_v21 = vld [vmem:[#allocation2 + $0x28] sm:$0xff]  ;;  %v550_v24 = vld [vmem:[%s2714_s3 + $0x10] sm:$0xff]  ;;  %v53_v27 = vld [vmem:[#allocation2] sm:$0xff] }
  0x14   :  { %1487 = vmatmul.msk.f32.vlgmr.msra.gmra.mxu1 %vm153_vm0, %v54_v8  ;;  %278 = vmatpush.msra.mxu0 %v144_v9  ;;  %v134_v25 = vld [vmem:[%s2715_s4 + $0x8] sm:$0xff]  ;;  %v60_v28 = vld [vmem:[#allocation2 + $0x38] sm:$0xff]  ;;  %v55_v30 = vld [vmem:[#allocation2 + $0x10] sm:$0xff] }
  0x15   :  { %591 = vperm.xlu0 %1642, %v548_v12   ;;  %1643 = vset.pattern.permute.xlu1 %v1783_v11  ;;  %v551_v29 = vld [vmem:[%s2714_s3 + $0x18] sm:$0xff]  ;;  %v62_v31 = vld [vmem:[#allocation2 + $0x48] sm:$0xff]  ;;  %v57_v32 = vld [vmem:[#allocation2 + $0x20] sm:$0xff] }
  0x16   :  { %279 = vmatpush.msra.mxu0 %v143_v10  ;;  %1644 = vset.pattern.permute.xlu2 %v1783_v11  ;;  %v64_v33 = vld [vmem:[#allocation2 + $0x58] sm:$0xff]  ;;  %v59_v34 = vld [vmem:[#allocation2 + $0x30] sm:$0xff]  ;;  %v66_v35 = vld [vmem:[#allocation2 + $0x68] sm:$0xff] }
  0x17   :  { %1611 = vmatpush.msra.mxu2 %v144_v9  ;;  %1626 = vmatpush.msra.mxu3 %v149_v7  ;;  %v554_v36 = vld [vmem:[%s2714_s3 + $0x30] sm:$0xff]  ;;  %v61_v37 = vld [vmem:[#allocation2 + $0x40] sm:$0xff]  ;;  %v68_v38 = vld [vmem:[#allocation2 + $0x78] sm:$0xff] }
  0x18   :  { %280 = vmatpush.msra.mxu0 %v142_v13  ;;  %601 = vperm.xlu1 %1643, %v550_v24   ;;  %v552_v39 = vld [vmem:[%s2714_s3 + $0x20] sm:$0xff]  ;;  %v555_v40 = vld [vmem:[%s2714_s3 + $0x38] sm:$0xff]  ;;  %v63_v41 = vld [vmem:[#allocation2 + $0x50] sm:$0xff] }
  0x19   :  { %1612 = vmatpush.msra.mxu2 %v143_v10  ;;  %611 = vperm.xlu2 %1644, %v552_v39   ;;  %v70_v42 = vld [vmem:[#allocation2 + $0x88] sm:$0xff]  ;;  %v65_v44 = vld [vmem:[#allocation2 + $0x60] sm:$0xff]  ;;  %v72_v45 = vld [vmem:[#allocation2 + $0x98] sm:$0xff] }
  0x1a   :  { %281 = vmatpush.msra.mxu0 %v141_v14  ;;  %v553_v43 = vld [vmem:[%s2714_s3 + $0x28] sm:$0xff]  ;;  %v67_v47 = vld [vmem:[#allocation2 + $0x70] sm:$0xff]  ;;  %v69_v49 = vld [vmem:[#allocation2 + $0x80] sm:$0xff] }
  0x1b   :  { %1613 = vmatpush.msra.mxu2 %v142_v13  ;;  %v557_v46 = vld [vmem:[%s2714_s3 + $0x48] sm:$0xff]  ;;  %v76_v50 = vld [vmem:[#allocation2 + $0xb8] sm:$0xff]  ;;  %v556_v51 = vld [vmem:[%s2714_s3 + $0x40] sm:$0xff] }
  0x1c   :  { %1488 = vmatmul.msk.f32.gmra.mxu1 %vm153_vm0, %v56_v15  ;;  %282 = vmatpush.msra.mxu0 %v140_v16  ;;  %v74_v48 = vld [vmem:[#allocation2 + $0xa8] sm:$0xff]  ;;  %v71_v52 = vld [vmem:[#allocation2 + $0x90] sm:$0xff]  ;;  %v73_v54 = vld [vmem:[#allocation2 + $0xa0] sm:$0xff] }
  0x1d   :  { %596 = vperm.xlu0 %1642, %v549_v18   ;;  %1614 = vmatpush.msra.mxu2 %v141_v14  ;;  %v78_v53 = vld [vmem:[#allocation2 + $0xc8] sm:$0xff]  ;;  %v80_v55 = vld [vmem:[#allocation2 + $0xd8] sm:$0xff]  ;;  %v75_v56 = vld [vmem:[#allocation2 + $0xb0] sm:$0xff] }
  0x1e   :  { %283 = vmatpush.msra.mxu0 %v139_v17  ;;  %v82_v57 = vld [vmem:[#allocation2 + $0xe8] sm:$0xff]  ;;  %v77_v58 = vld [vmem:[#allocation2 + $0xc0] sm:$0xff]  ;;  %v84_v59 = vld [vmem:[#allocation2 + $0xf8] sm:$0xff] }
  0x1f   :  { %1615 = vmatpush.msra.mxu2 %v140_v16  ;;  %v111_v60 = vld [vmem:[#allocation2 + $0x1d0] sm:$0xff]  ;;  %v86_v63 = vld [vmem:[#allocation2 + $0x108] sm:$0xff]  ;;  %v113_v0 = vld [vmem:[#allocation2 + $0x1e0] sm:$0xff] }
  0x20   :  { %284 = vmatpush.msra.mxu0 %v138_v19  ;;  %606 = vperm.xlu1 %1643, %v551_v29   ;;  %v79_v62 = vld [vmem:[#allocation2 + $0xd0] sm:$0xff]  ;;  %v81_v2 = vld [vmem:[#allocation2 + $0xe0] sm:$0xff]  ;;  %v88_v3 = vld [vmem:[#allocation2 + $0x118] sm:$0xff] }
  0x21   :  { %1616 = vmatpush.msra.mxu2 %v139_v17  ;;  %616 = vperm.xlu2 %1644, %v553_v43   ;;  %v115_v4 = vld [vmem:[#allocation2 + $0x1f0] sm:$0xff]  ;;  %v90_v7 = vld [vmem:[#allocation2 + $0x128] sm:$0xff]  ;;  %v117_v8 = vld [vmem:[#allocation2 + $0x200] sm:$0xff] }
  0x22   :  { %285 = vmatpush.msra.mxu0 %v137_v20  ;;  %v83_v6 = vld [vmem:[#allocation2 + $0xf0] sm:$0xff]  ;;  %v118_v9 = vld [vmem:[#allocation2 + $0x208] sm:$0xff]  ;;  %v85_v12 = vld [vmem:[#allocation2 + $0x100] sm:$0xff] }
  0x23   :  { %1617 = vmatpush.msra.mxu2 %v138_v19  ;;  %1519 = vmatmul.msk.f32.vlgmr.msra.gmra.mxu3 %vm153_vm0, %v118_v9  ;;  %v92_v13 = vld [vmem:[#allocation2 + $0x138] sm:$0xff]  ;;  %v119_v14 = vld [vmem:[#allocation2 + $0x210] sm:$0xff]  ;;  %v94_v19 = vld [vmem:[#allocation2 + $0x148] sm:$0xff] }
  0x24   :  { %1489 = vmatmul.msk.f32.gmra.mxu1 %vm153_vm0, %v58_v21  ;;  %286 = vmatpush.msra.mxu0 %v136_v22  ;;  %v120_v15 = vld [vmem:[#allocation2 + $0x218] sm:$0xff]  ;;  %v87_v18 = vld [vmem:[#allocation2 + $0x110] sm:$0xff]  ;;  %v122_v21 = vld [vmem:[#allocation2 + $0x228] sm:$0xff] }
  0x25   :  { %1618 = vmatpush.msra.mxu2 %v137_v20  ;;  %621 = vperm.xlu0 %1642, %v554_v36   ;;  %v121_v20 = vld [vmem:[#allocation2 + $0x220] sm:$0xff]  ;;  %v124_v29 = vld [vmem:[#allocation2 + $0x238] sm:$0xff]  ;;  %v561_v43 = vld [vmem:[%s2714_s3 + $0x68] sm:$0xff] }
  0x26   :  { %287 = vmatpush.msra.mxu0 %v135_v23  ;;  %v560_v36 = vld [vmem:[%s2714_s3 + $0x60] sm:$0xff]  ;;  %v103_v9 = vld [vmem:[#allocation2 + $0x190] sm:$0xff] }
  0x27   :  { %1619 = vmatpush.msra.mxu2 %v136_v22  ;;  %v558_v22 = vld [vmem:[%s2714_s3 + $0x50] sm:$0xff]  ;;  %v93_v39 = vld [vmem:[#allocation2 + $0x140] sm:$0xff] }
  0x28   :  { %288 = vmatpush.msra.mxu0 %v134_v25  ;;  %626 = vperm.xlu1 %1643, %v555_v40   ;;  %v100_v40 = vld [vmem:[#allocation2 + $0x178] sm:$0xff] }
  0x29   :  { %1620 = vmatpush.msra.mxu2 %v135_v23  ;;  %631 = vperm.xlu2 %1644, %v556_v51  }
  0x2a   :  { %289 = vmatpush.msra.mxu0 %v133_v26 }
  0x2b   :  { %290 = vmatmul.f32.vlgmr.msra.gmra.mxu0 %v53_v27  ;;  %1621 = vmatpush.msra.mxu2 %v134_v25  ;;  %v89_v25 = vld [vmem:[#allocation2 + $0x120] sm:$0xff] }
  0x2c   :  { %1490 = vmatmul.msk.f32.gmra.mxu1 %vm153_vm0, %v60_v28  ;;  %1520 = vmatmul.msk.f32.gmra.mxu3 %vm153_vm0, %v120_v15  ;;  %v123_v28 = vld [vmem:[#allocation2 + $0x230] sm:$0xff] }
  0x2d   :  { %1622 = vmatpush.msra.mxu2 %v133_v26  ;;  %636 = vperm.xlu0 %1642, %v557_v46   ;;  %v96_v26 = vld [vmem:[#allocation2 + $0x158] sm:$0xff]  ;;  %v95_v46 = vld [vmem:[#allocation2 + $0x150] sm:$0xff] }
  0x2e   :  { %377 = vmatmul.f32.vlgmr.msra.gmra.mxu2 %v111_v60  ;;  %v106_v60 = vld [vmem:[#allocation2 + $0x1a8] sm:$0xff] }
  0x30   :  { %641 = vperm.xlu1 %1643, %v558_v22   ;;  %v105_v22 = vld [vmem:[#allocation2 + $0x1a0] sm:$0xff] }
  0x33   :  { %293 = vmatmul.f32.gmra.mxu0 %v55_v30 }
  0x34   :  { %1491 = vmatmul.msk.f32.gmra.mxu1 %vm153_vm0, %v62_v31  ;;  %1521 = vmatmul.msk.f32.gmra.mxu3 %vm153_vm0, %v122_v21 }
  0x35   :  { %651 = vperm.xlu0 %1642, %v560_v36   ;;  %v116_v36 = vld [vmem:[#allocation2 + $0x1f8] sm:$0xff] }
  0x36   :  { %380 = vmatmul.f32.gmra.mxu2 %v113_v0  ;;  %v567_v0 = vld [vmem:[%s2714_s3 + $0x98] sm:$0xff] }
  0x38   :  { %656 = vperm.xlu1 %1643, %v561_v43  }
  0x3b   :  { %296 = vmatmul.f32.gmra.mxu0 %v57_v32  ;;  %v91_v32 = vld [vmem:[#allocation2 + $0x130] sm:$0xff] }
  0x3c   :  { %1492 = vmatmul.msk.f32.gmra.mxu1 %vm153_vm0, %v64_v33  ;;  %1522 = vmatmul.msk.f32.gmra.mxu3 %vm153_vm0, %v124_v29  ;;  %v98_v33 = vld [vmem:[#allocation2 + $0x168] sm:$0xff] }
  0x3e   :  { %383 = vmatmul.f32.gmra.mxu2 %v115_v4  ;;  %v101_v4 = vld [vmem:[#allocation2 + $0x180] sm:$0xff] }
  0x43   :  { %299 = vmatmul.f32.gmra.mxu0 %v59_v34  ;;  %v125_v34 = vld [vmem:[#allocation2 + $0x240] sm:$0xff] }
  0x44   :  { %1493 = vmatmul.msk.f32.gmra.mxu1 %vm153_vm0, %v66_v35  ;;  %v126_v35 = vld [vmem:[#allocation2 + $0x248] sm:$0xff] }
  0x45   :  { %1523 = vmatmul.msk.f32.gmra.mxu3 %vm153_vm0, %v126_v35  ;;  %v109_v35 = vld [vmem:[#allocation2 + $0x1c0] sm:$0xff] }
  0x46   :  { %386 = vmatmul.f32.gmra.mxu2 %v117_v8 }
  0x4b   :  { %302 = vmatmul.f32.gmra.mxu0 %v61_v37 }
  0x4c   :  { %1494 = vmatmul.msk.f32.gmra.mxu1 %vm153_vm0, %v68_v38 }
  0x4e   :  { %389 = vmatmul.f32.gmra.mxu2 %v119_v14 }
  0x53   :  { %305 = vmatmul.f32.gmra.mxu0 %v63_v41  ;;  %v127_v41 = vld [vmem:[#allocation2 + $0x250] sm:$0xff] }
  0x54   :  { %1495 = vmatmul.msk.f32.gmra.mxu1 %vm153_vm0, %v70_v42  ;;  %v128_v42 = vld [vmem:[#allocation2 + $0x258] sm:$0xff] }
  0x55   :  { %1524 = vmatmul.msk.f32.gmra.mxu3 %vm153_vm0, %v128_v42  ;;  %v571_v42 = vld [vmem:[%s2712_s1 + $0x10] sm:$0xff] }
  0x56   :  { %392 = vmatmul.f32.gmra.mxu2 %v121_v20 }
  0x5b   :  { %308 = vmatmul.f32.gmra.mxu0 %v65_v44 }
  0x5c   :  { %1496 = vmatmul.msk.f32.gmra.mxu1 %vm153_vm0, %v72_v45 }
  0x5e   :  { %395 = vmatmul.f32.gmra.mxu2 %v123_v28 }
  0x63   :  { %311 = vmatmul.f32.gmra.mxu0 %v67_v47  ;;  %v102_v47 = vld [vmem:[#allocation2 + $0x188] sm:$0xff] }
  0x64   :  { %1497 = vmatmul.msk.f32.gmra.mxu1 %vm153_vm0, %v74_v48  ;;  %v129_v48 = vld [vmem:[#allocation2 + $0x260] sm:$0xff] }
  0x66   :  { %398 = vmatmul.f32.gmra.mxu2 %v125_v34 }
  0x6b   :  { %314 = vmatmul.f32.gmra.mxu0 %v69_v49  ;;  %v130_v49 = vld [vmem:[#allocation2 + $0x268] sm:$0xff] }
  0x6c   :  { %1498 = vmatmul.msk.f32.gmra.mxu1 %vm153_vm0, %v76_v50  ;;  %1525 = vmatmul.msk.f32.gmra.mxu3 %vm153_vm0, %v130_v49  ;;  %v573_v49 = vld [vmem:[%s2712_s1 + $0x20] sm:$0xff] }
  0x6e   :  { %401 = vmatmul.f32.gmra.mxu2 %v127_v41 }
  0x73   :  { %317 = vmatmul.f32.gmra.mxu0 %v71_v52  ;;  %v97_v52 = vld [vmem:[#allocation2 + $0x160] sm:$0xff] }
  0x74   :  { %1499 = vmatmul.msk.f32.gmra.mxu1 %vm153_vm0, %v78_v53  ;;  %v104_v53 = vld [vmem:[#allocation2 + $0x198] sm:$0xff] }
  0x76   :  { %404 = vmatmul.f32.gmra.mxu2 %v129_v48 }
  0x7b   :  { %320 = vmatmul.f32.gmra.mxu0 %v73_v54  ;;  %v559_v54 = vld [vmem:[%s2714_s3 + $0x58] sm:$0xff] }
  0x7c   :  { %1500 = vmatmul.msk.f32.gmra.mxu1 %vm153_vm0, %v80_v55  ;;  %646 = vperm.xlu2 %1644, %v559_v54   ;;  %v131_v55 = vld [vmem:[#allocation2 + $0x270] sm:$0xff] }
  0x7e   :  { %407 = vmatmul.f32.gmra.mxu2 %v131_v55 }
  0x83   :  { %323 = vmatmul.f32.gmra.mxu0 %v75_v56  ;;  %v132_v56 = vld [vmem:[#allocation2 + $0x278] sm:$0xff] }
  0x84   :  { %1501 = vmatmul.msk.f32.gmra.mxu1 %vm153_vm0, %v82_v57  ;;  %v99_v57 = vld [vmem:[#allocation2 + $0x170] sm:$0xff]  ;;  %1526 = vmatmul.msk.f32.gmra.mxu3 %vm153_vm0, %v132_v56 }
  0x8b   :  { %326 = vmatmul.f32.gmra.mxu0 %v77_v58 }
  0x8c   :  { %1502 = vmatmul.msk.f32.gmra.mxu1 %vm153_vm0, %v84_v59 }
  0x91   :  { %v1931_v61 = vpop.f32.mrf.mxu1 }
  0x93   :  { %329 = vmatmul.f32.gmra.mxu0 %v79_v62  ;;  %v564_v62 = vld [vmem:[%s2714_s3 + $0x80] sm:$0xff] }
  0x94   :  { %1503 = vmatmul.msk.f32.gmra.mxu1 %vm153_vm0, %v86_v63  ;;  %v563_v63 = vld [vmem:[%s2714_s3 + $0x78] sm:$0xff]  ;;  %671 = vperm.xlu1 %1643, %v564_v62  }
  0x95   :  { %666 = vperm.xlu0 %1642, %v563_v63  }
  0x99   :  { %v1934_v1 = vpop.f32.mrf.mxu1 }
  0x9b   :  { %332 = vmatmul.f32.gmra.mxu0 %v81_v2 }
  0x9c   :  { %1504 = vmatmul.msk.f32.gmra.mxu1 %vm153_vm0, %v88_v3  ;;  %686 = vperm.xlu1 %1643, %v567_v0   ;;  %v2119_v0 = vpop.permute.xlu1 %601 }
  0xa1   :  { %v434_v5 = vpop.f32.mrf.mxu1 }
  0xa3   :  { %335 = vmatmul.f32.gmra.mxu0 %v83_v6  ;;  %v562_v6 = vld [vmem:[%s2714_s3 + $0x70] sm:$0xff] }
  0xa4   :  { %1505 = vmatmul.msk.f32.gmra.mxu1 %vm153_vm0, %v90_v7  ;;  %661 = vperm.xlu2 %1644, %v562_v6  }
  0xa6   :  { %v2117_v63 = vpop.f32.mrf.mxu3 }
  0xa8   :  { %v1939_v10 = vpop.f32.mrf.mxu0 }
  0xa9   :  { %v1941_v11 = vpop.f32.mrf.mxu1 }
  0xab   :  { %338 = vmatmul.f32.gmra.mxu0 %v85_v12  ;;  %v110_v12 = vld [vmem:[#allocation2 + $0x1c8] sm:$0xff] }
  0xac   :  { %1506 = vmatmul.msk.f32.gmra.mxu1 %vm153_vm0, %v92_v13 }
  0xb0   :  { %v1945_v16 = vpop.f32.mrf.mxu0 }
  0xb1   :  { %v1947_v17 = vpop.f32.mrf.mxu1  ;;  %v2052_v34 = vadd.f32 %v1934_v1, %v1945_v16  ;;  %v569_v1 = vld [vmem:[%s2712_s1] sm:$0xff] }
  0xb2   :  { %v577_v16 = vld [vmem:[%s2712_s1 + $0x40] sm:$0xff] }
  0xb3   :  { %341 = vmatmul.f32.gmra.mxu0 %v87_v18  ;;  %v566_v18 = vld [vmem:[%s2714_s3 + $0x90] sm:$0xff] }
  0xb4   :  { %1507 = vmatmul.msk.f32.gmra.mxu1 %vm153_vm0, %v94_v19  ;;  %681 = vperm.xlu0 %1642, %v566_v18  }
  0xb8   :  { %v297_v23 = vpop.f32.mrf.mxu0 }
  0xb9   :  { %v1954_v24 = vpop.f32.mrf.mxu1  ;;  %v1956_v27 = vadd.f32 %v434_v5, %v297_v23  ;;  %v108_v5 = vld [vmem:[#allocation2 + $0x1b8] sm:$0xff] }
  0xba   :  { %v112_v23 = vld [vmem:[#allocation2 + $0x1d8] sm:$0xff] }
  0xbb   :  { %344 = vmatmul.f32.gmra.mxu0 %v89_v25 }
  0xbc   :  { %1508 = vmatmul.msk.f32.gmra.mxu1 %vm153_vm0, %v96_v26 }
  0xc0   :  { %v1960_v30 = vpop.f32.mrf.mxu0 }
  0xc1   :  { %v1962_v31 = vpop.f32.mrf.mxu1  ;;  %v2040_v29 = vadd.f32 %v1941_v11, %v1960_v30  ;;  %v2059_v11 = vadd.f32 %v1931_v61, %v1939_v10  ;;  %v565_v61 = vld [vmem:[%s2714_s3 + $0x88] sm:$0xff] }
  0xc2   :  { %676 = vperm.xlu2 %1644, %v565_v61  }
  0xc3   :  { %347 = vmatmul.f32.gmra.mxu0 %v91_v32  ;;  %v114_v32 = vld [vmem:[#allocation2 + $0x1e8] sm:$0xff] }
  0xc4   :  { %1509 = vmatmul.msk.f32.gmra.mxu1 %vm153_vm0, %v98_v33 }
  0xc8   :  { %v1969_v37 = vpop.f32.mrf.mxu0 }
  0xc9   :  { %v1971_v38 = vpop.f32.mrf.mxu1  ;;  %v2034_v28 = vadd.f32 %v1947_v17, %v1969_v37  ;;  %v107_v17 = vld [vmem:[#allocation2 + $0x1b0] sm:$0xff] }
  0xcb   :  { %350 = vmatmul.f32.gmra.mxu0 %v93_v39  ;;  %v578_v39 = vld [vmem:[%s2712_s1 + $0x48] sm:$0xff] }
  0xcc   :  { %1510 = vmatmul.msk.f32.gmra.mxu1 %vm153_vm0, %v100_v40 }
  0xd0   :  { %v1978_v44 = vpop.f32.mrf.mxu0 }
  0xd1   :  { %v452_v45 = vpop.f32.mrf.mxu1  ;;  %v2027_v26 = vadd.f32 %v1954_v24, %v1978_v44 }
  0xd3   :  { %353 = vmatmul.f32.gmra.mxu0 %v95_v46  ;;  %2736 = vst [vmem:[#allocation12_spill] sm:$0xff] %v2027_v26  ;;  %v572_v46 = vld [vmem:[%s2712_s1 + $0x18] sm:$0xff] }
  0xd4   :  { %1511 = vmatmul.msk.f32.gmra.mxu1 %vm153_vm0, %v102_v47 }
  0xd8   :  { %v309_v50 = vpop.f32.mrf.mxu0 }
  0xd9   :  { %v455_v51 = vpop.f32.mrf.mxu1  ;;  %v2017_v19 = vadd.f32 %v1962_v31, %v309_v50 }
  0xdb   :  { %356 = vmatmul.f32.gmra.mxu0 %v97_v52  ;;  %2735 = vst [vmem:[#allocation11_spill] sm:$0xff] %v2017_v19 }
  0xdc   :  { %1512 = vmatmul.msk.f32.gmra.mxu1 %vm153_vm0, %v104_v53  ;;  %v574_v53 = vld [vmem:[%s2712_s1 + $0x28] sm:$0xff] }
  0xe0   :  { %v312_v58 = vpop.f32.mrf.mxu0 }
  0xe1   :  { %v458_v59 = vpop.f32.mrf.mxu1  ;;  %v2009_v15 = vadd.f32 %v1971_v38, %v312_v58  ;;  %v570_v38 = vld [vmem:[%s2712_s1 + $0x8] sm:$0xff]  ;;  %v575_v58 = vld [vmem:[%s2712_s1 + $0x30] sm:$0xff] }
  0xe3   :  { %359 = vmatmul.f32.gmra.mxu0 %v99_v57  ;;  %2734 = vst [vmem:[#allocation10_spill] sm:$0xff] %v2009_v15  ;;  %v2109_v57 = vpop.permute.xlu0 %591 }
  0xe4   :  { %1513 = vmatmul.msk.f32.gmra.mxu1 %vm153_vm0, %v106_v60 }
  0xe8   :  { %v315_v2 = vpop.f32.mrf.mxu0 }
  0xe9   :  { %v461_v3 = vpop.f32.mrf.mxu1  ;;  %v2004_v14 = vadd.f32 %v452_v45, %v315_v2  ;;  %v2091_v45 = vpop.f32.mrf.mxu2  ;;  %v576_v2 = vld [vmem:[%s2712_s1 + $0x38] sm:$0xff] }
  0xeb   :  { %362 = vmatmul.f32.gmra.mxu0 %v101_v4  ;;  %2733 = vst [vmem:[#allocation9_spill] sm:$0xff] %v2004_v14 }
  0xec   :  { %1514 = vmatmul.msk.f32.gmra.mxu1 %vm153_vm0, %v108_v5 }
  0xf0   :  { %v318_v7 = vpop.f32.mrf.mxu0 }
  0xf1   :  { %v464_v8 = vpop.f32.mrf.mxu1  ;;  %v2001_v13 = vadd.f32 %v455_v51, %v318_v7  ;;  %v2100_v50 = vpop.f32.mrf.mxu2 }
  0xf2   :  { %v2129_v7 = vpop.permute.xlu2 %611 }
  0xf3   :  { %2732 = vst [vmem:[#allocation8_spill] sm:$0xff] %v2001_v13  ;;  %365 = vmatmul.f32.gmra.mxu0 %v103_v9  ;;  %746 = vmatpush.msrb.mxu2 %v2001_v13 }
  0xf4   :  { %1515 = vmatmul.msk.f32.gmra.mxu1 %vm153_vm0, %v110_v12  ;;  %1627 = vmatpush.msrb.mxu3 %v2001_v13  ;;  %v2136_v12 = vpop.f32.mrf.mxu3 }
  0xf5   :  { %747 = vmatpush.msrb.mxu2 %v2004_v14 }
  0xf6   :  { %1628 = vmatpush.msrb.mxu3 %v2004_v14 }
  0xf7   :  { %748 = vmatpush.msrb.mxu2 %v2009_v15 }
  0xf8   :  { %1629 = vmatpush.msrb.mxu3 %v2009_v15  ;;  %v321_v20 = vpop.f32.mrf.mxu0 }
  0xf9   :  { %v2021_v21 = vpop.f32.mrf.mxu1  ;;  %v2023_v25 = vadd.f32 %v458_v59, %v321_v20  ;;  %749 = vmatpush.msrb.mxu2 %v2017_v19  ;;  %v2107_v54 = vpop.f32.mrf.mxu2 }
  0xfa   :  { %1630 = vmatpush.msrb.mxu3 %v2017_v19  ;;  %v2141_v20 = vpop.permute.xlu1 %606  ;;  %v2157_v61 = vpop.permute.xlu2 %616 }
  0xfb   :  { %368 = vmatmul.f32.gmra.mxu0 %v105_v22  ;;  %750 = vmatpush.msrb.mxu2 %v2027_v26 }
  0xfc   :  { %1516 = vmatmul.msk.f32.gmra.mxu1 %vm153_vm0, %v112_v23  ;;  %1631 = vmatpush.msrb.mxu3 %v2027_v26 }
  0xfd   :  { %751 = vmatpush.msrb.mxu2 %v2034_v28 }
  0xfe   :  { %1632 = vmatpush.msrb.mxu3 %v2034_v28 }
  0xff   :  { %752 = vmatpush.msrb.mxu2 %v2040_v29 }
 0x100   :  { %1633 = vmatpush.msrb.mxu3 %v2040_v29  ;;  %v324_v24 = vpop.f32.mrf.mxu0 }
 0x101   :  { %v2046_v31 = vpop.f32.mrf.mxu1  ;;  %v2048_v33 = vadd.f32 %v461_v3, %v324_v24  ;;  %753 = vmatpush.msrb.mxu2 %v1956_v27  ;;  %v2115_v62 = vpop.f32.mrf.mxu2 }
 0x102   :  { %1634 = vmatpush.msrb.mxu3 %v1956_v27  ;;  %v2124_v3 = vpop.permute.xlu0 %596 }
 0x103   :  { %371 = vmatmul.f32.gmra.mxu0 %v107_v17  ;;  %754 = vmatpush.msrb.mxu2 %v2052_v34 }
 0x104   :  { %1517 = vmatmul.msk.f32.gmra.mxu1 %vm153_vm0, %v114_v32  ;;  %1635 = vmatpush.msrb.mxu3 %v2052_v34 }
 0x105   :  { %755 = vmatpush.msrb.mxu2 %v2059_v11 }
 0x106   :  { %1636 = vmatpush.msrb.mxu3 %v2059_v11  ;;  %1527 = vmatmul.msk.f32.vlgmr.msrb.gmra.mxu2 %vm709_vm1, %v569_v1 }
 0x107   :  { %1535 = vmatmul.msk.f32.vlgmr.msrb.gmra.mxu3 %vm709_vm1, %v577_v16 }
 0x108   :  { %v327_v10 = vpop.f32.mrf.mxu0 }
 0x109   :  { %v473_v30 = vpop.f32.mrf.mxu1  ;;  %v2076_v37 = vadd.f32 %v464_v8, %v327_v10  ;;  %v2134_v9 = vpop.f32.mrf.mxu2 }
 0x10a   :  { %v2143_v22 = vpop.permute.xlu0 %621 }
 0x10b   :  { %374 = vmatmul.f32.gmra.mxu0 %v109_v35 }
 0x10c   :  { %1518 = vmatmul.msk.f32.gmra.mxu1 %vm153_vm0, %v116_v36  ;;  %v2167_v36 = vpop.permute.xlu1 %626 }
 0x10e   :  { %1528 = vmatmul.msk.f32.gmra.mxu2 %vm709_vm1, %v570_v38 }
 0x10f   :  { %1536 = vmatmul.msk.f32.gmra.mxu3 %vm709_vm1, %v578_v39 }
 0x110   :  { %v330_v40 = vpop.f32.mrf.mxu0 }
 0x111   :  { %v476_v41 = vpop.f32.mrf.mxu1  ;;  %v2160_v10 = vadd.f32 %v2021_v21, %v330_v40  ;;  %v2163_v35 = vpop.f32.mrf.mxu2  ;;  %v884_v21 = vld [vmem:[%s2713_s2] sm:$0xff] }
 0x112   :  { %v2169_v38 = vpop.permute.xlu0 %636  ;;  %v2179_v40 = vpop.permute.xlu2 %631 }
 0x116   :  { %1529 = vmatmul.msk.f32.gmra.mxu2 %vm709_vm1, %v571_v42  ;;  %v2182_v42 = vpop.permute.xlu1 %641 }
 0x117   :  { %2737 = vst [vmem:[#allocation13_spill] sm:$0xff] %v2182_v42 }
 0x118   :  { %v333_v43 = vpop.f32.mrf.mxu0 }
 0x119   :  { %v479_v44 = vpop.f32.mrf.mxu1  ;;  %v2154_v16 = vadd.f32 %v2046_v31, %v333_v43 }
 0x11a   :  { %v2185_v43 = vpop.permute.xlu0 %651 }
 0x11b   :  { %2738 = vst [vmem:[#allocation14_spill] sm:$0xff] %v2185_v43 }
 0x11e   :  { %1530 = vmatmul.msk.f32.gmra.mxu2 %vm709_vm1, %v572_v46 }
 0x120   :  { %v336_v47 = vpop.f32.mrf.mxu0 }
 0x121   :  { %v482_v48 = vpop.f32.mrf.mxu1  ;;  %v2148_v32 = vadd.f32 %v473_v30, %v336_v47  ;;  %v2165_v30 = vpop.f32.mrf.mxu3 }
 0x126   :  { %1531 = vmatmul.msk.f32.gmra.mxu2 %vm709_vm1, %v573_v49 }
 0x128   :  { %v339_v51 = vpop.f32.mrf.mxu0 }
 0x129   :  { %v485_v52 = vpop.f32.mrf.mxu1  ;;  %v2145_v23 = vadd.f32 %v476_v41, %v339_v51  ;;  %v2189_v46 = vpop.f32.mrf.mxu3 }
 0x12e   :  { %1532 = vmatmul.msk.f32.gmra.mxu2 %vm709_vm1, %v574_v53  ;;  %v2201_v53 = vpop.permute.xlu2 %646 }
 0x12f   :  { %2740 = vst [vmem:[#allocation16_spill] sm:$0xff] %v2201_v53 }
 0x130   :  { %v342_v55 = vpop.f32.mrf.mxu0 }
 0x131   :  { %v488_v56 = vpop.f32.mrf.mxu1  ;;  %v2138_v18 = vadd.f32 %v479_v44, %v342_v55  ;;  %v2187_v44 = vpop.f32.mrf.mxu2 }
 0x132   :  { %v2203_v55 = vpop.permute.xlu1 %656 }
 0x133   :  { %2741 = vst [vmem:[#allocation17_spill] sm:$0xff] %v2203_v55 }
 0x136   :  { %1533 = vmatmul.msk.f32.gmra.mxu2 %vm709_vm1, %v575_v58 }
 0x138   :  { %v345_v59 = vpop.f32.mrf.mxu0 }
 0x139   :  { %v491_v60 = vpop.f32.mrf.mxu1  ;;  %v2131_v8 = vadd.f32 %v482_v48, %v345_v59 }
 0x13e   :  { %1534 = vmatmul.msk.f32.gmra.mxu2 %vm709_vm1, %v576_v2  ;;  %v2209_v2 = vpop.f32.mrf.mxu3 }
 0x140   :  { %v348_v4 = vpop.f32.mrf.mxu0 }
 0x141   :  { %v494_v5 = vpop.f32.mrf.mxu1  ;;  %v2127_v6 = vadd.f32 %v485_v52, %v348_v4  ;;  %v885_v52 = vld [vmem:[%s2713_s2 + $0x8] sm:$0xff] }
 0x143   :  { %940 = vmatpush.msra.mxu2 %v2127_v6 }
 0x145   :  { %941 = vmatpush.msra.mxu2 %v2131_v8 }
 0x147   :  { %942 = vmatpush.msra.mxu2 %v2138_v18 }
 0x148   :  { %v351_v24 = vpop.f32.mrf.mxu0 }
 0x149   :  { %v497_v17 = vpop.f32.mrf.mxu1  ;;  %v2150_v1 = vadd.f32 %v488_v56, %v351_v24  ;;  %943 = vmatpush.msra.mxu2 %v2145_v23  ;;  %v2219_v24 = vpop.permute.xlu2 %661 }
 0x14a   :  { %2743 = vst [vmem:[#allocation19_spill] sm:$0xff] %v2219_v24 }
 0x14b   :  { %944 = vmatpush.msra.mxu2 %v2148_v32 }
 0x14d   :  { %945 = vmatpush.msra.mxu2 %v2154_v16 }
 0x14f   :  { %946 = vmatpush.msra.mxu2 %v2160_v10 }
 0x150   :  { %v354_v31 = vpop.f32.mrf.mxu0 }
 0x151   :  { %v500_v39 = vpop.f32.mrf.mxu1  ;;  %v2172_v41 = vadd.f32 %v491_v60, %v354_v31  ;;  %947 = vmatpush.msra.mxu2 %v2076_v37  ;;  %v2207_v60 = vpop.f32.mrf.mxu2 }
 0x152   :  { %v2263_v26 = vpop.permute.xlu2 %676 }
 0x153   :  { %948 = vmatpush.msra.mxu2 %v2048_v33  ;;  %2751 = vst [vmem:[#allocation27_spill] sm:$0xff] %v2263_v26 }
 0x155   :  { %949 = vmatpush.msra.mxu2 %v2023_v25 }
 0x156   :  { %1547 = vmatmul.msk.f32.vlgmr.msra.gmra.mxu2 %vm709_vm1, %v884_v21 }
 0x158   :  { %v357_v47 = vpop.f32.mrf.mxu0 }
 0x159   :  { %v503_v48 = vpop.f32.mrf.mxu1  ;;  %v2191_v49 = vadd.f32 %v494_v5, %v357_v47  ;;  %v886_v5 = vld [vmem:[%s2713_s2 + $0x10] sm:$0xff] }
 0x15b   :  { %v2195_v51 = vmul.f32 %v2185_v43, %v2191_v49 }
 0x15d   :  { %2739 = vst [vmem:[#allocation15_spill] sm:$0xff] %v2195_v51  ;;  %v2237_v51 = vpop.permute.xlu0 %666 }
 0x15e   :  { %1548 = vmatmul.msk.f32.gmra.mxu2 %vm709_vm1, %v885_v52  ;;  %v887_v52 = vld [vmem:[%s2713_s2 + $0x18] sm:$0xff]  ;;  %2746 = vst [vmem:[#allocation22_spill] sm:$0xff] %v2237_v51 }
 0x160   :  { %v360_v56 = vpop.f32.mrf.mxu0 }
 0x161   :  { %v506_v58 = vpop.f32.mrf.mxu1  ;;  %v2205_v59 = vadd.f32 %v497_v17, %v360_v56  ;;  %v2230_v56 = vpop.f32.mrf.mxu2 }
 0x163   :  { %v2213_v4 = vmul.f32 %v2203_v55, %v2205_v59 }
 0x165   :  { %2742 = vst [vmem:[#allocation18_spill] sm:$0xff] %v2213_v4  ;;  %v2232_v4 = vpop.f32.mrf.mxu3 }
 0x166   :  { %1549 = vmatmul.msk.f32.gmra.mxu2 %vm709_vm1, %v886_v5  ;;  %v2235_v5 = vpop.permute.xlu1 %671 }
 0x167   :  { %2745 = vst [vmem:[#allocation21_spill] sm:$0xff] %v2235_v5 }
 0x168   :  { %v363_v31 = vpop.f32.mrf.mxu0 }
 0x169   :  { %v509_v21 = vpop.f32.mrf.mxu1  ;;  %v2221_v17 = vadd.f32 %v500_v39, %v363_v31  ;;  %v2245_v43 = vpop.f32.mrf.mxu2 }
 0x16b   :  { %v2225_v47 = vmul.f32 %v2219_v24, %v2221_v17 }
 0x16d   :  { %2744 = vst [vmem:[#allocation20_spill] sm:$0xff] %v2225_v47  ;;  %v888_v47 = vld [vmem:[%s2713_s2 + $0x20] sm:$0xff]  ;;  %v2247_v53 = vpop.f32.mrf.mxu3 }
 0x16e   :  { %1550 = vmatmul.msk.f32.gmra.mxu2 %vm709_vm1, %v887_v52  ;;  %v2250_v52 = vpop.permute.xlu1 %686 }
 0x16f   :  { %2748 = vst [vmem:[#allocation24_spill] sm:$0xff] %v2250_v52 }
 0x170   :  { %v366_v39 = vpop.f32.mrf.mxu0 }
 0x171   :  { %v512_v31 = vpop.f32.mrf.mxu1  ;;  %v504_v55 = vadd.f32 %v503_v48, %v366_v39 }
 0x173   :  { %v2240_v24 = vmul.f32 %v2237_v51, %v504_v55 }
 0x175   :  { %2747 = vst [vmem:[#allocation23_spill] sm:$0xff] %v2240_v24  ;;  %v889_v24 = vld [vmem:[%s2713_s2 + $0x28] sm:$0xff]  ;;  %v545_v15 = vpop.f32.mrf.mxu3 }
 0x176   :  { %1551 = vmatmul.msk.f32.gmra.mxu2 %vm709_vm1, %v888_v47  ;;  %v408_v47 = vpop.f32.mrf.mxu2 }
 0x178   :  { %v369_v13 = vpop.f32.mrf.mxu0 }
 0x179   :  { %v515_v42 = vpop.f32.mrf.mxu1  ;;  %v507_v14 = vadd.f32 %v506_v58, %v369_v13 }
 0x17a   :  { %v516_v48 = vadd.f32 %v515_v42, %v2091_v45  ;;  %v890_v42 = vld [vmem:[%s2713_s2 + $0x30] sm:$0xff] }
 0x17b   :  { %v2260_v51 = vmul.f32 %v2235_v5, %v507_v14 }
 0x17c   :  { %v2254_v39 = vmul.f32 %v2250_v52, %v516_v48  ;;  %823 = vmatpush.msra.mxu3 %v516_v48  ;;  %v2272_v48 = vpop.permute.xlu0 %681 }
 0x17d   :  { %2750 = vst [vmem:[#allocation26_spill] sm:$0xff] %v2260_v51  ;;  %v2276_v51 = vld [vmem:[#allocation4] ss:$0 sm:$0xff] }
 0x17e   :  { %2749 = vst [vmem:[#allocation25_spill] sm:$0xff] %v2254_v39  ;;  %1552 = vmatmul.msk.f32.gmra.mxu2 %vm709_vm1, %v889_v24  ;;  %v689_v24 = vmul.f32 %v2109_v57, %v2023_v25 }
 0x180   :  { %v372_v19 = vpop.f32.mrf.mxu0 }
 0x181   :  { %v510_v13 = vadd.f32 %v509_v21, %v372_v19  ;;  %v697_v19 = vmul.f32 %v2179_v40, %v2131_v8 }
 0x183   :  { %v2266_v45 = vmul.f32 %v2263_v26, %v510_v13 }
 0x185   :  { %2752 = vst [vmem:[#allocation28_spill] sm:$0xff] %v2266_v45 }
 0x186   :  { %1553 = vmatmul.msk.f32.gmra.mxu2 %vm709_vm1, %v890_v42 }
 0x188   :  { %v375_v58 = vpop.f32.mrf.mxu0 }
 0x189   :  { %v513_v39 = vadd.f32 %v512_v31, %v375_v58  ;;  %v757_v21 = vpop.f32.mrf.mxu2  ;;  %v891_v31 = vld [vmem:[%s2713_s2 + $0x38] sm:$0xff] }
 0x18a   :  { %v781_v45 = vpop.f32.mrf.mxu3  ;;  %v758_v52 = vadd.f32 %v757_v21, %v689_v24 }
 0x18b   :  { %v782_v26 = vadd.f32 %v781_v45, %v697_v19  ;;  %v2281_v5 = vmul.f32 %v2272_v48, %v513_v39  ;;  %824 = vmatpush.msra.mxu3 %v513_v39  ;;  %v690_v19 = vmul.f32 %v2124_v3, %v2048_v33  ;;  %v698_v39 = vmul.f32 %v2169_v38, %v2127_v6 }
 0x18c   :  { %v1081_v42 = vadd.f32 %v2276_v51, %v758_v52 }
 0x18d   :  { %2753 = vst [vmem:[#allocation29_spill] sm:$0xff] %v2281_v5  ;;  %v1089_v25 = vadd.f32 %v2276_v51, %v782_v26  ;;  %825 = vmatpush.msra.mxu3 %v510_v13 }
 0x18e   :  { %1554 = vmatmul.msk.f32.gmra.mxu2 %vm709_vm1, %v891_v31  ;;  %v1121_v8 = vmin.f32 %v1081_v42, 0.0  ;;  %vm1101_vm2 = vcmp.gt.f32.partialorder %v1081_v42, 0.0 }
 0x18f   :  { %v1129_v58 = vmin.f32 %v1089_v25, 0.0  ;;  %826 = vmatpush.msra.mxu3 %v507_v14  ;;  %v892_v14 = vld [vmem:[%s2713_s2 + $0x40] sm:$0xff]  ;;  %vm1109_vm3 = vcmp.gt.f32.partialorder %v1089_v25, 0.0 }
 0x190   :  { %v1141_v24 = vmul.f32 1.442695, %v1121_v8 }
 0x191   :  { %v1157_v45 = vmul.f32 1.442695, %v1129_v58  ;;  %827 = vmatpush.msra.mxu3 %v504_v55  ;;  %v760_v21 = vpop.f32.mrf.mxu2  ;;  %v691_v58 = vmul.f32 %v2119_v0, %v2076_v37  ;;  %v893_v37 = vld [vmem:[%s2713_s2 + $0x48] sm:$0xff] }
 0x192   :  { %v784_v5 = vpop.f32.mrf.mxu3  ;;  %1646 = vpow2.f32 %v1141_v24  ;;  %v761_v52 = vadd.f32 %v760_v21, %v690_v19  ;;  %v2327_v21 = vadd.f32 %v2232_v4, %v2230_v56 }
 0x193   :  { %v785_v26 = vadd.f32 %v784_v5, %v698_v39  ;;  %828 = vmatpush.msra.mxu3 %v2221_v17  ;;  %1648 = vpow2.f32 %v1157_v45  ;;  %v2308_v5 = vadd.f32 %v545_v15, %v408_v47 }
 0x194   :  { %v2298_v13 = vadd.f32 %v2276_v51, %v761_v52  ;;  %v518_v52 = vpop.f32.mrf.mxu1 }
 0x195   :  { %v2301_v33 = vadd.f32 %v2276_v51, %v785_v26  ;;  %829 = vmatpush.msra.mxu3 %v2205_v59  ;;  %v579_v59 = vld [vmem:[%s2712_s1 + $0x50] sm:$0xff] }
 0x196   :  { %1555 = vmatmul.msk.f32.gmra.mxu2 %vm709_vm1, %v892_v14  ;;  %v1122_v6 = vmin.f32 %v2298_v13, 0.0  ;;  %v2336_v14 = vadd.f32 %v2209_v2, %v2207_v60  ;;  %v692_v60 = vmul.f32 %v2141_v20, %v2160_v10  ;;  %v580_v2 = vld [vmem:[%s2712_s1 + $0x58] sm:$0xff]  ;;  %vm1102_vm4 = vcmp.gt.f32.partialorder %v2298_v13, 0.0 }
 0x197   :  { %v1130_v55 = vmin.f32 %v2301_v33, 0.0  ;;  %830 = vmatpush.msra.mxu3 %v2191_v49  ;;  %v2318_v49 = vadd.f32 %v2247_v53, %v2245_v43  ;;  %vm1110_vm5 = vcmp.gt.f32.partialorder %v2301_v33, 0.0 }
 0x198   :  { %v1647_v17 = vpop.eup %1646  ;;  %v1143_v31 = vmul.f32 1.442695, %v1122_v6 }
 0x199   :  { %v1159_v8 = vmul.f32 1.442695, %v1130_v55  ;;  %831 = vmatpush.msra.mxu3 %v2172_v41  ;;  %v1649_v24 = vpop.eup %1648  ;;  %v1567_v45 = vadd.f32 -1.0, %v1647_v17  ;;  %v763_v19 = vpop.f32.mrf.mxu2 }
 0x19a   :  { %v1575_v15 = vadd.f32 -1.0, %v1649_v24  ;;  %1650 = vpow2.f32 %v1143_v31  ;;  %v764_v47 = vadd.f32 %v763_v19, %v691_v58  ;;  %v2342_v31 = vadd.f32 %v2189_v46, %v2187_v44 }
 0x19b   :  { %832 = vmatpush.msra.mxu3 %v2150_v1  ;;  %v1201_v39 = vmul.f32 1.6732632, %v1567_v45  ;;  %1652 = vpow2.f32 %v1159_v8  ;;  %v2360_v8 = vadd.f32 %v2165_v30, %v2163_v35  ;;  %v2366_v24 = vadd.f32 %v2136_v12, %v2134_v9 }
 0x19c   :  { %1537 = vmatmul.msk.f32.vlgmr.msra.gmra.mxu3 %vm709_vm1, %v579_v59  ;;  %v1209_v43 = vmul.f32 1.6732632, %v1575_v15  ;;  %v2330_v53 = vadd.f32 %v2276_v51, %v764_v47 }
 0x19d   :  { %1017 = vmatpush.msrb.mxu3 %v2308_v5  ;;  %v1221_v26 = vsel %vm1101_vm2, %v1081_v42, %v1201_v39  ;;  %v2377_v39 = vadd.f32 %v2117_v63, %v2115_v62 }
 0x19e   :  { %1556 = vmatmul.msk.f32.gmra.mxu2 %vm709_vm1, %v893_v37  ;;  %v1241_v6 = vmul.f32 1.050701, %v1221_v26  ;;  %v1229_v55 = vsel %vm1109_vm3, %v1089_v25, %v1209_v43  ;;  %v1123_v4 = vmin.f32 %v2330_v53, 0.0  ;;  %v521_v37 = vpop.f32.mrf.mxu1  ;;  %v581_v43 = vld [vmem:[%s2712_s1 + $0x60] sm:$0xff]  ;;  %vm1103_vm6 = vcmp.gt.f32.partialorder %v2330_v53, 0.0 }
 0x19f   :  { %1018 = vmatpush.msrb.mxu3 %v2318_v49  ;;  %v1249_v56 = vmul.f32 1.050701, %v1229_v55  ;;  %v2394_v26 = vadd.f32 %v521_v37, %v2107_v54 }
 0x1a0   :  { %v1651_v17 = vpop.eup %1650  ;;  %1261 = vst.msk [vmem:[%s2717_s6] sm:$0xff] %vm153_vm0, %v1241_v6  ;;  %v1145_v42 = vmul.f32 1.442695, %v1123_v4 }
 0x1a1   :  { %1019 = vmatpush.msrb.mxu3 %v2327_v21  ;;  %v1653_v25 = vpop.eup %1652  ;;  %1269 = vst.msk [vmem:[%s2717_s6 + $0x40] sm:$0xff] %vm153_vm0, %v1249_v56  ;;  %v1568_v44 = vadd.f32 -1.0, %v1651_v17  ;;  %v766_v46 = vpop.f32.mrf.mxu2 }
 0x1a2   :  { %v1576_v58 = vadd.f32 -1.0, %v1653_v25  ;;  %1654 = vpow2.f32 %v1145_v42  ;;  %v767_v59 = vadd.f32 %v766_v46, %v692_v60  ;;  %v582_v60 = vld [vmem:[%s2712_s1 + $0x68] sm:$0xff] }
 0x1a3   :  { %1020 = vmatpush.msrb.mxu3 %v2336_v14  ;;  %v1202_v10 = vmul.f32 1.6732632, %v1568_v44 }
 0x1a4   :  { %1538 = vmatmul.msk.f32.gmra.mxu3 %vm709_vm1, %v580_v2  ;;  %v1210_v45 = vmul.f32 1.6732632, %v1576_v58  ;;  %v1084_v19 = vadd.f32 %v2276_v51, %v767_v59 }
 0x1a5   :  { %1021 = vmatpush.msrb.mxu3 %v2342_v31  ;;  %v1222_v35 = vsel %vm1102_vm4, %v2298_v13, %v1202_v10 }
 0x1a6   :  { %v1242_v30 = vmul.f32 1.050701, %v1222_v35  ;;  %v1230_v15 = vsel %vm1110_vm5, %v2301_v33, %v1210_v45  ;;  %v1124_v47 = vmin.f32 %v1084_v19, 0.0  ;;  %v693_v33 = vmul.f32 %v2129_v7, %v2154_v16 }
 0x1a7   :  { %1022 = vmatpush.msrb.mxu3 %v2360_v8  ;;  %v1250_v9 = vmul.f32 1.050701, %v1230_v15  ;;  %v2399_v16 = vadd.f32 %v518_v52, %v2100_v50  ;;  %v694_v52 = vmul.f32 %v2157_v61, %v2148_v32  ;;  %vm1104_vm7 = vcmp.gt.f32.partialorder %v1084_v19, 0.0 }
 0x1a8   :  { %v1655_v12 = vpop.eup %1654  ;;  %1262 = vst.msk [vmem:[%s2717_s6 + $0x8] sm:$0xff] %vm153_vm0, %v1242_v30  ;;  %v1147_v13 = vmul.f32 1.442695, %v1124_v47  ;;  %v695_v35 = vmul.f32 %v2143_v22, %v2145_v23  ;;  %v583_v30 = vld [vmem:[%s2712_s1 + $0x70] sm:$0xff] }
 0x1a9   :  { %1023 = vmatpush.msrb.mxu3 %v2366_v24  ;;  %1270 = vst.msk [vmem:[%s2717_s6 + $0x48] sm:$0xff] %vm153_vm0, %v1250_v9  ;;  %v1569_v62 = vadd.f32 -1.0, %v1655_v12  ;;  %v769_v63 = vpop.f32.mrf.mxu2 }
 0x1aa   :  { %1656 = vpow2.f32 %v1147_v13  ;;  %v770_v6 = vadd.f32 %v769_v63, %v693_v33  ;;  %v584_v63 = vld [vmem:[%s2712_s1 + $0x78] sm:$0xff] }
 0x1ab   :  { %1024 = vmatpush.msrb.mxu3 %v2377_v39  ;;  %v1203_v55 = vmul.f32 1.6732632, %v1569_v62  ;;  %v696_v62 = vmul.f32 %v2167_v36, %v2138_v18 }
 0x1ac   :  { %1539 = vmatmul.msk.f32.gmra.mxu3 %vm709_vm1, %v581_v43  ;;  %v1085_v4 = vadd.f32 %v2276_v51, %v770_v6 }
 0x1ad   :  { %1025 = vmatpush.msrb.mxu3 %v2394_v26  ;;  %v1223_v56 = vsel %vm1103_vm6, %v2330_v53, %v1203_v55 }
 0x1ae   :  { %v1243_v54 = vmul.f32 1.050701, %v1223_v56  ;;  %v1125_v17 = vmin.f32 %v1085_v4, 0.0  ;;  %vm1105_vm8 = vcmp.gt.f32.partialorder %v1085_v4, 0.0 }
 0x1af   :  { %1026 = vmatpush.msrb.mxu3 %v2399_v16 }
 0x1b0   :  { %v1657_v42 = vpop.eup %1656  ;;  %1263 = vst.msk [vmem:[%s2717_s6 + $0x10] sm:$0xff] %vm153_vm0, %v1243_v54  ;;  %v1149_v50 = vmul.f32 1.442695, %v1125_v17 }
 0x1b1   :  { %v1570_v2 = vadd.f32 -1.0, %v1657_v42  ;;  %v772_v53 = vpop.f32.mrf.mxu2 }
 0x1b2   :  { %1658 = vpow2.f32 %v1149_v50  ;;  %v773_v25 = vadd.f32 %v772_v53, %v694_v52 }
 0x1b3   :  { %v1204_v44 = vmul.f32 1.6732632, %v1570_v2 }
 0x1b4   :  { %1540 = vmatmul.msk.f32.gmra.mxu3 %vm709_vm1, %v582_v60  ;;  %v1086_v46 = vadd.f32 %v2276_v51, %v773_v25  ;;  %v585_v60 = vld [vmem:[%s2712_s1 + $0x80] sm:$0xff] }
 0x1b5   :  { %v1224_v58 = vsel %vm1104_vm7, %v1084_v19, %v1204_v44 }
 0x1b6   :  { %v1244_v59 = vmul.f32 1.050701, %v1224_v58  ;;  %v1126_v10 = vmin.f32 %v1086_v46, 0.0  ;;  %vm1106_vm9 = vcmp.gt.f32.partialorder %v1086_v46, 0.0  ;;  %v586_v58 = vld [vmem:[%s2712_s1 + $0x88] sm:$0xff] }
 0x1b8   :  { %v1659_v45 = vpop.eup %1658  ;;  %1264 = vst.msk [vmem:[%s2717_s6 + $0x18] sm:$0xff] %vm153_vm0, %v1244_v59  ;;  %v1151_v32 = vmul.f32 1.442695, %v1126_v10 }
 0x1b9   :  { %v1571_v15 = vadd.f32 -1.0, %v1659_v45  ;;  %v775_v47 = vpop.f32.mrf.mxu2 }
 0x1ba   :  { %1660 = vpow2.f32 %v1151_v32  ;;  %v776_v19 = vadd.f32 %v775_v47, %v695_v35  ;;  %v864_v35 = vmul.f32 %v2109_v57, %v2059_v11 }
 0x1bb   :  { %v1205_v37 = vmul.f32 1.6732632, %v1571_v15  ;;  %v587_v15 = vld [vmem:[%s2712_s1 + $0x90] sm:$0xff] }
 0x1bc   :  { %1541 = vmatmul.msk.f32.gmra.mxu3 %vm709_vm1, %v583_v30  ;;  %v1087_v9 = vadd.f32 %v2276_v51, %v776_v19 }
 0x1bd   :  { %v1225_v12 = vsel %vm1105_vm8, %v1085_v4, %v1205_v37 }
 0x1be   :  { %v1245_v13 = vmul.f32 1.050701, %v1225_v12  ;;  %v1127_v33 = vmin.f32 %v1087_v9, 0.0  ;;  %vm1107_vm10 = vcmp.gt.f32.partialorder %v1087_v9, 0.0  ;;  %v588_v12 = vld [vmem:[%s2712_s1 + $0x98] sm:$0xff] }
 0x1c0   :  { %v1661_v43 = vpop.eup %1660  ;;  %1265 = vst.msk [vmem:[%s2717_s6 + $0x20] sm:$0xff] %vm153_vm0, %v1245_v13  ;;  %v1153_v23 = vmul.f32 1.442695, %v1127_v33 }
 0x1c1   :  { %v1572_v6 = vadd.f32 -1.0, %v1661_v43  ;;  %v778_v55 = vpop.f32.mrf.mxu2 }
 0x1c2   :  { %1662 = vpow2.f32 %v1153_v23  ;;  %v779_v4 = vadd.f32 %v778_v55, %v696_v62  ;;  %v866_v62 = vmul.f32 %v2119_v0, %v1956_v27  ;;  %v867_v27 = vmul.f32 %v2141_v20, %v2040_v29 }
 0x1c3   :  { %v1206_v56 = vmul.f32 1.6732632, %v1572_v6 }
 0x1c4   :  { %1542 = vmatmul.msk.f32.gmra.mxu3 %vm709_vm1, %v584_v63  ;;  %v1088_v54 = vadd.f32 %v2276_v51, %v779_v4 }
 0x1c5   :  { %v1226_v17 = vsel %vm1106_vm9, %v1086_v46, %v1206_v56 }
 0x1c6   :  { %v1246_v42 = vmul.f32 1.050701, %v1226_v17  ;;  %v1128_v50 = vmin.f32 %v1088_v54, 0.0  ;;  %vm1108_vm11 = vcmp.gt.f32.partialorder %v1088_v54, 0.0 }
 0x1c8   :  { %v1663_v52 = vpop.eup %1662  ;;  %1266 = vst.msk [vmem:[%s2717_s6 + $0x28] sm:$0xff] %vm153_vm0, %v1246_v42  ;;  %v1155_v18 = vmul.f32 1.442695, %v1128_v50 }
 0x1c9   :  { %v1573_v2 = vadd.f32 -1.0, %v1663_v52 }
 0x1ca   :  { %1664 = vpow2.f32 %v1155_v18 }
 0x1cb   :  { %v1207_v53 = vmul.f32 1.6732632, %v1573_v2 }
 0x1cc   :  { %1543 = vmatmul.msk.f32.gmra.mxu3 %vm709_vm1, %v585_v60  ;;  %v895_v60 = vld [vmem:[%s2713_s2 + $0x58] sm:$0xff] }
 0x1cd   :  { %v1227_v25 = vsel %vm1107_vm10, %v1087_v9, %v1207_v53  ;;  %v865_v9 = vmul.f32 %v2124_v3, %v2052_v34  ;;  %v894_v3 = vld [vmem:[%s2713_s2 + $0x50] sm:$0xff] }
 0x1ce   :  { %v1247_v44 = vmul.f32 1.050701, %v1227_v25 }
 0x1d0   :  { %v1665_v46 = vpop.eup %1664  ;;  %1267 = vst.msk [vmem:[%s2717_s6 + $0x30] sm:$0xff] %vm153_vm0, %v1247_v44 }
 0x1d1   :  { %v1574_v59 = vadd.f32 -1.0, %v1665_v46 }
 0x1d3   :  { %v1208_v10 = vmul.f32 1.6732632, %v1574_v59 }
 0x1d4   :  { %1544 = vmatmul.msk.f32.gmra.mxu3 %vm709_vm1, %v586_v58  ;;  %v868_v58 = vmul.f32 %v2129_v7, %v2034_v28 }
 0x1d5   :  { %v1228_v45 = vsel %vm1108_vm11, %v1088_v54, %v1208_v10 }
 0x1d6   :  { %v1248_v32 = vmul.f32 1.050701, %v1228_v45 }
 0x1d8   :  { %1268 = vst.msk [vmem:[%s2717_s6 + $0x38] sm:$0xff] %vm153_vm0, %v1248_v32  ;;  %v896_v32 = vld [vmem:[%s2713_s2 + $0x60] sm:$0xff] }
 0x1d9   :  { %v951_v30 = vpop.f32.mrf.mxu2 }
 0x1da   :  { %v1058_v47 = vadd.f32 %v951_v30, %v864_v35 }
 0x1dc   :  { %v1281_v19 = vadd.f32 %v2276_v51, %v1058_v47  ;;  %1545 = vmatmul.msk.f32.gmra.mxu3 %vm709_vm1, %v587_v15 }
 0x1de   :  { %v1321_v37 = vmin.f32 %v1281_v19, 0.0  ;;  %vm1301_vm12 = vcmp.gt.f32.partialorder %v1281_v19, 0.0 }
 0x1e0   :  { %v1341_v11 = vmul.f32 1.442695, %v1321_v37  ;;  %v2754_v37 = vld [vmem:[#allocation12_spill] sm:$0xff] }
 0x1e1   :  { %v954_v57 = vpop.f32.mrf.mxu2 }
 0x1e2   :  { %1666 = vpow2.f32 %v1341_v11  ;;  %v1059_v13 = vadd.f32 %v954_v57, %v865_v9  ;;  %v869_v9 = vmul.f32 %v2157_v61, %v2754_v37 }
 0x1e4   :  { %v1282_v33 = vadd.f32 %v2276_v51, %v1059_v13  ;;  %1546 = vmatmul.msk.f32.gmra.mxu3 %vm709_vm1, %v588_v12  ;;  %v897_v13 = vld [vmem:[%s2713_s2 + $0x68] sm:$0xff] }
 0x1e6   :  { %v1322_v43 = vmin.f32 %v1282_v33, 0.0  ;;  %vm1302_vm13 = vcmp.gt.f32.partialorder %v1282_v33, 0.0 }
 0x1e8   :  { %v1667_v23 = vpop.eup %1666  ;;  %v1343_v63 = vmul.f32 1.442695, %v1322_v43 }
 0x1e9   :  { %v1587_v6 = vadd.f32 -1.0, %v1667_v23  ;;  %v957_v34 = vpop.f32.mrf.mxu2 }
 0x1ea   :  { %1668 = vpow2.f32 %v1343_v63  ;;  %v1060_v55 = vadd.f32 %v957_v34, %v866_v62  ;;  %v2755_v34 = vld [vmem:[#allocation11_spill] sm:$0xff] }
 0x1eb   :  { %v1401_v4 = vmul.f32 1.6732632, %v1587_v6 }
 0x1ec   :  { %v1283_v56 = vadd.f32 %v2276_v51, %v1060_v55  ;;  %1557 = vmatmul.msk.f32.vlgmr.msrb.gmra.mxu3 %vm709_vm1, %v894_v3  ;;  %v870_v3 = vmul.f32 %v2143_v22, %v2755_v34 }
 0x1ed   :  { %v1421_v54 = vsel %vm1301_vm12, %v1281_v19, %v1401_v4 }
 0x1ee   :  { %v1441_v17 = vmul.f32 1.050701, %v1421_v54  ;;  %v1323_v42 = vmin.f32 %v1283_v56, 0.0  ;;  %vm1303_vm14 = vcmp.gt.f32.partialorder %v1283_v56, 0.0  ;;  %v898_v54 = vld [vmem:[%s2713_s2 + $0x70] sm:$0xff] }
 0x1f0   :  { %v1669_v50 = vpop.eup %1668  ;;  %1461 = vst.msk [vmem:[%s2717_s6 + $0x50] sm:$0xff] %vm153_vm0, %v1441_v17  ;;  %v1345_v0 = vmul.f32 1.442695, %v1323_v42 }
 0x1f1   :  { %v1588_v52 = vadd.f32 -1.0, %v1669_v50  ;;  %v960_v18 = vpop.f32.mrf.mxu2 }
 0x1f2   :  { %1670 = vpow2.f32 %v1345_v0  ;;  %v1061_v2 = vadd.f32 %v960_v18, %v867_v27  ;;  %v2756_v18 = vld [vmem:[#allocation10_spill] sm:$0xff] }
 0x1f3   :  { %v1402_v53 = vmul.f32 1.6732632, %v1588_v52 }
 0x1f4   :  { %v1284_v25 = vadd.f32 %v2276_v51, %v1061_v2  ;;  %1558 = vmatmul.msk.f32.gmra.mxu3 %vm709_vm1, %v895_v60  ;;  %v871_v60 = vmul.f32 %v2167_v36, %v2756_v18 }
 0x1f5   :  { %v1422_v29 = vsel %vm1302_vm13, %v1282_v33, %v1402_v53 }
 0x1f6   :  { %v1442_v20 = vmul.f32 1.050701, %v1422_v29  ;;  %v1324_v44 = vmin.f32 %v1284_v25, 0.0  ;;  %vm1304_vm15 = vcmp.gt.f32.partialorder %v1284_v25, 0.0  ;;  %v899_v29 = vld [vmem:[%s2713_s2 + $0x78] sm:$0xff] }
 0x1f8   :  { %v1671_v46 = vpop.eup %1670  ;;  %1462 = vst.msk [vmem:[%s2717_s6 + $0x58] sm:$0xff] %vm153_vm0, %v1442_v20  ;;  %v1347_v59 = vmul.f32 1.442695, %v1324_v44 }
 0x1f9   :  { %v1589_v10 = vadd.f32 -1.0, %v1671_v46  ;;  %v963_v45 = vpop.f32.mrf.mxu2 }
 0x1fa   :  { %1672 = vpow2.f32 %v1347_v59  ;;  %v1062_v35 = vadd.f32 %v963_v45, %v868_v58  ;;  %v2757_v45 = vld [vmem:[#allocation9_spill] sm:$0xff] }
 0x1fb   :  { %v1403_v30 = vmul.f32 1.6732632, %v1589_v10 }
 0x1fc   :  { %v1285_v15 = vadd.f32 %v2276_v51, %v1062_v35  ;;  %1559 = vmatmul.msk.f32.gmra.mxu3 %vm709_vm1, %v896_v32  ;;  %v872_v32 = vmul.f32 %v2179_v40, %v2757_v45 }
 0x1fd   :  { %v1423_v28 = vsel %vm1303_vm14, %v1283_v56, %v1403_v30 }
 0x1fe   :  { %v1443_v7 = vmul.f32 1.050701, %v1423_v28  ;;  %v1325_v47 = vmin.f32 %v1285_v15, 0.0  ;;  %vm1305_vm2 = vcmp.gt.f32.partialorder %v1285_v15, 0.0  ;;  %v900_v28 = vld [vmem:[%s2713_s2 + $0x80] sm:$0xff] }
 0x200   :  { %v1673_v19 = vpop.eup %1672  ;;  %1463 = vst.msk [vmem:[%s2717_s6 + $0x60] sm:$0xff] %vm153_vm0, %v1443_v7  ;;  %v1349_v11 = vmul.f32 1.442695, %v1325_v47 }
 0x201   :  { %v1590_v57 = vadd.f32 -1.0, %v1673_v19  ;;  %v966_v12 = vpop.f32.mrf.mxu2 }
 0x202   :  { %1674 = vpow2.f32 %v1349_v11  ;;  %v1063_v33 = vadd.f32 %v966_v12, %v869_v9  ;;  %v2758_v11 = vld [vmem:[#allocation13_spill] sm:$0xff] }
 0x203   :  { %v1404_v43 = vmul.f32 1.6732632, %v1590_v57  ;;  %v699_v57 = vmul.f32 %v2758_v11, %v2399_v16 }
 0x204   :  { %v1286_v23 = vadd.f32 %v2276_v51, %v1063_v33  ;;  %1560 = vmatmul.msk.f32.gmra.mxu3 %vm709_vm1, %v897_v13  ;;  %v2759_v33 = vld [vmem:[#allocation8_spill] sm:$0xff] }
 0x205   :  { %v1424_v61 = vsel %vm1304_vm15, %v1284_v25, %v1404_v43  ;;  %v873_v43 = vmul.f32 %v2169_v38, %v2759_v33 }
 0x206   :  { %v1444_v62 = vmul.f32 1.050701, %v1424_v61  ;;  %v1326_v63 = vmin.f32 %v1286_v23, 0.0  ;;  %vm1306_vm3 = vcmp.gt.f32.partialorder %v1286_v23, 0.0 }
 0x208   :  { %v1675_v6 = vpop.eup %1674  ;;  %1464 = vst.msk [vmem:[%s2717_s6 + $0x68] sm:$0xff] %vm153_vm0, %v1444_v62  ;;  %v1351_v55 = vmul.f32 1.442695, %v1326_v63 }
 0x209   :  { %v1591_v4 = vadd.f32 -1.0, %v1675_v6  ;;  %v969_v56 = vpop.f32.mrf.mxu2  ;;  %v901_v6 = vld [vmem:[%s2713_s2 + $0x88] sm:$0xff] }
 0x20a   :  { %1676 = vpow2.f32 %v1351_v55  ;;  %v1064_v17 = vadd.f32 %v969_v56, %v870_v3 }
 0x20b   :  { %v1405_v42 = vmul.f32 1.6732632, %v1591_v4 }
 0x20c   :  { %v1287_v50 = vadd.f32 %v2276_v51, %v1064_v17  ;;  %1561 = vmatmul.msk.f32.gmra.mxu3 %vm709_vm1, %v898_v54 }
 0x20d   :  { %v1425_v22 = vsel %vm1305_vm2, %v1285_v15, %v1405_v42  ;;  %v2760_v42 = vld [vmem:[#allocation16_spill] sm:$0xff] }
 0x20e   :  { %v1445_v27 = vmul.f32 1.050701, %v1425_v22  ;;  %v1327_v0 = vmin.f32 %v1287_v50, 0.0  ;;  %vm1307_vm4 = vcmp.gt.f32.partialorder %v1287_v50, 0.0 }
 0x210   :  { %v1677_v52 = vpop.eup %1676  ;;  %1465 = vst.msk [vmem:[%s2717_s6 + $0x70] sm:$0xff] %vm153_vm0, %v1445_v27  ;;  %v1353_v2 = vmul.f32 1.442695, %v1327_v0 }
 0x211   :  { %v1592_v53 = vadd.f32 -1.0, %v1677_v52  ;;  %v972_v25 = vpop.f32.mrf.mxu2 }
 0x212   :  { %1678 = vpow2.f32 %v1353_v2  ;;  %v1065_v20 = vadd.f32 %v972_v25, %v871_v60  ;;  %v902_v60 = vld [vmem:[%s2713_s2 + $0x90] sm:$0xff] }
 0x213   :  { %v1406_v44 = vmul.f32 1.6732632, %v1592_v53 }
 0x214   :  { %v1288_v46 = vadd.f32 %v2276_v51, %v1065_v20  ;;  %1562 = vmatmul.msk.f32.gmra.mxu3 %vm709_vm1, %v899_v29  ;;  %v2761_v20 = vld [vmem:[#allocation14_spill] sm:$0xff] }
 0x215   :  { %v1426_v36 = vsel %vm1306_vm3, %v1286_v23, %v1406_v44  ;;  %v701_v44 = vmul.f32 %v2761_v20, %v2377_v39 }
 0x216   :  { %v1446_v58 = vmul.f32 1.050701, %v1426_v36  ;;  %v1328_v59 = vmin.f32 %v1288_v46, 0.0  ;;  %vm1308_vm5 = vcmp.gt.f32.partialorder %v1288_v46, 0.0 }
 0x218   :  { %v1679_v10 = vpop.eup %1678  ;;  %1466 = vst.msk [vmem:[%s2717_s6 + $0x78] sm:$0xff] %vm153_vm0, %v1446_v58  ;;  %v1355_v35 = vmul.f32 1.442695, %v1328_v59 }
 0x219   :  { %v1593_v30 = vadd.f32 -1.0, %v1679_v10  ;;  %v975_v15 = vpop.f32.mrf.mxu2 }
 0x21a   :  { %1680 = vpow2.f32 %v1355_v35  ;;  %v1066_v7 = vadd.f32 %v975_v15, %v872_v32 }
 0x21b   :  { %v1407_v47 = vmul.f32 1.6732632, %v1593_v30  ;;  %v903_v30 = vld [vmem:[%s2713_s2 + $0x98] sm:$0xff] }
 0x21c   :  { %v1289_v19 = vadd.f32 %v2276_v51, %v1066_v7  ;;  %1563 = vmatmul.msk.f32.gmra.mxu3 %vm709_vm1, %v900_v28 }
 0x21d   :  { %v1427_v40 = vsel %vm1307_vm4, %v1287_v50, %v1407_v47  ;;  %v700_v50 = vmul.f32 %v2760_v42, %v2394_v26 }
 0x21e   :  { %v1447_v37 = vmul.f32 1.050701, %v1427_v40  ;;  %v1329_v9 = vmin.f32 %v1289_v19, 0.0  ;;  %vm1309_vm6 = vcmp.gt.f32.partialorder %v1289_v19, 0.0 }
 0x21f   :  { %v834_v12 = vpop.f32.mrf.mxu3 }
 0x220   :  { %v1681_v13 = vpop.eup %1680  ;;  %1467 = vst.msk [vmem:[%s2717_s6 + $0x80] sm:$0xff] %vm153_vm0, %v1447_v37  ;;  %v1357_v23 = vmul.f32 1.442695, %v1329_v9  ;;  %v835_v61 = vadd.f32 %v834_v12, %v699_v57  ;;  %v2762_v37 = vld [vmem:[#allocation17_spill] sm:$0xff] }
 0x221   :  { %v1594_v62 = vadd.f32 -1.0, %v1681_v13  ;;  %v978_v63 = vpop.f32.mrf.mxu2  ;;  %v702_v9 = vmul.f32 %v2762_v37, %v2366_v24 }
 0x222   :  { %1682 = vpow2.f32 %v1357_v23  ;;  %v1091_v16 = vadd.f32 %v2276_v51, %v835_v61  ;;  %v1067_v34 = vadd.f32 %v978_v63, %v873_v43 }
 0x223   :  { %v1408_v3 = vmul.f32 1.6732632, %v1594_v62 }
 0x224   :  { %v1131_v38 = vmin.f32 %v1091_v16, 0.0  ;;  %v1290_v55 = vadd.f32 %v2276_v51, %v1067_v34  ;;  %1564 = vmatmul.msk.f32.gmra.mxu3 %vm709_vm1, %v901_v6  ;;  %vm1111_vm7 = vcmp.gt.f32.partialorder %v1091_v16, 0.0 }
 0x225   :  { %v1428_v4 = vsel %vm1308_vm5, %v1288_v46, %v1408_v3 }
 0x226   :  { %v1448_v56 = vmul.f32 1.050701, %v1428_v4  ;;  %v1161_v54 = vmul.f32 1.442695, %v1131_v38  ;;  %v1330_v17 = vmin.f32 %v1290_v55, 0.0  ;;  %vm1310_vm8 = vcmp.gt.f32.partialorder %v1290_v55, 0.0 }
 0x227   :  { %v837_v22 = vpop.f32.mrf.mxu3 }
 0x228   :  { %v1683_v27 = vpop.eup %1682  ;;  %1468 = vst.msk [vmem:[%s2717_s6 + $0x88] sm:$0xff] %vm153_vm0, %v1448_v56  ;;  %1684 = vpow2.f32 %v1161_v54  ;;  %v1359_v0 = vmul.f32 1.442695, %v1330_v17  ;;  %v838_v52 = vadd.f32 %v837_v22, %v700_v50 }
 0x229   :  { %v1595_v18 = vadd.f32 -1.0, %v1683_v27 }
 0x22a   :  { %1686 = vpow2.f32 %v1359_v0  ;;  %v1092_v2 = vadd.f32 %v2276_v51, %v838_v52 }
 0x22b   :  { %v1409_v53 = vmul.f32 1.6732632, %v1595_v18 }
 0x22c   :  { %v1132_v26 = vmin.f32 %v1092_v2, 0.0  ;;  %1565 = vmatmul.msk.f32.gmra.mxu3 %vm709_vm1, %v902_v60 }
 0x22d   :  { %v1429_v25 = vsel %vm1309_vm6, %v1289_v19, %v1409_v53 }
 0x22e   :  { %v1685_v29 = vpop.eup %1684  ;;  %v1449_v46 = vmul.f32 1.050701, %v1429_v25  ;;  %v1163_v36 = vmul.f32 1.442695, %v1132_v26 }
 0x22f   :  { %v1577_v58 = vadd.f32 -1.0, %v1685_v29  ;;  %v840_v59 = vpop.f32.mrf.mxu3 }
 0x230   :  { %v1687_v10 = vpop.eup %1686  ;;  %1469 = vst.msk [vmem:[%s2717_s6 + $0x90] sm:$0xff] %vm153_vm0, %v1449_v46  ;;  %1688 = vpow2.f32 %v1163_v36  ;;  %v841_v45 = vadd.f32 %v840_v59, %v701_v44 }
 0x231   :  { %v1211_v32 = vmul.f32 1.6732632, %v1577_v58  ;;  %v1596_v35 = vadd.f32 -1.0, %v1687_v10 }
 0x232   :  { %v1093_v39 = vadd.f32 %v2276_v51, %v841_v45 }
 0x233   :  { %v1231_v15 = vsel %vm1111_vm7, %v1091_v16, %v1211_v32  ;;  %v1410_v28 = vmul.f32 1.6732632, %v1596_v35  ;;  %v2763_v16 = vld [vmem:[#allocation19_spill] sm:$0xff] }
 0x234   :  { %v1251_v7 = vmul.f32 1.050701, %v1231_v15  ;;  %v1133_v47 = vmin.f32 %v1093_v39, 0.0  ;;  %1566 = vmatmul.msk.f32.gmra.mxu3 %vm709_vm1, %v903_v30  ;;  %vm1112_vm1 = vcmp.gt.f32.partialorder %v1092_v2, 0.0  ;;  %v703_v34 = vmul.f32 %v2763_v16, %v2360_v8  ;;  %v2764_v8 = vld [vmem:[#allocation22_spill] sm:$0xff] }
 0x235   :  { %v1430_v19 = vsel %vm1310_vm8, %v1290_v55, %v1410_v28  ;;  %vm1113_vm9 = vcmp.gt.f32.partialorder %v1093_v39, 0.0  ;;  %v704_v0 = vmul.f32 %v2764_v8, %v2342_v31  ;;  %v2765_v31 = vld [vmem:[#allocation21_spill] sm:$0xff] }
 0x236   :  { %v1689_v40 = vpop.eup %1688  ;;  %1271 = vst.msk [vmem:[%s2717_s6 + $0xa0] sm:$0xff] %vm153_vm0, %v1251_v7  ;;  %v1450_v57 = vmul.f32 1.050701, %v1430_v19  ;;  %v1165_v12 = vmul.f32 1.442695, %v1133_v47  ;;  %v705_v46 = vmul.f32 %v2765_v31, %v2336_v14  ;;  %v2766_v14 = vld [vmem:[#allocation27_spill] sm:$0xff] }
 0x237   :  { %v1578_v13 = vadd.f32 -1.0, %v1689_v40  ;;  %v843_v33 = vpop.f32.mrf.mxu3  ;;  %v706_v28 = vmul.f32 %v2766_v14, %v2327_v21  ;;  %v707_v21 = vmul.f32 %v2272_v48, %v2318_v49  ;;  %v2767_v49 = vld [vmem:[#allocation24_spill] sm:$0xff]  ;;  %v2654_v14 = vld [vmem:[#allocation4] ss:$0 sm:$0xff] }
 0x238   :  { %1470 = vst.msk [vmem:[%s2717_s6 + $0x98] sm:$0xff] %vm153_vm0, %v1450_v57  ;;  %1690 = vpow2.f32 %v1165_v12  ;;  %v844_v43 = vadd.f32 %v843_v33, %v702_v9 }
 0x239   :  { %v1212_v23 = vmul.f32 1.6732632, %v1578_v13 }
 0x23a   :  { %v1094_v24 = vadd.f32 %v2276_v51, %v844_v43 }
 0x23b   :  { %v1232_v61 = vsel %vm1112_vm1, %v1092_v2, %v1212_v23 }
 0x23c   :  { %v1252_v62 = vmul.f32 1.050701, %v1232_v61  ;;  %v1134_v63 = vmin.f32 %v1094_v24, 0.0  ;;  %vm1114_vm10 = vcmp.gt.f32.partialorder %v1094_v24, 0.0 }
 0x23e   :  { %v1691_v6 = vpop.eup %1690  ;;  %1272 = vst.msk [vmem:[%s2717_s6 + $0xa8] sm:$0xff] %vm153_vm0, %v1252_v62  ;;  %v1167_v3 = vmul.f32 1.442695, %v1134_v63 }
 0x23f   :  { %v1579_v38 = vadd.f32 -1.0, %v1691_v6  ;;  %v846_v55 = vpop.f32.mrf.mxu3 }
 0x240   :  { %1692 = vpow2.f32 %v1167_v3  ;;  %v847_v4 = vadd.f32 %v846_v55, %v703_v34 }
 0x241   :  { %v1213_v56 = vmul.f32 1.6732632, %v1579_v38  ;;  %v708_v38 = vmul.f32 %v2767_v49, %v2308_v5 }
 0x242   :  { %v1095_v54 = vadd.f32 %v2276_v51, %v847_v4 }
 0x243   :  { %v1233_v17 = vsel %vm1113_vm9, %v1093_v39, %v1213_v56 }
 0x244   :  { %v1253_v50 = vmul.f32 1.050701, %v1233_v17  ;;  %v1135_v22 = vmin.f32 %v1095_v54, 0.0  ;;  %vm1115_vm11 = vcmp.gt.f32.partialorder %v1095_v54, 0.0 }
 0x246   :  { %v1693_v27 = vpop.eup %1692  ;;  %1273 = vst.msk [vmem:[%s2717_s6 + $0xb0] sm:$0xff] %vm153_vm0, %v1253_v50  ;;  %v1169_v52 = vmul.f32 1.442695, %v1135_v22 }
 0x247   :  { %v1580_v18 = vadd.f32 -1.0, %v1693_v27  ;;  %v849_v60 = vpop.f32.mrf.mxu3 }
 0x248   :  { %1694 = vpow2.f32 %v1169_v52  ;;  %v850_v2 = vadd.f32 %v849_v60, %v704_v0  ;;  %v874_v0 = vmul.f32 %v2758_v11, %v2150_v1  ;;  %v875_v1 = vmul.f32 %v2760_v42, %v2172_v41 }
 0x249   :  { %v1214_v53 = vmul.f32 1.6732632, %v1580_v18 }
 0x24a   :  { %v1096_v26 = vadd.f32 %v2276_v51, %v850_v2 }
 0x24b   :  { %v1234_v25 = vsel %vm1114_vm10, %v1094_v24, %v1214_v53 }
 0x24c   :  { %v1254_v29 = vmul.f32 1.050701, %v1234_v25  ;;  %v1136_v20 = vmin.f32 %v1096_v26, 0.0  ;;  %vm1116_vm12 = vcmp.gt.f32.partialorder %v1096_v26, 0.0 }
 0x24e   :  { %v1695_v44 = vpop.eup %1694  ;;  %1274 = vst.msk [vmem:[%s2717_s6 + $0xb8] sm:$0xff] %vm153_vm0, %v1254_v29  ;;  %v1171_v36 = vmul.f32 1.442695, %v1136_v20 }
 0x24f   :  { %v1581_v58 = vadd.f32 -1.0, %v1695_v44  ;;  %v852_v59 = vpop.f32.mrf.mxu3 }
 0x250   :  { %1696 = vpow2.f32 %v1171_v36  ;;  %v853_v10 = vadd.f32 %v852_v59, %v705_v46 }
 0x251   :  { %v1215_v45 = vmul.f32 1.6732632, %v1581_v58 }
 0x252   :  { %v1097_v32 = vadd.f32 %v2276_v51, %v853_v10 }
 0x253   :  { %v1235_v35 = vsel %vm1115_vm11, %v1095_v54, %v1215_v45 }
 0x254   :  { %v1255_v30 = vmul.f32 1.050701, %v1235_v35  ;;  %v1137_v39 = vmin.f32 %v1097_v32, 0.0  ;;  %vm1117_vm13 = vcmp.gt.f32.partialorder %v1097_v32, 0.0 }
 0x256   :  { %v1697_v15 = vpop.eup %1696  ;;  %1275 = vst.msk [vmem:[%s2717_s6 + $0xc0] sm:$0xff] %vm153_vm0, %v1255_v30  ;;  %v1173_v7 = vmul.f32 1.442695, %v1137_v39  ;;  %v2768_v30 = vld [vmem:[#allocation15_spill] sm:$0xff] }
 0x257   :  { %v1582_v47 = vadd.f32 -1.0, %v1697_v15  ;;  %v855_v19 = vpop.f32.mrf.mxu3 }
 0x258   :  { %1698 = vpow2.f32 %v1173_v7  ;;  %v856_v40 = vadd.f32 %v855_v19, %v706_v28 }
 0x259   :  { %v1216_v37 = vmul.f32 1.6732632, %v1582_v47 }
 0x25a   :  { %v1098_v9 = vadd.f32 %v2276_v51, %v856_v40 }
 0x25b   :  { %v1236_v57 = vsel %vm1116_vm12, %v1096_v26, %v1216_v37 }
 0x25c   :  { %v1256_v12 = vmul.f32 1.050701, %v1236_v57  ;;  %v1138_v13 = vmin.f32 %v1098_v9, 0.0  ;;  %vm1118_vm14 = vcmp.gt.f32.partialorder %v1098_v9, 0.0  ;;  %v2769_v57 = vld [vmem:[#allocation18_spill] sm:$0xff] }
 0x25e   :  { %v1699_v33 = vpop.eup %1698  ;;  %1276 = vst.msk [vmem:[%s2717_s6 + $0xc8] sm:$0xff] %vm153_vm0, %v1256_v12  ;;  %v1175_v43 = vmul.f32 1.442695, %v1138_v13 }
 0x25f   :  { %v1583_v23 = vadd.f32 -1.0, %v1699_v33  ;;  %v858_v24 = vpop.f32.mrf.mxu3 }
 0x260   :  { %1700 = vpow2.f32 %v1175_v43  ;;  %v859_v61 = vadd.f32 %v858_v24, %v707_v21 }
 0x261   :  { %v1217_v62 = vmul.f32 1.6732632, %v1583_v23 }
 0x262   :  { %v1099_v63 = vadd.f32 %v2276_v51, %v859_v61 }
 0x263   :  { %v1237_v6 = vsel %vm1117_vm13, %v1097_v32, %v1217_v62 }
 0x264   :  { %v1257_v16 = vmul.f32 1.050701, %v1237_v6  ;;  %v1139_v34 = vmin.f32 %v1099_v63, 0.0  ;;  %vm1119_vm15 = vcmp.gt.f32.partialorder %v1099_v63, 0.0  ;;  %v2770_v6 = vld [vmem:[#allocation20_spill] sm:$0xff] }
 0x266   :  { %v1701_v3 = vpop.eup %1700  ;;  %1277 = vst.msk [vmem:[%s2717_s6 + $0xd0] sm:$0xff] %vm153_vm0, %v1257_v16  ;;  %v1177_v48 = vmul.f32 1.442695, %v1139_v34 }
 0x267   :  { %v1584_v55 = vadd.f32 -1.0, %v1701_v3  ;;  %v861_v4 = vpop.f32.mrf.mxu3 }
 0x268   :  { %1702 = vpow2.f32 %v1177_v48  ;;  %v862_v56 = vadd.f32 %v861_v4, %v708_v38 }
 0x269   :  { %v1218_v54 = vmul.f32 1.6732632, %v1584_v55 }
 0x26a   :  { %v1100_v17 = vadd.f32 %v2276_v51, %v862_v56 }
 0x26b   :  { %v1238_v50 = vsel %vm1118_vm14, %v1098_v9, %v1218_v54 }
 0x26c   :  { %v1258_v22 = vmul.f32 1.050701, %v1238_v50  ;;  %v1140_v27 = vmin.f32 %v1100_v17, 0.0  ;;  %vm1120_vm2 = vcmp.gt.f32.partialorder %v1100_v17, 0.0 }
 0x26e   :  { %v1703_v8 = vpop.eup %1702  ;;  %1278 = vst.msk [vmem:[%s2717_s6 + $0xd8] sm:$0xff] %vm153_vm0, %v1258_v22  ;;  %v1179_v5 = vmul.f32 1.442695, %v1140_v27 }
 0x26f   :  { %v1585_v52 = vadd.f32 -1.0, %v1703_v8  ;;  %v1028_v18 = vpop.f32.mrf.mxu3 }
 0x270   :  { %1704 = vpow2.f32 %v1179_v5  ;;  %v1068_v60 = vadd.f32 %v1028_v18, %v874_v0 }
 0x271   :  { %v1219_v2 = vmul.f32 1.6732632, %v1585_v52 }
 0x272   :  { %v1291_v53 = vadd.f32 %v2276_v51, %v1068_v60 }
 0x273   :  { %v1239_v26 = vsel %vm1119_vm15, %v1099_v63, %v1219_v2 }
 0x274   :  { %v1259_v25 = vmul.f32 1.050701, %v1239_v26  ;;  %v1331_v29 = vmin.f32 %v1291_v53, 0.0  ;;  %vm1311_vm3 = vcmp.gt.f32.partialorder %v1291_v53, 0.0 }
 0x276   :  { %v1705_v20 = vpop.eup %1704  ;;  %1279 = vst.msk [vmem:[%s2717_s6 + $0xe0] sm:$0xff] %vm153_vm0, %v1259_v25  ;;  %v1361_v11 = vmul.f32 1.442695, %v1331_v29 }
 0x277   :  { %v1586_v44 = vadd.f32 -1.0, %v1705_v20  ;;  %v1031_v31 = vpop.f32.mrf.mxu3 }
 0x278   :  { %1706 = vpow2.f32 %v1361_v11  ;;  %v1069_v46 = vadd.f32 %v1031_v31, %v875_v1 }
 0x279   :  { %v1220_v36 = vmul.f32 1.6732632, %v1586_v44 }
 0x27a   :  { %v1292_v58 = vadd.f32 %v2276_v51, %v1069_v46 }
 0x27b   :  { %v1240_v59 = vsel %vm1120_vm2, %v1100_v17, %v1220_v36  ;;  %v2771_v17 = vld [vmem:[#allocation23_spill] sm:$0xff] }
 0x27c   :  { %v1260_v10 = vmul.f32 1.050701, %v1240_v59  ;;  %v1332_v45 = vmin.f32 %v1292_v58, 0.0  ;;  %vm1312_vm4 = vcmp.gt.f32.partialorder %v1292_v58, 0.0 }
 0x27e   :  { %v1707_v32 = vpop.eup %1706  ;;  %1280 = vst.msk [vmem:[%s2717_s6 + $0xe8] sm:$0xff] %vm153_vm0, %v1260_v10  ;;  %v1363_v41 = vmul.f32 1.442695, %v1332_v45 }
 0x27f   :  { %v1597_v42 = vadd.f32 -1.0, %v1707_v32  ;;  %v1034_v35 = vpop.f32.mrf.mxu3 }
 0x280   :  { %1708 = vpow2.f32 %v1363_v41  ;;  %v1070_v39 = vadd.f32 %v1034_v35, %v2768_v30 }
 0x281   :  { %v1411_v15 = vmul.f32 1.6732632, %v1597_v42 }
 0x282   :  { %v1293_v51 = vadd.f32 %v2654_v14, %v1070_v39 }
 0x283   :  { %v1431_v28 = vsel %vm1311_vm3, %v1291_v53, %v1411_v15  ;;  %v2772_v53 = vld [vmem:[#allocation26_spill] sm:$0xff] }
 0x284   :  { %v1451_v7 = vmul.f32 1.050701, %v1431_v28  ;;  %v1333_v47 = vmin.f32 %v1293_v51, 0.0  ;;  %vm1313_vm5 = vcmp.gt.f32.partialorder %v1293_v51, 0.0 }
 0x286   :  { %v1709_v19 = vpop.eup %1708  ;;  %1471 = vst.msk [vmem:[%s2717_s6 + $0xf0] sm:$0xff] %vm153_vm0, %v1451_v7  ;;  %v1365_v40 = vmul.f32 1.442695, %v1333_v47 }
 0x287   :  { %v1598_v37 = vadd.f32 -1.0, %v1709_v19  ;;  %v1037_v9 = vpop.f32.mrf.mxu3 }
 0x288   :  { %1710 = vpow2.f32 %v1365_v40  ;;  %v1071_v12 = vadd.f32 %v1037_v9, %v2769_v57 }
 0x289   :  { %v1412_v13 = vmul.f32 1.6732632, %v1598_v37 }
 0x28a   :  { %v1294_v33 = vadd.f32 %v2654_v14, %v1071_v12 }
 0x28b   :  { %v1432_v21 = vsel %vm1312_vm4, %v1292_v58, %v1412_v13  ;;  %v2773_v58 = vld [vmem:[#allocation28_spill] sm:$0xff] }
 0x28c   :  { %v1452_v43 = vmul.f32 1.050701, %v1432_v21  ;;  %v1334_v23 = vmin.f32 %v1294_v33, 0.0  ;;  %vm1314_vm6 = vcmp.gt.f32.partialorder %v1294_v33, 0.0 }
 0x28e   :  { %v1711_v24 = vpop.eup %1710  ;;  %1472 = vst.msk [vmem:[%s2717_s6 + $0xf8] sm:$0xff] %vm153_vm0, %v1452_v43  ;;  %v1367_v61 = vmul.f32 1.442695, %v1334_v23 }
 0x28f   :  { %v1599_v62 = vadd.f32 -1.0, %v1711_v24  ;;  %v1040_v63 = vpop.f32.mrf.mxu3 }
 0x290   :  { %1712 = vpow2.f32 %v1367_v61  ;;  %v1072_v16 = vadd.f32 %v1040_v63, %v2770_v6 }
 0x291   :  { %v1413_v34 = vmul.f32 1.6732632, %v1599_v62 }
 0x292   :  { %v1295_v3 = vadd.f32 %v2654_v14, %v1072_v16 }
 0x293   :  { %v1433_v48 = vsel %vm1313_vm5, %v1293_v51, %v1413_v34  ;;  %v2774_v51 = vld [vmem:[#allocation29_spill] sm:$0xff] }
 0x294   :  { %v1453_v49 = vmul.f32 1.050701, %v1433_v48  ;;  %v1335_v38 = vmin.f32 %v1295_v3, 0.0  ;;  %vm1315_vm7 = vcmp.gt.f32.partialorder %v1295_v3, 0.0 }
 0x296   :  { %v1713_v55 = vpop.eup %1712  ;;  %1473 = vst.msk [vmem:[%s2717_s6 + $0x100] sm:$0xff] %vm153_vm0, %v1453_v49  ;;  %v1369_v4 = vmul.f32 1.442695, %v1335_v38 }
 0x297   :  { %v1600_v56 = vadd.f32 -1.0, %v1713_v55  ;;  %v1043_v54 = vpop.f32.mrf.mxu3 }
 0x298   :  { %1714 = vpow2.f32 %v1369_v4  ;;  %v1073_v50 = vadd.f32 %v1043_v54, %v2771_v17 }
 0x299   :  { %v1414_v22 = vmul.f32 1.6732632, %v1600_v56 }
 0x29a   :  { %v1296_v27 = vadd.f32 %v2654_v14, %v1073_v50 }
 0x29b   :  { %v1434_v8 = vsel %vm1314_vm6, %v1294_v33, %v1414_v22  ;;  %v2775_v33 = vld [vmem:[#allocation25_spill] sm:$0xff] }
 0x29c   :  { %v1454_v0 = vmul.f32 1.050701, %v1434_v8  ;;  %v1336_v5 = vmin.f32 %v1296_v27, 0.0  ;;  %vm1316_vm8 = vcmp.gt.f32.partialorder %v1296_v27, 0.0 }
 0x29e   :  { %v1715_v52 = vpop.eup %1714  ;;  %1474 = vst.msk [vmem:[%s2717_s6 + $0x108] sm:$0xff] %vm153_vm0, %v1454_v0  ;;  %v1371_v18 = vmul.f32 1.442695, %v1336_v5 }
 0x29f   :  { %v1601_v60 = vadd.f32 -1.0, %v1715_v52  ;;  %v1046_v2 = vpop.f32.mrf.mxu3 }
 0x2a0   :  { %1716 = vpow2.f32 %v1371_v18  ;;  %v1074_v26 = vadd.f32 %v1046_v2, %v2772_v53 }
 0x2a1   :  { %v1415_v25 = vmul.f32 1.6732632, %v1601_v60 }
 0x2a2   :  { %v1297_v29 = vadd.f32 %v2654_v14, %v1074_v26 }
 0x2a3   :  { %v1435_v20 = vsel %vm1315_vm7, %v1295_v3, %v1415_v25 }
 0x2a4   :  { %v1455_v1 = vmul.f32 1.050701, %v1435_v20  ;;  %v1337_v11 = vmin.f32 %v1297_v29, 0.0  ;;  %vm1317_vm1 = vcmp.gt.f32.partialorder %v1297_v29, 0.0 }
 0x2a6   :  { %v1717_v44 = vpop.eup %1716  ;;  %1475 = vst.msk [vmem:[%s2717_s6 + $0x110] sm:$0xff] %vm153_vm0, %v1455_v1  ;;  %v1373_v31 = vmul.f32 1.442695, %v1337_v11 }
 0x2a7   :  { %v1602_v46 = vadd.f32 -1.0, %v1717_v44  ;;  %v1049_v36 = vpop.f32.mrf.mxu3 }
 0x2a8   :  { %1718 = vpow2.f32 %v1373_v31  ;;  %v1075_v59 = vadd.f32 %v1049_v36, %v2773_v58 }
 0x2a9   :  { %v1416_v10 = vmul.f32 1.6732632, %v1602_v46 }
 0x2aa   :  { %v1298_v45 = vadd.f32 %v2654_v14, %v1075_v59 }
 0x2ab   :  { %v1436_v32 = vsel %vm1316_vm8, %v1296_v27, %v1416_v10 }
 0x2ac   :  { %v1456_v41 = vmul.f32 1.050701, %v1436_v32  ;;  %v1338_v42 = vmin.f32 %v1298_v45, 0.0  ;;  %vm1318_vm9 = vcmp.gt.f32.partialorder %v1298_v45, 0.0 }
 0x2ae   :  { %v1719_v35 = vpop.eup %1718  ;;  %1476 = vst.msk [vmem:[%s2717_s6 + $0x118] sm:$0xff] %vm153_vm0, %v1456_v41  ;;  %v1375_v30 = vmul.f32 1.442695, %v1338_v42 }
 0x2af   :  { %v1603_v39 = vadd.f32 -1.0, %v1719_v35  ;;  %v1052_v15 = vpop.f32.mrf.mxu3 }
 0x2b0   :  { %1720 = vpow2.f32 %v1375_v30  ;;  %v1076_v28 = vadd.f32 %v1052_v15, %v2774_v51 }
 0x2b1   :  { %v1417_v7 = vmul.f32 1.6732632, %v1603_v39 }
 0x2b2   :  { %v1299_v47 = vadd.f32 %v2654_v14, %v1076_v28 }
 0x2b3   :  { %v1437_v19 = vsel %vm1317_vm1, %v1297_v29, %v1417_v7 }
 0x2b4   :  { %v1457_v40 = vmul.f32 1.050701, %v1437_v19  ;;  %v1339_v37 = vmin.f32 %v1299_v47, 0.0  ;;  %vm1319_vm10 = vcmp.gt.f32.partialorder %v1299_v47, 0.0 }
 0x2b6   :  { %v1721_v9 = vpop.eup %1720  ;;  %1477 = vst.msk [vmem:[%s2717_s6 + $0x120] sm:$0xff] %vm153_vm0, %v1457_v40  ;;  %v1377_v57 = vmul.f32 1.442695, %v1339_v37 }
 0x2b7   :  { %v1604_v12 = vadd.f32 -1.0, %v1721_v9  ;;  %v1055_v13 = vpop.f32.mrf.mxu3 }
 0x2b8   :  { %1722 = vpow2.f32 %v1377_v57  ;;  %v1077_v21 = vadd.f32 %v1055_v13, %v2775_v33 }
 0x2b9   :  { %v1418_v43 = vmul.f32 1.6732632, %v1604_v12 }
 0x2ba   :  { %v1300_v23 = vadd.f32 %v2654_v14, %v1077_v21 }
 0x2bb   :  { %v1438_v24 = vsel %vm1318_vm9, %v1298_v45, %v1418_v43 }
 0x2bc   :  { %v1458_v61 = vmul.f32 1.050701, %v1438_v24  ;;  %v1340_v62 = vmin.f32 %v1300_v23, 0.0  ;;  %vm1320_vm11 = vcmp.gt.f32.partialorder %v1300_v23, 0.0 }
 0x2be   :  { %v1723_v63 = vpop.eup %1722  ;;  %1478 = vst.msk [vmem:[%s2717_s6 + $0x128] sm:$0xff] %vm153_vm0, %v1458_v61  ;;  %v1379_v6 = vmul.f32 1.442695, %v1340_v62 }
 0x2bf   :  { %v1605_v16 = vadd.f32 -1.0, %v1723_v63 }
 0x2c0   :  { %1724 = vpow2.f32 %v1379_v6 }
 0x2c1   :  { %v1419_v34 = vmul.f32 1.6732632, %v1605_v16 }
 0x2c3   :  { %v1439_v3 = vsel %vm1319_vm10, %v1299_v47, %v1419_v34 }
 0x2c4   :  { %v1459_v48 = vmul.f32 1.050701, %v1439_v3 }
 0x2c6   :  { %v1725_v49 = vpop.eup %1724  ;;  %1479 = vst.msk [vmem:[%s2717_s6 + $0x130] sm:$0xff] %vm153_vm0, %v1459_v48 }
 0x2c7   :  { %v1606_v14 = vadd.f32 -1.0, %v1725_v49 }
 0x2c9   :  { %v1420_v38 = vmul.f32 1.6732632, %v1606_v14 }
 0x2cb   :  { %v1440_v55 = vsel %vm1320_vm11, %v1300_v23, %v1420_v38 }
 0x2cc   :  { %v1460_v4 = vmul.f32 1.050701, %v1440_v55 }
 0x2ce   :  { %1480 = vst.msk [vmem:[%s2717_s6 + $0x138] sm:$0xff] %vm153_vm0, %v1460_v4 }
 0x2cf   :  { %1485 = vsyncpa [#allocation3], 1 }
 0x2d0   :  { %1486 = vsyncpa [#allocation5], 1 }

// kernel: _lambda_.2
= control target key start
LH: loop header
LB: loop body
LE: loop exit
PB: predicated region body
PF: predicated region fallthrough
CT: control target
= control target key end

     0   :  { %9 = vsyncpa [#allocation3], 0  ;;  %s7631_s0 = inlined_call_operand.vmem [shape: bf16[2,12800], index: 0, kind: input, shape index: {}]   ;;  %s7632_s1 = inlined_call_operand.hbm [shape: s8[5,12800,128], index: 1, kind: input, shape index: {}]   ;;  %s7633_s2 = inlined_call_operand.hbm [shape: f32[1,640], index: 2, kind: input, shape index: {}]   ;;  %s7634_s3 = inlined_call_operand.vmem [shape: f32[1,640], index: 3, kind: input, shape index: {}]   ;;  %s7635_s4 = inlined_call_operand.vmem [shape: f32[2,640], index: 4, kind: output, shape index: {}]  }
   0x1   :  { %11 = vsyncpa [#allocation3 + $0x1], 0 }
   0x2   :  { %12 = vsyncpa [#allocation5], 0 }
   0x3   :  { %14 = vsyncpa [#allocation5 + $0x1], 0  ;;  %s6604_s15 = smov 0   ;;  %s6606_s16 = smov 0  }
   0x4   :  { %s6608_s17 = smov 0   ;;  %s6610_s18 = smov 0  }
   0x5   :  { %s6612_s19 = smov 0   ;;  %s6614_s20 = smov 0  }
   0x6 LB: > { %s6382_s21 = sadd.s32 4294967295, %s6574_s20   ;;  %s32_s22 = sadd.s32 1, %s6570_s19  ;;  %s6574_s20 = sphi %s6614_s20, %s20_s20   ;;  %s6570_s19 = sphi %s6612_s19, %s7642_s19   ;;  %s6566_s18 = sphi %s6610_s18, %s7641_s18   ;;  %s6562_s17 = sphi %s6608_s17, %s7640_s17   ;;  %s6558_s16 = sphi %s6606_s16, %s7639_s16   ;;  %s6554_s15 = sphi %s6604_s15, %s7638_s15  }
   0x7   : > { %p34_p0 = scmp.ge.s32.totalorder %s32_s22, 5  ;;  %s67_s23 = sadd.s32 1, %s6562_s17 }
   0x8   : > { %p74_p1 = scmp.ne.s32.totalorder %s6562_s17, %s6558_s16  ;;  %p75_p2 = scmp.eq.s32.totalorder %s6574_s20, 0 }
   0x9   : > { %s7644_s22 = smov (%p34_p0, %s32_s22), 0  ;;  %p80_p4 = scmp.ne.s32.totalorder %s6558_s16, %s6554_s15 }
   0xa   : > { %p76_p3 = por %p75_p2, %p74_p1  ;;  %s62_s24 = ssub.s32 %s6570_s19, %s7644_s22 }
   0xb   : > { %p81_p5 = scmp.eq.s32.totalorder %s6382_s21, 0  ;;  %p65_p6 = scmp.eq.s32.totalorder %s62_s24, 0 }
   0xc   : > { %p6406_p8 = scmp.lt.s32.totalorder %s6574_s20, 5  ;;  %s190_s27 = sand.u32 1, %s6562_s17  }
   0xd   : > { %p6643_p7 = por %p81_p5, %p80_p4  ;;  %s6393_s28 = smul.u32 3200, %s6570_s19 }
   0xe   : > { %s6649_s26 = scalar_select %p65_p6, %s6562_s17, %s67_s23  }
   0xf   : > { %s6392_s29 = smul.u32 3200, %s190_s27  ;;  %s201_s6 = scalar_lea.hbm %s7632_s1, %s6393_s28 }
  0x10   : > { %p6656_p9 = pnand %p6406_p8, %p76_p3  ;;  %s202_s8 = sshll.u32 %s201_s6, 4  ;;  %s203_s8 = int_to_ptr.hbm [resolvable:$true] %s202_s8 }
  0x11   : > { %s194_s9 = scalar_lea.vmem [#allocation2], %s6392_s29  ;;  %s191_s11 = scalar_lea.sflag [#allocation3], %s190_s27 }
  0x12   : > { %s204_s10 = sshll.u32 %s194_s9, 4  ;;  %s6576_s12 = smov 128   ;;  %s205_s10 = int_to_ptr.vmem [resolvable:$true] %s204_s10 }
  0x13   : > { %s6577_s13 = smov 8   ;;  %p6388_p10 = scmp.ge.s32.totalorder %s6574_s20, 1 }
  0x14   : > { %6402 = dma.hbm_to_vmem [thread:$0]  (!%p6656_p9), %s203_s8, 51200, %s205_s10, %s191_s11, %s6576_s12, %s6576_s12, %s6577_s13  }
  0x15   : > { %p235_p11 = scmp.lt.s32.totalorder %s6574_s20, 6  ;;  %s220_s21 = scalar_lea.hbm %s7633_s2, %s6570_s19 }
  0x16   : > { %s222_s23 = sshll.u32 %s220_s21, 4  ;;  %s217_s24 = scalar_lea.vmem [#allocation4], %s190_s27  ;;  %s223_s23 = int_to_ptr.hbm [resolvable:$true] %s222_s23 }
  0x17   : > { %p236_p12 = pnand %p6388_p10, %p235_p11  ;;  %s224_s28 = sshll.u32 %s217_s24, 4  ;;  %s225_s28 = int_to_ptr.vmem [resolvable:$true] %s224_s28 }
  0x18   : > { %s215_s29 = scalar_lea.sflag [#allocation5], %s190_s27  ;;  %s6671_s30 = sand.u32 (!%p236_p12), 1, %s6558_s16  }
  0x19   : > { %6405 = dma.hbm_to_vmem [thread:$0]  (!%p6656_p9), %s223_s23, 16, %s225_s28, %s215_s29  }
  0x1a   : > { %239 = sbr.rel (%p236_p12) target bundleno = 1213 (0x4bd), region = 36  ;;  %s242_s6 = scalar_lea.sflag (!%p236_p12), [#allocation3], %s6671_s30 }
  0x1b   : > { %s6394_s5 = smul.u32 (!%p236_p12), 3200, %s6671_s30 }
  0x1d   : > { %s6675_s8 = scalar_lea.vmem (!%p236_p12), [#allocation2], %s6394_s5 }
  0x1f   : > { %6545 = dma.done.wait (%p6643_p7), %s242_s6, 51200  }
  0x20   : > { %6547 = vsyncadd (%p6643_p7), %s242_s6, 4294916096  ;;  %s252_s27 = scalar_lea.sflag [#allocation5], %s6671_s30  ;;  %s254_s7 = scalar_lea.vmem [#allocation4], %s6671_s30 }
  0x21   : > { %6549 = dma.done.wait (%p6643_p7), %s252_s27, 16  }
  0x22   : > { %6551 = vsyncadd (%p6643_p7), %s252_s27, 4294967280  ;;  %v311_v0 = vld [vmem:[%s6675_s8 + $0x18] sm:$0xff]  ;;  %v310_v28 = vld [vmem:[%s6675_s8 + $0x10] sm:$0xff]  ;;  %p296_p13 = scmp.lt.s32.totalorder %s6566_s18, 4 }
  0x23   : > { %v315_v1 = vld [vmem:[%s6675_s8 + $0x38] sm:$0xff]  ;;  %v722_v3 = vunpack.c.2.s8 %v311_v0  ;;  %v723_v4 = vunpack.c.3.s8 %v311_v0  ;;  %v720_v22 = vunpack.c.0.s8 %v311_v0  ;;  %v721_v23 = vunpack.c.1.s8 %v311_v0  ;;  %v314_v37 = vld [vmem:[%s6675_s8 + $0x30] sm:$0xff] }
  0x24   : > { %v319_v2 = vld [vmem:[%s6675_s8 + $0x58] sm:$0xff]  ;;  %v738_v5 = vunpack.c.2.s8 %v315_v1  ;;  %v739_v6 = vunpack.c.3.s8 %v315_v1  ;;  %v736_v26 = vunpack.c.0.s8 %v315_v1  ;;  %v737_v27 = vunpack.c.1.s8 %v315_v1  ;;  %v318_v42 = vld [vmem:[%s6675_s8 + $0x50] sm:$0xff]  ;;  %s7646_s18 = smov (!%p296_p13, %s6566_s18), 4 }
  0x25   : > { %v323_v7 = vld [vmem:[%s6675_s8 + $0x78] sm:$0xff]  ;;  %v754_v8 = vunpack.c.2.s8 %v319_v2  ;;  %v755_v9 = vunpack.c.3.s8 %v319_v2  ;;  %v2322_v12 = vcvt.s32.f32 %v722_v3  ;;  %v2323_v13 = vcvt.s32.f32 %v723_v4  ;;  %v322_v47 = vld [vmem:[%s6675_s8 + $0x70] sm:$0xff]  ;;  %s298_s28 = scalar_lea.vmem %s7634_s3, %s7646_s18  ;;  %s6389_s29 = sshll.u32 %s7646_s18, 1 }
  0x26   : > { %v770_v10 = vunpack.c.2.s8 %v323_v7  ;;  %v771_v11 = vunpack.c.3.s8 %v323_v7  ;;  %v2338_v14 = vcvt.s32.f32 %v738_v5  ;;  %v2339_v15 = vcvt.s32.f32 %v739_v6  ;;  %s302_s27 = scalar_lea.vmem %s7635_s4, %s6389_s29 }
  0x27   : > { %v2354_v16 = vcvt.s32.f32 %v754_v8  ;;  %v2355_v17 = vcvt.s32.f32 %v755_v9  ;;  %v3915_v20 = vpack.c.bf16 %v2323_v13, %v2322_v12  ;;  %v2320_v29 = vcvt.s32.f32 %v720_v22  ;;  %v309_v8 = vld [vmem:[%s6675_s8 + $0x8] sm:$0xff] }
  0x28   : > { %v2370_v18 = vcvt.s32.f32 %v770_v10  ;;  %v2371_v19 = vcvt.s32.f32 %v771_v11  ;;  %v3923_v21 = vpack.c.bf16 %v2339_v15, %v2338_v14  ;;  %v2321_v30 = vcvt.s32.f32 %v721_v23  ;;  %v317_v22 = vld [vmem:[%s6675_s8 + $0x48] sm:$0xff] }
  0x29   : > { %v3931_v24 = vpack.c.bf16 %v2355_v17, %v2354_v16  ;;  %4948 = vmatpush.bf16.msra.mxu0 %v3915_v20  ;;  %v752_v31 = vunpack.c.0.s8 %v319_v2  ;;  %v753_v32 = vunpack.c.1.s8 %v319_v2  ;;  %v2336_v33 = vcvt.s32.f32 %v736_v26  ;;  %v313_v17 = vld [vmem:[%s6675_s8 + $0x28] sm:$0xff] }
  0x2a   : > { %v3939_v25 = vpack.c.bf16 %v2371_v19, %v2370_v18  ;;  %4961 = vmatpush.bf16.msra.mxu1 %v3923_v21  ;;  %v2337_v34 = vcvt.s32.f32 %v737_v27  ;;  %v768_v35 = vunpack.c.0.s8 %v323_v7  ;;  %v769_v36 = vunpack.c.1.s8 %v323_v7  ;;  %v321_v27 = vld [vmem:[%s6675_s8 + $0x68] sm:$0xff] }
  0x2b   : > { %4974 = vmatpush.bf16.msra.mxu2 %v3931_v24  ;;  %v3914_v38 = vpack.c.bf16 %v2321_v30, %v2320_v29  ;;  %v2352_v39 = vcvt.s32.f32 %v752_v31  ;;  %v2353_v40 = vcvt.s32.f32 %v753_v32  ;;  %v718_v41 = vunpack.c.2.s8 %v310_v28 }
  0x2c   : > { %4987 = vmatpush.bf16.msra.mxu3 %v3939_v25  ;;  %v3922_v43 = vpack.c.bf16 %v2337_v34, %v2336_v33  ;;  %v2368_v44 = vcvt.s32.f32 %v768_v35  ;;  %v2369_v45 = vcvt.s32.f32 %v769_v36  ;;  %v719_v46 = vunpack.c.3.s8 %v310_v28 }
  0x2d   : > { %4949 = vmatpush.bf16.msra.mxu0 %v3914_v38  ;;  %v3930_v48 = vpack.c.bf16 %v2353_v40, %v2352_v39  ;;  %v2318_v49 = vcvt.s32.f32 %v718_v41  ;;  %v734_v50 = vunpack.c.2.s8 %v314_v37  ;;  %v735_v51 = vunpack.c.3.s8 %v314_v37 }
  0x2e   : > { %4962 = vmatpush.bf16.msra.mxu1 %v3922_v43  ;;  %v3938_v52 = vpack.c.bf16 %v2369_v45, %v2368_v44  ;;  %v2319_v53 = vcvt.s32.f32 %v719_v46  ;;  %v750_v54 = vunpack.c.2.s8 %v318_v42  ;;  %v751_v55 = vunpack.c.3.s8 %v318_v42 }
  0x2f   : > { %4975 = vmatpush.bf16.msra.mxu2 %v3930_v48  ;;  %v2334_v56 = vcvt.s32.f32 %v734_v50  ;;  %v2335_v57 = vcvt.s32.f32 %v735_v51  ;;  %v766_v58 = vunpack.c.2.s8 %v322_v47  ;;  %v767_v59 = vunpack.c.3.s8 %v322_v47 }
  0x30   : > { %4988 = vmatpush.bf16.msra.mxu3 %v3938_v52  ;;  %v3913_v60 = vpack.c.bf16 %v2319_v53, %v2318_v49  ;;  %v2350_v61 = vcvt.s32.f32 %v750_v54  ;;  %v2351_v62 = vcvt.s32.f32 %v751_v55  ;;  %v716_v63 = vunpack.c.0.s8 %v310_v28  ;;  %v308_v52 = vld [vmem:[%s6675_s8] sm:$0xff] }
  0x31   : > { %v3921_v0 = vpack.c.bf16 %v2335_v57, %v2334_v56  ;;  %v2366_v1 = vcvt.s32.f32 %v766_v58  ;;  %v2367_v2 = vcvt.s32.f32 %v767_v59  ;;  %v717_v3 = vunpack.c.1.s8 %v310_v28 }
  0x32   : > { %4950 = vmatpush.bf16.msra.mxu0 %v3913_v60  ;;  %v3929_v4 = vpack.c.bf16 %v2351_v62, %v2350_v61  ;;  %v2316_v5 = vcvt.s32.f32 %v716_v63  ;;  %v732_v6 = vunpack.c.0.s8 %v314_v37  ;;  %v733_v7 = vunpack.c.1.s8 %v314_v37  ;;  %v312_v61 = vld [vmem:[%s6675_s8 + $0x20] sm:$0xff] }
  0x33   : > { %4963 = vmatpush.bf16.msra.mxu1 %v3921_v0  ;;  %v3937_v9 = vpack.c.bf16 %v2367_v2, %v2366_v1  ;;  %v2317_v10 = vcvt.s32.f32 %v717_v3  ;;  %v748_v11 = vunpack.c.0.s8 %v318_v42  ;;  %v749_v12 = vunpack.c.1.s8 %v318_v42  ;;  %v316_v2 = vld [vmem:[%s6675_s8 + $0x40] sm:$0xff] }
  0x34   : > { %4976 = vmatpush.bf16.msra.mxu2 %v3929_v4  ;;  %v2332_v13 = vcvt.s32.f32 %v732_v6  ;;  %v2333_v14 = vcvt.s32.f32 %v733_v7  ;;  %v764_v15 = vunpack.c.0.s8 %v322_v47  ;;  %v765_v16 = vunpack.c.1.s8 %v322_v47  ;;  %v320_v7 = vld [vmem:[%s6675_s8 + $0x60] sm:$0xff] }
  0x35   : > { %4989 = vmatpush.bf16.msra.mxu3 %v3937_v9  ;;  %v3912_v18 = vpack.c.bf16 %v2317_v10, %v2316_v5  ;;  %v2348_v19 = vcvt.s32.f32 %v748_v11  ;;  %v2349_v20 = vcvt.s32.f32 %v749_v12  ;;  %v714_v21 = vunpack.c.2.s8 %v309_v8  ;;  %v4709_v12 = vld [vmem:[%s7631_s0] sm:$0xff] }
  0x36   : > { %v3920_v23 = vpack.c.bf16 %v2333_v14, %v2332_v13  ;;  %v2364_v24 = vcvt.s32.f32 %v764_v15  ;;  %v2365_v25 = vcvt.s32.f32 %v765_v16  ;;  %v715_v26 = vunpack.c.3.s8 %v309_v8  ;;  %4723 = vst [vmem:[#allocation1] ss:$9 sm:$0xff] %v4709_v12 }
  0x37   : > { %4951 = vmatpush.bf16.msra.mxu0 %v3912_v18  ;;  %v3928_v28 = vpack.c.bf16 %v2349_v20, %v2348_v19  ;;  %v2314_v29 = vcvt.s32.f32 %v714_v21  ;;  %v730_v30 = vunpack.c.2.s8 %v313_v17  ;;  %v731_v31 = vunpack.c.3.s8 %v313_v17 }
  0x38   : > { %4964 = vmatpush.bf16.msra.mxu1 %v3920_v23  ;;  %v3936_v32 = vpack.c.bf16 %v2365_v25, %v2364_v24  ;;  %v2315_v33 = vcvt.s32.f32 %v715_v26  ;;  %v746_v34 = vunpack.c.2.s8 %v317_v22  ;;  %v747_v35 = vunpack.c.3.s8 %v317_v22 }
  0x39   : > { %4977 = vmatpush.bf16.msra.mxu2 %v3928_v28  ;;  %v2330_v36 = vcvt.s32.f32 %v730_v30  ;;  %v2331_v37 = vcvt.s32.f32 %v731_v31  ;;  %v762_v38 = vunpack.c.2.s8 %v321_v27  ;;  %v763_v39 = vunpack.c.3.s8 %v321_v27 }
  0x3a   : > { %4990 = vmatpush.bf16.msra.mxu3 %v3936_v32  ;;  %v3911_v40 = vpack.c.bf16 %v2315_v33, %v2314_v29  ;;  %v2346_v41 = vcvt.s32.f32 %v746_v34  ;;  %v2347_v42 = vcvt.s32.f32 %v747_v35  ;;  %v712_v43 = vunpack.c.0.s8 %v309_v8  ;;  %v327_v33 = vld [vmem:[%s6675_s8 + $0x98] sm:$0xff] }
  0x3b   : > { %v3919_v44 = vpack.c.bf16 %v2331_v37, %v2330_v36  ;;  %v2362_v45 = vcvt.s32.f32 %v762_v38  ;;  %v2363_v46 = vcvt.s32.f32 %v763_v39  ;;  %v713_v47 = vunpack.c.1.s8 %v309_v8 }
  0x3c   : > { %4952 = vmatpush.bf16.msra.mxu0 %v3911_v40  ;;  %v3927_v48 = vpack.c.bf16 %v2347_v42, %v2346_v41  ;;  %v2312_v49 = vcvt.s32.f32 %v712_v43  ;;  %v728_v50 = vunpack.c.0.s8 %v313_v17  ;;  %v729_v51 = vunpack.c.1.s8 %v313_v17  ;;  %v331_v42 = vld [vmem:[%s6675_s8 + $0xb8] sm:$0xff] }
  0x3d   : > { %4965 = vmatpush.bf16.msra.mxu1 %v3919_v44  ;;  %v3935_v53 = vpack.c.bf16 %v2363_v46, %v2362_v45  ;;  %v2313_v54 = vcvt.s32.f32 %v713_v47  ;;  %v744_v55 = vunpack.c.0.s8 %v317_v22  ;;  %v745_v56 = vunpack.c.1.s8 %v317_v22  ;;  %v335_v47 = vld [vmem:[%s6675_s8 + $0xd8] sm:$0xff] }
  0x3e   : > { %4978 = vmatpush.bf16.msra.mxu2 %v3927_v48  ;;  %v2328_v57 = vcvt.s32.f32 %v728_v50  ;;  %v2329_v58 = vcvt.s32.f32 %v729_v51  ;;  %v760_v59 = vunpack.c.0.s8 %v321_v27  ;;  %v761_v60 = vunpack.c.1.s8 %v321_v27 }
  0x3f   : > { %4991 = vmatpush.bf16.msra.mxu3 %v3935_v53  ;;  %v3910_v62 = vpack.c.bf16 %v2313_v54, %v2312_v49  ;;  %v2344_v63 = vcvt.s32.f32 %v744_v55  ;;  %v2345_v0 = vcvt.s32.f32 %v745_v56  ;;  %v710_v1 = vunpack.c.2.s8 %v308_v52 }
  0x40   : > { %v3918_v3 = vpack.c.bf16 %v2329_v58, %v2328_v57  ;;  %v2360_v4 = vcvt.s32.f32 %v760_v59  ;;  %v2361_v5 = vcvt.s32.f32 %v761_v60  ;;  %v711_v6 = vunpack.c.3.s8 %v308_v52 }
  0x41   : > { %4953 = vmatpush.bf16.msra.mxu0 %v3910_v62  ;;  %v3926_v8 = vpack.c.bf16 %v2345_v0, %v2344_v63  ;;  %v2310_v9 = vcvt.s32.f32 %v710_v1  ;;  %v726_v10 = vunpack.c.2.s8 %v312_v61  ;;  %v727_v11 = vunpack.c.3.s8 %v312_v61  ;;  %v4725_v62 = vld [vmem:[#allocation1 + $0x9] sm:$0xff] }
  0x42   : > { %4966 = vmatpush.bf16.msra.mxu1 %v3918_v3  ;;  %v3934_v13 = vpack.c.bf16 %v2361_v5, %v2360_v4  ;;  %v2311_v14 = vcvt.s32.f32 %v711_v6  ;;  %v742_v15 = vunpack.c.2.s8 %v316_v2  ;;  %v743_v16 = vunpack.c.3.s8 %v316_v2  ;;  %v4726_v3 = vld [vmem:[#allocation1 + $0x12] sm:$0xff] }
  0x43   : > { %4979 = vmatpush.bf16.msra.mxu2 %v3926_v8  ;;  %v2326_v17 = vcvt.s32.f32 %v726_v10  ;;  %v2327_v18 = vcvt.s32.f32 %v727_v11  ;;  %v758_v19 = vunpack.c.2.s8 %v320_v7  ;;  %v759_v20 = vunpack.c.3.s8 %v320_v7  ;;  %v4727_v8 = vld [vmem:[#allocation1 + $0x1b] sm:$0xff] }
  0x44   : > { %4992 = vmatpush.bf16.msra.mxu3 %v3934_v13  ;;  %v3909_v21 = vpack.c.bf16 %v2311_v14, %v2310_v9  ;;  %v2342_v22 = vcvt.s32.f32 %v742_v15  ;;  %v2343_v23 = vcvt.s32.f32 %v743_v16  ;;  %v708_v24 = vunpack.c.0.s8 %v308_v52 }
  0x45   : > { %v3917_v25 = vpack.c.bf16 %v2327_v18, %v2326_v17  ;;  %v2358_v26 = vcvt.s32.f32 %v758_v19  ;;  %v2359_v27 = vcvt.s32.f32 %v759_v20  ;;  %v709_v28 = vunpack.c.1.s8 %v308_v52  ;;  %v339_v52 = vld [vmem:[%s6675_s8 + $0xf8] sm:$0xff]  ;;  %v326_v17 = vld [vmem:[%s6675_s8 + $0x90] sm:$0xff] }
  0x46   : > { %4954 = vmatpush.bf16.msra.mxu0 %v3909_v21  ;;  %v3925_v29 = vpack.c.bf16 %v2343_v23, %v2342_v22  ;;  %v2308_v30 = vcvt.s32.f32 %v708_v24  ;;  %v724_v31 = vunpack.c.0.s8 %v312_v61  ;;  %v725_v32 = vunpack.c.1.s8 %v312_v61  ;;  %v4724_v61 = vld [vmem:[#allocation1] sm:$0xff] }
  0x47   : > { %4967 = vmatpush.bf16.msra.mxu1 %v3917_v25  ;;  %v3933_v34 = vpack.c.bf16 %v2359_v27, %v2358_v26  ;;  %v2309_v35 = vcvt.s32.f32 %v709_v28  ;;  %v740_v36 = vunpack.c.0.s8 %v316_v2  ;;  %v741_v37 = vunpack.c.1.s8 %v316_v2  ;;  %v330_v26 = vld [vmem:[%s6675_s8 + $0xb0] sm:$0xff] }
  0x48   : > { %4980 = vmatpush.bf16.msra.mxu2 %v3925_v29  ;;  %v2324_v38 = vcvt.s32.f32 %v724_v31  ;;  %v2325_v39 = vcvt.s32.f32 %v725_v32  ;;  %v756_v40 = vunpack.c.0.s8 %v320_v7  ;;  %v757_v41 = vunpack.c.1.s8 %v320_v7  ;;  %v334_v31 = vld [vmem:[%s6675_s8 + $0xd0] sm:$0xff] }
  0x49   : > { %4993 = vmatpush.bf16.msra.mxu3 %v3933_v34  ;;  %v3908_v43 = vpack.c.bf16 %v2309_v35, %v2308_v30  ;;  %v2340_v44 = vcvt.s32.f32 %v740_v36  ;;  %v2341_v45 = vcvt.s32.f32 %v741_v37  ;;  %v786_v46 = vunpack.c.2.s8 %v327_v33  ;;  %v338_v36 = vld [vmem:[%s6675_s8 + $0xf0] sm:$0xff] }
  0x4a   : > { %v3916_v48 = vpack.c.bf16 %v2325_v39, %v2324_v38  ;;  %v2356_v49 = vcvt.s32.f32 %v756_v40  ;;  %v2357_v50 = vcvt.s32.f32 %v757_v41  ;;  %v787_v51 = vunpack.c.3.s8 %v327_v33 }
  0x4b   : > { %4955 = vmatpush.bf16.msra.mxu0 %v3908_v43  ;;  %v3924_v53 = vpack.c.bf16 %v2341_v45, %v2340_v44  ;;  %v2386_v54 = vcvt.s32.f32 %v786_v46  ;;  %v802_v55 = vunpack.c.2.s8 %v331_v42  ;;  %v803_v56 = vunpack.c.3.s8 %v331_v42 }
  0x4c   : > { %4968 = vmatpush.bf16.msra.mxu1 %v3916_v48  ;;  %v3932_v57 = vpack.c.bf16 %v2357_v50, %v2356_v49  ;;  %v2387_v58 = vcvt.s32.f32 %v787_v51  ;;  %v818_v59 = vunpack.c.2.s8 %v335_v47  ;;  %v819_v60 = vunpack.c.3.s8 %v335_v47 }
  0x4d   : > { %4981 = vmatpush.bf16.msra.mxu2 %v3924_v53  ;;  %v2402_v63 = vcvt.s32.f32 %v802_v55  ;;  %v2403_v0 = vcvt.s32.f32 %v803_v56  ;;  %v834_v1 = vunpack.c.2.s8 %v339_v52  ;;  %v835_v2 = vunpack.c.3.s8 %v339_v52 }
  0x4e   : > { %4994 = vmatpush.bf16.msra.mxu3 %v3932_v57  ;;  %v3947_v4 = vpack.c.bf16 %v2387_v58, %v2386_v54  ;;  %v2418_v5 = vcvt.s32.f32 %v818_v59  ;;  %v2419_v6 = vcvt.s32.f32 %v819_v60  ;;  %v784_v7 = vunpack.c.0.s8 %v327_v33  ;;  %4956 = vmatmul.bf16.vlgmr.msra.gmra.mxu0 %v4724_v61  ;;  %v325_v61 = vld [vmem:[%s6675_s8 + $0x88] sm:$0xff] }
  0x4f   : > { %v3955_v9 = vpack.c.bf16 %v2403_v0, %v2402_v63  ;;  %v2434_v10 = vcvt.s32.f32 %v834_v1  ;;  %v2435_v11 = vcvt.s32.f32 %v835_v2  ;;  %v785_v12 = vunpack.c.1.s8 %v327_v33  ;;  %4969 = vmatmul.bf16.vlgmr.msra.gmra.mxu1 %v4725_v62 }
  0x50   : > { %5000 = vmatpush.bf16.msrb.mxu0 %v3947_v4  ;;  %v3963_v13 = vpack.c.bf16 %v2419_v6, %v2418_v5  ;;  %v2384_v14 = vcvt.s32.f32 %v784_v7  ;;  %v800_v15 = vunpack.c.0.s8 %v331_v42  ;;  %v801_v16 = vunpack.c.1.s8 %v331_v42  ;;  %4982 = vmatmul.bf16.vlgmr.msra.gmra.mxu2 %v4726_v3  ;;  %v329_v6 = vld [vmem:[%s6675_s8 + $0xa8] sm:$0xff] }
  0x51   : > { %5013 = vmatpush.bf16.msrb.mxu1 %v3955_v9  ;;  %v3971_v18 = vpack.c.bf16 %v2435_v11, %v2434_v10  ;;  %v2385_v19 = vcvt.s32.f32 %v785_v12  ;;  %v816_v20 = vunpack.c.0.s8 %v335_v47  ;;  %v817_v21 = vunpack.c.1.s8 %v335_v47  ;;  %4995 = vmatmul.bf16.vlgmr.msra.gmra.mxu3 %v4727_v8  ;;  %v333_v11 = vld [vmem:[%s6675_s8 + $0xc8] sm:$0xff] }
  0x52   : > { %5026 = vmatpush.bf16.msrb.mxu2 %v3963_v13  ;;  %v2400_v22 = vcvt.s32.f32 %v800_v15  ;;  %v2401_v23 = vcvt.s32.f32 %v801_v16  ;;  %v832_v24 = vunpack.c.0.s8 %v339_v52  ;;  %v833_v25 = vunpack.c.1.s8 %v339_v52  ;;  %v337_v16 = vld [vmem:[%s6675_s8 + $0xe8] sm:$0xff] }
  0x53   : > { %5039 = vmatpush.bf16.msrb.mxu3 %v3971_v18  ;;  %v3946_v27 = vpack.c.bf16 %v2385_v19, %v2384_v14  ;;  %v2416_v28 = vcvt.s32.f32 %v816_v20  ;;  %v2417_v29 = vcvt.s32.f32 %v817_v21  ;;  %v782_v30 = vunpack.c.2.s8 %v326_v17 }
  0x54   : > { %v3954_v32 = vpack.c.bf16 %v2401_v23, %v2400_v22  ;;  %v2432_v33 = vcvt.s32.f32 %v832_v24  ;;  %v2433_v34 = vcvt.s32.f32 %v833_v25  ;;  %v783_v35 = vunpack.c.3.s8 %v326_v17 }
  0x55   : > { %5001 = vmatpush.bf16.msrb.mxu0 %v3946_v27  ;;  %v3962_v37 = vpack.c.bf16 %v2417_v29, %v2416_v28  ;;  %v2382_v38 = vcvt.s32.f32 %v782_v30  ;;  %v798_v39 = vunpack.c.2.s8 %v330_v26  ;;  %v799_v40 = vunpack.c.3.s8 %v330_v26 }
  0x56   : > { %5014 = vmatpush.bf16.msrb.mxu1 %v3954_v32  ;;  %v3970_v41 = vpack.c.bf16 %v2433_v34, %v2432_v33  ;;  %v2383_v42 = vcvt.s32.f32 %v783_v35  ;;  %v814_v43 = vunpack.c.2.s8 %v334_v31  ;;  %v815_v44 = vunpack.c.3.s8 %v334_v31 }
  0x57   : > { %5027 = vmatpush.bf16.msrb.mxu2 %v3962_v37  ;;  %v2398_v45 = vcvt.s32.f32 %v798_v39  ;;  %v2399_v46 = vcvt.s32.f32 %v799_v40  ;;  %v830_v47 = vunpack.c.2.s8 %v338_v36  ;;  %v831_v48 = vunpack.c.3.s8 %v338_v36 }
  0x58   : > { %5040 = vmatpush.bf16.msrb.mxu3 %v3970_v41  ;;  %v3945_v49 = vpack.c.bf16 %v2383_v42, %v2382_v38  ;;  %v2414_v50 = vcvt.s32.f32 %v814_v43  ;;  %v2415_v51 = vcvt.s32.f32 %v815_v44  ;;  %v780_v52 = vunpack.c.0.s8 %v326_v17  ;;  %v324_v41 = vld [vmem:[%s6675_s8 + $0x80] sm:$0xff] }
  0x59   : > { %v3953_v53 = vpack.c.bf16 %v2399_v46, %v2398_v45  ;;  %v2430_v54 = vcvt.s32.f32 %v830_v47  ;;  %v2431_v55 = vcvt.s32.f32 %v831_v48  ;;  %v781_v56 = vunpack.c.1.s8 %v326_v17 }
  0x5a   : > { %5002 = vmatpush.bf16.msrb.mxu0 %v3945_v49  ;;  %v3961_v57 = vpack.c.bf16 %v2415_v51, %v2414_v50  ;;  %v2380_v58 = vcvt.s32.f32 %v780_v52  ;;  %v796_v59 = vunpack.c.0.s8 %v330_v26  ;;  %v797_v60 = vunpack.c.1.s8 %v330_v26  ;;  %v328_v50 = vld [vmem:[%s6675_s8 + $0xa0] sm:$0xff] }
  0x5b   : > { %5015 = vmatpush.bf16.msrb.mxu1 %v3953_v53  ;;  %v3969_v62 = vpack.c.bf16 %v2431_v55, %v2430_v54  ;;  %v2381_v63 = vcvt.s32.f32 %v781_v56  ;;  %v812_v0 = vunpack.c.0.s8 %v334_v31  ;;  %v813_v1 = vunpack.c.1.s8 %v334_v31  ;;  %v332_v55 = vld [vmem:[%s6675_s8 + $0xc0] sm:$0xff] }
  0x5c   : > { %5028 = vmatpush.bf16.msrb.mxu2 %v3961_v57  ;;  %v2396_v2 = vcvt.s32.f32 %v796_v59  ;;  %v2397_v3 = vcvt.s32.f32 %v797_v60  ;;  %v828_v4 = vunpack.c.0.s8 %v338_v36  ;;  %v829_v5 = vunpack.c.1.s8 %v338_v36  ;;  %v336_v60 = vld [vmem:[%s6675_s8 + $0xe0] sm:$0xff] }
  0x5d   : > { %5041 = vmatpush.bf16.msrb.mxu3 %v3969_v62  ;;  %v3944_v7 = vpack.c.bf16 %v2381_v63, %v2380_v58  ;;  %v2412_v8 = vcvt.s32.f32 %v812_v0  ;;  %v2413_v9 = vcvt.s32.f32 %v813_v1  ;;  %v778_v10 = vunpack.c.2.s8 %v325_v61 }
  0x5e   : > { %v3952_v12 = vpack.c.bf16 %v2397_v3, %v2396_v2  ;;  %v2428_v13 = vcvt.s32.f32 %v828_v4  ;;  %v2429_v14 = vcvt.s32.f32 %v829_v5  ;;  %v779_v15 = vunpack.c.3.s8 %v325_v61 }
  0x5f   : > { %5003 = vmatpush.bf16.msrb.mxu0 %v3944_v7  ;;  %v3960_v17 = vpack.c.bf16 %v2413_v9, %v2412_v8  ;;  %v2378_v18 = vcvt.s32.f32 %v778_v10  ;;  %v794_v19 = vunpack.c.2.s8 %v329_v6  ;;  %v795_v20 = vunpack.c.3.s8 %v329_v6 }
  0x60   : > { %5016 = vmatpush.bf16.msrb.mxu1 %v3952_v12  ;;  %v3968_v21 = vpack.c.bf16 %v2429_v14, %v2428_v13  ;;  %v2379_v22 = vcvt.s32.f32 %v779_v15  ;;  %v810_v23 = vunpack.c.2.s8 %v333_v11  ;;  %v811_v24 = vunpack.c.3.s8 %v333_v11 }
  0x61   : > { %5029 = vmatpush.bf16.msrb.mxu2 %v3960_v17  ;;  %v2394_v25 = vcvt.s32.f32 %v794_v19  ;;  %v2395_v26 = vcvt.s32.f32 %v795_v20  ;;  %v826_v27 = vunpack.c.2.s8 %v337_v16  ;;  %v827_v28 = vunpack.c.3.s8 %v337_v16 }
  0x62   : > { %5042 = vmatpush.bf16.msrb.mxu3 %v3968_v21  ;;  %v3943_v29 = vpack.c.bf16 %v2379_v22, %v2378_v18  ;;  %v2410_v30 = vcvt.s32.f32 %v810_v23  ;;  %v2411_v31 = vcvt.s32.f32 %v811_v24  ;;  %v776_v32 = vunpack.c.0.s8 %v325_v61  ;;  %v343_v21 = vld [vmem:[%s6675_s8 + $0x118] sm:$0xff] }
  0x63   : > { %v3951_v33 = vpack.c.bf16 %v2395_v26, %v2394_v25  ;;  %v2426_v34 = vcvt.s32.f32 %v826_v27  ;;  %v2427_v35 = vcvt.s32.f32 %v827_v28  ;;  %v777_v36 = vunpack.c.1.s8 %v325_v61 }
  0x64   : > { %5004 = vmatpush.bf16.msrb.mxu0 %v3943_v29  ;;  %v3959_v37 = vpack.c.bf16 %v2411_v31, %v2410_v30  ;;  %v2376_v38 = vcvt.s32.f32 %v776_v32  ;;  %v792_v39 = vunpack.c.0.s8 %v329_v6  ;;  %v793_v40 = vunpack.c.1.s8 %v329_v6  ;;  %v347_v30 = vld [vmem:[%s6675_s8 + $0x138] sm:$0xff] }
  0x65   : > { %5017 = vmatpush.bf16.msrb.mxu1 %v3951_v33  ;;  %v3967_v42 = vpack.c.bf16 %v2427_v35, %v2426_v34  ;;  %v2377_v43 = vcvt.s32.f32 %v777_v36  ;;  %v808_v44 = vunpack.c.0.s8 %v333_v11  ;;  %v809_v45 = vunpack.c.1.s8 %v333_v11  ;;  %v351_v35 = vld [vmem:[%s6675_s8 + $0x158] sm:$0xff] }
  0x66   : > { %5030 = vmatpush.bf16.msrb.mxu2 %v3959_v37  ;;  %v2392_v46 = vcvt.s32.f32 %v792_v39  ;;  %v2393_v47 = vcvt.s32.f32 %v793_v40  ;;  %v824_v48 = vunpack.c.0.s8 %v337_v16  ;;  %v825_v49 = vunpack.c.1.s8 %v337_v16  ;;  %v355_v40 = vld [vmem:[%s6675_s8 + $0x178] sm:$0xff] }
  0x67   : > { %5043 = vmatpush.bf16.msrb.mxu3 %v3967_v42  ;;  %v3942_v51 = vpack.c.bf16 %v2377_v43, %v2376_v38  ;;  %v2408_v52 = vcvt.s32.f32 %v808_v44  ;;  %v2409_v53 = vcvt.s32.f32 %v809_v45  ;;  %v774_v54 = vunpack.c.2.s8 %v324_v41  ;;  %v4728_v45 = vld [vmem:[#allocation1 + $0x24] sm:$0xff] }
  0x68   : > { %v3950_v56 = vpack.c.bf16 %v2393_v47, %v2392_v46  ;;  %v2424_v57 = vcvt.s32.f32 %v824_v48  ;;  %v2425_v58 = vcvt.s32.f32 %v825_v49  ;;  %v775_v59 = vunpack.c.3.s8 %v324_v41 }
  0x69   : > { %5005 = vmatpush.bf16.msrb.mxu0 %v3942_v51  ;;  %v3958_v61 = vpack.c.bf16 %v2409_v53, %v2408_v52  ;;  %v2374_v62 = vcvt.s32.f32 %v774_v54  ;;  %v790_v63 = vunpack.c.2.s8 %v328_v50  ;;  %v791_v0 = vunpack.c.3.s8 %v328_v50 }
  0x6a   : > { %5018 = vmatpush.bf16.msrb.mxu1 %v3950_v56  ;;  %v3966_v1 = vpack.c.bf16 %v2425_v58, %v2424_v57  ;;  %v2375_v2 = vcvt.s32.f32 %v775_v59  ;;  %v806_v3 = vunpack.c.2.s8 %v332_v55  ;;  %v807_v4 = vunpack.c.3.s8 %v332_v55 }
  0x6b   : > { %5031 = vmatpush.bf16.msrb.mxu2 %v3958_v61  ;;  %v2390_v5 = vcvt.s32.f32 %v790_v63  ;;  %v2391_v6 = vcvt.s32.f32 %v791_v0  ;;  %v822_v7 = vunpack.c.2.s8 %v336_v60  ;;  %v823_v8 = vunpack.c.3.s8 %v336_v60 }
  0x6c   : > { %5044 = vmatpush.bf16.msrb.mxu3 %v3966_v1  ;;  %v3941_v9 = vpack.c.bf16 %v2375_v2, %v2374_v62  ;;  %v2406_v10 = vcvt.s32.f32 %v806_v3  ;;  %v2407_v11 = vcvt.s32.f32 %v807_v4  ;;  %v772_v12 = vunpack.c.0.s8 %v324_v41 }
  0x6d   : > { %v3949_v13 = vpack.c.bf16 %v2391_v6, %v2390_v5  ;;  %v2422_v14 = vcvt.s32.f32 %v822_v7  ;;  %v2423_v15 = vcvt.s32.f32 %v823_v8  ;;  %v773_v16 = vunpack.c.1.s8 %v324_v41  ;;  %v342_v5 = vld [vmem:[%s6675_s8 + $0x110] sm:$0xff] }
  0x6e   : > { %5006 = vmatpush.bf16.msrb.mxu0 %v3941_v9  ;;  %v3957_v17 = vpack.c.bf16 %v2407_v11, %v2406_v10  ;;  %v2372_v18 = vcvt.s32.f32 %v772_v12  ;;  %v788_v19 = vunpack.c.0.s8 %v328_v50  ;;  %v789_v20 = vunpack.c.1.s8 %v328_v50  ;;  %v4729_v50 = vld [vmem:[#allocation1 + $0x2d] sm:$0xff] }
  0x6f   : > { %5019 = vmatpush.bf16.msrb.mxu1 %v3949_v13  ;;  %v3965_v22 = vpack.c.bf16 %v2423_v15, %v2422_v14  ;;  %v2373_v23 = vcvt.s32.f32 %v773_v16  ;;  %v804_v24 = vunpack.c.0.s8 %v332_v55  ;;  %v805_v25 = vunpack.c.1.s8 %v332_v55  ;;  %v4730_v55 = vld [vmem:[#allocation1 + $0x36] sm:$0xff] }
  0x70   : > { %5032 = vmatpush.bf16.msrb.mxu2 %v3957_v17  ;;  %v2388_v26 = vcvt.s32.f32 %v788_v19  ;;  %v2389_v27 = vcvt.s32.f32 %v789_v20  ;;  %v820_v28 = vunpack.c.0.s8 %v336_v60  ;;  %v821_v29 = vunpack.c.1.s8 %v336_v60  ;;  %v4731_v60 = vld [vmem:[#allocation1 + $0x3f] sm:$0xff] }
  0x71   : > { %5045 = vmatpush.bf16.msrb.mxu3 %v3965_v22  ;;  %v3940_v31 = vpack.c.bf16 %v2373_v23, %v2372_v18  ;;  %v2404_v32 = vcvt.s32.f32 %v804_v24  ;;  %v2405_v33 = vcvt.s32.f32 %v805_v25  ;;  %v850_v34 = vunpack.c.2.s8 %v343_v21  ;;  %v346_v14 = vld [vmem:[%s6675_s8 + $0x130] sm:$0xff]  ;;  %v4710_v25 = vld [vmem:[%s7631_s0 + $0x8] sm:$0xff] }
  0x72   : > { %v3948_v36 = vpack.c.bf16 %v2389_v27, %v2388_v26  ;;  %v2420_v37 = vcvt.s32.f32 %v820_v28  ;;  %v2421_v38 = vcvt.s32.f32 %v821_v29  ;;  %v851_v39 = vunpack.c.3.s8 %v343_v21  ;;  %v350_v19 = vld [vmem:[%s6675_s8 + $0x150] sm:$0xff]  ;;  %4733 = vst [vmem:[#allocation1] ss:$9 sm:$0xff] %v4710_v25 }
  0x73   : > { %5007 = vmatpush.bf16.msrb.mxu0 %v3940_v31  ;;  %v3956_v41 = vpack.c.bf16 %v2405_v33, %v2404_v32  ;;  %v2450_v42 = vcvt.s32.f32 %v850_v34  ;;  %v866_v43 = vunpack.c.2.s8 %v347_v30  ;;  %v867_v44 = vunpack.c.3.s8 %v347_v30  ;;  %v354_v24 = vld [vmem:[%s6675_s8 + $0x170] sm:$0xff] }
  0x74   : > { %5020 = vmatpush.bf16.msrb.mxu1 %v3948_v36  ;;  %v3964_v46 = vpack.c.bf16 %v2421_v38, %v2420_v37  ;;  %v2451_v47 = vcvt.s32.f32 %v851_v39  ;;  %v882_v48 = vunpack.c.2.s8 %v351_v35  ;;  %v883_v49 = vunpack.c.3.s8 %v351_v35 }
  0x75   : > { %5033 = vmatpush.bf16.msrb.mxu2 %v3956_v41  ;;  %v2466_v51 = vcvt.s32.f32 %v866_v43  ;;  %v2467_v52 = vcvt.s32.f32 %v867_v44  ;;  %v898_v53 = vunpack.c.2.s8 %v355_v40  ;;  %v899_v54 = vunpack.c.3.s8 %v355_v40 }
  0x76   : > { %5046 = vmatpush.bf16.msrb.mxu3 %v3964_v46  ;;  %v3979_v56 = vpack.c.bf16 %v2451_v47, %v2450_v42  ;;  %v2482_v57 = vcvt.s32.f32 %v882_v48  ;;  %v2483_v58 = vcvt.s32.f32 %v883_v49  ;;  %v848_v59 = vunpack.c.0.s8 %v343_v21  ;;  %5008 = vmatmul.bf16.vlgmr.msrb.gmra.mxu0 %v4728_v45 }
  0x77   : > { %v3987_v61 = vpack.c.bf16 %v2467_v52, %v2466_v51  ;;  %v2498_v62 = vcvt.s32.f32 %v898_v53  ;;  %v2499_v63 = vcvt.s32.f32 %v899_v54  ;;  %v849_v0 = vunpack.c.1.s8 %v343_v21  ;;  %5021 = vmatmul.bf16.vlgmr.msrb.gmra.mxu1 %v4729_v50  ;;  %v341_v50 = vld [vmem:[%s6675_s8 + $0x108] sm:$0xff] }
  0x78   : > { %5052 = vmatpush.bf16.msra.mxu0 %v3979_v56  ;;  %v3995_v1 = vpack.c.bf16 %v2483_v58, %v2482_v57  ;;  %v2448_v2 = vcvt.s32.f32 %v848_v59  ;;  %v864_v3 = vunpack.c.0.s8 %v347_v30  ;;  %v865_v4 = vunpack.c.1.s8 %v347_v30  ;;  %5034 = vmatmul.bf16.vlgmr.msrb.gmra.mxu2 %v4730_v55  ;;  %v345_v59 = vld [vmem:[%s6675_s8 + $0x128] sm:$0xff] }
  0x79   : > { %5065 = vmatpush.bf16.msra.mxu1 %v3987_v61  ;;  %v4003_v6 = vpack.c.bf16 %v2499_v63, %v2498_v62  ;;  %v2449_v7 = vcvt.s32.f32 %v849_v0  ;;  %v880_v8 = vunpack.c.0.s8 %v351_v35  ;;  %v881_v9 = vunpack.c.1.s8 %v351_v35  ;;  %5047 = vmatmul.bf16.vlgmr.msrb.gmra.mxu3 %v4731_v60  ;;  %v349_v0 = vld [vmem:[%s6675_s8 + $0x148] sm:$0xff] }
  0x7a   : > { %5078 = vmatpush.bf16.msra.mxu2 %v3995_v1  ;;  %v2464_v10 = vcvt.s32.f32 %v864_v3  ;;  %v2465_v11 = vcvt.s32.f32 %v865_v4  ;;  %v896_v12 = vunpack.c.0.s8 %v355_v40  ;;  %v897_v13 = vunpack.c.1.s8 %v355_v40 }
  0x7b   : > { %5091 = vmatpush.bf16.msra.mxu3 %v4003_v6  ;;  %v3978_v15 = vpack.c.bf16 %v2449_v7, %v2448_v2  ;;  %v2480_v16 = vcvt.s32.f32 %v880_v8  ;;  %v2481_v17 = vcvt.s32.f32 %v881_v9  ;;  %v846_v18 = vunpack.c.2.s8 %v342_v5 }
  0x7c   : > { %v3986_v20 = vpack.c.bf16 %v2465_v11, %v2464_v10  ;;  %v2496_v21 = vcvt.s32.f32 %v896_v12  ;;  %v2497_v22 = vcvt.s32.f32 %v897_v13  ;;  %v847_v23 = vunpack.c.3.s8 %v342_v5 }
  0x7d   : > { %5053 = vmatpush.bf16.msra.mxu0 %v3978_v15  ;;  %v3994_v26 = vpack.c.bf16 %v2481_v17, %v2480_v16  ;;  %v2446_v27 = vcvt.s32.f32 %v846_v18  ;;  %v862_v28 = vunpack.c.2.s8 %v346_v14  ;;  %v863_v29 = vunpack.c.3.s8 %v346_v14 }
  0x7e   : > { %5066 = vmatpush.bf16.msra.mxu1 %v3986_v20  ;;  %v4002_v30 = vpack.c.bf16 %v2497_v22, %v2496_v21  ;;  %v2447_v31 = vcvt.s32.f32 %v847_v23  ;;  %v878_v32 = vunpack.c.2.s8 %v350_v19  ;;  %v879_v33 = vunpack.c.3.s8 %v350_v19 }
  0x7f   : > { %5079 = vmatpush.bf16.msra.mxu2 %v3994_v26  ;;  %v2462_v34 = vcvt.s32.f32 %v862_v28  ;;  %v2463_v35 = vcvt.s32.f32 %v863_v29  ;;  %v894_v36 = vunpack.c.2.s8 %v354_v24  ;;  %v895_v37 = vunpack.c.3.s8 %v354_v24 }
  0x80   : > { %5092 = vmatpush.bf16.msra.mxu3 %v4002_v30  ;;  %v3977_v38 = vpack.c.bf16 %v2447_v31, %v2446_v27  ;;  %v2478_v39 = vcvt.s32.f32 %v878_v32  ;;  %v2479_v40 = vcvt.s32.f32 %v879_v33  ;;  %v844_v41 = vunpack.c.0.s8 %v342_v5  ;;  %v340_v30 = vld [vmem:[%s6675_s8 + $0x100] sm:$0xff] }
  0x81   : > { %v3985_v42 = vpack.c.bf16 %v2463_v35, %v2462_v34  ;;  %v2494_v43 = vcvt.s32.f32 %v894_v36  ;;  %v2495_v44 = vcvt.s32.f32 %v895_v37  ;;  %v845_v45 = vunpack.c.1.s8 %v342_v5  ;;  %v353_v5 = vld [vmem:[%s6675_s8 + $0x168] sm:$0xff] }
  0x82   : > { %5054 = vmatpush.bf16.msra.mxu0 %v3977_v38  ;;  %v3993_v46 = vpack.c.bf16 %v2479_v40, %v2478_v39  ;;  %v2444_v47 = vcvt.s32.f32 %v844_v41  ;;  %v860_v48 = vunpack.c.0.s8 %v346_v14  ;;  %v861_v49 = vunpack.c.1.s8 %v346_v14  ;;  %v344_v39 = vld [vmem:[%s6675_s8 + $0x120] sm:$0xff] }
  0x83   : > { %5067 = vmatpush.bf16.msra.mxu1 %v3985_v42  ;;  %v4001_v51 = vpack.c.bf16 %v2495_v44, %v2494_v43  ;;  %v2445_v52 = vcvt.s32.f32 %v845_v45  ;;  %v876_v53 = vunpack.c.0.s8 %v350_v19  ;;  %v877_v54 = vunpack.c.1.s8 %v350_v19  ;;  %v348_v44 = vld [vmem:[%s6675_s8 + $0x140] sm:$0xff] }
  0x84   : > { %5080 = vmatpush.bf16.msra.mxu2 %v3993_v46  ;;  %v2460_v55 = vcvt.s32.f32 %v860_v48  ;;  %v2461_v56 = vcvt.s32.f32 %v861_v49  ;;  %v892_v57 = vunpack.c.0.s8 %v354_v24  ;;  %v893_v58 = vunpack.c.1.s8 %v354_v24  ;;  %v352_v49 = vld [vmem:[%s6675_s8 + $0x160] sm:$0xff] }
  0x85   : > { %5093 = vmatpush.bf16.msra.mxu3 %v4001_v51  ;;  %v3976_v60 = vpack.c.bf16 %v2445_v52, %v2444_v47  ;;  %v2476_v61 = vcvt.s32.f32 %v876_v53  ;;  %v2477_v62 = vcvt.s32.f32 %v877_v54  ;;  %v842_v63 = vunpack.c.2.s8 %v341_v50 }
  0x86   : > { %v3984_v1 = vpack.c.bf16 %v2461_v56, %v2460_v55  ;;  %v2492_v2 = vcvt.s32.f32 %v892_v57  ;;  %v2493_v3 = vcvt.s32.f32 %v893_v58  ;;  %v843_v4 = vunpack.c.3.s8 %v341_v50 }
  0x87   : > { %5055 = vmatpush.bf16.msra.mxu0 %v3976_v60  ;;  %v3992_v6 = vpack.c.bf16 %v2477_v62, %v2476_v61  ;;  %v2442_v7 = vcvt.s32.f32 %v842_v63  ;;  %v858_v8 = vunpack.c.2.s8 %v345_v59  ;;  %v859_v9 = vunpack.c.3.s8 %v345_v59 }
  0x88   : > { %5068 = vmatpush.bf16.msra.mxu1 %v3984_v1  ;;  %v4000_v10 = vpack.c.bf16 %v2493_v3, %v2492_v2  ;;  %v2443_v11 = vcvt.s32.f32 %v843_v4  ;;  %v874_v12 = vunpack.c.2.s8 %v349_v0  ;;  %v875_v13 = vunpack.c.3.s8 %v349_v0 }
  0x89   : > { %5081 = vmatpush.bf16.msra.mxu2 %v3992_v6  ;;  %v2458_v14 = vcvt.s32.f32 %v858_v8  ;;  %v2459_v15 = vcvt.s32.f32 %v859_v9  ;;  %v890_v16 = vunpack.c.2.s8 %v353_v5  ;;  %v891_v17 = vunpack.c.3.s8 %v353_v5 }
  0x8a   : > { %5094 = vmatpush.bf16.msra.mxu3 %v4000_v10  ;;  %v3975_v18 = vpack.c.bf16 %v2443_v11, %v2442_v7  ;;  %v2474_v19 = vcvt.s32.f32 %v874_v12  ;;  %v2475_v20 = vcvt.s32.f32 %v875_v13  ;;  %v840_v21 = vunpack.c.0.s8 %v341_v50  ;;  %v6742_v10 = vld [vmem:[%s6675_s8 + $0x198] sm:$0xff] }
  0x8b   : > { %v3983_v22 = vpack.c.bf16 %v2459_v15, %v2458_v14  ;;  %v2490_v23 = vcvt.s32.f32 %v890_v16  ;;  %v2491_v24 = vcvt.s32.f32 %v891_v17  ;;  %v841_v25 = vunpack.c.1.s8 %v341_v50 }
  0x8c   : > { %5056 = vmatpush.bf16.msra.mxu0 %v3975_v18  ;;  %v3991_v26 = vpack.c.bf16 %v2475_v20, %v2474_v19  ;;  %v2440_v27 = vcvt.s32.f32 %v840_v21  ;;  %v856_v28 = vunpack.c.0.s8 %v345_v59  ;;  %v857_v29 = vunpack.c.1.s8 %v345_v59  ;;  %v363_v19 = vld [vmem:[%s6675_s8 + $0x1b8] sm:$0xff] }
  0x8d   : > { %5069 = vmatpush.bf16.msra.mxu1 %v3983_v22  ;;  %v3999_v31 = vpack.c.bf16 %v2491_v24, %v2490_v23  ;;  %v2441_v32 = vcvt.s32.f32 %v841_v25  ;;  %v872_v33 = vunpack.c.0.s8 %v349_v0  ;;  %v873_v34 = vunpack.c.1.s8 %v349_v0  ;;  %v367_v24 = vld [vmem:[%s6675_s8 + $0x1d8] sm:$0xff] }
  0x8e   : > { %5082 = vmatpush.bf16.msra.mxu2 %v3991_v26  ;;  %v2456_v35 = vcvt.s32.f32 %v856_v28  ;;  %v2457_v36 = vcvt.s32.f32 %v857_v29  ;;  %v888_v37 = vunpack.c.0.s8 %v353_v5  ;;  %v889_v38 = vunpack.c.1.s8 %v353_v5  ;;  %v371_v29 = vld [vmem:[%s6675_s8 + $0x1f8] sm:$0xff] }
  0x8f   : > { %5095 = vmatpush.bf16.msra.mxu3 %v3999_v31  ;;  %v3974_v40 = vpack.c.bf16 %v2441_v32, %v2440_v27  ;;  %v2472_v41 = vcvt.s32.f32 %v872_v33  ;;  %v2473_v42 = vcvt.s32.f32 %v873_v34  ;;  %v838_v43 = vunpack.c.2.s8 %v340_v30  ;;  %v4734_v34 = vld [vmem:[#allocation1] sm:$0xff] }
  0x90   : > { %v3982_v45 = vpack.c.bf16 %v2457_v36, %v2456_v35  ;;  %v2488_v46 = vcvt.s32.f32 %v888_v37  ;;  %v2489_v47 = vcvt.s32.f32 %v889_v38  ;;  %v839_v48 = vunpack.c.3.s8 %v340_v30 }
  0x91   : > { %5057 = vmatpush.bf16.msra.mxu0 %v3974_v40  ;;  %v3990_v50 = vpack.c.bf16 %v2473_v42, %v2472_v41  ;;  %v2438_v51 = vcvt.s32.f32 %v838_v43  ;;  %v854_v52 = vunpack.c.2.s8 %v344_v39  ;;  %v855_v53 = vunpack.c.3.s8 %v344_v39 }
  0x92   : > { %5070 = vmatpush.bf16.msra.mxu1 %v3982_v45  ;;  %v3998_v54 = vpack.c.bf16 %v2489_v47, %v2488_v46  ;;  %v2439_v55 = vcvt.s32.f32 %v839_v48  ;;  %v870_v56 = vunpack.c.2.s8 %v348_v44  ;;  %v871_v57 = vunpack.c.3.s8 %v348_v44  ;;  %v4737_v48 = vld [vmem:[#allocation1 + $0x1b] sm:$0xff] }
  0x93   : > { %5083 = vmatpush.bf16.msra.mxu2 %v3990_v50  ;;  %v2454_v58 = vcvt.s32.f32 %v854_v52  ;;  %v2455_v59 = vcvt.s32.f32 %v855_v53  ;;  %v886_v60 = vunpack.c.2.s8 %v352_v49  ;;  %v887_v61 = vunpack.c.3.s8 %v352_v49 }
  0x94   : > { %5096 = vmatpush.bf16.msra.mxu3 %v3998_v54  ;;  %v3973_v62 = vpack.c.bf16 %v2439_v55, %v2438_v51  ;;  %v2470_v63 = vcvt.s32.f32 %v870_v56  ;;  %v2471_v0 = vcvt.s32.f32 %v871_v57  ;;  %v836_v1 = vunpack.c.0.s8 %v340_v30 }
  0x95   : > { %v3981_v2 = vpack.c.bf16 %v2455_v59, %v2454_v58  ;;  %v2486_v3 = vcvt.s32.f32 %v886_v60  ;;  %v2487_v4 = vcvt.s32.f32 %v887_v61  ;;  %v837_v5 = vunpack.c.1.s8 %v340_v30  ;;  %v358_v58 = vld [vmem:[%s6675_s8 + $0x190] sm:$0xff] }
  0x96   : > { %5058 = vmatpush.bf16.msra.mxu0 %v3973_v62  ;;  %v3989_v6 = vpack.c.bf16 %v2471_v0, %v2470_v63  ;;  %v2436_v7 = vcvt.s32.f32 %v836_v1  ;;  %v852_v8 = vunpack.c.0.s8 %v344_v39  ;;  %v853_v9 = vunpack.c.1.s8 %v344_v39  ;;  %v4735_v39 = vld [vmem:[#allocation1 + $0x9] sm:$0xff] }
  0x97   : > { %5071 = vmatpush.bf16.msra.mxu1 %v3981_v2  ;;  %v3997_v11 = vpack.c.bf16 %v2487_v4, %v2486_v3  ;;  %v2437_v12 = vcvt.s32.f32 %v837_v5  ;;  %v868_v13 = vunpack.c.0.s8 %v348_v44  ;;  %v869_v14 = vunpack.c.1.s8 %v348_v44  ;;  %v4736_v44 = vld [vmem:[#allocation1 + $0x12] sm:$0xff] }
  0x98   : > { %5084 = vmatpush.bf16.msra.mxu2 %v3989_v6  ;;  %v2452_v15 = vcvt.s32.f32 %v852_v8  ;;  %v2453_v16 = vcvt.s32.f32 %v853_v9  ;;  %v884_v17 = vunpack.c.0.s8 %v352_v49  ;;  %v885_v18 = vunpack.c.1.s8 %v352_v49  ;;  %v362_v3 = vld [vmem:[%s6675_s8 + $0x1b0] sm:$0xff] }
  0x99   : > { %5097 = vmatpush.bf16.msra.mxu3 %v3997_v11  ;;  %v3972_v20 = vpack.c.bf16 %v2437_v12, %v2436_v7  ;;  %v2468_v21 = vcvt.s32.f32 %v868_v13  ;;  %v2469_v22 = vcvt.s32.f32 %v869_v14  ;;  %v914_v23 = vunpack.c.2.s8 %v6742_v10  ;;  %v366_v8 = vld [vmem:[%s6675_s8 + $0x1d0] sm:$0xff] }
  0x9a   : > { %v3980_v25 = vpack.c.bf16 %v2453_v16, %v2452_v15  ;;  %v2484_v26 = vcvt.s32.f32 %v884_v17  ;;  %v2485_v27 = vcvt.s32.f32 %v885_v18  ;;  %v915_v28 = vunpack.c.3.s8 %v6742_v10  ;;  %v370_v13 = vld [vmem:[%s6675_s8 + $0x1f0] sm:$0xff] }
  0x9b   : > { %5059 = vmatpush.bf16.msra.mxu0 %v3972_v20  ;;  %v3988_v30 = vpack.c.bf16 %v2469_v22, %v2468_v21  ;;  %v2514_v31 = vcvt.s32.f32 %v914_v23  ;;  %v930_v32 = vunpack.c.2.s8 %v363_v19  ;;  %v931_v33 = vunpack.c.3.s8 %v363_v19 }
  0x9c   : > { %5072 = vmatpush.bf16.msra.mxu1 %v3980_v25  ;;  %v3996_v35 = vpack.c.bf16 %v2485_v27, %v2484_v26  ;;  %v2515_v36 = vcvt.s32.f32 %v915_v28  ;;  %v946_v37 = vunpack.c.2.s8 %v367_v24  ;;  %v947_v38 = vunpack.c.3.s8 %v367_v24 }
  0x9d   : > { %5085 = vmatpush.bf16.msra.mxu2 %v3988_v30  ;;  %v2530_v40 = vcvt.s32.f32 %v930_v32  ;;  %v2531_v41 = vcvt.s32.f32 %v931_v33  ;;  %v962_v42 = vunpack.c.2.s8 %v371_v29  ;;  %v963_v43 = vunpack.c.3.s8 %v371_v29 }
  0x9e   : > { %5098 = vmatpush.bf16.msra.mxu3 %v3996_v35  ;;  %v4011_v45 = vpack.c.bf16 %v2515_v36, %v2514_v31  ;;  %v2546_v46 = vcvt.s32.f32 %v946_v37  ;;  %v2547_v47 = vcvt.s32.f32 %v947_v38  ;;  %5060 = vmatmul.bf16.vlgmr.msra.gmra.mxu0 %v4734_v34  ;;  %v912_v49 = vunpack.c.0.s8 %v6742_v10  ;;  %v357_v38 = vld [vmem:[%s6675_s8 + $0x188] sm:$0xff] }
  0x9f   : > { %v4019_v50 = vpack.c.bf16 %v2531_v41, %v2530_v40  ;;  %v2562_v51 = vcvt.s32.f32 %v962_v42  ;;  %v2563_v52 = vcvt.s32.f32 %v963_v43  ;;  %5073 = vmatmul.bf16.vlgmr.msra.gmra.mxu1 %v4735_v39  ;;  %v913_v53 = vunpack.c.1.s8 %v6742_v10 }
  0xa0   : > { %5104 = vmatpush.bf16.msrb.mxu0 %v4011_v45  ;;  %v4027_v54 = vpack.c.bf16 %v2547_v47, %v2546_v46  ;;  %5086 = vmatmul.bf16.vlgmr.msra.gmra.mxu2 %v4736_v44  ;;  %v2512_v55 = vcvt.s32.f32 %v912_v49  ;;  %v928_v56 = vunpack.c.0.s8 %v363_v19  ;;  %v929_v57 = vunpack.c.1.s8 %v363_v19  ;;  %v361_v47 = vld [vmem:[%s6675_s8 + $0x1a8] sm:$0xff] }
  0xa1   : > { %5117 = vmatpush.bf16.msrb.mxu1 %v4019_v50  ;;  %v4035_v59 = vpack.c.bf16 %v2563_v52, %v2562_v51  ;;  %5099 = vmatmul.bf16.vlgmr.msra.gmra.mxu3 %v4737_v48  ;;  %v2513_v60 = vcvt.s32.f32 %v913_v53  ;;  %v944_v61 = vunpack.c.0.s8 %v367_v24  ;;  %v945_v62 = vunpack.c.1.s8 %v367_v24  ;;  %v365_v52 = vld [vmem:[%s6675_s8 + $0x1c8] sm:$0xff] }
  0xa2   : > { %5130 = vmatpush.bf16.msrb.mxu2 %v4027_v54  ;;  %v2528_v63 = vcvt.s32.f32 %v928_v56  ;;  %v2529_v0 = vcvt.s32.f32 %v929_v57  ;;  %v960_v1 = vunpack.c.0.s8 %v371_v29  ;;  %v961_v2 = vunpack.c.1.s8 %v371_v29  ;;  %v369_v57 = vld [vmem:[%s6675_s8 + $0x1e8] sm:$0xff] }
  0xa3   : > { %5143 = vmatpush.bf16.msrb.mxu3 %v4035_v59  ;;  %v4010_v4 = vpack.c.bf16 %v2513_v60, %v2512_v55  ;;  %v2544_v5 = vcvt.s32.f32 %v944_v61  ;;  %v2545_v6 = vcvt.s32.f32 %v945_v62  ;;  %v910_v7 = vunpack.c.2.s8 %v358_v58 }
  0xa4   : > { %v4018_v9 = vpack.c.bf16 %v2529_v0, %v2528_v63  ;;  %v2560_v10 = vcvt.s32.f32 %v960_v1  ;;  %v2561_v11 = vcvt.s32.f32 %v961_v2  ;;  %v911_v12 = vunpack.c.3.s8 %v358_v58 }
  0xa5   : > { %5105 = vmatpush.bf16.msrb.mxu0 %v4010_v4  ;;  %v4026_v14 = vpack.c.bf16 %v2545_v6, %v2544_v5  ;;  %v2510_v15 = vcvt.s32.f32 %v910_v7  ;;  %v926_v16 = vunpack.c.2.s8 %v362_v3  ;;  %v927_v17 = vunpack.c.3.s8 %v362_v3 }
  0xa6   : > { %5118 = vmatpush.bf16.msrb.mxu1 %v4018_v9  ;;  %v4034_v18 = vpack.c.bf16 %v2561_v11, %v2560_v10  ;;  %v2511_v19 = vcvt.s32.f32 %v911_v12  ;;  %v942_v20 = vunpack.c.2.s8 %v366_v8  ;;  %v943_v21 = vunpack.c.3.s8 %v366_v8 }
  0xa7   : > { %5131 = vmatpush.bf16.msrb.mxu2 %v4026_v14  ;;  %v2526_v22 = vcvt.s32.f32 %v926_v16  ;;  %v2527_v23 = vcvt.s32.f32 %v927_v17  ;;  %v958_v24 = vunpack.c.2.s8 %v370_v13  ;;  %v959_v25 = vunpack.c.3.s8 %v370_v13 }
  0xa8   : > { %5144 = vmatpush.bf16.msrb.mxu3 %v4034_v18  ;;  %v4009_v26 = vpack.c.bf16 %v2511_v19, %v2510_v15  ;;  %v2542_v27 = vcvt.s32.f32 %v942_v20  ;;  %v2543_v28 = vcvt.s32.f32 %v943_v21  ;;  %v908_v29 = vunpack.c.0.s8 %v358_v58  ;;  %v356_v18 = vld [vmem:[%s6675_s8 + $0x180] sm:$0xff] }
  0xa9   : > { %v4017_v30 = vpack.c.bf16 %v2527_v23, %v2526_v22  ;;  %v2558_v31 = vcvt.s32.f32 %v958_v24  ;;  %v2559_v32 = vcvt.s32.f32 %v959_v25  ;;  %v909_v33 = vunpack.c.1.s8 %v358_v58 }
  0xaa   : > { %5106 = vmatpush.bf16.msrb.mxu0 %v4009_v26  ;;  %v4025_v34 = vpack.c.bf16 %v2543_v28, %v2542_v27  ;;  %v2508_v35 = vcvt.s32.f32 %v908_v29  ;;  %v924_v36 = vunpack.c.0.s8 %v362_v3  ;;  %v925_v37 = vunpack.c.1.s8 %v362_v3  ;;  %v360_v27 = vld [vmem:[%s6675_s8 + $0x1a0] sm:$0xff] }
  0xab   : > { %5119 = vmatpush.bf16.msrb.mxu1 %v4017_v30  ;;  %v4033_v39 = vpack.c.bf16 %v2559_v32, %v2558_v31  ;;  %v2509_v40 = vcvt.s32.f32 %v909_v33  ;;  %v940_v41 = vunpack.c.0.s8 %v366_v8  ;;  %v941_v42 = vunpack.c.1.s8 %v366_v8  ;;  %v364_v32 = vld [vmem:[%s6675_s8 + $0x1c0] sm:$0xff] }
  0xac   : > { %5132 = vmatpush.bf16.msrb.mxu2 %v4025_v34  ;;  %v2524_v43 = vcvt.s32.f32 %v924_v36  ;;  %v2525_v44 = vcvt.s32.f32 %v925_v37  ;;  %v956_v45 = vunpack.c.0.s8 %v370_v13  ;;  %v957_v46 = vunpack.c.1.s8 %v370_v13  ;;  %v368_v37 = vld [vmem:[%s6675_s8 + $0x1e0] sm:$0xff] }
  0xad   : > { %5145 = vmatpush.bf16.msrb.mxu3 %v4033_v39  ;;  %v4008_v48 = vpack.c.bf16 %v2509_v40, %v2508_v35  ;;  %v2540_v49 = vcvt.s32.f32 %v940_v41  ;;  %v2541_v50 = vcvt.s32.f32 %v941_v42  ;;  %v906_v51 = vunpack.c.2.s8 %v357_v38 }
  0xae   : > { %v4016_v53 = vpack.c.bf16 %v2525_v44, %v2524_v43  ;;  %v2556_v54 = vcvt.s32.f32 %v956_v45  ;;  %v2557_v55 = vcvt.s32.f32 %v957_v46  ;;  %v907_v56 = vunpack.c.3.s8 %v357_v38 }
  0xaf   : > { %5107 = vmatpush.bf16.msrb.mxu0 %v4008_v48  ;;  %v4024_v58 = vpack.c.bf16 %v2541_v50, %v2540_v49  ;;  %v2506_v59 = vcvt.s32.f32 %v906_v51  ;;  %v922_v60 = vunpack.c.2.s8 %v361_v47  ;;  %v923_v61 = vunpack.c.3.s8 %v361_v47 }
  0xb0   : > { %5120 = vmatpush.bf16.msrb.mxu1 %v4016_v53  ;;  %v4032_v62 = vpack.c.bf16 %v2557_v55, %v2556_v54  ;;  %v2507_v63 = vcvt.s32.f32 %v907_v56  ;;  %v938_v0 = vunpack.c.2.s8 %v365_v52  ;;  %v939_v1 = vunpack.c.3.s8 %v365_v52 }
  0xb1   : > { %5133 = vmatpush.bf16.msrb.mxu2 %v4024_v58  ;;  %v2522_v2 = vcvt.s32.f32 %v922_v60  ;;  %v2523_v3 = vcvt.s32.f32 %v923_v61  ;;  %v954_v4 = vunpack.c.2.s8 %v369_v57  ;;  %v955_v5 = vunpack.c.3.s8 %v369_v57 }
  0xb2   : > { %5146 = vmatpush.bf16.msrb.mxu3 %v4032_v62  ;;  %v4007_v6 = vpack.c.bf16 %v2507_v63, %v2506_v59  ;;  %v2538_v7 = vcvt.s32.f32 %v938_v0  ;;  %v2539_v8 = vcvt.s32.f32 %v939_v1  ;;  %v904_v9 = vunpack.c.0.s8 %v357_v38  ;;  %v6764_v62 = vld [vmem:[%s6675_s8 + $0x218] sm:$0xff] }
  0xb3   : > { %v4015_v10 = vpack.c.bf16 %v2523_v3, %v2522_v2  ;;  %v2554_v11 = vcvt.s32.f32 %v954_v4  ;;  %v2555_v12 = vcvt.s32.f32 %v955_v5  ;;  %v905_v13 = vunpack.c.1.s8 %v357_v38 }
  0xb4   : > { %5108 = vmatpush.bf16.msrb.mxu0 %v4007_v6  ;;  %v4023_v14 = vpack.c.bf16 %v2539_v8, %v2538_v7  ;;  %v2504_v15 = vcvt.s32.f32 %v904_v9  ;;  %v920_v16 = vunpack.c.0.s8 %v361_v47  ;;  %v921_v17 = vunpack.c.1.s8 %v361_v47  ;;  %v379_v7 = vld [vmem:[%s6675_s8 + $0x238] sm:$0xff] }
  0xb5   : > { %5121 = vmatpush.bf16.msrb.mxu1 %v4015_v10  ;;  %v4031_v19 = vpack.c.bf16 %v2555_v12, %v2554_v11  ;;  %v2505_v20 = vcvt.s32.f32 %v905_v13  ;;  %v936_v21 = vunpack.c.0.s8 %v365_v52  ;;  %v937_v22 = vunpack.c.1.s8 %v365_v52  ;;  %v383_v12 = vld [vmem:[%s6675_s8 + $0x258] sm:$0xff] }
  0xb6   : > { %5134 = vmatpush.bf16.msrb.mxu2 %v4023_v14  ;;  %v2520_v23 = vcvt.s32.f32 %v920_v16  ;;  %v2521_v24 = vcvt.s32.f32 %v921_v17  ;;  %v952_v25 = vunpack.c.0.s8 %v369_v57  ;;  %v953_v26 = vunpack.c.1.s8 %v369_v57  ;;  %v387_v17 = vld [vmem:[%s6675_s8 + $0x278] sm:$0xff] }
  0xb7   : > { %5147 = vmatpush.bf16.msrb.mxu3 %v4031_v19  ;;  %v4006_v28 = vpack.c.bf16 %v2505_v20, %v2504_v15  ;;  %v2536_v29 = vcvt.s32.f32 %v936_v21  ;;  %v2537_v30 = vcvt.s32.f32 %v937_v22  ;;  %v902_v31 = vunpack.c.2.s8 %v356_v18  ;;  %v4738_v22 = vld [vmem:[#allocation1 + $0x24] sm:$0xff] }
  0xb8   : > { %v4014_v33 = vpack.c.bf16 %v2521_v24, %v2520_v23  ;;  %v2552_v34 = vcvt.s32.f32 %v952_v25  ;;  %v2553_v35 = vcvt.s32.f32 %v953_v26  ;;  %v903_v36 = vunpack.c.3.s8 %v356_v18 }
  0xb9   : > { %5109 = vmatpush.bf16.msrb.mxu0 %v4006_v28  ;;  %v4022_v38 = vpack.c.bf16 %v2537_v30, %v2536_v29  ;;  %v2502_v39 = vcvt.s32.f32 %v902_v31  ;;  %v918_v40 = vunpack.c.2.s8 %v360_v27  ;;  %v919_v41 = vunpack.c.3.s8 %v360_v27 }
  0xba   : > { %5122 = vmatpush.bf16.msrb.mxu1 %v4014_v33  ;;  %v4030_v42 = vpack.c.bf16 %v2553_v35, %v2552_v34  ;;  %v2503_v43 = vcvt.s32.f32 %v903_v36  ;;  %v934_v44 = vunpack.c.2.s8 %v364_v32  ;;  %v935_v45 = vunpack.c.3.s8 %v364_v32  ;;  %v4741_v36 = vld [vmem:[#allocation1 + $0x3f] sm:$0xff] }
  0xbb   : > { %5135 = vmatpush.bf16.msrb.mxu2 %v4022_v38  ;;  %v2518_v46 = vcvt.s32.f32 %v918_v40  ;;  %v2519_v47 = vcvt.s32.f32 %v919_v41  ;;  %v950_v48 = vunpack.c.2.s8 %v368_v37  ;;  %v951_v49 = vunpack.c.3.s8 %v368_v37 }
  0xbc   : > { %5148 = vmatpush.bf16.msrb.mxu3 %v4030_v42  ;;  %v4005_v50 = vpack.c.bf16 %v2503_v43, %v2502_v39  ;;  %v2534_v51 = vcvt.s32.f32 %v934_v44  ;;  %v2535_v52 = vcvt.s32.f32 %v935_v45  ;;  %v900_v53 = vunpack.c.0.s8 %v356_v18 }
  0xbd   : > { %v4013_v54 = vpack.c.bf16 %v2519_v47, %v2518_v46  ;;  %v2550_v55 = vcvt.s32.f32 %v950_v48  ;;  %v2551_v56 = vcvt.s32.f32 %v951_v49  ;;  %v901_v57 = vunpack.c.1.s8 %v356_v18  ;;  %v374_v46 = vld [vmem:[%s6675_s8 + $0x210] sm:$0xff] }
  0xbe   : > { %5110 = vmatpush.bf16.msrb.mxu0 %v4005_v50  ;;  %v4021_v58 = vpack.c.bf16 %v2535_v52, %v2534_v51  ;;  %v2500_v59 = vcvt.s32.f32 %v900_v53  ;;  %v916_v60 = vunpack.c.0.s8 %v360_v27  ;;  %v917_v61 = vunpack.c.1.s8 %v360_v27  ;;  %v4739_v27 = vld [vmem:[#allocation1 + $0x2d] sm:$0xff] }
  0xbf   : > { %5123 = vmatpush.bf16.msrb.mxu1 %v4013_v54  ;;  %v4029_v63 = vpack.c.bf16 %v2551_v56, %v2550_v55  ;;  %v2501_v0 = vcvt.s32.f32 %v901_v57  ;;  %v932_v1 = vunpack.c.0.s8 %v364_v32  ;;  %v933_v2 = vunpack.c.1.s8 %v364_v32  ;;  %v4740_v32 = vld [vmem:[#allocation1 + $0x36] sm:$0xff] }
  0xc0   : > { %5136 = vmatpush.bf16.msrb.mxu2 %v4021_v58  ;;  %v2516_v3 = vcvt.s32.f32 %v916_v60  ;;  %v2517_v4 = vcvt.s32.f32 %v917_v61  ;;  %v948_v5 = vunpack.c.0.s8 %v368_v37  ;;  %v949_v6 = vunpack.c.1.s8 %v368_v37  ;;  %v378_v55 = vld [vmem:[%s6675_s8 + $0x230] sm:$0xff] }
  0xc1   : > { %5149 = vmatpush.bf16.msrb.mxu3 %v4029_v63  ;;  %v4004_v8 = vpack.c.bf16 %v2501_v0, %v2500_v59  ;;  %v2532_v9 = vcvt.s32.f32 %v932_v1  ;;  %v2533_v10 = vcvt.s32.f32 %v933_v2  ;;  %v978_v11 = vunpack.c.2.s8 %v6764_v62  ;;  %v382_v60 = vld [vmem:[%s6675_s8 + $0x250] sm:$0xff]  ;;  %v4711_v2 = vld [vmem:[%s7631_s0 + $0x10] sm:$0xff] }
  0xc2   : > { %v4012_v13 = vpack.c.bf16 %v2517_v4, %v2516_v3  ;;  %v2548_v14 = vcvt.s32.f32 %v948_v5  ;;  %v2549_v15 = vcvt.s32.f32 %v949_v6  ;;  %v979_v16 = vunpack.c.3.s8 %v6764_v62  ;;  %v386_v1 = vld [vmem:[%s6675_s8 + $0x270] sm:$0xff]  ;;  %4743 = vst [vmem:[#allocation1] ss:$9 sm:$0xff] %v4711_v2 }
  0xc3   : > { %5111 = vmatpush.bf16.msrb.mxu0 %v4004_v8  ;;  %v4020_v18 = vpack.c.bf16 %v2533_v10, %v2532_v9  ;;  %v2578_v19 = vcvt.s32.f32 %v978_v11  ;;  %v994_v20 = vunpack.c.2.s8 %v379_v7  ;;  %v995_v21 = vunpack.c.3.s8 %v379_v7 }
  0xc4   : > { %5124 = vmatpush.bf16.msrb.mxu1 %v4012_v13  ;;  %v4028_v23 = vpack.c.bf16 %v2549_v15, %v2548_v14  ;;  %v2579_v24 = vcvt.s32.f32 %v979_v16  ;;  %v1010_v25 = vunpack.c.2.s8 %v383_v12  ;;  %v1011_v26 = vunpack.c.3.s8 %v383_v12 }
  0xc5   : > { %5137 = vmatpush.bf16.msrb.mxu2 %v4020_v18  ;;  %v2594_v28 = vcvt.s32.f32 %v994_v20  ;;  %v2595_v29 = vcvt.s32.f32 %v995_v21  ;;  %v1026_v30 = vunpack.c.2.s8 %v387_v17  ;;  %v1027_v31 = vunpack.c.3.s8 %v387_v17 }
  0xc6   : > { %5150 = vmatpush.bf16.msrb.mxu3 %v4028_v23  ;;  %v4043_v33 = vpack.c.bf16 %v2579_v24, %v2578_v19  ;;  %v2610_v34 = vcvt.s32.f32 %v1010_v25  ;;  %v2611_v35 = vcvt.s32.f32 %v1011_v26  ;;  %5112 = vmatmul.bf16.vlgmr.msrb.gmra.mxu0 %v4738_v22  ;;  %v976_v37 = vunpack.c.0.s8 %v6764_v62 }
  0xc7   : > { %v4051_v38 = vpack.c.bf16 %v2595_v29, %v2594_v28  ;;  %v2626_v39 = vcvt.s32.f32 %v1026_v30  ;;  %v2627_v40 = vcvt.s32.f32 %v1027_v31  ;;  %5125 = vmatmul.bf16.vlgmr.msrb.gmra.mxu1 %v4739_v27  ;;  %v977_v41 = vunpack.c.1.s8 %v6764_v62  ;;  %v373_v27 = vld [vmem:[%s6675_s8 + $0x208] sm:$0xff] }
  0xc8   : > { %5156 = vmatpush.bf16.msra.mxu0 %v4043_v33  ;;  %v4059_v42 = vpack.c.bf16 %v2611_v35, %v2610_v34  ;;  %5138 = vmatmul.bf16.vlgmr.msrb.gmra.mxu2 %v4740_v32  ;;  %v2576_v43 = vcvt.s32.f32 %v976_v37  ;;  %v992_v44 = vunpack.c.0.s8 %v379_v7  ;;  %v993_v45 = vunpack.c.1.s8 %v379_v7 }
  0xc9   : > { %5169 = vmatpush.bf16.msra.mxu1 %v4051_v38  ;;  %v4067_v47 = vpack.c.bf16 %v2627_v40, %v2626_v39  ;;  %5151 = vmatmul.bf16.vlgmr.msrb.gmra.mxu3 %v4741_v36  ;;  %v2577_v48 = vcvt.s32.f32 %v977_v41  ;;  %v1008_v49 = vunpack.c.0.s8 %v383_v12  ;;  %v1009_v50 = vunpack.c.1.s8 %v383_v12  ;;  %v377_v36 = vld [vmem:[%s6675_s8 + $0x228] sm:$0xff] }
  0xca   : > { %5182 = vmatpush.bf16.msra.mxu2 %v4059_v42  ;;  %v2592_v51 = vcvt.s32.f32 %v992_v44  ;;  %v2593_v52 = vcvt.s32.f32 %v993_v45  ;;  %v1024_v53 = vunpack.c.0.s8 %v387_v17  ;;  %v1025_v54 = vunpack.c.1.s8 %v387_v17  ;;  %v381_v41 = vld [vmem:[%s6675_s8 + $0x248] sm:$0xff] }
  0xcb   : > { %5195 = vmatpush.bf16.msra.mxu3 %v4067_v47  ;;  %v4042_v56 = vpack.c.bf16 %v2577_v48, %v2576_v43  ;;  %v2608_v57 = vcvt.s32.f32 %v1008_v49  ;;  %v2609_v58 = vcvt.s32.f32 %v1009_v50  ;;  %v974_v59 = vunpack.c.2.s8 %v374_v46 }
  0xcc   : > { %v4050_v61 = vpack.c.bf16 %v2593_v52, %v2592_v51  ;;  %v2624_v62 = vcvt.s32.f32 %v1024_v53  ;;  %v2625_v63 = vcvt.s32.f32 %v1025_v54  ;;  %v975_v0 = vunpack.c.3.s8 %v374_v46 }
  0xcd   : > { %5157 = vmatpush.bf16.msra.mxu0 %v4042_v56  ;;  %v4058_v3 = vpack.c.bf16 %v2609_v58, %v2608_v57  ;;  %v2574_v4 = vcvt.s32.f32 %v974_v59  ;;  %v990_v5 = vunpack.c.2.s8 %v378_v55  ;;  %v991_v6 = vunpack.c.3.s8 %v378_v55 }
  0xce   : > { %5170 = vmatpush.bf16.msra.mxu1 %v4050_v61  ;;  %v4066_v7 = vpack.c.bf16 %v2625_v63, %v2624_v62  ;;  %v2575_v8 = vcvt.s32.f32 %v975_v0  ;;  %v1006_v9 = vunpack.c.2.s8 %v382_v60  ;;  %v1007_v10 = vunpack.c.3.s8 %v382_v60 }
  0xcf   : > { %5183 = vmatpush.bf16.msra.mxu2 %v4058_v3  ;;  %v2590_v11 = vcvt.s32.f32 %v990_v5  ;;  %v2591_v12 = vcvt.s32.f32 %v991_v6  ;;  %v1022_v13 = vunpack.c.2.s8 %v386_v1  ;;  %v1023_v14 = vunpack.c.3.s8 %v386_v1 }
  0xd0   : > { %5196 = vmatpush.bf16.msra.mxu3 %v4066_v7  ;;  %v4041_v15 = vpack.c.bf16 %v2575_v8, %v2574_v4  ;;  %v2606_v16 = vcvt.s32.f32 %v1006_v9  ;;  %v2607_v17 = vcvt.s32.f32 %v1007_v10  ;;  %v972_v18 = vunpack.c.0.s8 %v374_v46  ;;  %v372_v7 = vld [vmem:[%s6675_s8 + $0x200] sm:$0xff] }
  0xd1   : > { %v4049_v19 = vpack.c.bf16 %v2591_v12, %v2590_v11  ;;  %v2622_v20 = vcvt.s32.f32 %v1022_v13  ;;  %v2623_v21 = vcvt.s32.f32 %v1023_v14  ;;  %v973_v22 = vunpack.c.1.s8 %v374_v46  ;;  %v385_v46 = vld [vmem:[%s6675_s8 + $0x268] sm:$0xff] }
  0xd2   : > { %5158 = vmatpush.bf16.msra.mxu0 %v4041_v15  ;;  %v4057_v23 = vpack.c.bf16 %v2607_v17, %v2606_v16  ;;  %v2572_v24 = vcvt.s32.f32 %v972_v18  ;;  %v988_v25 = vunpack.c.0.s8 %v378_v55  ;;  %v989_v26 = vunpack.c.1.s8 %v378_v55  ;;  %v376_v16 = vld [vmem:[%s6675_s8 + $0x220] sm:$0xff] }
  0xd3   : > { %5171 = vmatpush.bf16.msra.mxu1 %v4049_v19  ;;  %v4065_v28 = vpack.c.bf16 %v2623_v21, %v2622_v20  ;;  %v2573_v29 = vcvt.s32.f32 %v973_v22  ;;  %v1004_v30 = vunpack.c.0.s8 %v382_v60  ;;  %v1005_v31 = vunpack.c.1.s8 %v382_v60  ;;  %v380_v21 = vld [vmem:[%s6675_s8 + $0x240] sm:$0xff] }
  0xd4   : > { %5184 = vmatpush.bf16.msra.mxu2 %v4057_v23  ;;  %v2588_v32 = vcvt.s32.f32 %v988_v25  ;;  %v2589_v33 = vcvt.s32.f32 %v989_v26  ;;  %v1020_v34 = vunpack.c.0.s8 %v386_v1  ;;  %v1021_v35 = vunpack.c.1.s8 %v386_v1  ;;  %v384_v26 = vld [vmem:[%s6675_s8 + $0x260] sm:$0xff] }
  0xd5   : > { %5197 = vmatpush.bf16.msra.mxu3 %v4065_v28  ;;  %v4040_v37 = vpack.c.bf16 %v2573_v29, %v2572_v24  ;;  %v2604_v38 = vcvt.s32.f32 %v1004_v30  ;;  %v2605_v39 = vcvt.s32.f32 %v1005_v31  ;;  %v970_v40 = vunpack.c.2.s8 %v373_v27 }
  0xd6   : > { %v4048_v42 = vpack.c.bf16 %v2589_v33, %v2588_v32  ;;  %v2620_v43 = vcvt.s32.f32 %v1020_v34  ;;  %v2621_v44 = vcvt.s32.f32 %v1021_v35  ;;  %v971_v45 = vunpack.c.3.s8 %v373_v27 }
  0xd7   : > { %5159 = vmatpush.bf16.msra.mxu0 %v4040_v37  ;;  %v4056_v47 = vpack.c.bf16 %v2605_v39, %v2604_v38  ;;  %v2570_v48 = vcvt.s32.f32 %v970_v40  ;;  %v986_v49 = vunpack.c.2.s8 %v377_v36  ;;  %v987_v50 = vunpack.c.3.s8 %v377_v36 }
  0xd8   : > { %5172 = vmatpush.bf16.msra.mxu1 %v4048_v42  ;;  %v4064_v51 = vpack.c.bf16 %v2621_v44, %v2620_v43  ;;  %v2571_v52 = vcvt.s32.f32 %v971_v45  ;;  %v1002_v53 = vunpack.c.2.s8 %v381_v41  ;;  %v1003_v54 = vunpack.c.3.s8 %v381_v41 }
  0xd9   : > { %5185 = vmatpush.bf16.msra.mxu2 %v4056_v47  ;;  %v2586_v55 = vcvt.s32.f32 %v986_v49  ;;  %v2587_v56 = vcvt.s32.f32 %v987_v50  ;;  %v1018_v57 = vunpack.c.2.s8 %v385_v46  ;;  %v1019_v58 = vunpack.c.3.s8 %v385_v46 }
  0xda   : > { %5198 = vmatpush.bf16.msra.mxu3 %v4064_v51  ;;  %v4039_v59 = vpack.c.bf16 %v2571_v52, %v2570_v48  ;;  %v2602_v60 = vcvt.s32.f32 %v1002_v53  ;;  %v2603_v61 = vcvt.s32.f32 %v1003_v54  ;;  %v968_v62 = vunpack.c.0.s8 %v373_v27  ;;  %v6789_v51 = vld [vmem:[%s6675_s8 + $0x298] sm:$0xff] }
  0xdb   : > { %v4047_v63 = vpack.c.bf16 %v2587_v56, %v2586_v55  ;;  %v2618_v0 = vcvt.s32.f32 %v1018_v57  ;;  %v2619_v1 = vcvt.s32.f32 %v1019_v58  ;;  %v969_v2 = vunpack.c.1.s8 %v373_v27 }
  0xdc   : > { %5160 = vmatpush.bf16.msra.mxu0 %v4039_v59  ;;  %v4055_v3 = vpack.c.bf16 %v2603_v61, %v2602_v60  ;;  %v2568_v4 = vcvt.s32.f32 %v968_v62  ;;  %v984_v5 = vunpack.c.0.s8 %v377_v36  ;;  %v985_v6 = vunpack.c.1.s8 %v377_v36  ;;  %v395_v60 = vld [vmem:[%s6675_s8 + $0x2b8] sm:$0xff] }
  0xdd   : > { %5173 = vmatpush.bf16.msra.mxu1 %v4047_v63  ;;  %v4063_v8 = vpack.c.bf16 %v2619_v1, %v2618_v0  ;;  %v2569_v9 = vcvt.s32.f32 %v969_v2  ;;  %v1000_v10 = vunpack.c.0.s8 %v381_v41  ;;  %v1001_v11 = vunpack.c.1.s8 %v381_v41  ;;  %v399_v1 = vld [vmem:[%s6675_s8 + $0x2d8] sm:$0xff] }
  0xde   : > { %5186 = vmatpush.bf16.msra.mxu2 %v4055_v3  ;;  %v2584_v12 = vcvt.s32.f32 %v984_v5  ;;  %v2585_v13 = vcvt.s32.f32 %v985_v6  ;;  %v1016_v14 = vunpack.c.0.s8 %v385_v46  ;;  %v1017_v15 = vunpack.c.1.s8 %v385_v46  ;;  %v403_v6 = vld [vmem:[%s6675_s8 + $0x2f8] sm:$0xff] }
  0xdf   : > { %5199 = vmatpush.bf16.msra.mxu3 %v4063_v8  ;;  %v4038_v17 = vpack.c.bf16 %v2569_v9, %v2568_v4  ;;  %v2600_v18 = vcvt.s32.f32 %v1000_v10  ;;  %v2601_v19 = vcvt.s32.f32 %v1001_v11  ;;  %v966_v20 = vunpack.c.2.s8 %v372_v7  ;;  %v4744_v11 = vld [vmem:[#allocation1] sm:$0xff] }
  0xe0   : > { %v4046_v22 = vpack.c.bf16 %v2585_v13, %v2584_v12  ;;  %v2616_v23 = vcvt.s32.f32 %v1016_v14  ;;  %v2617_v24 = vcvt.s32.f32 %v1017_v15  ;;  %v967_v25 = vunpack.c.3.s8 %v372_v7 }
  0xe1   : > { %5161 = vmatpush.bf16.msra.mxu0 %v4038_v17  ;;  %v4054_v27 = vpack.c.bf16 %v2601_v19, %v2600_v18  ;;  %v2566_v28 = vcvt.s32.f32 %v966_v20  ;;  %v982_v29 = vunpack.c.2.s8 %v376_v16  ;;  %v983_v30 = vunpack.c.3.s8 %v376_v16 }
  0xe2   : > { %5174 = vmatpush.bf16.msra.mxu1 %v4046_v22  ;;  %v4062_v31 = vpack.c.bf16 %v2617_v24, %v2616_v23  ;;  %v2567_v32 = vcvt.s32.f32 %v967_v25  ;;  %v998_v33 = vunpack.c.2.s8 %v380_v21  ;;  %v999_v34 = vunpack.c.3.s8 %v380_v21  ;;  %v4747_v25 = vld [vmem:[#allocation1 + $0x1b] sm:$0xff] }
  0xe3   : > { %5187 = vmatpush.bf16.msra.mxu2 %v4054_v27  ;;  %v2582_v35 = vcvt.s32.f32 %v982_v29  ;;  %v2583_v36 = vcvt.s32.f32 %v983_v30  ;;  %v1014_v37 = vunpack.c.2.s8 %v384_v26  ;;  %v1015_v38 = vunpack.c.3.s8 %v384_v26 }
  0xe4   : > { %5200 = vmatpush.bf16.msra.mxu3 %v4062_v31  ;;  %v4037_v39 = vpack.c.bf16 %v2567_v32, %v2566_v28  ;;  %v2598_v40 = vcvt.s32.f32 %v998_v33  ;;  %v2599_v41 = vcvt.s32.f32 %v999_v34  ;;  %v964_v42 = vunpack.c.0.s8 %v372_v7 }
  0xe5   : > { %v4045_v43 = vpack.c.bf16 %v2583_v36, %v2582_v35  ;;  %v2614_v44 = vcvt.s32.f32 %v1014_v37  ;;  %v2615_v45 = vcvt.s32.f32 %v1015_v38  ;;  %v965_v46 = vunpack.c.1.s8 %v372_v7  ;;  %v390_v35 = vld [vmem:[%s6675_s8 + $0x290] sm:$0xff] }
  0xe6   : > { %5162 = vmatpush.bf16.msra.mxu0 %v4037_v39  ;;  %v4053_v47 = vpack.c.bf16 %v2599_v41, %v2598_v40  ;;  %v2564_v48 = vcvt.s32.f32 %v964_v42  ;;  %v980_v49 = vunpack.c.0.s8 %v376_v16  ;;  %v981_v50 = vunpack.c.1.s8 %v376_v16  ;;  %v4745_v16 = vld [vmem:[#allocation1 + $0x9] sm:$0xff] }
  0xe7   : > { %5175 = vmatpush.bf16.msra.mxu1 %v4045_v43  ;;  %v4061_v52 = vpack.c.bf16 %v2615_v45, %v2614_v44  ;;  %v2565_v53 = vcvt.s32.f32 %v965_v46  ;;  %v996_v54 = vunpack.c.0.s8 %v380_v21  ;;  %v997_v55 = vunpack.c.1.s8 %v380_v21  ;;  %v4746_v21 = vld [vmem:[#allocation1 + $0x12] sm:$0xff] }
  0xe8   : > { %5188 = vmatpush.bf16.msra.mxu2 %v4053_v47  ;;  %v2580_v56 = vcvt.s32.f32 %v980_v49  ;;  %v2581_v57 = vcvt.s32.f32 %v981_v50  ;;  %v1012_v58 = vunpack.c.0.s8 %v384_v26  ;;  %v1013_v59 = vunpack.c.1.s8 %v384_v26  ;;  %v394_v44 = vld [vmem:[%s6675_s8 + $0x2b0] sm:$0xff] }
  0xe9   : > { %5201 = vmatpush.bf16.msra.mxu3 %v4061_v52  ;;  %v4036_v61 = vpack.c.bf16 %v2565_v53, %v2564_v48  ;;  %v2596_v62 = vcvt.s32.f32 %v996_v54  ;;  %v2597_v63 = vcvt.s32.f32 %v997_v55  ;;  %v1042_v0 = vunpack.c.2.s8 %v6789_v51  ;;  %v398_v49 = vld [vmem:[%s6675_s8 + $0x2d0] sm:$0xff] }
  0xea   : > { %v4044_v2 = vpack.c.bf16 %v2581_v57, %v2580_v56  ;;  %v2612_v3 = vcvt.s32.f32 %v1012_v58  ;;  %v2613_v4 = vcvt.s32.f32 %v1013_v59  ;;  %v1043_v5 = vunpack.c.3.s8 %v6789_v51  ;;  %v402_v54 = vld [vmem:[%s6675_s8 + $0x2f0] sm:$0xff] }
  0xeb   : > { %5163 = vmatpush.bf16.msra.mxu0 %v4036_v61  ;;  %v4052_v7 = vpack.c.bf16 %v2597_v63, %v2596_v62  ;;  %v2642_v8 = vcvt.s32.f32 %v1042_v0  ;;  %v1058_v9 = vunpack.c.2.s8 %v395_v60  ;;  %v1059_v10 = vunpack.c.3.s8 %v395_v60 }
  0xec   : > { %5176 = vmatpush.bf16.msra.mxu1 %v4044_v2  ;;  %v4060_v12 = vpack.c.bf16 %v2613_v4, %v2612_v3  ;;  %v2643_v13 = vcvt.s32.f32 %v1043_v5  ;;  %v1074_v14 = vunpack.c.2.s8 %v399_v1  ;;  %v1075_v15 = vunpack.c.3.s8 %v399_v1 }
  0xed   : > { %5189 = vmatpush.bf16.msra.mxu2 %v4052_v7  ;;  %v2658_v17 = vcvt.s32.f32 %v1058_v9  ;;  %v2659_v18 = vcvt.s32.f32 %v1059_v10  ;;  %v1090_v19 = vunpack.c.2.s8 %v403_v6  ;;  %v1091_v20 = vunpack.c.3.s8 %v403_v6 }
  0xee   : > { %5202 = vmatpush.bf16.msra.mxu3 %v4060_v12  ;;  %v4075_v22 = vpack.c.bf16 %v2643_v13, %v2642_v8  ;;  %v2674_v23 = vcvt.s32.f32 %v1074_v14  ;;  %v2675_v24 = vcvt.s32.f32 %v1075_v15  ;;  %5164 = vmatmul.bf16.vlgmr.msra.gmra.mxu0 %v4744_v11  ;;  %v1040_v26 = vunpack.c.0.s8 %v6789_v51  ;;  %v389_v15 = vld [vmem:[%s6675_s8 + $0x288] sm:$0xff] }
  0xef   : > { %v4083_v27 = vpack.c.bf16 %v2659_v18, %v2658_v17  ;;  %v2690_v28 = vcvt.s32.f32 %v1090_v19  ;;  %v2691_v29 = vcvt.s32.f32 %v1091_v20  ;;  %5177 = vmatmul.bf16.vlgmr.msra.gmra.mxu1 %v4745_v16  ;;  %v1041_v30 = vunpack.c.1.s8 %v6789_v51  ;;  %v6803_v20 = vpop.f32.mrf.mxu0 }
  0xf0   : > { %5208 = vmatpush.bf16.msrb.mxu0 %v4075_v22  ;;  %v4091_v31 = vpack.c.bf16 %v2675_v24, %v2674_v23  ;;  %5190 = vmatmul.bf16.vlgmr.msra.gmra.mxu2 %v4746_v21  ;;  %v2640_v32 = vcvt.s32.f32 %v1040_v26  ;;  %v1056_v33 = vunpack.c.0.s8 %v395_v60  ;;  %v1057_v34 = vunpack.c.1.s8 %v395_v60  ;;  %v6805_v21 = vpop.f32.mrf.mxu1  ;;  %v393_v26 = vld [vmem:[%s6675_s8 + $0x2a8] sm:$0xff] }
  0xf1   : > { %5221 = vmatpush.bf16.msrb.mxu1 %v4083_v27  ;;  %v4099_v36 = vpack.c.bf16 %v2691_v29, %v2690_v28  ;;  %5203 = vmatmul.bf16.vlgmr.msra.gmra.mxu3 %v4747_v25  ;;  %v2641_v37 = vcvt.s32.f32 %v1041_v30  ;;  %v1072_v38 = vunpack.c.0.s8 %v399_v1  ;;  %v1073_v39 = vunpack.c.1.s8 %v399_v1 }
  0xf2   : > { %5234 = vmatpush.bf16.msrb.mxu2 %v4091_v31  ;;  %v2656_v40 = vcvt.s32.f32 %v1056_v33  ;;  %v2657_v41 = vcvt.s32.f32 %v1057_v34  ;;  %v1088_v42 = vunpack.c.0.s8 %v403_v6  ;;  %v1089_v43 = vunpack.c.1.s8 %v403_v6  ;;  %v397_v31 = vld [vmem:[%s6675_s8 + $0x2c8] sm:$0xff] }
  0xf3   : > { %5247 = vmatpush.bf16.msrb.mxu3 %v4099_v36  ;;  %v4074_v45 = vpack.c.bf16 %v2641_v37, %v2640_v32  ;;  %v2672_v46 = vcvt.s32.f32 %v1072_v38  ;;  %v2673_v47 = vcvt.s32.f32 %v1073_v39  ;;  %v1038_v48 = vunpack.c.2.s8 %v390_v35  ;;  %v401_v36 = vld [vmem:[%s6675_s8 + $0x2e8] sm:$0xff] }
  0xf4   : > { %v4082_v50 = vpack.c.bf16 %v2657_v41, %v2656_v40  ;;  %v2688_v51 = vcvt.s32.f32 %v1088_v42  ;;  %v2689_v52 = vcvt.s32.f32 %v1089_v43  ;;  %v1039_v53 = vunpack.c.3.s8 %v390_v35 }
  0xf5   : > { %5209 = vmatpush.bf16.msrb.mxu0 %v4074_v45  ;;  %v4090_v55 = vpack.c.bf16 %v2673_v47, %v2672_v46  ;;  %v2638_v56 = vcvt.s32.f32 %v1038_v48  ;;  %v1054_v57 = vunpack.c.2.s8 %v394_v44  ;;  %v1055_v58 = vunpack.c.3.s8 %v394_v44 }
  0xf6   : > { %5222 = vmatpush.bf16.msrb.mxu1 %v4082_v50  ;;  %v4098_v59 = vpack.c.bf16 %v2689_v52, %v2688_v51  ;;  %v2639_v60 = vcvt.s32.f32 %v1039_v53  ;;  %v1070_v61 = vunpack.c.2.s8 %v398_v49  ;;  %v1071_v62 = vunpack.c.3.s8 %v398_v49  ;;  %v6812_v50 = vpop.f32.mrf.mxu3 }
  0xf7   : > { %5235 = vmatpush.bf16.msrb.mxu2 %v4090_v55  ;;  %v2654_v63 = vcvt.s32.f32 %v1054_v57  ;;  %v2655_v0 = vcvt.s32.f32 %v1055_v58  ;;  %v1086_v1 = vunpack.c.2.s8 %v402_v54  ;;  %v1087_v2 = vunpack.c.3.s8 %v402_v54 }
  0xf8   : > { %5248 = vmatpush.bf16.msrb.mxu3 %v4098_v59  ;;  %v4073_v3 = vpack.c.bf16 %v2639_v60, %v2638_v56  ;;  %v2670_v4 = vcvt.s32.f32 %v1070_v61  ;;  %v2671_v5 = vcvt.s32.f32 %v1071_v62  ;;  %v1036_v6 = vunpack.c.0.s8 %v390_v35  ;;  %v4959_v59 = vpop.f32.mrf.mxu0  ;;  %v4972_v60 = vpop.f32.mrf.mxu1 }
  0xf9   : > { %v4081_v7 = vpack.c.bf16 %v2655_v0, %v2654_v63  ;;  %v2686_v8 = vcvt.s32.f32 %v1086_v1  ;;  %v2687_v9 = vcvt.s32.f32 %v1087_v2  ;;  %v1037_v10 = vunpack.c.1.s8 %v390_v35  ;;  %v388_v1 = vld [vmem:[%s6675_s8 + $0x280] sm:$0xff]  ;;  %v6822_v60 = vld [vmem:[%s6675_s8 + $0x338] sm:$0xff] }
  0xfa   : > { %5210 = vmatpush.bf16.msrb.mxu0 %v4073_v3  ;;  %v4089_v11 = vpack.c.bf16 %v2671_v5, %v2670_v4  ;;  %v2636_v12 = vcvt.s32.f32 %v1036_v6  ;;  %v1052_v13 = vunpack.c.0.s8 %v394_v44  ;;  %v1053_v14 = vunpack.c.1.s8 %v394_v44 }
  0xfb   : > { %5223 = vmatpush.bf16.msrb.mxu1 %v4081_v7  ;;  %v4097_v16 = vpack.c.bf16 %v2687_v9, %v2686_v8  ;;  %v2637_v17 = vcvt.s32.f32 %v1037_v10  ;;  %v1068_v18 = vunpack.c.0.s8 %v398_v49  ;;  %v1069_v19 = vunpack.c.1.s8 %v398_v49  ;;  %v6810_v49 = vpop.f32.mrf.mxu2  ;;  %v392_v10 = vld [vmem:[%s6675_s8 + $0x2a0] sm:$0xff] }
  0xfc   : > { %5236 = vmatpush.bf16.msrb.mxu2 %v4089_v11  ;;  %v2652_v22 = vcvt.s32.f32 %v1052_v13  ;;  %v2653_v23 = vcvt.s32.f32 %v1053_v14  ;;  %v1084_v24 = vunpack.c.0.s8 %v402_v54  ;;  %v1085_v25 = vunpack.c.1.s8 %v402_v54 }
  0xfd   : > { %5249 = vmatpush.bf16.msrb.mxu3 %v4097_v16  ;;  %v4072_v27 = vpack.c.bf16 %v2637_v17, %v2636_v12  ;;  %v2668_v28 = vcvt.s32.f32 %v1068_v18  ;;  %v2669_v29 = vcvt.s32.f32 %v1069_v19  ;;  %v1034_v30 = vunpack.c.2.s8 %v389_v15 }
  0xfe   : > { %v4080_v32 = vpack.c.bf16 %v2653_v23, %v2652_v22  ;;  %v2684_v33 = vcvt.s32.f32 %v1084_v24  ;;  %v2685_v34 = vcvt.s32.f32 %v1085_v25  ;;  %v1035_v35 = vunpack.c.3.s8 %v389_v15  ;;  %v400_v22 = vld [vmem:[%s6675_s8 + $0x2e0] sm:$0xff] }
  0xff   : > { %5211 = vmatpush.bf16.msrb.mxu0 %v4072_v27  ;;  %v4088_v37 = vpack.c.bf16 %v2669_v29, %v2668_v28  ;;  %v2634_v38 = vcvt.s32.f32 %v1034_v30  ;;  %v1050_v39 = vunpack.c.2.s8 %v393_v26  ;;  %v1051_v40 = vunpack.c.3.s8 %v393_v26  ;;  %v4998_v28 = vpop.f32.mrf.mxu3 }
 0x100   : > { %5224 = vmatpush.bf16.msrb.mxu1 %v4080_v32  ;;  %v4096_v41 = vpack.c.bf16 %v2685_v34, %v2684_v33  ;;  %v2635_v42 = vcvt.s32.f32 %v1035_v35  ;;  %v1066_v43 = vunpack.c.2.s8 %v397_v31  ;;  %v1067_v44 = vunpack.c.3.s8 %v397_v31 }
 0x101   : > { %5237 = vmatpush.bf16.msrb.mxu2 %v4088_v37  ;;  %v2650_v45 = vcvt.s32.f32 %v1050_v39  ;;  %v2651_v46 = vcvt.s32.f32 %v1051_v40  ;;  %v1082_v47 = vunpack.c.2.s8 %v401_v36  ;;  %v1083_v48 = vunpack.c.3.s8 %v401_v36 }
 0x102   : > { %5250 = vmatpush.bf16.msrb.mxu3 %v4096_v41  ;;  %v4071_v51 = vpack.c.bf16 %v2635_v42, %v2634_v38  ;;  %v2666_v52 = vcvt.s32.f32 %v1066_v43  ;;  %v2667_v53 = vcvt.s32.f32 %v1067_v44  ;;  %v1032_v54 = vunpack.c.0.s8 %v389_v15 }
 0x103   : > { %v4079_v55 = vpack.c.bf16 %v2651_v46, %v2650_v45  ;;  %v2682_v56 = vcvt.s32.f32 %v1082_v47  ;;  %v2683_v57 = vcvt.s32.f32 %v1083_v48  ;;  %v1033_v58 = vunpack.c.1.s8 %v389_v15  ;;  %v396_v15 = vld [vmem:[%s6675_s8 + $0x2c0] sm:$0xff]  ;;  %v4985_v27 = vpop.f32.mrf.mxu2 }
 0x104   : > { %5212 = vmatpush.bf16.msrb.mxu0 %v4071_v51  ;;  %v4087_v61 = vpack.c.bf16 %v2667_v53, %v2666_v52  ;;  %v2632_v62 = vcvt.s32.f32 %v1032_v54  ;;  %v1048_v63 = vunpack.c.0.s8 %v393_v26  ;;  %v1049_v0 = vunpack.c.1.s8 %v393_v26  ;;  %v6819_v51 = vld [vmem:[%s6675_s8 + $0x318] sm:$0xff] }
 0x105   : > { %5225 = vmatpush.bf16.msrb.mxu1 %v4079_v55  ;;  %v4095_v2 = vpack.c.bf16 %v2683_v57, %v2682_v56  ;;  %v2633_v3 = vcvt.s32.f32 %v1033_v58  ;;  %v1064_v4 = vunpack.c.0.s8 %v397_v31  ;;  %v1065_v5 = vunpack.c.1.s8 %v397_v31 }
 0x106   : > { %5238 = vmatpush.bf16.msrb.mxu2 %v4087_v61  ;;  %v2648_v6 = vcvt.s32.f32 %v1048_v63  ;;  %v2649_v7 = vcvt.s32.f32 %v1049_v0  ;;  %v1080_v8 = vunpack.c.0.s8 %v401_v36  ;;  %v1081_v9 = vunpack.c.1.s8 %v401_v36  ;;  %v6824_v61 = vpop.f32.mrf.mxu0 }
 0x107   : > { %5251 = vmatpush.bf16.msrb.mxu3 %v4095_v2  ;;  %v4070_v11 = vpack.c.bf16 %v2633_v3, %v2632_v62  ;;  %v2664_v12 = vcvt.s32.f32 %v1064_v4  ;;  %v2665_v13 = vcvt.s32.f32 %v1065_v5  ;;  %v1030_v14 = vunpack.c.2.s8 %v388_v1  ;;  %v6826_v62 = vpop.f32.mrf.mxu1  ;;  %v415_v3 = vld [vmem:[%s6675_s8 + $0x358] sm:$0xff]  ;;  %v6840_v27 = vpop.f32.mrf.mxu3 }
 0x108   : > { %v4078_v16 = vpack.c.bf16 %v2649_v7, %v2648_v6  ;;  %v2680_v17 = vcvt.s32.f32 %v1080_v8  ;;  %v2681_v18 = vcvt.s32.f32 %v1081_v9  ;;  %v1031_v19 = vunpack.c.3.s8 %v388_v1  ;;  %v6832_v8 = vld [vmem:[%s6675_s8 + $0x378] sm:$0xff] }
 0x109   : > { %5213 = vmatpush.bf16.msrb.mxu0 %v4070_v11  ;;  %v4086_v23 = vpack.c.bf16 %v2665_v13, %v2664_v12  ;;  %v2630_v24 = vcvt.s32.f32 %v1030_v14  ;;  %v1046_v25 = vunpack.c.2.s8 %v392_v10  ;;  %v1047_v26 = vunpack.c.3.s8 %v392_v10  ;;  %v4748_v13 = vld [vmem:[#allocation1 + $0x24] sm:$0xff] }
 0x10a   : > { %5226 = vmatpush.bf16.msrb.mxu1 %v4078_v16  ;;  %v4094_v29 = vpack.c.bf16 %v2681_v18, %v2680_v17  ;;  %v2631_v30 = vcvt.s32.f32 %v1031_v19  ;;  %v1062_v31 = vunpack.c.2.s8 %v396_v15  ;;  %v1063_v32 = vunpack.c.3.s8 %v396_v15  ;;  %v4749_v18 = vld [vmem:[#allocation1 + $0x2d] sm:$0xff] }
 0x10b   : > { %5239 = vmatpush.bf16.msrb.mxu2 %v4086_v23  ;;  %v2646_v33 = vcvt.s32.f32 %v1046_v25  ;;  %v2647_v34 = vcvt.s32.f32 %v1047_v26  ;;  %v1078_v35 = vunpack.c.2.s8 %v400_v22  ;;  %v1079_v36 = vunpack.c.3.s8 %v400_v22  ;;  %v4750_v25 = vld [vmem:[#allocation1 + $0x36] sm:$0xff]  ;;  %v6838_v26 = vpop.f32.mrf.mxu2 }
 0x10c   : > { %5252 = vmatpush.bf16.msrb.mxu3 %v4094_v29  ;;  %v4069_v37 = vpack.c.bf16 %v2631_v30, %v2630_v24  ;;  %v2662_v38 = vcvt.s32.f32 %v1062_v31  ;;  %v2663_v39 = vcvt.s32.f32 %v1063_v32  ;;  %v1028_v40 = vunpack.c.0.s8 %v388_v1  ;;  %v4751_v32 = vld [vmem:[#allocation1 + $0x3f] sm:$0xff] }
 0x10d   : > { %v4077_v41 = vpack.c.bf16 %v2647_v34, %v2646_v33  ;;  %v2678_v42 = vcvt.s32.f32 %v1078_v35  ;;  %v2679_v43 = vcvt.s32.f32 %v1079_v36  ;;  %v1029_v44 = vunpack.c.1.s8 %v388_v1 }
 0x10e   : > { %5214 = vmatpush.bf16.msrb.mxu0 %v4069_v37  ;;  %v4085_v45 = vpack.c.bf16 %v2663_v39, %v2662_v38  ;;  %v2628_v46 = vcvt.s32.f32 %v1028_v40  ;;  %v1044_v47 = vunpack.c.0.s8 %v392_v10  ;;  %v1045_v48 = vunpack.c.1.s8 %v392_v10 }
 0x10f   : > { %5227 = vmatpush.bf16.msrb.mxu1 %v4077_v41  ;;  %v4093_v52 = vpack.c.bf16 %v2679_v43, %v2678_v42  ;;  %v2629_v53 = vcvt.s32.f32 %v1029_v44  ;;  %v1060_v54 = vunpack.c.0.s8 %v396_v15  ;;  %v1061_v55 = vunpack.c.1.s8 %v396_v15  ;;  %v5011_v41 = vpop.f32.mrf.mxu0  ;;  %v5024_v42 = vpop.f32.mrf.mxu1 }
 0x110   : > { %5240 = vmatpush.bf16.msrb.mxu2 %v4085_v45  ;;  %v2644_v56 = vcvt.s32.f32 %v1044_v47  ;;  %v2645_v57 = vcvt.s32.f32 %v1045_v48  ;;  %v1076_v58 = vunpack.c.0.s8 %v400_v22  ;;  %v1077_v59 = vunpack.c.1.s8 %v400_v22  ;;  %v406_v45 = vld [vmem:[%s6675_s8 + $0x310] sm:$0xff] }
 0x111   : > { %5253 = vmatpush.bf16.msrb.mxu3 %v4093_v52  ;;  %v4068_v63 = vpack.c.bf16 %v2629_v53, %v2628_v46  ;;  %v2660_v0 = vcvt.s32.f32 %v1060_v54  ;;  %v2661_v1 = vcvt.s32.f32 %v1061_v55  ;;  %v1106_v2 = vunpack.c.2.s8 %v6819_v51 }
 0x112   : > { %v4076_v4 = vpack.c.bf16 %v2645_v57, %v2644_v56  ;;  %v2676_v5 = vcvt.s32.f32 %v1076_v58  ;;  %v2677_v6 = vcvt.s32.f32 %v1077_v59  ;;  %v1107_v7 = vunpack.c.3.s8 %v6819_v51  ;;  %v410_v56 = vld [vmem:[%s6675_s8 + $0x330] sm:$0xff] }
 0x113   : > { %5215 = vmatpush.bf16.msrb.mxu0 %v4068_v63  ;;  %v4084_v9 = vpack.c.bf16 %v2661_v1, %v2660_v0  ;;  %v2706_v10 = vcvt.s32.f32 %v1106_v2  ;;  %v1122_v11 = vunpack.c.2.s8 %v6822_v60  ;;  %v1123_v12 = vunpack.c.3.s8 %v6822_v60  ;;  %v414_v57 = vld [vmem:[%s6675_s8 + $0x350] sm:$0xff] }
 0x114   : > { %5228 = vmatpush.bf16.msrb.mxu1 %v4076_v4  ;;  %v4092_v14 = vpack.c.bf16 %v2677_v6, %v2676_v5  ;;  %v2707_v15 = vcvt.s32.f32 %v1107_v7  ;;  %v1138_v16 = vunpack.c.2.s8 %v415_v3  ;;  %v1139_v17 = vunpack.c.3.s8 %v415_v3  ;;  %v418_v0 = vld [vmem:[%s6675_s8 + $0x370] sm:$0xff]  ;;  %v5037_v5 = vpop.f32.mrf.mxu2  ;;  %v5050_v6 = vpop.f32.mrf.mxu3 }
 0x115   : > { %5241 = vmatpush.bf16.msrb.mxu2 %v4084_v9  ;;  %v2722_v19 = vcvt.s32.f32 %v1122_v11  ;;  %v2723_v22 = vcvt.s32.f32 %v1123_v12  ;;  %v1154_v23 = vunpack.c.2.s8 %v6832_v8  ;;  %v1155_v24 = vunpack.c.3.s8 %v6832_v8 }
 0x116   : > { %5254 = vmatpush.bf16.msrb.mxu3 %v4092_v14  ;;  %v4107_v28 = vpack.c.bf16 %v2707_v15, %v2706_v10  ;;  %v2738_v29 = vcvt.s32.f32 %v1138_v16  ;;  %v2739_v30 = vcvt.s32.f32 %v1139_v17  ;;  %5216 = vmatmul.bf16.vlgmr.msrb.gmra.mxu0 %v4748_v13  ;;  %v4971_v31 = vadd.f32 %v6805_v21, %v6803_v20  ;;  %v4712_v10 = vld [vmem:[%s7631_s0 + $0x18] sm:$0xff] }
 0x117   : > { %v4115_v33 = vpack.c.bf16 %v2723_v22, %v2722_v19  ;;  %v2754_v34 = vcvt.s32.f32 %v1154_v23  ;;  %v2755_v35 = vcvt.s32.f32 %v1155_v24  ;;  %5229 = vmatmul.bf16.vlgmr.msrb.gmra.mxu1 %v4749_v18  ;;  %v1104_v36 = vunpack.c.0.s8 %v6819_v51  ;;  %4753 = vst [vmem:[#allocation1] ss:$9 sm:$0xff] %v4712_v10 }
 0x118   : > { %5260 = vmatpush.bf16.msra.mxu0 %v4107_v28  ;;  %v4123_v37 = vpack.c.bf16 %v2739_v30, %v2738_v29  ;;  %5242 = vmatmul.bf16.vlgmr.msrb.gmra.mxu2 %v4750_v25  ;;  %v1105_v38 = vunpack.c.1.s8 %v6819_v51  ;;  %v1120_v39 = vunpack.c.0.s8 %v6822_v60  ;;  %v1121_v40 = vunpack.c.1.s8 %v6822_v60 }
 0x119   : > { %5273 = vmatpush.bf16.msra.mxu1 %v4115_v33  ;;  %v4131_v20 = vpack.c.bf16 %v2755_v35, %v2754_v34  ;;  %5255 = vmatmul.bf16.vlgmr.msrb.gmra.mxu3 %v4751_v32  ;;  %v2704_v21 = vcvt.s32.f32 %v1104_v36  ;;  %v1136_v43 = vunpack.c.0.s8 %v415_v3  ;;  %v1137_v44 = vunpack.c.1.s8 %v415_v3  ;;  %v405_v34 = vld [vmem:[%s6675_s8 + $0x308] sm:$0xff] }
 0x11a   : > { %5286 = vmatpush.bf16.msra.mxu2 %v4123_v37  ;;  %v2705_v46 = vcvt.s32.f32 %v1105_v38  ;;  %v2720_v47 = vcvt.s32.f32 %v1120_v39  ;;  %v2721_v48 = vcvt.s32.f32 %v1121_v40  ;;  %v1152_v51 = vunpack.c.0.s8 %v6832_v8  ;;  %v409_v39 = vld [vmem:[%s6675_s8 + $0x328] sm:$0xff] }
 0x11b   : > { %5299 = vmatpush.bf16.msra.mxu3 %v4131_v20  ;;  %v2736_v52 = vcvt.s32.f32 %v1136_v43  ;;  %v2737_v53 = vcvt.s32.f32 %v1137_v44  ;;  %v1153_v54 = vunpack.c.1.s8 %v6832_v8  ;;  %v4984_v55 = vadd.f32 %v6810_v49, %v4971_v31 }
 0x11c   : > { %v4106_v58 = vpack.c.bf16 %v2705_v46, %v2704_v21  ;;  %v4114_v59 = vpack.c.bf16 %v2721_v48, %v2720_v47  ;;  %v2752_v60 = vcvt.s32.f32 %v1152_v51  ;;  %v1102_v63 = vunpack.c.2.s8 %v406_v45  ;;  %v413_v46 = vld [vmem:[%s6675_s8 + $0x348] sm:$0xff] }
 0x11d   : > { %v4122_v1 = vpack.c.bf16 %v2737_v53, %v2736_v52  ;;  %v2753_v2 = vcvt.s32.f32 %v1153_v54  ;;  %v6856_v3 = vadd.f32 %v6812_v50, %v4984_v55  ;;  %v1103_v4 = vunpack.c.3.s8 %v406_v45  ;;  %v417_v53 = vld [vmem:[%s6675_s8 + $0x368] sm:$0xff] }
 0x11e   : > { %5261 = vmatpush.bf16.msra.mxu0 %v4106_v58  ;;  %5274 = vmatpush.bf16.msra.mxu1 %v4114_v59  ;;  %v2702_v7 = vcvt.s32.f32 %v1102_v63  ;;  %v1118_v8 = vunpack.c.2.s8 %v410_v56  ;;  %v1119_v49 = vunpack.c.3.s8 %v410_v56  ;;  %v1134_v9 = vunpack.c.2.s8 %v414_v57 }
 0x11f   : > { %5287 = vmatpush.bf16.msra.mxu2 %v4122_v1  ;;  %v4130_v11 = vpack.c.bf16 %v2753_v2, %v2752_v60  ;;  %v2703_v12 = vcvt.s32.f32 %v1103_v4  ;;  %v1135_v13 = vunpack.c.3.s8 %v414_v57  ;;  %v1150_v14 = vunpack.c.2.s8 %v418_v0 }
 0x120   : > { %v2718_v50 = vcvt.s32.f32 %v1118_v8  ;;  %v2719_v15 = vcvt.s32.f32 %v1119_v49  ;;  %v2734_v16 = vcvt.s32.f32 %v1134_v9  ;;  %v1151_v17 = vunpack.c.3.s8 %v418_v0 }
 0x121   : > { %5300 = vmatpush.bf16.msra.mxu3 %v4130_v11  ;;  %v4105_v18 = vpack.c.bf16 %v2703_v12, %v2702_v7  ;;  %v2735_v19 = vcvt.s32.f32 %v1135_v13  ;;  %v2750_v22 = vcvt.s32.f32 %v1150_v14  ;;  %v1100_v23 = vunpack.c.0.s8 %v406_v45 }
 0x122   : > { %v4113_v24 = vpack.c.bf16 %v2719_v15, %v2718_v50  ;;  %v2751_v25 = vcvt.s32.f32 %v1151_v17  ;;  %v1101_v28 = vunpack.c.1.s8 %v406_v45  ;;  %v1116_v29 = vunpack.c.0.s8 %v410_v56 }
 0x123   : > { %5262 = vmatpush.bf16.msra.mxu0 %v4105_v18  ;;  %v4121_v30 = vpack.c.bf16 %v2735_v19, %v2734_v16  ;;  %v2700_v31 = vcvt.s32.f32 %v1100_v23  ;;  %v1117_v32 = vunpack.c.1.s8 %v410_v56  ;;  %v1132_v33 = vunpack.c.0.s8 %v414_v57  ;;  %v404_v19 = vld [vmem:[%s6675_s8 + $0x300] sm:$0xff] }
 0x124   : > { %5275 = vmatpush.bf16.msra.mxu1 %v4113_v24  ;;  %v4129_v35 = vpack.c.bf16 %v2751_v25, %v2750_v22  ;;  %v2701_v36 = vcvt.s32.f32 %v1101_v28  ;;  %v2716_v37 = vcvt.s32.f32 %v1116_v29  ;;  %v1133_v38 = vunpack.c.1.s8 %v414_v57  ;;  %v408_v24 = vld [vmem:[%s6675_s8 + $0x320] sm:$0xff]  ;;  %v6870_v25 = vpop.f32.mrf.mxu0 }
 0x125   : > { %5288 = vmatpush.bf16.msra.mxu2 %v4121_v30  ;;  %v2717_v40 = vcvt.s32.f32 %v1117_v32  ;;  %v2732_v41 = vcvt.s32.f32 %v1132_v33  ;;  %v1148_v42 = vunpack.c.0.s8 %v418_v0  ;;  %v1149_v20 = vunpack.c.1.s8 %v418_v0 }
 0x126   : > { %5301 = vmatpush.bf16.msra.mxu3 %v4129_v35  ;;  %v4104_v21 = vpack.c.bf16 %v2701_v36, %v2700_v31  ;;  %v2733_v43 = vcvt.s32.f32 %v1133_v38  ;;  %v1098_v44 = vunpack.c.2.s8 %v405_v34  ;;  %v1099_v45 = vunpack.c.3.s8 %v405_v34  ;;  %v412_v35 = vld [vmem:[%s6675_s8 + $0x340] sm:$0xff] }
 0x127   : > { %v4112_v47 = vpack.c.bf16 %v2717_v40, %v2716_v37  ;;  %v2748_v48 = vcvt.s32.f32 %v1148_v42  ;;  %v2749_v51 = vcvt.s32.f32 %v1149_v20  ;;  %v1114_v52 = vunpack.c.2.s8 %v409_v39  ;;  %v416_v40 = vld [vmem:[%s6675_s8 + $0x360] sm:$0xff] }
 0x128   : > { %5263 = vmatpush.bf16.msra.mxu0 %v4104_v21  ;;  %v4120_v54 = vpack.c.bf16 %v2733_v43, %v2732_v41  ;;  %v2698_v55 = vcvt.s32.f32 %v1098_v44  ;;  %v2699_v56 = vcvt.s32.f32 %v1099_v45  ;;  %v1115_v57 = vunpack.c.3.s8 %v409_v39 }
 0x129   : > { %5276 = vmatpush.bf16.msra.mxu1 %v4112_v47  ;;  %v4128_v58 = vpack.c.bf16 %v2749_v51, %v2748_v48  ;;  %v2714_v59 = vcvt.s32.f32 %v1114_v52  ;;  %v1130_v60 = vunpack.c.2.s8 %v413_v46  ;;  %v1131_v63 = vunpack.c.3.s8 %v413_v46 }
 0x12a   : > { %5289 = vmatpush.bf16.msra.mxu2 %v4120_v54  ;;  %v4103_v0 = vpack.c.bf16 %v2699_v56, %v2698_v55  ;;  %v2715_v1 = vcvt.s32.f32 %v1115_v57  ;;  %v1146_v2 = vunpack.c.2.s8 %v417_v53  ;;  %v1147_v4 = vunpack.c.3.s8 %v417_v53 }
 0x12b   : > { %5302 = vmatpush.bf16.msra.mxu3 %v4128_v58  ;;  %v2730_v5 = vcvt.s32.f32 %v1130_v60  ;;  %v2731_v6 = vcvt.s32.f32 %v1131_v63  ;;  %v5010_v7 = vadd.f32 %v6824_v61, %v6856_v3  ;;  %v1096_v8 = vunpack.c.0.s8 %v405_v34 }
 0x12c   : > { %5264 = vmatpush.bf16.msra.mxu0 %v4103_v0  ;;  %v4111_v49 = vpack.c.bf16 %v2715_v1, %v2714_v59  ;;  %v2746_v9 = vcvt.s32.f32 %v1146_v2  ;;  %v2747_v10 = vcvt.s32.f32 %v1147_v4  ;;  %v1097_v11 = vunpack.c.1.s8 %v405_v34  ;;  %v5063_v60 = vpop.f32.mrf.mxu0  ;;  %v423_v4 = vld [vmem:[%s6675_s8 + $0x398] sm:$0xff] }
 0x12d   : > { %v4119_v12 = vpack.c.bf16 %v2731_v6, %v2730_v5  ;;  %v5023_v13 = vadd.f32 %v6826_v62, %v5010_v7  ;;  %v2696_v14 = vcvt.s32.f32 %v1096_v8  ;;  %v1112_v50 = vunpack.c.0.s8 %v409_v39 }
 0x12e   : > { %5277 = vmatpush.bf16.msra.mxu1 %v4111_v49  ;;  %v4127_v15 = vpack.c.bf16 %v2747_v10, %v2746_v9  ;;  %v2697_v16 = vcvt.s32.f32 %v1097_v11  ;;  %v1113_v17 = vunpack.c.1.s8 %v409_v39  ;;  %v1128_v18 = vunpack.c.0.s8 %v413_v46  ;;  %v6882_v49 = vld [vmem:[%s6675_s8 + $0x3b8] sm:$0xff] }
 0x12f   : > { %5290 = vmatpush.bf16.msra.mxu2 %v4119_v12  ;;  %v2712_v61 = vcvt.s32.f32 %v1112_v50  ;;  %v1129_v3 = vunpack.c.1.s8 %v413_v46  ;;  %v1144_v22 = vunpack.c.0.s8 %v417_v53  ;;  %v1145_v23 = vunpack.c.1.s8 %v417_v53  ;;  %v6878_v46 = vpop.f32.mrf.mxu1  ;;  %v6889_v50 = vpop.f32.mrf.mxu3 }
 0x130   : > { %5303 = vmatpush.bf16.msra.mxu3 %v4127_v15  ;;  %v4102_v62 = vpack.c.bf16 %v2697_v16, %v2696_v14  ;;  %v2713_v28 = vcvt.s32.f32 %v1113_v17  ;;  %v2728_v29 = vcvt.s32.f32 %v1128_v18  ;;  %v5036_v30 = vadd.f32 %v6838_v26, %v5023_v13  ;;  %v6885_v13 = vld [vmem:[%s6675_s8 + $0x3d8] sm:$0xff]  ;;  %v6887_v14 = vpop.f32.mrf.mxu2 }
 0x131   : > { %v2729_v31 = vcvt.s32.f32 %v1129_v3  ;;  %v2744_v32 = vcvt.s32.f32 %v1144_v22  ;;  %v2745_v33 = vcvt.s32.f32 %v1145_v23  ;;  %v1094_v34 = vunpack.c.2.s8 %v404_v19  ;;  %v435_v23 = vld [vmem:[%s6675_s8 + $0x3f8] sm:$0xff] }
 0x132   : > { %5265 = vmatpush.bf16.msra.mxu0 %v4102_v62  ;;  %v4110_v36 = vpack.c.bf16 %v2713_v28, %v2712_v61  ;;  %v6875_v37 = vadd.f32 %v6840_v27, %v5036_v30  ;;  %v1095_v38 = vunpack.c.3.s8 %v404_v19  ;;  %v1110_v39 = vunpack.c.2.s8 %v408_v24 }
 0x133   : > { %v4118_v41 = vpack.c.bf16 %v2729_v31, %v2728_v29  ;;  %v4126_v42 = vpack.c.bf16 %v2745_v33, %v2744_v32  ;;  %v2694_v20 = vcvt.s32.f32 %v1094_v34  ;;  %v1111_v21 = vunpack.c.3.s8 %v408_v24 }
 0x134   : > { %5278 = vmatpush.bf16.msra.mxu1 %v4110_v36  ;;  %v2695_v43 = vcvt.s32.f32 %v1095_v38  ;;  %v2710_v26 = vcvt.s32.f32 %v1110_v39  ;;  %v1126_v44 = vunpack.c.2.s8 %v412_v35  ;;  %v1127_v45 = vunpack.c.3.s8 %v412_v35  ;;  %v4755_v36 = vld [vmem:[#allocation1 + $0x9] sm:$0xff] }
 0x135   : > { %5291 = vmatpush.bf16.msra.mxu2 %v4118_v41  ;;  %5304 = vmatpush.bf16.msra.mxu3 %v4126_v42  ;;  %v2711_v47 = vcvt.s32.f32 %v1111_v21  ;;  %v1142_v48 = vunpack.c.2.s8 %v416_v40  ;;  %v1143_v27 = vunpack.c.3.s8 %v416_v40  ;;  %v1092_v51 = vunpack.c.0.s8 %v404_v19  ;;  %v4756_v42 = vld [vmem:[#allocation1 + $0x12] sm:$0xff] }
 0x136   : > { %v4101_v52 = vpack.c.bf16 %v2695_v43, %v2694_v20  ;;  %v2726_v53 = vcvt.s32.f32 %v1126_v44  ;;  %v2727_v54 = vcvt.s32.f32 %v1127_v45  ;;  %v1093_v55 = vunpack.c.1.s8 %v404_v19  ;;  %v4757_v43 = vld [vmem:[#allocation1 + $0x1b] sm:$0xff] }
 0x137   : > { %v4109_v56 = vpack.c.bf16 %v2711_v47, %v2710_v26  ;;  %v2742_v57 = vcvt.s32.f32 %v1142_v48  ;;  %v2743_v58 = vcvt.s32.f32 %v1143_v27  ;;  %v2692_v59 = vcvt.s32.f32 %v1092_v51  ;;  %v5076_v62 = vpop.f32.mrf.mxu1 }
 0x138   : > { %5266 = vmatpush.bf16.msra.mxu0 %v4101_v52  ;;  %v4117_v63 = vpack.c.bf16 %v2727_v54, %v2726_v53  ;;  %v2693_v0 = vcvt.s32.f32 %v1093_v55  ;;  %v1108_v1 = vunpack.c.0.s8 %v408_v24  ;;  %v1109_v2 = vunpack.c.1.s8 %v408_v24  ;;  %v4754_v24 = vld [vmem:[#allocation1] sm:$0xff]  ;;  %v422_v55 = vld [vmem:[%s6675_s8 + $0x390] sm:$0xff] }
 0x139   : > { %5279 = vmatpush.bf16.msra.mxu1 %v4109_v56  ;;  %v4125_v5 = vpack.c.bf16 %v2743_v58, %v2742_v57  ;;  %v1124_v6 = vunpack.c.0.s8 %v412_v35  ;;  %v1125_v7 = vunpack.c.1.s8 %v412_v35  ;;  %v1140_v8 = vunpack.c.0.s8 %v416_v40  ;;  %v5089_v56 = vpop.f32.mrf.mxu2  ;;  %v5102_v57 = vpop.f32.mrf.mxu3 }
 0x13a   : > { %5292 = vmatpush.bf16.msra.mxu2 %v4117_v63  ;;  %v4100_v9 = vpack.c.bf16 %v2693_v0, %v2692_v59  ;;  %v2708_v10 = vcvt.s32.f32 %v1108_v1  ;;  %v2709_v11 = vcvt.s32.f32 %v1109_v2  ;;  %v1141_v12 = vunpack.c.1.s8 %v416_v40  ;;  %v426_v0 = vld [vmem:[%s6675_s8 + $0x3b0] sm:$0xff] }
 0x13b   : > { %5305 = vmatpush.bf16.msra.mxu3 %v4125_v5  ;;  %v2724_v15 = vcvt.s32.f32 %v1124_v6  ;;  %v2725_v16 = vcvt.s32.f32 %v1125_v7  ;;  %v2740_v17 = vcvt.s32.f32 %v1140_v8  ;;  %v1170_v18 = vunpack.c.2.s8 %v423_v4 }
 0x13c   : > { %5267 = vmatpush.bf16.msra.mxu0 %v4100_v9  ;;  %v4108_v19 = vpack.c.bf16 %v2709_v11, %v2708_v10  ;;  %v2741_v61 = vcvt.s32.f32 %v1141_v12  ;;  %v1171_v3 = vunpack.c.3.s8 %v423_v4  ;;  %v1186_v22 = vunpack.c.2.s8 %v6882_v49  ;;  %v430_v9 = vld [vmem:[%s6675_s8 + $0x3d0] sm:$0xff] }
 0x13d   : > { %v4116_v28 = vpack.c.bf16 %v2725_v16, %v2724_v15  ;;  %v2770_v29 = vcvt.s32.f32 %v1170_v18  ;;  %v1187_v30 = vunpack.c.3.s8 %v6882_v49  ;;  %v1202_v31 = vunpack.c.2.s8 %v6885_v13  ;;  %v434_v16 = vld [vmem:[%s6675_s8 + $0x3f0] sm:$0xff] }
 0x13e   : > { %5280 = vmatpush.bf16.msra.mxu1 %v4108_v19  ;;  %v4124_v32 = vpack.c.bf16 %v2741_v61, %v2740_v17  ;;  %v2771_v33 = vcvt.s32.f32 %v1171_v3  ;;  %v2786_v34 = vcvt.s32.f32 %v1186_v22  ;;  %v1203_v35 = vunpack.c.3.s8 %v6885_v13 }
 0x13f   : > { %5293 = vmatpush.bf16.msra.mxu2 %v4116_v28  ;;  %v2787_v38 = vcvt.s32.f32 %v1187_v30  ;;  %v2802_v39 = vcvt.s32.f32 %v1202_v31  ;;  %v1218_v40 = vunpack.c.2.s8 %v435_v23  ;;  %v1219_v41 = vunpack.c.3.s8 %v435_v23  ;;  %5268 = vmatmul.bf16.vlgmr.msra.gmra.mxu0 %v4754_v24 }
 0x140   : > { %5306 = vmatpush.bf16.msra.mxu3 %v4124_v32  ;;  %v4139_v20 = vpack.c.bf16 %v2771_v33, %v2770_v29  ;;  %v2803_v21 = vcvt.s32.f32 %v1203_v35  ;;  %v1168_v26 = vunpack.c.0.s8 %v423_v4  ;;  %v1169_v44 = vunpack.c.1.s8 %v423_v4 }
 0x141   : > { %v4147_v45 = vpack.c.bf16 %v2787_v38, %v2786_v34  ;;  %v2818_v47 = vcvt.s32.f32 %v1218_v40  ;;  %v2819_v48 = vcvt.s32.f32 %v1219_v41  ;;  %5281 = vmatmul.bf16.vlgmr.msra.gmra.mxu1 %v4755_v36  ;;  %v1184_v27 = vunpack.c.0.s8 %v6882_v49 }
 0x142   : > { %5312 = vmatpush.bf16.msrb.mxu0 %v4139_v20  ;;  %v4155_v51 = vpack.c.bf16 %v2803_v21, %v2802_v39  ;;  %5294 = vmatmul.bf16.vlgmr.msra.gmra.mxu2 %v4756_v42  ;;  %v2768_v52 = vcvt.s32.f32 %v1168_v26  ;;  %v2769_v53 = vcvt.s32.f32 %v1169_v44  ;;  %v1185_v54 = vunpack.c.1.s8 %v6882_v49  ;;  %v421_v44 = vld [vmem:[%s6675_s8 + $0x388] sm:$0xff] }
 0x143   : > { %5325 = vmatpush.bf16.msrb.mxu1 %v4147_v45  ;;  %v4163_v58 = vpack.c.bf16 %v2819_v48, %v2818_v47  ;;  %5307 = vmatmul.bf16.vlgmr.msra.gmra.mxu3 %v4757_v43  ;;  %v2784_v59 = vcvt.s32.f32 %v1184_v27  ;;  %v1200_v60 = vunpack.c.0.s8 %v6885_v13  ;;  %v1201_v63 = vunpack.c.1.s8 %v6885_v13  ;;  %v425_v48 = vld [vmem:[%s6675_s8 + $0x3a8] sm:$0xff] }
 0x144   : > { %5338 = vmatpush.bf16.msrb.mxu2 %v4155_v51  ;;  %v4138_v1 = vpack.c.bf16 %v2769_v53, %v2768_v52  ;;  %v2785_v2 = vcvt.s32.f32 %v1185_v54  ;;  %v1216_v4 = vunpack.c.0.s8 %v435_v23  ;;  %v1217_v5 = vunpack.c.1.s8 %v435_v23  ;;  %v429_v54 = vld [vmem:[%s6675_s8 + $0x3c8] sm:$0xff] }
 0x145   : > { %5351 = vmatpush.bf16.msrb.mxu3 %v4163_v58  ;;  %v2800_v6 = vcvt.s32.f32 %v1200_v60  ;;  %v2801_v7 = vcvt.s32.f32 %v1201_v63  ;;  %v1166_v8 = vunpack.c.2.s8 %v422_v55  ;;  %v1167_v49 = vunpack.c.3.s8 %v422_v55 }
 0x146   : > { %5313 = vmatpush.bf16.msrb.mxu0 %v4138_v1  ;;  %v4146_v10 = vpack.c.bf16 %v2785_v2, %v2784_v59  ;;  %v2816_v11 = vcvt.s32.f32 %v1216_v4  ;;  %v2817_v12 = vcvt.s32.f32 %v1217_v5  ;;  %v1182_v15 = vunpack.c.2.s8 %v426_v0  ;;  %v433_v59 = vld [vmem:[%s6675_s8 + $0x3e8] sm:$0xff] }
 0x147   : > { %v4154_v13 = vpack.c.bf16 %v2801_v7, %v2800_v6  ;;  %v2766_v17 = vcvt.s32.f32 %v1166_v8  ;;  %v2767_v18 = vcvt.s32.f32 %v1167_v49  ;;  %v1183_v19 = vunpack.c.3.s8 %v426_v0 }
 0x148   : > { %5326 = vmatpush.bf16.msrb.mxu1 %v4146_v10  ;;  %v4162_v61 = vpack.c.bf16 %v2817_v12, %v2816_v11  ;;  %v2782_v3 = vcvt.s32.f32 %v1182_v15  ;;  %v1198_v22 = vunpack.c.2.s8 %v430_v9  ;;  %v1199_v23 = vunpack.c.3.s8 %v430_v9 }
 0x149   : > { %5339 = vmatpush.bf16.msrb.mxu2 %v4154_v13  ;;  %v4137_v24 = vpack.c.bf16 %v2767_v18, %v2766_v17  ;;  %v2783_v62 = vcvt.s32.f32 %v1183_v19  ;;  %v1214_v28 = vunpack.c.2.s8 %v434_v16  ;;  %v1215_v29 = vunpack.c.3.s8 %v434_v16 }
 0x14a   : > { %5352 = vmatpush.bf16.msrb.mxu3 %v4162_v61  ;;  %v2798_v30 = vcvt.s32.f32 %v1198_v22  ;;  %v2799_v31 = vcvt.s32.f32 %v1199_v23  ;;  %v5062_v32 = vadd.f32 %v6870_v25, %v6875_v37  ;;  %v1164_v33 = vunpack.c.0.s8 %v422_v55 }
 0x14b   : > { %5314 = vmatpush.bf16.msrb.mxu0 %v4137_v24  ;;  %v4145_v34 = vpack.c.bf16 %v2783_v62, %v2782_v3  ;;  %v2814_v35 = vcvt.s32.f32 %v1214_v28  ;;  %v2815_v36 = vcvt.s32.f32 %v1215_v29  ;;  %v1165_v38 = vunpack.c.1.s8 %v422_v55  ;;  %v420_v28 = vld [vmem:[%s6675_s8 + $0x380] sm:$0xff] }
 0x14c   : > { %v4153_v39 = vpack.c.bf16 %v2799_v31, %v2798_v30  ;;  %v2764_v40 = vcvt.s32.f32 %v1164_v33  ;;  %v1180_v41 = vunpack.c.0.s8 %v426_v0  ;;  %v1181_v42 = vunpack.c.1.s8 %v426_v0  ;;  %v6917_v33 = vpop.f32.mrf.mxu0 }
 0x14d   : > { %5327 = vmatpush.bf16.msrb.mxu1 %v4145_v34  ;;  %v4161_v20 = vpack.c.bf16 %v2815_v36, %v2814_v35  ;;  %v2765_v21 = vcvt.s32.f32 %v1165_v38  ;;  %v1196_v43 = vunpack.c.0.s8 %v430_v9  ;;  %v1197_v26 = vunpack.c.1.s8 %v430_v9  ;;  %v428_v38 = vld [vmem:[%s6675_s8 + $0x3c0] sm:$0xff] }
 0x14e   : > { %5340 = vmatpush.bf16.msrb.mxu2 %v4153_v39  ;;  %v2780_v25 = vcvt.s32.f32 %v1180_v41  ;;  %v2781_v37 = vcvt.s32.f32 %v1181_v42  ;;  %v1212_v45 = vunpack.c.0.s8 %v434_v16  ;;  %v1213_v47 = vunpack.c.1.s8 %v434_v16 }
 0x14f   : > { %5353 = vmatpush.bf16.msrb.mxu3 %v4161_v20  ;;  %v4136_v27 = vpack.c.bf16 %v2765_v21, %v2764_v40  ;;  %v2796_v51 = vcvt.s32.f32 %v1196_v43  ;;  %v2797_v52 = vcvt.s32.f32 %v1197_v26  ;;  %v5075_v53 = vadd.f32 %v6878_v46, %v5062_v32  ;;  %v424_v32 = vld [vmem:[%s6675_s8 + $0x3a0] sm:$0xff] }
 0x150   : > { %v4144_v55 = vpack.c.bf16 %v2781_v37, %v2780_v25  ;;  %v2812_v56 = vcvt.s32.f32 %v1212_v45  ;;  %v2813_v57 = vcvt.s32.f32 %v1213_v47  ;;  %v1162_v58 = vunpack.c.2.s8 %v421_v44 }
 0x151   : > { %5315 = vmatpush.bf16.msrb.mxu0 %v4136_v27  ;;  %v4152_v60 = vpack.c.bf16 %v2797_v52, %v2796_v51  ;;  %v1163_v63 = vunpack.c.3.s8 %v421_v44  ;;  %v1178_v0 = vunpack.c.2.s8 %v425_v48  ;;  %v1179_v1 = vunpack.c.3.s8 %v425_v48 }
 0x152   : > { %5328 = vmatpush.bf16.msrb.mxu1 %v4144_v55  ;;  %v4160_v2 = vpack.c.bf16 %v2813_v57, %v2812_v56  ;;  %v2762_v4 = vcvt.s32.f32 %v1162_v58  ;;  %v1194_v5 = vunpack.c.2.s8 %v429_v54  ;;  %v1195_v6 = vunpack.c.3.s8 %v429_v54 }
 0x153   : > { %5341 = vmatpush.bf16.msrb.mxu2 %v4152_v60  ;;  %v2763_v7 = vcvt.s32.f32 %v1163_v63  ;;  %v2778_v8 = vcvt.s32.f32 %v1178_v0  ;;  %v2779_v46 = vcvt.s32.f32 %v1179_v1  ;;  %v1210_v49 = vunpack.c.2.s8 %v433_v59 }
 0x154   : > { %5354 = vmatpush.bf16.msrb.mxu3 %v4160_v2  ;;  %v2794_v9 = vcvt.s32.f32 %v1194_v5  ;;  %v2795_v10 = vcvt.s32.f32 %v1195_v6  ;;  %v1211_v11 = vunpack.c.3.s8 %v433_v59  ;;  %v5088_v12 = vadd.f32 %v6887_v14, %v5075_v53  ;;  %v6921_v53 = vpop.f32.mrf.mxu1  ;;  %v5115_v5 = vpop.f32.mrf.mxu0 }
 0x155   : > { %v4135_v15 = vpack.c.bf16 %v2763_v7, %v2762_v4  ;;  %v4143_v16 = vpack.c.bf16 %v2779_v46, %v2778_v8  ;;  %v2810_v13 = vcvt.s32.f32 %v1210_v49  ;;  %v1160_v17 = vunpack.c.0.s8 %v421_v44  ;;  %v439_v49 = vld [vmem:[%s6675_s8 + $0x418] sm:$0xff] }
 0x156   : > { %v4151_v18 = vpack.c.bf16 %v2795_v10, %v2794_v9  ;;  %v2811_v19 = vcvt.s32.f32 %v1211_v11  ;;  %v6913_v61 = vadd.f32 %v6889_v50, %v5088_v12  ;;  %v1161_v3 = vunpack.c.1.s8 %v421_v44  ;;  %v432_v44 = vld [vmem:[%s6675_s8 + $0x3e0] sm:$0xff] }
 0x157   : > { %5316 = vmatpush.bf16.msrb.mxu0 %v4135_v15  ;;  %5329 = vmatpush.bf16.msrb.mxu1 %v4143_v16  ;;  %v2760_v22 = vcvt.s32.f32 %v1160_v17  ;;  %v1176_v23 = vunpack.c.0.s8 %v425_v48  ;;  %v1177_v24 = vunpack.c.1.s8 %v425_v48  ;;  %v1192_v62 = vunpack.c.0.s8 %v429_v54  ;;  %v6925_v15 = vld [vmem:[%s6675_s8 + $0x438] sm:$0xff] }
 0x158   : > { %5342 = vmatpush.bf16.msrb.mxu2 %v4151_v18  ;;  %v4159_v14 = vpack.c.bf16 %v2811_v19, %v2810_v13  ;;  %v2761_v29 = vcvt.s32.f32 %v1161_v3  ;;  %v1193_v30 = vunpack.c.1.s8 %v429_v54  ;;  %v1208_v31 = vunpack.c.0.s8 %v433_v59  ;;  %v6927_v19 = vpop.f32.mrf.mxu2  ;;  %v6929_v3 = vpop.f32.mrf.mxu3 }
 0x159   : > { %v2776_v50 = vcvt.s32.f32 %v1176_v23  ;;  %v2777_v34 = vcvt.s32.f32 %v1177_v24  ;;  %v2792_v35 = vcvt.s32.f32 %v1192_v62  ;;  %v1209_v36 = vunpack.c.1.s8 %v433_v59 }
 0x15a   : > { %5355 = vmatpush.bf16.msrb.mxu3 %v4159_v14  ;;  %v4134_v39 = vpack.c.bf16 %v2761_v29, %v2760_v22  ;;  %v2793_v40 = vcvt.s32.f32 %v1193_v30  ;;  %v2808_v41 = vcvt.s32.f32 %v1208_v31  ;;  %v1158_v42 = vunpack.c.2.s8 %v420_v28 }
 0x15b   : > { %v4142_v20 = vpack.c.bf16 %v2777_v34, %v2776_v50  ;;  %v2809_v21 = vcvt.s32.f32 %v1209_v36  ;;  %v1159_v43 = vunpack.c.3.s8 %v420_v28  ;;  %v1174_v26 = vunpack.c.2.s8 %v424_v32  ;;  %v4758_v50 = vld [vmem:[#allocation1 + $0x24] sm:$0xff] }
 0x15c   : > { %5317 = vmatpush.bf16.msrb.mxu0 %v4134_v39  ;;  %v4150_v25 = vpack.c.bf16 %v2793_v40, %v2792_v35  ;;  %v2758_v37 = vcvt.s32.f32 %v1158_v42  ;;  %v1175_v45 = vunpack.c.3.s8 %v424_v32  ;;  %v1190_v47 = vunpack.c.2.s8 %v428_v38  ;;  %v5128_v34 = vpop.f32.mrf.mxu1 }
 0x15d   : > { %5330 = vmatpush.bf16.msrb.mxu1 %v4142_v20  ;;  %v4158_v48 = vpack.c.bf16 %v2809_v21, %v2808_v41  ;;  %v2759_v27 = vcvt.s32.f32 %v1159_v43  ;;  %v2774_v51 = vcvt.s32.f32 %v1174_v26  ;;  %v1191_v52 = vunpack.c.3.s8 %v428_v38  ;;  %v4759_v21 = vld [vmem:[#allocation1 + $0x2d] sm:$0xff] }
 0x15e   : > { %5343 = vmatpush.bf16.msrb.mxu2 %v4150_v25  ;;  %v2775_v54 = vcvt.s32.f32 %v1175_v45  ;;  %v2790_v55 = vcvt.s32.f32 %v1190_v47  ;;  %v1206_v56 = vunpack.c.2.s8 %v432_v44  ;;  %v1207_v57 = vunpack.c.3.s8 %v432_v44 }
 0x15f   : > { %5356 = vmatpush.bf16.msrb.mxu3 %v4158_v48  ;;  %v4133_v58 = vpack.c.bf16 %v2759_v27, %v2758_v37  ;;  %v2791_v59 = vcvt.s32.f32 %v1191_v52  ;;  %v1156_v60 = vunpack.c.0.s8 %v420_v28  ;;  %v1157_v63 = vunpack.c.1.s8 %v420_v28  ;;  %v447_v28 = vld [vmem:[%s6675_s8 + $0x458] sm:$0xff]  ;;  %v4760_v37 = vld [vmem:[#allocation1 + $0x36] sm:$0xff] }
 0x160   : > { %v4141_v0 = vpack.c.bf16 %v2775_v54, %v2774_v51  ;;  %v2806_v1 = vcvt.s32.f32 %v1206_v56  ;;  %v2807_v2 = vcvt.s32.f32 %v1207_v57  ;;  %v1172_v4 = vunpack.c.0.s8 %v424_v32  ;;  %v4761_v48 = vld [vmem:[#allocation1 + $0x3f] sm:$0xff] }
 0x161   : > { %5318 = vmatpush.bf16.msrb.mxu0 %v4133_v58  ;;  %v4149_v6 = vpack.c.bf16 %v2791_v59, %v2790_v55  ;;  %v2756_v7 = vcvt.s32.f32 %v1156_v60  ;;  %v2757_v8 = vcvt.s32.f32 %v1157_v63  ;;  %v1173_v46 = vunpack.c.1.s8 %v424_v32  ;;  %v451_v32 = vld [vmem:[%s6675_s8 + $0x478] sm:$0xff]  ;;  %v438_v63 = vld [vmem:[%s6675_s8 + $0x410] sm:$0xff] }
 0x162   : > { %5331 = vmatpush.bf16.msrb.mxu1 %v4141_v0  ;;  %v4157_v9 = vpack.c.bf16 %v2807_v2, %v2806_v1  ;;  %v2772_v10 = vcvt.s32.f32 %v1172_v4  ;;  %v1188_v11 = vunpack.c.0.s8 %v428_v38  ;;  %v1189_v12 = vunpack.c.1.s8 %v428_v38  ;;  %v5141_v0 = vpop.f32.mrf.mxu2  ;;  %v5154_v1 = vpop.f32.mrf.mxu3 }
 0x163   : > { %5344 = vmatpush.bf16.msrb.mxu2 %v4149_v6  ;;  %v4132_v16 = vpack.c.bf16 %v2757_v8, %v2756_v7  ;;  %v2773_v13 = vcvt.s32.f32 %v1173_v46  ;;  %v1204_v17 = vunpack.c.0.s8 %v432_v44  ;;  %v1205_v18 = vunpack.c.1.s8 %v432_v44  ;;  %v442_v7 = vld [vmem:[%s6675_s8 + $0x430] sm:$0xff] }
 0x164   : > { %5357 = vmatpush.bf16.msrb.mxu3 %v4157_v9  ;;  %v2788_v22 = vcvt.s32.f32 %v1188_v11  ;;  %v2789_v23 = vcvt.s32.f32 %v1189_v12  ;;  %v1234_v24 = vunpack.c.2.s8 %v439_v49  ;;  %v1235_v62 = vunpack.c.3.s8 %v439_v49 }
 0x165   : > { %5319 = vmatpush.bf16.msrb.mxu0 %v4132_v16  ;;  %v4140_v14 = vpack.c.bf16 %v2773_v13, %v2772_v10  ;;  %v2804_v29 = vcvt.s32.f32 %v1204_v17  ;;  %v2805_v30 = vcvt.s32.f32 %v1205_v18  ;;  %v1250_v31 = vunpack.c.2.s8 %v6925_v15  ;;  %v446_v16 = vld [vmem:[%s6675_s8 + $0x450] sm:$0xff] }
 0x166   : > { %v4148_v35 = vpack.c.bf16 %v2789_v23, %v2788_v22  ;;  %v2834_v36 = vcvt.s32.f32 %v1234_v24  ;;  %v2835_v38 = vcvt.s32.f32 %v1235_v62  ;;  %v1251_v39 = vunpack.c.3.s8 %v6925_v15  ;;  %v450_v23 = vld [vmem:[%s6675_s8 + $0x470] sm:$0xff] }
 0x167   : > { %5332 = vmatpush.bf16.msrb.mxu1 %v4140_v14  ;;  %v4156_v40 = vpack.c.bf16 %v2805_v30, %v2804_v29  ;;  %v2850_v41 = vcvt.s32.f32 %v1250_v31  ;;  %v1266_v42 = vunpack.c.2.s8 %v447_v28  ;;  %v1267_v20 = vunpack.c.3.s8 %v447_v28  ;;  %v4713_v29 = vld [vmem:[%s7631_s0 + $0x20] sm:$0xff] }
 0x168   : > { %5345 = vmatpush.bf16.msrb.mxu2 %v4148_v35  ;;  %v4171_v43 = vpack.c.bf16 %v2835_v38, %v2834_v36  ;;  %v2851_v26 = vcvt.s32.f32 %v1251_v39  ;;  %v1282_v44 = vunpack.c.2.s8 %v451_v32  ;;  %v1283_v25 = vunpack.c.3.s8 %v451_v32  ;;  %5320 = vmatmul.bf16.vlgmr.msrb.gmra.mxu0 %v4758_v50  ;;  %4763 = vst [vmem:[#allocation1] ss:$9 sm:$0xff] %v4713_v29 }
 0x169   : > { %5358 = vmatpush.bf16.msrb.mxu3 %v4156_v40  ;;  %v2866_v45 = vcvt.s32.f32 %v1266_v42  ;;  %v2867_v47 = vcvt.s32.f32 %v1267_v20  ;;  %v1232_v27 = vunpack.c.0.s8 %v439_v49  ;;  %v1233_v51 = vunpack.c.1.s8 %v439_v49 }
 0x16a   : > { %5364 = vmatpush.bf16.msra.mxu0 %v4171_v43  ;;  %v4179_v52 = vpack.c.bf16 %v2851_v26, %v2850_v41  ;;  %v2882_v54 = vcvt.s32.f32 %v1282_v44  ;;  %v2883_v55 = vcvt.s32.f32 %v1283_v25  ;;  %5333 = vmatmul.bf16.vlgmr.msrb.gmra.mxu1 %v4759_v21  ;;  %v1248_v56 = vunpack.c.0.s8 %v6925_v15 }
 0x16b   : > { %v4187_v57 = vpack.c.bf16 %v2867_v47, %v2866_v45  ;;  %5346 = vmatmul.bf16.vlgmr.msrb.gmra.mxu2 %v4760_v37  ;;  %v2832_v58 = vcvt.s32.f32 %v1232_v27  ;;  %v2833_v59 = vcvt.s32.f32 %v1233_v51  ;;  %v1249_v60 = vunpack.c.1.s8 %v6925_v15 }
 0x16c   : > { %5377 = vmatpush.bf16.msra.mxu1 %v4179_v52  ;;  %v4195_v2 = vpack.c.bf16 %v2883_v55, %v2882_v54  ;;  %5359 = vmatmul.bf16.vlgmr.msrb.gmra.mxu3 %v4761_v48  ;;  %v2848_v4 = vcvt.s32.f32 %v1248_v56  ;;  %v1264_v5 = vunpack.c.0.s8 %v447_v28  ;;  %v1265_v6 = vunpack.c.1.s8 %v447_v28  ;;  %v437_v52 = vld [vmem:[%s6675_s8 + $0x408] sm:$0xff] }
 0x16d   : > { %5390 = vmatpush.bf16.msra.mxu2 %v4187_v57  ;;  %v4170_v8 = vpack.c.bf16 %v2833_v59, %v2832_v58  ;;  %v2849_v46 = vcvt.s32.f32 %v1249_v60  ;;  %v1280_v49 = vunpack.c.0.s8 %v451_v32  ;;  %v1281_v9 = vunpack.c.1.s8 %v451_v32  ;;  %v441_v56 = vld [vmem:[%s6675_s8 + $0x428] sm:$0xff] }
 0x16e   : > { %5403 = vmatpush.bf16.msra.mxu3 %v4195_v2  ;;  %v2864_v10 = vcvt.s32.f32 %v1264_v5  ;;  %v2865_v11 = vcvt.s32.f32 %v1265_v6  ;;  %v1230_v12 = vunpack.c.2.s8 %v438_v63  ;;  %v1231_v15 = vunpack.c.3.s8 %v438_v63  ;;  %v449_v5 = vld [vmem:[%s6675_s8 + $0x468] sm:$0xff] }
 0x16f   : > { %5365 = vmatpush.bf16.msra.mxu0 %v4170_v8  ;;  %v4178_v13 = vpack.c.bf16 %v2849_v46, %v2848_v4  ;;  %v2880_v17 = vcvt.s32.f32 %v1280_v49  ;;  %v2881_v18 = vcvt.s32.f32 %v1281_v9  ;;  %v1246_v22 = vunpack.c.2.s8 %v442_v7 }
 0x170   : > { %v4186_v24 = vpack.c.bf16 %v2865_v11, %v2864_v10  ;;  %v2830_v62 = vcvt.s32.f32 %v1230_v12  ;;  %v2831_v28 = vcvt.s32.f32 %v1231_v15  ;;  %v1247_v14 = vunpack.c.3.s8 %v442_v7 }
 0x171   : > { %5378 = vmatpush.bf16.msra.mxu1 %v4178_v13  ;;  %v4194_v30 = vpack.c.bf16 %v2881_v18, %v2880_v17  ;;  %v2846_v31 = vcvt.s32.f32 %v1246_v22  ;;  %v1262_v32 = vunpack.c.2.s8 %v446_v16  ;;  %v1263_v50 = vunpack.c.3.s8 %v446_v16 }
 0x172   : > { %5391 = vmatpush.bf16.msra.mxu2 %v4186_v24  ;;  %v4169_v34 = vpack.c.bf16 %v2831_v28, %v2830_v62  ;;  %v2847_v35 = vcvt.s32.f32 %v1247_v14  ;;  %v1278_v36 = vunpack.c.2.s8 %v450_v23  ;;  %v1279_v38 = vunpack.c.3.s8 %v450_v23 }
 0x173   : > { %5404 = vmatpush.bf16.msra.mxu3 %v4194_v30  ;;  %v2862_v39 = vcvt.s32.f32 %v1262_v32  ;;  %v2863_v40 = vcvt.s32.f32 %v1263_v50  ;;  %v5114_v41 = vadd.f32 %v6917_v33, %v6913_v61  ;;  %v1228_v42 = vunpack.c.0.s8 %v438_v63 }
 0x174   : > { %5366 = vmatpush.bf16.msra.mxu0 %v4169_v34  ;;  %v4177_v20 = vpack.c.bf16 %v2847_v35, %v2846_v31  ;;  %v2878_v21 = vcvt.s32.f32 %v1278_v36  ;;  %v2879_v43 = vcvt.s32.f32 %v1279_v38  ;;  %v1229_v26 = vunpack.c.1.s8 %v438_v63  ;;  %v445_v63 = vld [vmem:[%s6675_s8 + $0x448] sm:$0xff]  ;;  %v436_v36 = vld [vmem:[%s6675_s8 + $0x400] sm:$0xff] }
 0x175   : > { %v4185_v44 = vpack.c.bf16 %v2863_v40, %v2862_v39  ;;  %v2828_v25 = vcvt.s32.f32 %v1228_v42  ;;  %v1244_v37 = vunpack.c.0.s8 %v442_v7  ;;  %v1245_v45 = vunpack.c.1.s8 %v442_v7  ;;  %v6957_v42 = vpop.f32.mrf.mxu0 }
 0x176   : > { %5379 = vmatpush.bf16.msra.mxu1 %v4177_v20  ;;  %v4193_v47 = vpack.c.bf16 %v2879_v43, %v2878_v21  ;;  %v2829_v48 = vcvt.s32.f32 %v1229_v26  ;;  %v1260_v27 = vunpack.c.0.s8 %v446_v16  ;;  %v1261_v51 = vunpack.c.1.s8 %v446_v16  ;;  %v444_v26 = vld [vmem:[%s6675_s8 + $0x440] sm:$0xff] }
 0x177   : > { %5392 = vmatpush.bf16.msra.mxu2 %v4185_v44  ;;  %v2844_v61 = vcvt.s32.f32 %v1244_v37  ;;  %v2845_v33 = vcvt.s32.f32 %v1245_v45  ;;  %v1276_v54 = vunpack.c.0.s8 %v450_v23  ;;  %v1277_v55 = vunpack.c.1.s8 %v450_v23 }
 0x178   : > { %5405 = vmatpush.bf16.msra.mxu3 %v4193_v47  ;;  %v4168_v57 = vpack.c.bf16 %v2829_v48, %v2828_v25  ;;  %v2860_v58 = vcvt.s32.f32 %v1260_v27  ;;  %v2861_v59 = vcvt.s32.f32 %v1261_v51  ;;  %v5127_v60 = vadd.f32 %v6921_v53, %v5114_v41  ;;  %v440_v41 = vld [vmem:[%s6675_s8 + $0x420] sm:$0xff] }
 0x179   : > { %v4176_v0 = vpack.c.bf16 %v2845_v33, %v2844_v61  ;;  %v2876_v1 = vcvt.s32.f32 %v1276_v54  ;;  %v2877_v2 = vcvt.s32.f32 %v1277_v55  ;;  %v1226_v4 = vunpack.c.2.s8 %v437_v52 }
 0x17a   : > { %5367 = vmatpush.bf16.msra.mxu0 %v4168_v57  ;;  %v4184_v6 = vpack.c.bf16 %v2861_v59, %v2860_v58  ;;  %v1227_v7 = vunpack.c.3.s8 %v437_v52  ;;  %v1242_v8 = vunpack.c.2.s8 %v441_v56  ;;  %v1243_v46 = vunpack.c.3.s8 %v441_v56 }
 0x17b   : > { %5380 = vmatpush.bf16.msra.mxu1 %v4176_v0  ;;  %v4192_v49 = vpack.c.bf16 %v2877_v2, %v2876_v1  ;;  %v2826_v9 = vcvt.s32.f32 %v1226_v4  ;;  %v1258_v10 = vunpack.c.2.s8 %v445_v63  ;;  %v1259_v11 = vunpack.c.3.s8 %v445_v63 }
 0x17c   : > { %5393 = vmatpush.bf16.msra.mxu2 %v4184_v6  ;;  %v2827_v12 = vcvt.s32.f32 %v1227_v7  ;;  %v2842_v15 = vcvt.s32.f32 %v1242_v8  ;;  %v2843_v53 = vcvt.s32.f32 %v1243_v46  ;;  %v1274_v16 = vunpack.c.2.s8 %v449_v5 }
 0x17d   : > { %5406 = vmatpush.bf16.msra.mxu3 %v4192_v49  ;;  %v2858_v13 = vcvt.s32.f32 %v1258_v10  ;;  %v2859_v17 = vcvt.s32.f32 %v1259_v11  ;;  %v1275_v18 = vunpack.c.3.s8 %v449_v5  ;;  %v5140_v22 = vadd.f32 %v6927_v19, %v5127_v60  ;;  %v6961_v60 = vpop.f32.mrf.mxu1  ;;  %v5167_v10 = vpop.f32.mrf.mxu0 }
 0x17e   : > { %v4167_v23 = vpack.c.bf16 %v2827_v12, %v2826_v9  ;;  %v4175_v24 = vpack.c.bf16 %v2843_v53, %v2842_v15  ;;  %v2874_v62 = vcvt.s32.f32 %v1274_v16  ;;  %v1224_v28 = vunpack.c.0.s8 %v437_v52  ;;  %v455_v16 = vld [vmem:[%s6675_s8 + $0x498] sm:$0xff] }
 0x17f   : > { %v4183_v14 = vpack.c.bf16 %v2859_v17, %v2858_v13  ;;  %v2875_v29 = vcvt.s32.f32 %v1275_v18  ;;  %v6953_v30 = vadd.f32 %v6929_v3, %v5140_v22  ;;  %v1225_v31 = vunpack.c.1.s8 %v437_v52  ;;  %v448_v52 = vld [vmem:[%s6675_s8 + $0x460] sm:$0xff] }
 0x180   : > { %5368 = vmatpush.bf16.msra.mxu0 %v4167_v23  ;;  %5381 = vmatpush.bf16.msra.mxu1 %v4175_v24  ;;  %v2824_v32 = vcvt.s32.f32 %v1224_v28  ;;  %v1240_v50 = vunpack.c.0.s8 %v441_v56  ;;  %v1241_v34 = vunpack.c.1.s8 %v441_v56  ;;  %v1256_v35 = vunpack.c.0.s8 %v445_v63  ;;  %v6965_v23 = vld [vmem:[%s6675_s8 + $0x4b8] sm:$0xff] }
 0x181   : > { %5394 = vmatpush.bf16.msra.mxu2 %v4183_v14  ;;  %v4191_v19 = vpack.c.bf16 %v2875_v29, %v2874_v62  ;;  %v2825_v38 = vcvt.s32.f32 %v1225_v31  ;;  %v1257_v39 = vunpack.c.1.s8 %v445_v63  ;;  %v1272_v40 = vunpack.c.0.s8 %v449_v5  ;;  %v6967_v29 = vpop.f32.mrf.mxu2  ;;  %v6969_v31 = vpop.f32.mrf.mxu3 }
 0x182   : > { %v2840_v3 = vcvt.s32.f32 %v1240_v50  ;;  %v2841_v20 = vcvt.s32.f32 %v1241_v34  ;;  %v2856_v21 = vcvt.s32.f32 %v1256_v35  ;;  %v1273_v43 = vunpack.c.1.s8 %v449_v5 }
 0x183   : > { %5407 = vmatpush.bf16.msra.mxu3 %v4191_v19  ;;  %v4166_v44 = vpack.c.bf16 %v2825_v38, %v2824_v32  ;;  %v2857_v25 = vcvt.s32.f32 %v1257_v39  ;;  %v2872_v37 = vcvt.s32.f32 %v1272_v40  ;;  %v1222_v45 = vunpack.c.2.s8 %v436_v36 }
 0x184   : > { %v4174_v47 = vpack.c.bf16 %v2841_v20, %v2840_v3  ;;  %v2873_v48 = vcvt.s32.f32 %v1273_v43  ;;  %v1223_v27 = vunpack.c.3.s8 %v436_v36  ;;  %v1238_v51 = vunpack.c.2.s8 %v440_v41  ;;  %v4764_v3 = vld [vmem:[#allocation1] sm:$0xff] }
 0x185   : > { %5369 = vmatpush.bf16.msra.mxu0 %v4166_v44  ;;  %v4182_v61 = vpack.c.bf16 %v2857_v25, %v2856_v21  ;;  %v2822_v33 = vcvt.s32.f32 %v1222_v45  ;;  %v1239_v54 = vunpack.c.3.s8 %v440_v41  ;;  %v1254_v55 = vunpack.c.2.s8 %v444_v26  ;;  %v5180_v20 = vpop.f32.mrf.mxu1 }
 0x186   : > { %5382 = vmatpush.bf16.msra.mxu1 %v4174_v47  ;;  %v4190_v56 = vpack.c.bf16 %v2873_v48, %v2872_v37  ;;  %v2823_v57 = vcvt.s32.f32 %v1223_v27  ;;  %v2838_v58 = vcvt.s32.f32 %v1238_v51  ;;  %v1255_v59 = vunpack.c.3.s8 %v444_v26  ;;  %v4765_v48 = vld [vmem:[#allocation1 + $0x9] sm:$0xff] }
 0x187   : > { %5395 = vmatpush.bf16.msra.mxu2 %v4182_v61  ;;  %v2839_v63 = vcvt.s32.f32 %v1239_v54  ;;  %v2854_v0 = vcvt.s32.f32 %v1254_v55  ;;  %v1270_v1 = vunpack.c.2.s8 %v448_v52  ;;  %v1271_v2 = vunpack.c.3.s8 %v448_v52 }
 0x188   : > { %5408 = vmatpush.bf16.msra.mxu3 %v4190_v56  ;;  %v4165_v4 = vpack.c.bf16 %v2823_v57, %v2822_v33  ;;  %v2855_v5 = vcvt.s32.f32 %v1255_v59  ;;  %v1220_v6 = vunpack.c.0.s8 %v436_v36  ;;  %v1221_v7 = vunpack.c.1.s8 %v436_v36  ;;  %v463_v36 = vld [vmem:[%s6675_s8 + $0x4d8] sm:$0xff]  ;;  %v4766_v33 = vld [vmem:[#allocation1 + $0x12] sm:$0xff] }
 0x189   : > { %v4173_v8 = vpack.c.bf16 %v2839_v63, %v2838_v58  ;;  %v2870_v46 = vcvt.s32.f32 %v1270_v1  ;;  %v2871_v49 = vcvt.s32.f32 %v1271_v2  ;;  %v1236_v9 = vunpack.c.0.s8 %v440_v41  ;;  %v4767_v56 = vld [vmem:[#allocation1 + $0x1b] sm:$0xff] }
 0x18a   : > { %5370 = vmatpush.bf16.msra.mxu0 %v4165_v4  ;;  %v4181_v11 = vpack.c.bf16 %v2855_v5, %v2854_v0  ;;  %v2820_v12 = vcvt.s32.f32 %v1220_v6  ;;  %v2821_v15 = vcvt.s32.f32 %v1221_v7  ;;  %v1237_v53 = vunpack.c.1.s8 %v440_v41  ;;  %v467_v41 = vld [vmem:[%s6675_s8 + $0x4f8] sm:$0xff]  ;;  %v454_v7 = vld [vmem:[%s6675_s8 + $0x490] sm:$0xff] }
 0x18b   : > { %5383 = vmatpush.bf16.msra.mxu1 %v4173_v8  ;;  %v4189_v13 = vpack.c.bf16 %v2871_v49, %v2870_v46  ;;  %v2836_v17 = vcvt.s32.f32 %v1236_v9  ;;  %v1252_v18 = vunpack.c.0.s8 %v444_v26  ;;  %v1253_v22 = vunpack.c.1.s8 %v444_v26  ;;  %v5193_v8 = vpop.f32.mrf.mxu2  ;;  %v5206_v46 = vpop.f32.mrf.mxu3 }
 0x18c   : > { %5396 = vmatpush.bf16.msra.mxu2 %v4181_v11  ;;  %v4164_v24 = vpack.c.bf16 %v2821_v15, %v2820_v12  ;;  %v2837_v62 = vcvt.s32.f32 %v1237_v53  ;;  %v1268_v28 = vunpack.c.0.s8 %v448_v52  ;;  %v1269_v14 = vunpack.c.1.s8 %v448_v52  ;;  %v458_v12 = vld [vmem:[%s6675_s8 + $0x4b0] sm:$0xff] }
 0x18d   : > { %5409 = vmatpush.bf16.msra.mxu3 %v4189_v13  ;;  %v2852_v32 = vcvt.s32.f32 %v1252_v18  ;;  %v2853_v50 = vcvt.s32.f32 %v1253_v22  ;;  %v1298_v34 = vunpack.c.2.s8 %v455_v16  ;;  %v1299_v35 = vunpack.c.3.s8 %v455_v16 }
 0x18e   : > { %5371 = vmatpush.bf16.msra.mxu0 %v4164_v24  ;;  %v4172_v19 = vpack.c.bf16 %v2837_v62, %v2836_v17  ;;  %v2868_v38 = vcvt.s32.f32 %v1268_v28  ;;  %v2869_v39 = vcvt.s32.f32 %v1269_v14  ;;  %v1314_v40 = vunpack.c.2.s8 %v6965_v23  ;;  %v462_v24 = vld [vmem:[%s6675_s8 + $0x4d0] sm:$0xff] }
 0x18f   : > { %v4180_v21 = vpack.c.bf16 %v2853_v50, %v2852_v32  ;;  %v2898_v43 = vcvt.s32.f32 %v1298_v34  ;;  %v2899_v26 = vcvt.s32.f32 %v1299_v35  ;;  %v1315_v44 = vunpack.c.3.s8 %v6965_v23  ;;  %v466_v50 = vld [vmem:[%s6675_s8 + $0x4f0] sm:$0xff] }
 0x190   : > { %5384 = vmatpush.bf16.msra.mxu1 %v4172_v19  ;;  %v4188_v25 = vpack.c.bf16 %v2869_v39, %v2868_v38  ;;  %v2914_v37 = vcvt.s32.f32 %v1314_v40  ;;  %v1330_v45 = vunpack.c.2.s8 %v463_v36  ;;  %v1331_v47 = vunpack.c.3.s8 %v463_v36 }
 0x191   : > { %5397 = vmatpush.bf16.msra.mxu2 %v4180_v21  ;;  %v4203_v27 = vpack.c.bf16 %v2899_v26, %v2898_v43  ;;  %v2915_v51 = vcvt.s32.f32 %v1315_v44  ;;  %v1346_v52 = vunpack.c.2.s8 %v467_v41  ;;  %v1347_v61 = vunpack.c.3.s8 %v467_v41  ;;  %5372 = vmatmul.bf16.vlgmr.msra.gmra.mxu0 %v4764_v3 }
 0x192   : > { %5410 = vmatpush.bf16.msra.mxu3 %v4188_v25  ;;  %v2930_v54 = vcvt.s32.f32 %v1330_v45  ;;  %v2931_v55 = vcvt.s32.f32 %v1331_v47  ;;  %v1296_v57 = vunpack.c.0.s8 %v455_v16  ;;  %v1297_v58 = vunpack.c.1.s8 %v455_v16 }
 0x193   : > { %5416 = vmatpush.bf16.msrb.mxu0 %v4203_v27  ;;  %v4211_v59 = vpack.c.bf16 %v2915_v51, %v2914_v37  ;;  %v2946_v63 = vcvt.s32.f32 %v1346_v52  ;;  %v2947_v0 = vcvt.s32.f32 %v1347_v61  ;;  %5385 = vmatmul.bf16.vlgmr.msra.gmra.mxu1 %v4765_v48  ;;  %v1312_v1 = vunpack.c.0.s8 %v6965_v23 }
 0x194   : > { %v4219_v2 = vpack.c.bf16 %v2931_v55, %v2930_v54  ;;  %5398 = vmatmul.bf16.vlgmr.msra.gmra.mxu2 %v4766_v33  ;;  %v2896_v4 = vcvt.s32.f32 %v1296_v57  ;;  %v2897_v5 = vcvt.s32.f32 %v1297_v58  ;;  %v1313_v6 = vunpack.c.1.s8 %v6965_v23  ;;  %v453_v58 = vld [vmem:[%s6675_s8 + $0x488] sm:$0xff] }
 0x195   : > { %5429 = vmatpush.bf16.msrb.mxu1 %v4211_v59  ;;  %v4227_v49 = vpack.c.bf16 %v2947_v0, %v2946_v63  ;;  %5411 = vmatmul.bf16.vlgmr.msra.gmra.mxu3 %v4767_v56  ;;  %v2912_v9 = vcvt.s32.f32 %v1312_v1  ;;  %v1328_v10 = vunpack.c.0.s8 %v463_v36  ;;  %v1329_v11 = vunpack.c.1.s8 %v463_v36  ;;  %v457_v0 = vld [vmem:[%s6675_s8 + $0x4a8] sm:$0xff] }
 0x196   : > { %5442 = vmatpush.bf16.msrb.mxu2 %v4219_v2  ;;  %v4202_v15 = vpack.c.bf16 %v2897_v5, %v2896_v4  ;;  %v2913_v53 = vcvt.s32.f32 %v1313_v6  ;;  %v1344_v16 = vunpack.c.0.s8 %v467_v41  ;;  %v1345_v13 = vunpack.c.1.s8 %v467_v41  ;;  %v461_v6 = vld [vmem:[%s6675_s8 + $0x4c8] sm:$0xff] }
 0x197   : > { %5455 = vmatpush.bf16.msrb.mxu3 %v4227_v49  ;;  %v2928_v17 = vcvt.s32.f32 %v1328_v10  ;;  %v2929_v18 = vcvt.s32.f32 %v1329_v11  ;;  %v1294_v22 = vunpack.c.2.s8 %v454_v7  ;;  %v1295_v23 = vunpack.c.3.s8 %v454_v7 }
 0x198   : > { %5417 = vmatpush.bf16.msrb.mxu0 %v4202_v15  ;;  %v4210_v62 = vpack.c.bf16 %v2913_v53, %v2912_v9  ;;  %v2944_v28 = vcvt.s32.f32 %v1344_v16  ;;  %v2945_v14 = vcvt.s32.f32 %v1345_v13  ;;  %v1310_v32 = vunpack.c.2.s8 %v458_v12  ;;  %v465_v9 = vld [vmem:[%s6675_s8 + $0x4e8] sm:$0xff] }
 0x199   : > { %v4218_v34 = vpack.c.bf16 %v2929_v18, %v2928_v17  ;;  %v2894_v35 = vcvt.s32.f32 %v1294_v22  ;;  %v2895_v36 = vcvt.s32.f32 %v1295_v23  ;;  %v1311_v19 = vunpack.c.3.s8 %v458_v12 }
 0x19a   : > { %5430 = vmatpush.bf16.msrb.mxu1 %v4210_v62  ;;  %v4226_v38 = vpack.c.bf16 %v2945_v14, %v2944_v28  ;;  %v2910_v39 = vcvt.s32.f32 %v1310_v32  ;;  %v1326_v40 = vunpack.c.2.s8 %v462_v24  ;;  %v1327_v41 = vunpack.c.3.s8 %v462_v24 }
 0x19b   : > { %5443 = vmatpush.bf16.msrb.mxu2 %v4218_v34  ;;  %v4201_v3 = vpack.c.bf16 %v2895_v36, %v2894_v35  ;;  %v2911_v20 = vcvt.s32.f32 %v1311_v19  ;;  %v1342_v21 = vunpack.c.2.s8 %v466_v50  ;;  %v1343_v43 = vunpack.c.3.s8 %v466_v50 }
 0x19c   : > { %5456 = vmatpush.bf16.msrb.mxu3 %v4226_v38  ;;  %v2926_v26 = vcvt.s32.f32 %v1326_v40  ;;  %v2927_v44 = vcvt.s32.f32 %v1327_v41  ;;  %v5166_v25 = vadd.f32 %v6957_v42, %v6953_v30  ;;  %v1292_v37 = vunpack.c.0.s8 %v454_v7 }
 0x19d   : > { %5418 = vmatpush.bf16.msrb.mxu0 %v4201_v3  ;;  %v4209_v45 = vpack.c.bf16 %v2911_v20, %v2910_v39  ;;  %v2942_v47 = vcvt.s32.f32 %v1342_v21  ;;  %v2943_v48 = vcvt.s32.f32 %v1343_v43  ;;  %v1293_v27 = vunpack.c.1.s8 %v454_v7  ;;  %v452_v21 = vld [vmem:[%s6675_s8 + $0x480] sm:$0xff] }
 0x19e   : > { %v4217_v51 = vpack.c.bf16 %v2927_v44, %v2926_v26  ;;  %v2892_v52 = vcvt.s32.f32 %v1292_v37  ;;  %v1308_v61 = vunpack.c.0.s8 %v458_v12  ;;  %v1309_v33 = vunpack.c.1.s8 %v458_v12  ;;  %v6994_v37 = vpop.f32.mrf.mxu0 }
 0x19f   : > { %5431 = vmatpush.bf16.msrb.mxu1 %v4209_v45  ;;  %v4225_v54 = vpack.c.bf16 %v2943_v48, %v2942_v47  ;;  %v2893_v55 = vcvt.s32.f32 %v1293_v27  ;;  %v1324_v56 = vunpack.c.0.s8 %v462_v24  ;;  %v1325_v57 = vunpack.c.1.s8 %v462_v24  ;;  %v460_v27 = vld [vmem:[%s6675_s8 + $0x4c0] sm:$0xff] }
 0x1a0   : > { %5444 = vmatpush.bf16.msrb.mxu2 %v4217_v51  ;;  %v2908_v30 = vcvt.s32.f32 %v1308_v61  ;;  %v2909_v42 = vcvt.s32.f32 %v1309_v33  ;;  %v1340_v59 = vunpack.c.0.s8 %v466_v50  ;;  %v1341_v63 = vunpack.c.1.s8 %v466_v50 }
 0x1a1   : > { %5457 = vmatpush.bf16.msrb.mxu3 %v4225_v54  ;;  %v4200_v1 = vpack.c.bf16 %v2893_v55, %v2892_v52  ;;  %v2924_v2 = vcvt.s32.f32 %v1324_v56  ;;  %v2925_v4 = vcvt.s32.f32 %v1325_v57  ;;  %v5179_v5 = vadd.f32 %v6961_v60, %v5166_v25  ;;  %v456_v25 = vld [vmem:[%s6675_s8 + $0x4a0] sm:$0xff] }
 0x1a2   : > { %v4208_v7 = vpack.c.bf16 %v2909_v42, %v2908_v30  ;;  %v2940_v8 = vcvt.s32.f32 %v1340_v59  ;;  %v2941_v46 = vcvt.s32.f32 %v1341_v63  ;;  %v1290_v49 = vunpack.c.2.s8 %v453_v58 }
 0x1a3   : > { %5419 = vmatpush.bf16.msrb.mxu0 %v4200_v1  ;;  %v4216_v10 = vpack.c.bf16 %v2925_v4, %v2924_v2  ;;  %v1291_v11 = vunpack.c.3.s8 %v453_v58  ;;  %v1306_v12 = vunpack.c.2.s8 %v457_v0  ;;  %v1307_v15 = vunpack.c.3.s8 %v457_v0 }
 0x1a4   : > { %5432 = vmatpush.bf16.msrb.mxu1 %v4208_v7  ;;  %v4224_v53 = vpack.c.bf16 %v2941_v46, %v2940_v8  ;;  %v2890_v16 = vcvt.s32.f32 %v1290_v49  ;;  %v1322_v13 = vunpack.c.2.s8 %v461_v6  ;;  %v1323_v17 = vunpack.c.3.s8 %v461_v6 }
 0x1a5   : > { %5445 = vmatpush.bf16.msrb.mxu2 %v4216_v10  ;;  %v2891_v18 = vcvt.s32.f32 %v1291_v11  ;;  %v2906_v22 = vcvt.s32.f32 %v1306_v12  ;;  %v2907_v60 = vcvt.s32.f32 %v1307_v15  ;;  %v1338_v23 = vunpack.c.2.s8 %v465_v9 }
 0x1a6   : > { %5458 = vmatpush.bf16.msrb.mxu3 %v4224_v53  ;;  %v2922_v24 = vcvt.s32.f32 %v1322_v13  ;;  %v2923_v62 = vcvt.s32.f32 %v1323_v17  ;;  %v1339_v28 = vunpack.c.3.s8 %v465_v9  ;;  %v5192_v14 = vadd.f32 %v6967_v29, %v5179_v5  ;;  %v6998_v5 = vpop.f32.mrf.mxu1  ;;  %v5219_v13 = vpop.f32.mrf.mxu0 }
 0x1a7   : > { %v4199_v32 = vpack.c.bf16 %v2891_v18, %v2890_v16  ;;  %v4207_v50 = vpack.c.bf16 %v2907_v60, %v2906_v22  ;;  %v2938_v34 = vcvt.s32.f32 %v1338_v23  ;;  %v1288_v35 = vunpack.c.0.s8 %v453_v58  ;;  %v471_v23 = vld [vmem:[%s6675_s8 + $0x518] sm:$0xff] }
 0x1a8   : > { %v4215_v36 = vpack.c.bf16 %v2923_v62, %v2922_v24  ;;  %v2939_v19 = vcvt.s32.f32 %v1339_v28  ;;  %v6990_v38 = vadd.f32 %v6969_v31, %v5192_v14  ;;  %v1289_v39 = vunpack.c.1.s8 %v453_v58  ;;  %v464_v58 = vld [vmem:[%s6675_s8 + $0x4e0] sm:$0xff] }
 0x1a9   : > { %5420 = vmatpush.bf16.msrb.mxu0 %v4199_v32  ;;  %5433 = vmatpush.bf16.msrb.mxu1 %v4207_v50  ;;  %v2888_v40 = vcvt.s32.f32 %v1288_v35  ;;  %v1304_v41 = vunpack.c.0.s8 %v457_v0  ;;  %v1305_v3 = vunpack.c.1.s8 %v457_v0  ;;  %v1320_v20 = vunpack.c.0.s8 %v461_v6  ;;  %v7002_v32 = vld [vmem:[%s6675_s8 + $0x538] sm:$0xff] }
 0x1aa   : > { %5446 = vmatpush.bf16.msrb.mxu2 %v4215_v36  ;;  %v4223_v29 = vpack.c.bf16 %v2939_v19, %v2938_v34  ;;  %v2889_v43 = vcvt.s32.f32 %v1289_v39  ;;  %v1321_v26 = vunpack.c.1.s8 %v461_v6  ;;  %v1336_v44 = vunpack.c.0.s8 %v465_v9  ;;  %v7004_v19 = vpop.f32.mrf.mxu2  ;;  %v7006_v39 = vpop.f32.mrf.mxu3 }
 0x1ab   : > { %v2904_v31 = vcvt.s32.f32 %v1304_v41  ;;  %v2905_v45 = vcvt.s32.f32 %v1305_v3  ;;  %v2920_v47 = vcvt.s32.f32 %v1320_v20  ;;  %v1337_v48 = vunpack.c.1.s8 %v465_v9 }
 0x1ac   : > { %5459 = vmatpush.bf16.msrb.mxu3 %v4223_v29  ;;  %v4198_v51 = vpack.c.bf16 %v2889_v43, %v2888_v40  ;;  %v2921_v52 = vcvt.s32.f32 %v1321_v26  ;;  %v2936_v61 = vcvt.s32.f32 %v1336_v44  ;;  %v1286_v33 = vunpack.c.2.s8 %v452_v21 }
 0x1ad   : > { %v4206_v54 = vpack.c.bf16 %v2905_v45, %v2904_v31  ;;  %v2937_v55 = vcvt.s32.f32 %v1337_v48  ;;  %v1287_v56 = vunpack.c.3.s8 %v452_v21  ;;  %v1302_v57 = vunpack.c.2.s8 %v456_v25  ;;  %v4768_v31 = vld [vmem:[#allocation1 + $0x24] sm:$0xff] }
 0x1ae   : > { %5421 = vmatpush.bf16.msrb.mxu0 %v4198_v51  ;;  %v4214_v30 = vpack.c.bf16 %v2921_v52, %v2920_v47  ;;  %v2886_v42 = vcvt.s32.f32 %v1286_v33  ;;  %v1303_v59 = vunpack.c.3.s8 %v456_v25  ;;  %v1318_v63 = vunpack.c.2.s8 %v460_v27  ;;  %v5232_v45 = vpop.f32.mrf.mxu1 }
 0x1af   : > { %5434 = vmatpush.bf16.msrb.mxu1 %v4206_v54  ;;  %v4222_v0 = vpack.c.bf16 %v2937_v55, %v2936_v61  ;;  %v2887_v1 = vcvt.s32.f32 %v1287_v56  ;;  %v2902_v2 = vcvt.s32.f32 %v1302_v57  ;;  %v1319_v4 = vunpack.c.3.s8 %v460_v27  ;;  %v4769_v55 = vld [vmem:[#allocation1 + $0x2d] sm:$0xff] }
 0x1b0   : > { %5447 = vmatpush.bf16.msrb.mxu2 %v4214_v30  ;;  %v2903_v6 = vcvt.s32.f32 %v1303_v59  ;;  %v2918_v7 = vcvt.s32.f32 %v1318_v63  ;;  %v1334_v8 = vunpack.c.2.s8 %v464_v58  ;;  %v1335_v46 = vunpack.c.3.s8 %v464_v58 }
 0x1b1   : > { %5460 = vmatpush.bf16.msrb.mxu3 %v4222_v0  ;;  %v4197_v49 = vpack.c.bf16 %v2887_v1, %v2886_v42  ;;  %v2919_v9 = vcvt.s32.f32 %v1319_v4  ;;  %v1284_v10 = vunpack.c.0.s8 %v452_v21  ;;  %v1285_v11 = vunpack.c.1.s8 %v452_v21  ;;  %v479_v21 = vld [vmem:[%s6675_s8 + $0x558] sm:$0xff]  ;;  %v4770_v42 = vld [vmem:[#allocation1 + $0x36] sm:$0xff] }
 0x1b2   : > { %v4205_v12 = vpack.c.bf16 %v2903_v6, %v2902_v2  ;;  %v2934_v15 = vcvt.s32.f32 %v1334_v8  ;;  %v2935_v53 = vcvt.s32.f32 %v1335_v46  ;;  %v1300_v16 = vunpack.c.0.s8 %v456_v25  ;;  %v4771_v0 = vld [vmem:[#allocation1 + $0x3f] sm:$0xff] }
 0x1b3   : > { %5422 = vmatpush.bf16.msrb.mxu0 %v4197_v49  ;;  %v4213_v17 = vpack.c.bf16 %v2919_v9, %v2918_v7  ;;  %v2884_v18 = vcvt.s32.f32 %v1284_v10  ;;  %v2885_v22 = vcvt.s32.f32 %v1285_v11  ;;  %v1301_v60 = vunpack.c.1.s8 %v456_v25  ;;  %v483_v25 = vld [vmem:[%s6675_s8 + $0x578] sm:$0xff]  ;;  %v470_v11 = vld [vmem:[%s6675_s8 + $0x510] sm:$0xff] }
 0x1b4   : > { %5435 = vmatpush.bf16.msrb.mxu1 %v4205_v12  ;;  %v4221_v24 = vpack.c.bf16 %v2935_v53, %v2934_v15  ;;  %v2900_v62 = vcvt.s32.f32 %v1300_v16  ;;  %v1316_v28 = vunpack.c.0.s8 %v460_v27  ;;  %v1317_v14 = vunpack.c.1.s8 %v460_v27  ;;  %v5245_v12 = vpop.f32.mrf.mxu2  ;;  %v5258_v15 = vpop.f32.mrf.mxu3 }
 0x1b5   : > { %5448 = vmatpush.bf16.msrb.mxu2 %v4213_v17  ;;  %v4196_v50 = vpack.c.bf16 %v2885_v22, %v2884_v18  ;;  %v2901_v34 = vcvt.s32.f32 %v1301_v60  ;;  %v1332_v35 = vunpack.c.0.s8 %v464_v58  ;;  %v1333_v36 = vunpack.c.1.s8 %v464_v58  ;;  %v474_v18 = vld [vmem:[%s6675_s8 + $0x530] sm:$0xff] }
 0x1b6   : > { %5461 = vmatpush.bf16.msrb.mxu3 %v4221_v24  ;;  %v2916_v40 = vcvt.s32.f32 %v1316_v28  ;;  %v2917_v41 = vcvt.s32.f32 %v1317_v14  ;;  %v1362_v3 = vunpack.c.2.s8 %v471_v23  ;;  %v1363_v20 = vunpack.c.3.s8 %v471_v23 }
 0x1b7   : > { %5423 = vmatpush.bf16.msrb.mxu0 %v4196_v50  ;;  %v4204_v29 = vpack.c.bf16 %v2901_v34, %v2900_v62  ;;  %v2932_v43 = vcvt.s32.f32 %v1332_v35  ;;  %v2933_v26 = vcvt.s32.f32 %v1333_v36  ;;  %v1378_v44 = vunpack.c.2.s8 %v7002_v32  ;;  %v478_v50 = vld [vmem:[%s6675_s8 + $0x550] sm:$0xff] }
 0x1b8   : > { %v4212_v47 = vpack.c.bf16 %v2917_v41, %v2916_v40  ;;  %v2962_v48 = vcvt.s32.f32 %v1362_v3  ;;  %v2963_v27 = vcvt.s32.f32 %v1363_v20  ;;  %v1379_v51 = vunpack.c.3.s8 %v7002_v32  ;;  %v482_v41 = vld [vmem:[%s6675_s8 + $0x570] sm:$0xff] }
 0x1b9   : > { %5436 = vmatpush.bf16.msrb.mxu1 %v4204_v29  ;;  %v4220_v52 = vpack.c.bf16 %v2933_v26, %v2932_v43  ;;  %v2978_v61 = vcvt.s32.f32 %v1378_v44  ;;  %v1394_v33 = vunpack.c.2.s8 %v479_v21  ;;  %v1395_v54 = vunpack.c.3.s8 %v479_v21  ;;  %v4714_v43 = vld [vmem:[%s7631_s0 + $0x28] sm:$0xff] }
 0x1ba   : > { %5449 = vmatpush.bf16.msrb.mxu2 %v4212_v47  ;;  %v4235_v56 = vpack.c.bf16 %v2963_v27, %v2962_v48  ;;  %v2979_v57 = vcvt.s32.f32 %v1379_v51  ;;  %v1410_v58 = vunpack.c.2.s8 %v483_v25  ;;  %v1411_v30 = vunpack.c.3.s8 %v483_v25  ;;  %5424 = vmatmul.bf16.vlgmr.msrb.gmra.mxu0 %v4768_v31  ;;  %4773 = vst [vmem:[#allocation1] ss:$9 sm:$0xff] %v4714_v43 }
 0x1bb   : > { %5462 = vmatpush.bf16.msrb.mxu3 %v4220_v52  ;;  %v2994_v59 = vcvt.s32.f32 %v1394_v33  ;;  %v2995_v63 = vcvt.s32.f32 %v1395_v54  ;;  %v1360_v1 = vunpack.c.0.s8 %v471_v23  ;;  %v1361_v2 = vunpack.c.1.s8 %v471_v23 }
 0x1bc   : > { %5468 = vmatpush.bf16.msra.mxu0 %v4235_v56  ;;  %v4243_v4 = vpack.c.bf16 %v2979_v57, %v2978_v61  ;;  %v3010_v6 = vcvt.s32.f32 %v1410_v58  ;;  %v3011_v7 = vcvt.s32.f32 %v1411_v30  ;;  %5437 = vmatmul.bf16.vlgmr.msrb.gmra.mxu1 %v4769_v55  ;;  %v1376_v8 = vunpack.c.0.s8 %v7002_v32 }
 0x1bd   : > { %v4251_v46 = vpack.c.bf16 %v2995_v63, %v2994_v59  ;;  %5450 = vmatmul.bf16.vlgmr.msrb.gmra.mxu2 %v4770_v42  ;;  %v2960_v49 = vcvt.s32.f32 %v1360_v1  ;;  %v2961_v9 = vcvt.s32.f32 %v1361_v2  ;;  %v1377_v10 = vunpack.c.1.s8 %v7002_v32 }
 0x1be   : > { %5481 = vmatpush.bf16.msra.mxu1 %v4243_v4  ;;  %v4259_v53 = vpack.c.bf16 %v3011_v7, %v3010_v6  ;;  %5463 = vmatmul.bf16.vlgmr.msrb.gmra.mxu3 %v4771_v0  ;;  %v2976_v16 = vcvt.s32.f32 %v1376_v8  ;;  %v1392_v13 = vunpack.c.0.s8 %v479_v21  ;;  %v1393_v17 = vunpack.c.1.s8 %v479_v21  ;;  %v469_v4 = vld [vmem:[%s6675_s8 + $0x508] sm:$0xff] }
 0x1bf   : > { %5494 = vmatpush.bf16.msra.mxu2 %v4251_v46  ;;  %v4234_v22 = vpack.c.bf16 %v2961_v9, %v2960_v49  ;;  %v2977_v60 = vcvt.s32.f32 %v1377_v10  ;;  %v1408_v23 = vunpack.c.0.s8 %v483_v25  ;;  %v1409_v24 = vunpack.c.1.s8 %v483_v25  ;;  %v473_v8 = vld [vmem:[%s6675_s8 + $0x528] sm:$0xff] }
 0x1c0   : > { %5507 = vmatpush.bf16.msra.mxu3 %v4259_v53  ;;  %v2992_v62 = vcvt.s32.f32 %v1392_v13  ;;  %v2993_v28 = vcvt.s32.f32 %v1393_v17  ;;  %v1358_v14 = vunpack.c.2.s8 %v470_v11  ;;  %v1359_v32 = vunpack.c.3.s8 %v470_v11  ;;  %v481_v13 = vld [vmem:[%s6675_s8 + $0x568] sm:$0xff] }
 0x1c1   : > { %5469 = vmatpush.bf16.msra.mxu0 %v4234_v22  ;;  %v4242_v34 = vpack.c.bf16 %v2977_v60, %v2976_v16  ;;  %v3008_v35 = vcvt.s32.f32 %v1408_v23  ;;  %v3009_v36 = vcvt.s32.f32 %v1409_v24  ;;  %v1374_v40 = vunpack.c.2.s8 %v474_v18 }
 0x1c2   : > { %v4250_v3 = vpack.c.bf16 %v2993_v28, %v2992_v62  ;;  %v2958_v20 = vcvt.s32.f32 %v1358_v14  ;;  %v2959_v21 = vcvt.s32.f32 %v1359_v32  ;;  %v1375_v29 = vunpack.c.3.s8 %v474_v18 }
 0x1c3   : > { %5482 = vmatpush.bf16.msra.mxu1 %v4242_v34  ;;  %v4258_v26 = vpack.c.bf16 %v3009_v36, %v3008_v35  ;;  %v2974_v44 = vcvt.s32.f32 %v1374_v40  ;;  %v1390_v25 = vunpack.c.2.s8 %v478_v50  ;;  %v1391_v31 = vunpack.c.3.s8 %v478_v50 }
 0x1c4   : > { %5495 = vmatpush.bf16.msra.mxu2 %v4250_v3  ;;  %v4233_v45 = vpack.c.bf16 %v2959_v21, %v2958_v20  ;;  %v2975_v47 = vcvt.s32.f32 %v1375_v29  ;;  %v1406_v48 = vunpack.c.2.s8 %v482_v41  ;;  %v1407_v27 = vunpack.c.3.s8 %v482_v41 }
 0x1c5   : > { %5508 = vmatpush.bf16.msra.mxu3 %v4258_v26  ;;  %v2990_v51 = vcvt.s32.f32 %v1390_v25  ;;  %v2991_v52 = vcvt.s32.f32 %v1391_v31  ;;  %v5218_v61 = vadd.f32 %v6994_v37, %v6990_v38  ;;  %v1356_v33 = vunpack.c.0.s8 %v470_v11 }
 0x1c6   : > { %5470 = vmatpush.bf16.msra.mxu0 %v4233_v45  ;;  %v4241_v54 = vpack.c.bf16 %v2975_v47, %v2974_v44  ;;  %v3006_v55 = vcvt.s32.f32 %v1406_v48  ;;  %v3007_v56 = vcvt.s32.f32 %v1407_v27  ;;  %v1357_v57 = vunpack.c.1.s8 %v470_v11  ;;  %v477_v11 = vld [vmem:[%s6675_s8 + $0x548] sm:$0xff]  ;;  %v468_v48 = vld [vmem:[%s6675_s8 + $0x500] sm:$0xff] }
 0x1c7   : > { %v4249_v58 = vpack.c.bf16 %v2991_v52, %v2990_v51  ;;  %v2956_v30 = vcvt.s32.f32 %v1356_v33  ;;  %v1372_v42 = vunpack.c.0.s8 %v474_v18  ;;  %v1373_v59 = vunpack.c.1.s8 %v474_v18  ;;  %v7034_v33 = vpop.f32.mrf.mxu0 }
 0x1c8   : > { %5483 = vmatpush.bf16.msra.mxu1 %v4241_v54  ;;  %v4257_v63 = vpack.c.bf16 %v3007_v56, %v3006_v55  ;;  %v2957_v0 = vcvt.s32.f32 %v1357_v57  ;;  %v1388_v1 = vunpack.c.0.s8 %v478_v50  ;;  %v1389_v2 = vunpack.c.1.s8 %v478_v50  ;;  %v476_v57 = vld [vmem:[%s6675_s8 + $0x540] sm:$0xff] }
 0x1c9   : > { %5496 = vmatpush.bf16.msra.mxu2 %v4249_v58  ;;  %v2972_v38 = vcvt.s32.f32 %v1372_v42  ;;  %v2973_v37 = vcvt.s32.f32 %v1373_v59  ;;  %v1404_v6 = vunpack.c.0.s8 %v482_v41  ;;  %v1405_v7 = vunpack.c.1.s8 %v482_v41 }
 0x1ca   : > { %5509 = vmatpush.bf16.msra.mxu3 %v4257_v63  ;;  %v4232_v46 = vpack.c.bf16 %v2957_v0, %v2956_v30  ;;  %v2988_v49 = vcvt.s32.f32 %v1388_v1  ;;  %v2989_v9 = vcvt.s32.f32 %v1389_v2  ;;  %v5231_v10 = vadd.f32 %v6998_v5, %v5218_v61  ;;  %v472_v61 = vld [vmem:[%s6675_s8 + $0x520] sm:$0xff] }
 0x1cb   : > { %v4240_v12 = vpack.c.bf16 %v2973_v37, %v2972_v38  ;;  %v3004_v15 = vcvt.s32.f32 %v1404_v6  ;;  %v3005_v53 = vcvt.s32.f32 %v1405_v7  ;;  %v1354_v16 = vunpack.c.2.s8 %v469_v4 }
 0x1cc   : > { %5471 = vmatpush.bf16.msra.mxu0 %v4232_v46  ;;  %v4248_v17 = vpack.c.bf16 %v2989_v9, %v2988_v49  ;;  %v1355_v18 = vunpack.c.3.s8 %v469_v4  ;;  %v1370_v22 = vunpack.c.2.s8 %v473_v8  ;;  %v1371_v60 = vunpack.c.3.s8 %v473_v8 }
 0x1cd   : > { %5484 = vmatpush.bf16.msra.mxu1 %v4240_v12  ;;  %v4256_v23 = vpack.c.bf16 %v3005_v53, %v3004_v15  ;;  %v2954_v24 = vcvt.s32.f32 %v1354_v16  ;;  %v1386_v62 = vunpack.c.2.s8 %v477_v11  ;;  %v1387_v28 = vunpack.c.3.s8 %v477_v11 }
 0x1ce   : > { %5497 = vmatpush.bf16.msra.mxu2 %v4248_v17  ;;  %v2955_v14 = vcvt.s32.f32 %v1355_v18  ;;  %v2970_v32 = vcvt.s32.f32 %v1370_v22  ;;  %v2971_v5 = vcvt.s32.f32 %v1371_v60  ;;  %v1402_v50 = vunpack.c.2.s8 %v481_v13 }
 0x1cf   : > { %5510 = vmatpush.bf16.msra.mxu3 %v4256_v23  ;;  %v2986_v34 = vcvt.s32.f32 %v1386_v62  ;;  %v2987_v35 = vcvt.s32.f32 %v1387_v28  ;;  %v1403_v36 = vunpack.c.3.s8 %v481_v13  ;;  %v5244_v40 = vadd.f32 %v7004_v19, %v5231_v10  ;;  %v7038_v10 = vpop.f32.mrf.mxu1  ;;  %v5271_v62 = vpop.f32.mrf.mxu0 }
 0x1d0   : > { %v4231_v41 = vpack.c.bf16 %v2955_v14, %v2954_v24  ;;  %v4239_v3 = vpack.c.bf16 %v2971_v5, %v2970_v32  ;;  %v3002_v20 = vcvt.s32.f32 %v1402_v50  ;;  %v1352_v21 = vunpack.c.0.s8 %v469_v4  ;;  %v487_v50 = vld [vmem:[%s6675_s8 + $0x598] sm:$0xff] }
 0x1d1   : > { %v4247_v29 = vpack.c.bf16 %v2987_v35, %v2986_v34  ;;  %v3003_v43 = vcvt.s32.f32 %v1403_v36  ;;  %v7030_v26 = vadd.f32 %v7006_v39, %v5244_v40  ;;  %v1353_v44 = vunpack.c.1.s8 %v469_v4  ;;  %v480_v4 = vld [vmem:[%s6675_s8 + $0x560] sm:$0xff] }
 0x1d2   : > { %5472 = vmatpush.bf16.msra.mxu0 %v4231_v41  ;;  %5485 = vmatpush.bf16.msra.mxu1 %v4239_v3  ;;  %v2952_v25 = vcvt.s32.f32 %v1352_v21  ;;  %v1368_v31 = vunpack.c.0.s8 %v473_v8  ;;  %v1369_v45 = vunpack.c.1.s8 %v473_v8  ;;  %v1384_v47 = vunpack.c.0.s8 %v477_v11  ;;  %v7042_v41 = vld [vmem:[%s6675_s8 + $0x5b8] sm:$0xff] }
 0x1d3   : > { %5498 = vmatpush.bf16.msra.mxu2 %v4247_v29  ;;  %v4255_v19 = vpack.c.bf16 %v3003_v43, %v3002_v20  ;;  %v2953_v27 = vcvt.s32.f32 %v1353_v44  ;;  %v1385_v51 = vunpack.c.1.s8 %v477_v11  ;;  %v1400_v52 = vunpack.c.0.s8 %v481_v13  ;;  %v7044_v43 = vpop.f32.mrf.mxu2  ;;  %v7046_v44 = vpop.f32.mrf.mxu3 }
 0x1d4   : > { %v2968_v39 = vcvt.s32.f32 %v1368_v31  ;;  %v2969_v54 = vcvt.s32.f32 %v1369_v45  ;;  %v2984_v55 = vcvt.s32.f32 %v1384_v47  ;;  %v1401_v56 = vunpack.c.1.s8 %v481_v13 }
 0x1d5   : > { %5511 = vmatpush.bf16.msra.mxu3 %v4255_v19  ;;  %v4230_v58 = vpack.c.bf16 %v2953_v27, %v2952_v25  ;;  %v2985_v30 = vcvt.s32.f32 %v1385_v51  ;;  %v3000_v42 = vcvt.s32.f32 %v1400_v52  ;;  %v1350_v59 = vunpack.c.2.s8 %v468_v48 }
 0x1d6   : > { %v4238_v63 = vpack.c.bf16 %v2969_v54, %v2968_v39  ;;  %v3001_v0 = vcvt.s32.f32 %v1401_v56  ;;  %v1351_v1 = vunpack.c.3.s8 %v468_v48  ;;  %v1366_v2 = vunpack.c.2.s8 %v472_v61  ;;  %v4774_v39 = vld [vmem:[#allocation1] sm:$0xff] }
 0x1d7   : > { %5473 = vmatpush.bf16.msra.mxu0 %v4230_v58  ;;  %v4246_v38 = vpack.c.bf16 %v2985_v30, %v2984_v55  ;;  %v2950_v37 = vcvt.s32.f32 %v1350_v59  ;;  %v1367_v6 = vunpack.c.3.s8 %v472_v61  ;;  %v1382_v7 = vunpack.c.2.s8 %v476_v57  ;;  %v5284_v54 = vpop.f32.mrf.mxu1 }
 0x1d8   : > { %5486 = vmatpush.bf16.msra.mxu1 %v4238_v63  ;;  %v4254_v8 = vpack.c.bf16 %v3001_v0, %v3000_v42  ;;  %v2951_v46 = vcvt.s32.f32 %v1351_v1  ;;  %v2966_v49 = vcvt.s32.f32 %v1366_v2  ;;  %v1383_v9 = vunpack.c.3.s8 %v476_v57  ;;  %v4775_v0 = vld [vmem:[#allocation1 + $0x9] sm:$0xff] }
 0x1d9   : > { %5499 = vmatpush.bf16.msra.mxu2 %v4246_v38  ;;  %v2967_v11 = vcvt.s32.f32 %v1367_v6  ;;  %v2982_v12 = vcvt.s32.f32 %v1382_v7  ;;  %v1398_v15 = vunpack.c.2.s8 %v480_v4  ;;  %v1399_v53 = vunpack.c.3.s8 %v480_v4 }
 0x1da   : > { %5512 = vmatpush.bf16.msra.mxu3 %v4254_v8  ;;  %v4229_v16 = vpack.c.bf16 %v2951_v46, %v2950_v37  ;;  %v2983_v13 = vcvt.s32.f32 %v1383_v9  ;;  %v1348_v17 = vunpack.c.0.s8 %v468_v48  ;;  %v1349_v18 = vunpack.c.1.s8 %v468_v48  ;;  %v495_v48 = vld [vmem:[%s6675_s8 + $0x5d8] sm:$0xff]  ;;  %v4776_v37 = vld [vmem:[#allocation1 + $0x12] sm:$0xff] }
 0x1db   : > { %v4237_v22 = vpack.c.bf16 %v2967_v11, %v2966_v49  ;;  %v2998_v60 = vcvt.s32.f32 %v1398_v15  ;;  %v2999_v23 = vcvt.s32.f32 %v1399_v53  ;;  %v1364_v24 = vunpack.c.0.s8 %v472_v61  ;;  %v4777_v8 = vld [vmem:[#allocation1 + $0x1b] sm:$0xff] }
 0x1dc   : > { %5474 = vmatpush.bf16.msra.mxu0 %v4229_v16  ;;  %v4245_v28 = vpack.c.bf16 %v2983_v13, %v2982_v12  ;;  %v2948_v14 = vcvt.s32.f32 %v1348_v17  ;;  %v2949_v32 = vcvt.s32.f32 %v1349_v18  ;;  %v1365_v5 = vunpack.c.1.s8 %v472_v61  ;;  %v499_v61 = vld [vmem:[%s6675_s8 + $0x5f8] sm:$0xff]  ;;  %v486_v18 = vld [vmem:[%s6675_s8 + $0x590] sm:$0xff] }
 0x1dd   : > { %5487 = vmatpush.bf16.msra.mxu1 %v4237_v22  ;;  %v4253_v34 = vpack.c.bf16 %v2999_v23, %v2998_v60  ;;  %v2964_v35 = vcvt.s32.f32 %v1364_v24  ;;  %v1380_v36 = vunpack.c.0.s8 %v476_v57  ;;  %v1381_v40 = vunpack.c.1.s8 %v476_v57  ;;  %v5297_v22 = vpop.f32.mrf.mxu2  ;;  %v5310_v60 = vpop.f32.mrf.mxu3 }
 0x1de   : > { %5500 = vmatpush.bf16.msra.mxu2 %v4245_v28  ;;  %v4228_v3 = vpack.c.bf16 %v2949_v32, %v2948_v14  ;;  %v2965_v20 = vcvt.s32.f32 %v1365_v5  ;;  %v1396_v21 = vunpack.c.0.s8 %v480_v4  ;;  %v1397_v29 = vunpack.c.1.s8 %v480_v4  ;;  %v490_v14 = vld [vmem:[%s6675_s8 + $0x5b0] sm:$0xff] }
 0x1df   : > { %5513 = vmatpush.bf16.msra.mxu3 %v4253_v34  ;;  %v2980_v25 = vcvt.s32.f32 %v1380_v36  ;;  %v2981_v31 = vcvt.s32.f32 %v1381_v40  ;;  %v1426_v45 = vunpack.c.2.s8 %v487_v50  ;;  %v1427_v47 = vunpack.c.3.s8 %v487_v50 }
 0x1e0   : > { %5475 = vmatpush.bf16.msra.mxu0 %v4228_v3  ;;  %v4236_v19 = vpack.c.bf16 %v2965_v20, %v2964_v35  ;;  %v2996_v27 = vcvt.s32.f32 %v1396_v21  ;;  %v2997_v51 = vcvt.s32.f32 %v1397_v29  ;;  %v1442_v52 = vunpack.c.2.s8 %v7042_v41  ;;  %v494_v3 = vld [vmem:[%s6675_s8 + $0x5d0] sm:$0xff] }
 0x1e1   : > { %v4244_v55 = vpack.c.bf16 %v2981_v31, %v2980_v25  ;;  %v3026_v56 = vcvt.s32.f32 %v1426_v45  ;;  %v3027_v57 = vcvt.s32.f32 %v1427_v47  ;;  %v1443_v58 = vunpack.c.3.s8 %v7042_v41  ;;  %v498_v31 = vld [vmem:[%s6675_s8 + $0x5f0] sm:$0xff] }
 0x1e2   : > { %5488 = vmatpush.bf16.msra.mxu1 %v4236_v19  ;;  %v4252_v30 = vpack.c.bf16 %v2997_v51, %v2996_v27  ;;  %v3042_v42 = vcvt.s32.f32 %v1442_v52  ;;  %v1458_v59 = vunpack.c.2.s8 %v495_v48  ;;  %v1459_v63 = vunpack.c.3.s8 %v495_v48 }
 0x1e3   : > { %5501 = vmatpush.bf16.msra.mxu2 %v4244_v55  ;;  %v4267_v1 = vpack.c.bf16 %v3027_v57, %v3026_v56  ;;  %v3043_v2 = vcvt.s32.f32 %v1443_v58  ;;  %v1474_v4 = vunpack.c.2.s8 %v499_v61  ;;  %v1475_v38 = vunpack.c.3.s8 %v499_v61  ;;  %5476 = vmatmul.bf16.vlgmr.msra.gmra.mxu0 %v4774_v39 }
 0x1e4   : > { %5514 = vmatpush.bf16.msra.mxu3 %v4252_v30  ;;  %v3058_v6 = vcvt.s32.f32 %v1458_v59  ;;  %v3059_v7 = vcvt.s32.f32 %v1459_v63  ;;  %v1424_v46 = vunpack.c.0.s8 %v487_v50  ;;  %v1425_v49 = vunpack.c.1.s8 %v487_v50 }
 0x1e5   : > { %5520 = vmatpush.bf16.msrb.mxu0 %v4267_v1  ;;  %v4275_v9 = vpack.c.bf16 %v3043_v2, %v3042_v42  ;;  %v3074_v11 = vcvt.s32.f32 %v1474_v4  ;;  %v3075_v12 = vcvt.s32.f32 %v1475_v38  ;;  %5489 = vmatmul.bf16.vlgmr.msra.gmra.mxu1 %v4775_v0  ;;  %v1440_v15 = vunpack.c.0.s8 %v7042_v41 }
 0x1e6   : > { %v4283_v53 = vpack.c.bf16 %v3059_v7, %v3058_v6  ;;  %5502 = vmatmul.bf16.vlgmr.msra.gmra.mxu2 %v4776_v37  ;;  %v3024_v16 = vcvt.s32.f32 %v1424_v46  ;;  %v3025_v13 = vcvt.s32.f32 %v1425_v49  ;;  %v1441_v17 = vunpack.c.1.s8 %v7042_v41  ;;  %v485_v49 = vld [vmem:[%s6675_s8 + $0x588] sm:$0xff] }
 0x1e7   : > { %5533 = vmatpush.bf16.msrb.mxu1 %v4275_v9  ;;  %v4291_v23 = vpack.c.bf16 %v3075_v12, %v3074_v11  ;;  %5515 = vmatmul.bf16.vlgmr.msra.gmra.mxu3 %v4777_v8  ;;  %v3040_v24 = vcvt.s32.f32 %v1440_v15  ;;  %v1456_v62 = vunpack.c.0.s8 %v495_v48  ;;  %v1457_v28 = vunpack.c.1.s8 %v495_v48  ;;  %v489_v12 = vld [vmem:[%s6675_s8 + $0x5a8] sm:$0xff] }
 0x1e8   : > { %5546 = vmatpush.bf16.msrb.mxu2 %v4283_v53  ;;  %v4266_v32 = vpack.c.bf16 %v3025_v13, %v3024_v16  ;;  %v3041_v5 = vcvt.s32.f32 %v1441_v17  ;;  %v1472_v50 = vunpack.c.0.s8 %v499_v61  ;;  %v1473_v34 = vunpack.c.1.s8 %v499_v61  ;;  %v493_v17 = vld [vmem:[%s6675_s8 + $0x5c8] sm:$0xff] }
 0x1e9   : > { %5559 = vmatpush.bf16.msrb.mxu3 %v4291_v23  ;;  %v3056_v35 = vcvt.s32.f32 %v1456_v62  ;;  %v3057_v36 = vcvt.s32.f32 %v1457_v28  ;;  %v1422_v40 = vunpack.c.2.s8 %v486_v18  ;;  %v1423_v41 = vunpack.c.3.s8 %v486_v18 }
 0x1ea   : > { %5521 = vmatpush.bf16.msrb.mxu0 %v4266_v32  ;;  %v4274_v20 = vpack.c.bf16 %v3041_v5, %v3040_v24  ;;  %v3072_v21 = vcvt.s32.f32 %v1472_v50  ;;  %v3073_v29 = vcvt.s32.f32 %v1473_v34  ;;  %v1438_v25 = vunpack.c.2.s8 %v490_v14  ;;  %v497_v24 = vld [vmem:[%s6675_s8 + $0x5e8] sm:$0xff] }
 0x1eb   : > { %v4282_v45 = vpack.c.bf16 %v3057_v36, %v3056_v35  ;;  %v3022_v47 = vcvt.s32.f32 %v1422_v40  ;;  %v3023_v48 = vcvt.s32.f32 %v1423_v41  ;;  %v1439_v19 = vunpack.c.3.s8 %v490_v14 }
 0x1ec   : > { %5534 = vmatpush.bf16.msrb.mxu1 %v4274_v20  ;;  %v4290_v27 = vpack.c.bf16 %v3073_v29, %v3072_v21  ;;  %v3038_v51 = vcvt.s32.f32 %v1438_v25  ;;  %v1454_v52 = vunpack.c.2.s8 %v494_v3  ;;  %v1455_v61 = vunpack.c.3.s8 %v494_v3 }
 0x1ed   : > { %5547 = vmatpush.bf16.msrb.mxu2 %v4282_v45  ;;  %v4265_v39 = vpack.c.bf16 %v3023_v48, %v3022_v47  ;;  %v3039_v54 = vcvt.s32.f32 %v1439_v19  ;;  %v1470_v55 = vunpack.c.2.s8 %v498_v31  ;;  %v1471_v56 = vunpack.c.3.s8 %v498_v31 }
 0x1ee   : > { %5560 = vmatpush.bf16.msrb.mxu3 %v4290_v27  ;;  %v3054_v57 = vcvt.s32.f32 %v1454_v52  ;;  %v3055_v58 = vcvt.s32.f32 %v1455_v61  ;;  %v5270_v30 = vadd.f32 %v7034_v33, %v7030_v26  ;;  %v1420_v42 = vunpack.c.0.s8 %v486_v18 }
 0x1ef   : > { %5522 = vmatpush.bf16.msrb.mxu0 %v4265_v39  ;;  %v4273_v59 = vpack.c.bf16 %v3039_v54, %v3038_v51  ;;  %v3070_v63 = vcvt.s32.f32 %v1470_v55  ;;  %v3071_v0 = vcvt.s32.f32 %v1471_v56  ;;  %v1421_v1 = vunpack.c.1.s8 %v486_v18  ;;  %v484_v55 = vld [vmem:[%s6675_s8 + $0x580] sm:$0xff] }
 0x1f0   : > { %v4281_v2 = vpack.c.bf16 %v3055_v58, %v3054_v57  ;;  %v3020_v4 = vcvt.s32.f32 %v1420_v42  ;;  %v1436_v38 = vunpack.c.0.s8 %v490_v14  ;;  %v1437_v37 = vunpack.c.1.s8 %v490_v14  ;;  %v7071_v42 = vpop.f32.mrf.mxu0 }
 0x1f1   : > { %5535 = vmatpush.bf16.msrb.mxu1 %v4273_v59  ;;  %v4289_v6 = vpack.c.bf16 %v3071_v0, %v3070_v63  ;;  %v3021_v7 = vcvt.s32.f32 %v1421_v1  ;;  %v1452_v8 = vunpack.c.0.s8 %v494_v3  ;;  %v1453_v46 = vunpack.c.1.s8 %v494_v3  ;;  %v492_v1 = vld [vmem:[%s6675_s8 + $0x5c0] sm:$0xff] }
 0x1f2   : > { %5548 = vmatpush.bf16.msrb.mxu2 %v4281_v2  ;;  %v3036_v26 = vcvt.s32.f32 %v1436_v38  ;;  %v3037_v33 = vcvt.s32.f32 %v1437_v37  ;;  %v1468_v9 = vunpack.c.0.s8 %v498_v31  ;;  %v1469_v11 = vunpack.c.1.s8 %v498_v31 }
 0x1f3   : > { %5561 = vmatpush.bf16.msrb.mxu3 %v4289_v6  ;;  %v4264_v15 = vpack.c.bf16 %v3021_v7, %v3020_v4  ;;  %v3052_v53 = vcvt.s32.f32 %v1452_v8  ;;  %v3053_v16 = vcvt.s32.f32 %v1453_v46  ;;  %v5283_v13 = vadd.f32 %v7038_v10, %v5270_v30  ;;  %v488_v30 = vld [vmem:[%s6675_s8 + $0x5a0] sm:$0xff] }
 0x1f4   : > { %v4272_v18 = vpack.c.bf16 %v3037_v33, %v3036_v26  ;;  %v3068_v22 = vcvt.s32.f32 %v1468_v9  ;;  %v3069_v60 = vcvt.s32.f32 %v1469_v11  ;;  %v1418_v23 = vunpack.c.2.s8 %v485_v49 }
 0x1f5   : > { %5523 = vmatpush.bf16.msrb.mxu0 %v4264_v15  ;;  %v4280_v62 = vpack.c.bf16 %v3053_v16, %v3052_v53  ;;  %v1419_v28 = vunpack.c.3.s8 %v485_v49  ;;  %v1434_v14 = vunpack.c.2.s8 %v489_v12  ;;  %v1435_v32 = vunpack.c.3.s8 %v489_v12 }
 0x1f6   : > { %5536 = vmatpush.bf16.msrb.mxu1 %v4272_v18  ;;  %v4288_v5 = vpack.c.bf16 %v3069_v60, %v3068_v22  ;;  %v3018_v50 = vcvt.s32.f32 %v1418_v23  ;;  %v1450_v34 = vunpack.c.2.s8 %v493_v17  ;;  %v1451_v35 = vunpack.c.3.s8 %v493_v17 }
 0x1f7   : > { %5549 = vmatpush.bf16.msrb.mxu2 %v4280_v62  ;;  %v3019_v36 = vcvt.s32.f32 %v1419_v28  ;;  %v3034_v40 = vcvt.s32.f32 %v1434_v14  ;;  %v3035_v10 = vcvt.s32.f32 %v1435_v32  ;;  %v1466_v41 = vunpack.c.2.s8 %v497_v24 }
 0x1f8   : > { %5562 = vmatpush.bf16.msrb.mxu3 %v4288_v5  ;;  %v3050_v3 = vcvt.s32.f32 %v1450_v34  ;;  %v3051_v20 = vcvt.s32.f32 %v1451_v35  ;;  %v1467_v21 = vunpack.c.3.s8 %v497_v24  ;;  %v5296_v29 = vadd.f32 %v7044_v43, %v5283_v13  ;;  %v7075_v13 = vpop.f32.mrf.mxu1  ;;  %v5323_v34 = vpop.f32.mrf.mxu0 }
 0x1f9   : > { %v4263_v25 = vpack.c.bf16 %v3019_v36, %v3018_v50  ;;  %v4271_v31 = vpack.c.bf16 %v3035_v10, %v3034_v40  ;;  %v3066_v45 = vcvt.s32.f32 %v1466_v41  ;;  %v1416_v47 = vunpack.c.0.s8 %v485_v49  ;;  %v503_v41 = vld [vmem:[%s6675_s8 + $0x618] sm:$0xff] }
 0x1fa   : > { %v4279_v48 = vpack.c.bf16 %v3051_v20, %v3050_v3  ;;  %v3067_v19 = vcvt.s32.f32 %v1467_v21  ;;  %v7067_v27 = vadd.f32 %v7046_v44, %v5296_v29  ;;  %v1417_v51 = vunpack.c.1.s8 %v485_v49  ;;  %v496_v49 = vld [vmem:[%s6675_s8 + $0x5e0] sm:$0xff] }
 0x1fb   : > { %5524 = vmatpush.bf16.msrb.mxu0 %v4263_v25  ;;  %5537 = vmatpush.bf16.msrb.mxu1 %v4271_v31  ;;  %v3016_v52 = vcvt.s32.f32 %v1416_v47  ;;  %v1432_v61 = vunpack.c.0.s8 %v489_v12  ;;  %v1433_v39 = vunpack.c.1.s8 %v489_v12  ;;  %v1448_v54 = vunpack.c.0.s8 %v493_v17  ;;  %v7079_v25 = vld [vmem:[%s6675_s8 + $0x638] sm:$0xff] }
 0x1fc   : > { %5550 = vmatpush.bf16.msrb.mxu2 %v4279_v48  ;;  %v4287_v43 = vpack.c.bf16 %v3067_v19, %v3066_v45  ;;  %v3017_v56 = vcvt.s32.f32 %v1417_v51  ;;  %v1449_v57 = vunpack.c.1.s8 %v493_v17  ;;  %v1464_v58 = vunpack.c.0.s8 %v497_v24  ;;  %v7081_v19 = vpop.f32.mrf.mxu2  ;;  %v7083_v51 = vpop.f32.mrf.mxu3 }
 0x1fd   : > { %v3032_v44 = vcvt.s32.f32 %v1432_v61  ;;  %v3033_v59 = vcvt.s32.f32 %v1433_v39  ;;  %v3048_v63 = vcvt.s32.f32 %v1448_v54  ;;  %v1465_v0 = vunpack.c.1.s8 %v497_v24 }
 0x1fe   : > { %5563 = vmatpush.bf16.msrb.mxu3 %v4287_v43  ;;  %v4262_v2 = vpack.c.bf16 %v3017_v56, %v3016_v52  ;;  %v3049_v4 = vcvt.s32.f32 %v1449_v57  ;;  %v3064_v38 = vcvt.s32.f32 %v1464_v58  ;;  %v1414_v37 = vunpack.c.2.s8 %v484_v55 }
 0x1ff   : > { %v4270_v6 = vpack.c.bf16 %v3033_v59, %v3032_v44  ;;  %v3065_v7 = vcvt.s32.f32 %v1465_v0  ;;  %v1415_v8 = vunpack.c.3.s8 %v484_v55  ;;  %v1430_v46 = vunpack.c.2.s8 %v488_v30  ;;  %v4778_v44 = vld [vmem:[#allocation1 + $0x24] sm:$0xff] }
 0x200   : > { %5525 = vmatpush.bf16.msrb.mxu0 %v4262_v2  ;;  %v4278_v26 = vpack.c.bf16 %v3049_v4, %v3048_v63  ;;  %v3014_v33 = vcvt.s32.f32 %v1414_v37  ;;  %v1431_v9 = vunpack.c.3.s8 %v488_v30  ;;  %v1446_v11 = vunpack.c.2.s8 %v492_v1  ;;  %v5336_v59 = vpop.f32.mrf.mxu1 }
 0x201   : > { %5538 = vmatpush.bf16.msrb.mxu1 %v4270_v6  ;;  %v4286_v12 = vpack.c.bf16 %v3065_v7, %v3064_v38  ;;  %v3015_v15 = vcvt.s32.f32 %v1415_v8  ;;  %v3030_v53 = vcvt.s32.f32 %v1430_v46  ;;  %v1447_v16 = vunpack.c.3.s8 %v492_v1  ;;  %v4779_v7 = vld [vmem:[#allocation1 + $0x2d] sm:$0xff] }
 0x202   : > { %5551 = vmatpush.bf16.msrb.mxu2 %v4278_v26  ;;  %v3031_v17 = vcvt.s32.f32 %v1431_v9  ;;  %v3046_v18 = vcvt.s32.f32 %v1446_v11  ;;  %v1462_v22 = vunpack.c.2.s8 %v496_v49  ;;  %v1463_v60 = vunpack.c.3.s8 %v496_v49 }
 0x203   : > { %5564 = vmatpush.bf16.msrb.mxu3 %v4286_v12  ;;  %v4261_v23 = vpack.c.bf16 %v3015_v15, %v3014_v33  ;;  %v3047_v24 = vcvt.s32.f32 %v1447_v16  ;;  %v1412_v62 = vunpack.c.0.s8 %v484_v55  ;;  %v1413_v28 = vunpack.c.1.s8 %v484_v55  ;;  %v511_v55 = vld [vmem:[%s6675_s8 + $0x658] sm:$0xff]  ;;  %v4780_v33 = vld [vmem:[#allocation1 + $0x36] sm:$0xff] }
 0x204   : > { %v4269_v14 = vpack.c.bf16 %v3031_v17, %v3030_v53  ;;  %v3062_v32 = vcvt.s32.f32 %v1462_v22  ;;  %v3063_v5 = vcvt.s32.f32 %v1463_v60  ;;  %v1428_v50 = vunpack.c.0.s8 %v488_v30  ;;  %v4781_v12 = vld [vmem:[#allocation1 + $0x3f] sm:$0xff] }
 0x205   : > { %5526 = vmatpush.bf16.msrb.mxu0 %v4261_v23  ;;  %v4277_v35 = vpack.c.bf16 %v3047_v24, %v3046_v18  ;;  %v3012_v36 = vcvt.s32.f32 %v1412_v62  ;;  %v3013_v40 = vcvt.s32.f32 %v1413_v28  ;;  %v1429_v10 = vunpack.c.1.s8 %v488_v30  ;;  %v515_v30 = vld [vmem:[%s6675_s8 + $0x678] sm:$0xff]  ;;  %v502_v28 = vld [vmem:[%s6675_s8 + $0x610] sm:$0xff] }
 0x206   : > { %5539 = vmatpush.bf16.msrb.mxu1 %v4269_v14  ;;  %v4285_v3 = vpack.c.bf16 %v3063_v5, %v3062_v32  ;;  %v3028_v20 = vcvt.s32.f32 %v1428_v50  ;;  %v1444_v21 = vunpack.c.0.s8 %v492_v1  ;;  %v1445_v29 = vunpack.c.1.s8 %v492_v1  ;;  %v5349_v14 = vpop.f32.mrf.mxu2  ;;  %v5362_v32 = vpop.f32.mrf.mxu3 }
 0x207   : > { %5552 = vmatpush.bf16.msrb.mxu2 %v4277_v35  ;;  %v4260_v31 = vpack.c.bf16 %v3013_v40, %v3012_v36  ;;  %v3029_v45 = vcvt.s32.f32 %v1429_v10  ;;  %v1460_v47 = vunpack.c.0.s8 %v496_v49  ;;  %v1461_v48 = vunpack.c.1.s8 %v496_v49  ;;  %v506_v36 = vld [vmem:[%s6675_s8 + $0x630] sm:$0xff] }
 0x208   : > { %5565 = vmatpush.bf16.msrb.mxu3 %v4285_v3  ;;  %v3044_v52 = vcvt.s32.f32 %v1444_v21  ;;  %v3045_v61 = vcvt.s32.f32 %v1445_v29  ;;  %v1490_v39 = vunpack.c.2.s8 %v503_v41  ;;  %v1491_v54 = vunpack.c.3.s8 %v503_v41 }
 0x209   : > { %5527 = vmatpush.bf16.msrb.mxu0 %v4260_v31  ;;  %v4268_v43 = vpack.c.bf16 %v3029_v45, %v3028_v20  ;;  %v3060_v56 = vcvt.s32.f32 %v1460_v47  ;;  %v3061_v57 = vcvt.s32.f32 %v1461_v48  ;;  %v1506_v58 = vunpack.c.2.s8 %v7079_v25  ;;  %v510_v31 = vld [vmem:[%s6675_s8 + $0x650] sm:$0xff] }
 0x20a   : > { %v4276_v63 = vpack.c.bf16 %v3045_v61, %v3044_v52  ;;  %v3090_v0 = vcvt.s32.f32 %v1490_v39  ;;  %v3091_v1 = vcvt.s32.f32 %v1491_v54  ;;  %v1507_v2 = vunpack.c.3.s8 %v7079_v25  ;;  %v514_v61 = vld [vmem:[%s6675_s8 + $0x670] sm:$0xff] }
 0x20b   : > { %5540 = vmatpush.bf16.msrb.mxu1 %v4268_v43  ;;  %v4284_v4 = vpack.c.bf16 %v3061_v57, %v3060_v56  ;;  %v3106_v38 = vcvt.s32.f32 %v1506_v58  ;;  %v1522_v37 = vunpack.c.2.s8 %v511_v55  ;;  %v1523_v6 = vunpack.c.3.s8 %v511_v55  ;;  %v4715_v56 = vld [vmem:[%s7631_s0 + $0x30] sm:$0xff] }
 0x20c   : > { %5553 = vmatpush.bf16.msrb.mxu2 %v4276_v63  ;;  %v4299_v8 = vpack.c.bf16 %v3091_v1, %v3090_v0  ;;  %v3107_v46 = vcvt.s32.f32 %v1507_v2  ;;  %v1538_v49 = vunpack.c.2.s8 %v515_v30  ;;  %v1539_v26 = vunpack.c.3.s8 %v515_v30  ;;  %5528 = vmatmul.bf16.vlgmr.msrb.gmra.mxu0 %v4778_v44  ;;  %4783 = vst [vmem:[#allocation1] ss:$9 sm:$0xff] %v4715_v56 }
 0x20d   : > { %5566 = vmatpush.bf16.msrb.mxu3 %v4284_v4  ;;  %v3122_v9 = vcvt.s32.f32 %v1522_v37  ;;  %v3123_v11 = vcvt.s32.f32 %v1523_v6  ;;  %v1488_v15 = vunpack.c.0.s8 %v503_v41  ;;  %v1489_v53 = vunpack.c.1.s8 %v503_v41 }
 0x20e   : > { %5572 = vmatpush.bf16.msra.mxu0 %v4299_v8  ;;  %v4307_v16 = vpack.c.bf16 %v3107_v46, %v3106_v38  ;;  %v3138_v17 = vcvt.s32.f32 %v1538_v49  ;;  %v3139_v18 = vcvt.s32.f32 %v1539_v26  ;;  %5541 = vmatmul.bf16.vlgmr.msrb.gmra.mxu1 %v4779_v7  ;;  %v1504_v22 = vunpack.c.0.s8 %v7079_v25 }
 0x20f   : > { %v4315_v60 = vpack.c.bf16 %v3123_v11, %v3122_v9  ;;  %5554 = vmatmul.bf16.vlgmr.msrb.gmra.mxu2 %v4780_v33  ;;  %v3088_v23 = vcvt.s32.f32 %v1488_v15  ;;  %v3089_v24 = vcvt.s32.f32 %v1489_v53  ;;  %v1505_v62 = vunpack.c.1.s8 %v7079_v25 }
 0x210   : > { %5585 = vmatpush.bf16.msra.mxu1 %v4307_v16  ;;  %v4323_v5 = vpack.c.bf16 %v3139_v18, %v3138_v17  ;;  %5567 = vmatmul.bf16.vlgmr.msrb.gmra.mxu3 %v4781_v12  ;;  %v3104_v50 = vcvt.s32.f32 %v1504_v22  ;;  %v1520_v34 = vunpack.c.0.s8 %v511_v55  ;;  %v1521_v35 = vunpack.c.1.s8 %v511_v55  ;;  %v501_v16 = vld [vmem:[%s6675_s8 + $0x608] sm:$0xff] }
 0x211   : > { %5598 = vmatpush.bf16.msra.mxu2 %v4315_v60  ;;  %v4298_v40 = vpack.c.bf16 %v3089_v24, %v3088_v23  ;;  %v3105_v10 = vcvt.s32.f32 %v1505_v62  ;;  %v1536_v41 = vunpack.c.0.s8 %v515_v30  ;;  %v1537_v3 = vunpack.c.1.s8 %v515_v30  ;;  %v505_v22 = vld [vmem:[%s6675_s8 + $0x628] sm:$0xff] }
 0x212   : > { %5611 = vmatpush.bf16.msra.mxu3 %v4323_v5  ;;  %v3120_v20 = vcvt.s32.f32 %v1520_v34  ;;  %v3121_v21 = vcvt.s32.f32 %v1521_v35  ;;  %v1486_v29 = vunpack.c.2.s8 %v502_v28  ;;  %v1487_v25 = vunpack.c.3.s8 %v502_v28  ;;  %v513_v34 = vld [vmem:[%s6675_s8 + $0x668] sm:$0xff] }
 0x213   : > { %5573 = vmatpush.bf16.msra.mxu0 %v4298_v40  ;;  %v4306_v45 = vpack.c.bf16 %v3105_v10, %v3104_v50  ;;  %v3136_v47 = vcvt.s32.f32 %v1536_v41  ;;  %v3137_v48 = vcvt.s32.f32 %v1537_v3  ;;  %v1502_v52 = vunpack.c.2.s8 %v506_v36 }
 0x214   : > { %v4314_v39 = vpack.c.bf16 %v3121_v21, %v3120_v20  ;;  %v3086_v54 = vcvt.s32.f32 %v1486_v29  ;;  %v3087_v55 = vcvt.s32.f32 %v1487_v25  ;;  %v1503_v43 = vunpack.c.3.s8 %v506_v36 }
 0x215   : > { %5586 = vmatpush.bf16.msra.mxu1 %v4306_v45  ;;  %v4322_v57 = vpack.c.bf16 %v3137_v48, %v3136_v47  ;;  %v3102_v58 = vcvt.s32.f32 %v1502_v52  ;;  %v1518_v30 = vunpack.c.2.s8 %v510_v31  ;;  %v1519_v44 = vunpack.c.3.s8 %v510_v31 }
 0x216   : > { %5599 = vmatpush.bf16.msra.mxu2 %v4314_v39  ;;  %v4297_v59 = vpack.c.bf16 %v3087_v55, %v3086_v54  ;;  %v3103_v63 = vcvt.s32.f32 %v1503_v43  ;;  %v1534_v0 = vunpack.c.2.s8 %v514_v61  ;;  %v1535_v1 = vunpack.c.3.s8 %v514_v61 }
 0x217   : > { %5612 = vmatpush.bf16.msra.mxu3 %v4322_v57  ;;  %v3118_v2 = vcvt.s32.f32 %v1518_v30  ;;  %v3119_v4 = vcvt.s32.f32 %v1519_v44  ;;  %v5322_v38 = vadd.f32 %v7071_v42, %v7067_v27  ;;  %v1484_v37 = vunpack.c.0.s8 %v502_v28 }
 0x218   : > { %5574 = vmatpush.bf16.msra.mxu0 %v4297_v59  ;;  %v4305_v6 = vpack.c.bf16 %v3103_v63, %v3102_v58  ;;  %v3134_v7 = vcvt.s32.f32 %v1534_v0  ;;  %v3135_v8 = vcvt.s32.f32 %v1535_v1  ;;  %v1485_v46 = vunpack.c.1.s8 %v502_v28  ;;  %v509_v28 = vld [vmem:[%s6675_s8 + $0x648] sm:$0xff]  ;;  %v500_v0 = vld [vmem:[%s6675_s8 + $0x600] sm:$0xff] }
 0x219   : > { %v4313_v49 = vpack.c.bf16 %v3119_v4, %v3118_v2  ;;  %v3084_v26 = vcvt.s32.f32 %v1484_v37  ;;  %v1500_v33 = vunpack.c.0.s8 %v506_v36  ;;  %v1501_v9 = vunpack.c.1.s8 %v506_v36  ;;  %v7111_v37 = vpop.f32.mrf.mxu0 }
 0x21a   : > { %5587 = vmatpush.bf16.msra.mxu1 %v4305_v6  ;;  %v4321_v11 = vpack.c.bf16 %v3135_v8, %v3134_v7  ;;  %v3085_v12 = vcvt.s32.f32 %v1485_v46  ;;  %v1516_v15 = vunpack.c.0.s8 %v510_v31  ;;  %v1517_v53 = vunpack.c.1.s8 %v510_v31  ;;  %v508_v46 = vld [vmem:[%s6675_s8 + $0x640] sm:$0xff] }
 0x21b   : > { %5600 = vmatpush.bf16.msra.mxu2 %v4313_v49  ;;  %v3100_v27 = vcvt.s32.f32 %v1500_v33  ;;  %v3101_v42 = vcvt.s32.f32 %v1501_v9  ;;  %v1532_v17 = vunpack.c.0.s8 %v514_v61  ;;  %v1533_v18 = vunpack.c.1.s8 %v514_v61 }
 0x21c   : > { %5613 = vmatpush.bf16.msra.mxu3 %v4321_v11  ;;  %v4296_v60 = vpack.c.bf16 %v3085_v12, %v3084_v26  ;;  %v3116_v23 = vcvt.s32.f32 %v1516_v15  ;;  %v3117_v24 = vcvt.s32.f32 %v1517_v53  ;;  %v5335_v62 = vadd.f32 %v7075_v13, %v5322_v38  ;;  %v504_v38 = vld [vmem:[%s6675_s8 + $0x620] sm:$0xff] }
 0x21d   : > { %v4304_v14 = vpack.c.bf16 %v3101_v42, %v3100_v27  ;;  %v3132_v32 = vcvt.s32.f32 %v1532_v17  ;;  %v3133_v5 = vcvt.s32.f32 %v1533_v18  ;;  %v1482_v50 = vunpack.c.2.s8 %v501_v16 }
 0x21e   : > { %5575 = vmatpush.bf16.msra.mxu0 %v4296_v60  ;;  %v4312_v35 = vpack.c.bf16 %v3117_v24, %v3116_v23  ;;  %v1483_v36 = vunpack.c.3.s8 %v501_v16  ;;  %v1498_v40 = vunpack.c.2.s8 %v505_v22  ;;  %v1499_v10 = vunpack.c.3.s8 %v505_v22 }
 0x21f   : > { %5588 = vmatpush.bf16.msra.mxu1 %v4304_v14  ;;  %v4320_v41 = vpack.c.bf16 %v3133_v5, %v3132_v32  ;;  %v3082_v3 = vcvt.s32.f32 %v1482_v50  ;;  %v1514_v20 = vunpack.c.2.s8 %v509_v28  ;;  %v1515_v21 = vunpack.c.3.s8 %v509_v28 }
 0x220   : > { %5601 = vmatpush.bf16.msra.mxu2 %v4312_v35  ;;  %v3083_v29 = vcvt.s32.f32 %v1483_v36  ;;  %v3098_v25 = vcvt.s32.f32 %v1498_v40  ;;  %v3099_v13 = vcvt.s32.f32 %v1499_v10  ;;  %v1530_v31 = vunpack.c.2.s8 %v513_v34 }
 0x221   : > { %5614 = vmatpush.bf16.msra.mxu3 %v4320_v41  ;;  %v3114_v45 = vcvt.s32.f32 %v1514_v20  ;;  %v3115_v47 = vcvt.s32.f32 %v1515_v21  ;;  %v1531_v48 = vunpack.c.3.s8 %v513_v34  ;;  %v5348_v52 = vadd.f32 %v7081_v19, %v5335_v62  ;;  %v7115_v62 = vpop.f32.mrf.mxu1  ;;  %v5375_v20 = vpop.f32.mrf.mxu0 }
 0x222   : > { %v4295_v61 = vpack.c.bf16 %v3083_v29, %v3082_v3  ;;  %v4303_v39 = vpack.c.bf16 %v3099_v13, %v3098_v25  ;;  %v3130_v54 = vcvt.s32.f32 %v1530_v31  ;;  %v1480_v55 = vunpack.c.0.s8 %v501_v16  ;;  %v519_v31 = vld [vmem:[%s6675_s8 + $0x698] sm:$0xff] }
 0x223   : > { %v4311_v43 = vpack.c.bf16 %v3115_v47, %v3114_v45  ;;  %v3131_v56 = vcvt.s32.f32 %v1531_v48  ;;  %v7107_v57 = vadd.f32 %v7083_v51, %v5348_v52  ;;  %v1481_v58 = vunpack.c.1.s8 %v501_v16  ;;  %v512_v16 = vld [vmem:[%s6675_s8 + $0x660] sm:$0xff] }
 0x224   : > { %5576 = vmatpush.bf16.msra.mxu0 %v4295_v61  ;;  %5589 = vmatpush.bf16.msra.mxu1 %v4303_v39  ;;  %v3080_v30 = vcvt.s32.f32 %v1480_v55  ;;  %v1496_v44 = vunpack.c.0.s8 %v505_v22  ;;  %v1497_v59 = vunpack.c.1.s8 %v505_v22  ;;  %v1512_v63 = vunpack.c.0.s8 %v509_v28  ;;  %v7119_v61 = vld [vmem:[%s6675_s8 + $0x6b8] sm:$0xff] }
 0x225   : > { %5602 = vmatpush.bf16.msra.mxu2 %v4311_v43  ;;  %v4319_v19 = vpack.c.bf16 %v3131_v56, %v3130_v54  ;;  %v3081_v1 = vcvt.s32.f32 %v1481_v58  ;;  %v1513_v2 = vunpack.c.1.s8 %v509_v28  ;;  %v1528_v4 = vunpack.c.0.s8 %v513_v34  ;;  %v7121_v56 = vpop.f32.mrf.mxu2  ;;  %v7123_v58 = vpop.f32.mrf.mxu3 }
 0x226   : > { %v3096_v51 = vcvt.s32.f32 %v1496_v44  ;;  %v3097_v6 = vcvt.s32.f32 %v1497_v59  ;;  %v3112_v7 = vcvt.s32.f32 %v1512_v63  ;;  %v1529_v8 = vunpack.c.1.s8 %v513_v34 }
 0x227   : > { %5615 = vmatpush.bf16.msra.mxu3 %v4319_v19  ;;  %v4294_v49 = vpack.c.bf16 %v3081_v1, %v3080_v30  ;;  %v3113_v26 = vcvt.s32.f32 %v1513_v2  ;;  %v3128_v33 = vcvt.s32.f32 %v1528_v4  ;;  %v1478_v9 = vunpack.c.2.s8 %v500_v0 }
 0x228   : > { %v4302_v11 = vpack.c.bf16 %v3097_v6, %v3096_v51  ;;  %v3129_v12 = vcvt.s32.f32 %v1529_v8  ;;  %v1479_v15 = vunpack.c.3.s8 %v500_v0  ;;  %v1494_v53 = vunpack.c.2.s8 %v504_v38  ;;  %v4784_v51 = vld [vmem:[#allocation1] sm:$0xff] }
 0x229   : > { %5577 = vmatpush.bf16.msra.mxu0 %v4294_v49  ;;  %v4310_v27 = vpack.c.bf16 %v3113_v26, %v3112_v7  ;;  %v3078_v42 = vcvt.s32.f32 %v1478_v9  ;;  %v1495_v17 = vunpack.c.3.s8 %v504_v38  ;;  %v1510_v18 = vunpack.c.2.s8 %v508_v46  ;;  %v5388_v6 = vpop.f32.mrf.mxu1 }
 0x22a   : > { %5590 = vmatpush.bf16.msra.mxu1 %v4302_v11  ;;  %v4318_v22 = vpack.c.bf16 %v3129_v12, %v3128_v33  ;;  %v3079_v60 = vcvt.s32.f32 %v1479_v15  ;;  %v3094_v23 = vcvt.s32.f32 %v1494_v53  ;;  %v1511_v24 = vunpack.c.3.s8 %v508_v46  ;;  %v4785_v12 = vld [vmem:[#allocation1 + $0x9] sm:$0xff] }
 0x22b   : > { %5603 = vmatpush.bf16.msra.mxu2 %v4310_v27  ;;  %v3095_v28 = vcvt.s32.f32 %v1495_v17  ;;  %v3110_v14 = vcvt.s32.f32 %v1510_v18  ;;  %v1526_v32 = vunpack.c.2.s8 %v512_v16  ;;  %v1527_v5 = vunpack.c.3.s8 %v512_v16 }
 0x22c   : > { %5616 = vmatpush.bf16.msra.mxu3 %v4318_v22  ;;  %v4293_v50 = vpack.c.bf16 %v3079_v60, %v3078_v42  ;;  %v3111_v34 = vcvt.s32.f32 %v1511_v24  ;;  %v1476_v35 = vunpack.c.0.s8 %v500_v0  ;;  %v1477_v36 = vunpack.c.1.s8 %v500_v0  ;;  %v527_v0 = vld [vmem:[%s6675_s8 + $0x6d8] sm:$0xff]  ;;  %v4786_v42 = vld [vmem:[#allocation1 + $0x12] sm:$0xff] }
 0x22d   : > { %v4301_v40 = vpack.c.bf16 %v3095_v28, %v3094_v23  ;;  %v3126_v10 = vcvt.s32.f32 %v1526_v32  ;;  %v3127_v41 = vcvt.s32.f32 %v1527_v5  ;;  %v1492_v3 = vunpack.c.0.s8 %v504_v38  ;;  %v4787_v22 = vld [vmem:[#allocation1 + $0x1b] sm:$0xff] }
 0x22e   : > { %5578 = vmatpush.bf16.msra.mxu0 %v4293_v50  ;;  %v4309_v21 = vpack.c.bf16 %v3111_v34, %v3110_v14  ;;  %v3076_v29 = vcvt.s32.f32 %v1476_v35  ;;  %v3077_v25 = vcvt.s32.f32 %v1477_v36  ;;  %v1493_v13 = vunpack.c.1.s8 %v504_v38  ;;  %v531_v38 = vld [vmem:[%s6675_s8 + $0x6f8] sm:$0xff]  ;;  %v518_v36 = vld [vmem:[%s6675_s8 + $0x690] sm:$0xff] }
 0x22f   : > { %5591 = vmatpush.bf16.msra.mxu1 %v4301_v40  ;;  %v4317_v45 = vpack.c.bf16 %v3127_v41, %v3126_v10  ;;  %v3092_v47 = vcvt.s32.f32 %v1492_v3  ;;  %v1508_v48 = vunpack.c.0.s8 %v508_v46  ;;  %v1509_v52 = vunpack.c.1.s8 %v508_v46  ;;  %v5401_v40 = vpop.f32.mrf.mxu2  ;;  %v5414_v10 = vpop.f32.mrf.mxu3 }
 0x230   : > { %5604 = vmatpush.bf16.msra.mxu2 %v4309_v21  ;;  %v4292_v39 = vpack.c.bf16 %v3077_v25, %v3076_v29  ;;  %v3093_v54 = vcvt.s32.f32 %v1493_v13  ;;  %v1524_v55 = vunpack.c.0.s8 %v512_v16  ;;  %v1525_v43 = vunpack.c.1.s8 %v512_v16  ;;  %v522_v29 = vld [vmem:[%s6675_s8 + $0x6b0] sm:$0xff] }
 0x231   : > { %5617 = vmatpush.bf16.msra.mxu3 %v4317_v45  ;;  %v3108_v30 = vcvt.s32.f32 %v1508_v48  ;;  %v3109_v44 = vcvt.s32.f32 %v1509_v52  ;;  %v1554_v59 = vunpack.c.2.s8 %v519_v31  ;;  %v1555_v63 = vunpack.c.3.s8 %v519_v31 }
 0x232   : > { %5579 = vmatpush.bf16.msra.mxu0 %v4292_v39  ;;  %v4300_v19 = vpack.c.bf16 %v3093_v54, %v3092_v47  ;;  %v3124_v1 = vcvt.s32.f32 %v1524_v55  ;;  %v3125_v2 = vcvt.s32.f32 %v1525_v43  ;;  %v1570_v4 = vunpack.c.2.s8 %v7119_v61  ;;  %v526_v39 = vld [vmem:[%s6675_s8 + $0x6d0] sm:$0xff] }
 0x233   : > { %v4308_v7 = vpack.c.bf16 %v3109_v44, %v3108_v30  ;;  %v3154_v8 = vcvt.s32.f32 %v1554_v59  ;;  %v3155_v46 = vcvt.s32.f32 %v1555_v63  ;;  %v1571_v49 = vunpack.c.3.s8 %v7119_v61  ;;  %v530_v44 = vld [vmem:[%s6675_s8 + $0x6f0] sm:$0xff] }
 0x234   : > { %5592 = vmatpush.bf16.msra.mxu1 %v4300_v19  ;;  %v4316_v26 = vpack.c.bf16 %v3125_v2, %v3124_v1  ;;  %v3170_v33 = vcvt.s32.f32 %v1570_v4  ;;  %v1586_v9 = vunpack.c.2.s8 %v527_v0  ;;  %v1587_v11 = vunpack.c.3.s8 %v527_v0 }
 0x235   : > { %5605 = vmatpush.bf16.msra.mxu2 %v4308_v7  ;;  %v4331_v15 = vpack.c.bf16 %v3155_v46, %v3154_v8  ;;  %v3171_v53 = vcvt.s32.f32 %v1571_v49  ;;  %v1602_v16 = vunpack.c.2.s8 %v531_v38  ;;  %v1603_v27 = vunpack.c.3.s8 %v531_v38  ;;  %5580 = vmatmul.bf16.vlgmr.msra.gmra.mxu0 %v4784_v51 }
 0x236   : > { %5618 = vmatpush.bf16.msra.mxu3 %v4316_v26  ;;  %v3186_v17 = vcvt.s32.f32 %v1586_v9  ;;  %v3187_v18 = vcvt.s32.f32 %v1587_v11  ;;  %v1552_v60 = vunpack.c.0.s8 %v519_v31  ;;  %v1553_v23 = vunpack.c.1.s8 %v519_v31 }
 0x237   : > { %5624 = vmatpush.bf16.msrb.mxu0 %v4331_v15  ;;  %v4339_v24 = vpack.c.bf16 %v3171_v53, %v3170_v33  ;;  %v3202_v28 = vcvt.s32.f32 %v1602_v16  ;;  %v3203_v14 = vcvt.s32.f32 %v1603_v27  ;;  %5593 = vmatmul.bf16.vlgmr.msra.gmra.mxu1 %v4785_v12  ;;  %v1568_v32 = vunpack.c.0.s8 %v7119_v61 }
 0x238   : > { %v4347_v5 = vpack.c.bf16 %v3187_v18, %v3186_v17  ;;  %5606 = vmatmul.bf16.vlgmr.msra.gmra.mxu2 %v4786_v42  ;;  %v3152_v50 = vcvt.s32.f32 %v1552_v60  ;;  %v3153_v34 = vcvt.s32.f32 %v1553_v23  ;;  %v1569_v35 = vunpack.c.1.s8 %v7119_v61  ;;  %v517_v23 = vld [vmem:[%s6675_s8 + $0x688] sm:$0xff] }
 0x239   : > { %5637 = vmatpush.bf16.msrb.mxu1 %v4339_v24  ;;  %v4355_v41 = vpack.c.bf16 %v3203_v14, %v3202_v28  ;;  %5619 = vmatmul.bf16.vlgmr.msra.gmra.mxu3 %v4787_v22  ;;  %v3168_v3 = vcvt.s32.f32 %v1568_v32  ;;  %v1584_v20 = vunpack.c.0.s8 %v527_v0  ;;  %v1585_v21 = vunpack.c.1.s8 %v527_v0  ;;  %v521_v14 = vld [vmem:[%s6675_s8 + $0x6a8] sm:$0xff] }
 0x23a   : > { %5650 = vmatpush.bf16.msrb.mxu2 %v4347_v5  ;;  %v4330_v25 = vpack.c.bf16 %v3153_v34, %v3152_v50  ;;  %v3169_v13 = vcvt.s32.f32 %v1569_v35  ;;  %v1600_v31 = vunpack.c.0.s8 %v531_v38  ;;  %v1601_v45 = vunpack.c.1.s8 %v531_v38  ;;  %v525_v35 = vld [vmem:[%s6675_s8 + $0x6c8] sm:$0xff] }
 0x23b   : > { %5663 = vmatpush.bf16.msrb.mxu3 %v4355_v41  ;;  %v3184_v47 = vcvt.s32.f32 %v1584_v20  ;;  %v3185_v48 = vcvt.s32.f32 %v1585_v21  ;;  %v1550_v52 = vunpack.c.2.s8 %v518_v36  ;;  %v1551_v61 = vunpack.c.3.s8 %v518_v36 }
 0x23c   : > { %5625 = vmatpush.bf16.msrb.mxu0 %v4330_v25  ;;  %v4338_v54 = vpack.c.bf16 %v3169_v13, %v3168_v3  ;;  %v3200_v55 = vcvt.s32.f32 %v1600_v31  ;;  %v3201_v43 = vcvt.s32.f32 %v1601_v45  ;;  %v1566_v30 = vunpack.c.2.s8 %v522_v29  ;;  %v529_v3 = vld [vmem:[%s6675_s8 + $0x6e8] sm:$0xff] }
 0x23d   : > { %v4346_v59 = vpack.c.bf16 %v3185_v48, %v3184_v47  ;;  %v3150_v63 = vcvt.s32.f32 %v1550_v52  ;;  %v3151_v0 = vcvt.s32.f32 %v1551_v61  ;;  %v1567_v19 = vunpack.c.3.s8 %v522_v29 }
 0x23e   : > { %5638 = vmatpush.bf16.msrb.mxu1 %v4338_v54  ;;  %v4354_v1 = vpack.c.bf16 %v3201_v43, %v3200_v55  ;;  %v3166_v2 = vcvt.s32.f32 %v1566_v30  ;;  %v1582_v4 = vunpack.c.2.s8 %v526_v39  ;;  %v1583_v38 = vunpack.c.3.s8 %v526_v39 }
 0x23f   : > { %5651 = vmatpush.bf16.msrb.mxu2 %v4346_v59  ;;  %v4329_v51 = vpack.c.bf16 %v3151_v0, %v3150_v63  ;;  %v3167_v6 = vcvt.s32.f32 %v1567_v19  ;;  %v1598_v7 = vunpack.c.2.s8 %v530_v44  ;;  %v1599_v8 = vunpack.c.3.s8 %v530_v44 }
 0x240   : > { %5664 = vmatpush.bf16.msrb.mxu3 %v4354_v1  ;;  %v3182_v46 = vcvt.s32.f32 %v1582_v4  ;;  %v3183_v49 = vcvt.s32.f32 %v1583_v38  ;;  %v5374_v26 = vadd.f32 %v7111_v37, %v7107_v57  ;;  %v1548_v33 = vunpack.c.0.s8 %v518_v36 }
 0x241   : > { %5626 = vmatpush.bf16.msrb.mxu0 %v4329_v51  ;;  %v4337_v9 = vpack.c.bf16 %v3167_v6, %v3166_v2  ;;  %v3198_v11 = vcvt.s32.f32 %v1598_v7  ;;  %v3199_v12 = vcvt.s32.f32 %v1599_v8  ;;  %v1549_v15 = vunpack.c.1.s8 %v518_v36  ;;  %v516_v7 = vld [vmem:[%s6675_s8 + $0x680] sm:$0xff] }
 0x242   : > { %v4345_v53 = vpack.c.bf16 %v3183_v49, %v3182_v46  ;;  %v3148_v16 = vcvt.s32.f32 %v1548_v33  ;;  %v1564_v27 = vunpack.c.0.s8 %v522_v29  ;;  %v1565_v42 = vunpack.c.1.s8 %v522_v29  ;;  %v7148_v33 = vpop.f32.mrf.mxu0 }
 0x243   : > { %5639 = vmatpush.bf16.msrb.mxu1 %v4337_v9  ;;  %v4353_v17 = vpack.c.bf16 %v3199_v12, %v3198_v11  ;;  %v3149_v18 = vcvt.s32.f32 %v1549_v15  ;;  %v1580_v22 = vunpack.c.0.s8 %v526_v39  ;;  %v1581_v60 = vunpack.c.1.s8 %v526_v39  ;;  %v524_v15 = vld [vmem:[%s6675_s8 + $0x6c0] sm:$0xff] }
 0x244   : > { %5652 = vmatpush.bf16.msrb.mxu2 %v4345_v53  ;;  %v3164_v57 = vcvt.s32.f32 %v1564_v27  ;;  %v3165_v37 = vcvt.s32.f32 %v1565_v42  ;;  %v1596_v24 = vunpack.c.0.s8 %v530_v44  ;;  %v1597_v28 = vunpack.c.1.s8 %v530_v44 }
 0x245   : > { %5665 = vmatpush.bf16.msrb.mxu3 %v4353_v17  ;;  %v4328_v32 = vpack.c.bf16 %v3149_v18, %v3148_v16  ;;  %v3180_v5 = vcvt.s32.f32 %v1580_v22  ;;  %v3181_v50 = vcvt.s32.f32 %v1581_v60  ;;  %v5387_v34 = vadd.f32 %v7115_v62, %v5374_v26  ;;  %v520_v26 = vld [vmem:[%s6675_s8 + $0x6a0] sm:$0xff] }
 0x246   : > { %v4336_v36 = vpack.c.bf16 %v3165_v37, %v3164_v57  ;;  %v3196_v40 = vcvt.s32.f32 %v1596_v24  ;;  %v3197_v10 = vcvt.s32.f32 %v1597_v28  ;;  %v1546_v41 = vunpack.c.2.s8 %v517_v23 }
 0x247   : > { %5627 = vmatpush.bf16.msrb.mxu0 %v4328_v32  ;;  %v4344_v20 = vpack.c.bf16 %v3181_v50, %v3180_v5  ;;  %v1547_v21 = vunpack.c.3.s8 %v517_v23  ;;  %v1562_v29 = vunpack.c.2.s8 %v521_v14  ;;  %v1563_v25 = vunpack.c.3.s8 %v521_v14 }
 0x248   : > { %5640 = vmatpush.bf16.msrb.mxu1 %v4336_v36  ;;  %v4352_v13 = vpack.c.bf16 %v3197_v10, %v3196_v40  ;;  %v3146_v31 = vcvt.s32.f32 %v1546_v41  ;;  %v1578_v45 = vunpack.c.2.s8 %v525_v35  ;;  %v1579_v47 = vunpack.c.3.s8 %v525_v35 }
 0x249   : > { %5653 = vmatpush.bf16.msrb.mxu2 %v4344_v20  ;;  %v3147_v48 = vcvt.s32.f32 %v1547_v21  ;;  %v3162_v52 = vcvt.s32.f32 %v1562_v29  ;;  %v3163_v62 = vcvt.s32.f32 %v1563_v25  ;;  %v1594_v61 = vunpack.c.2.s8 %v529_v3 }
 0x24a   : > { %5666 = vmatpush.bf16.msrb.mxu3 %v4352_v13  ;;  %v3178_v39 = vcvt.s32.f32 %v1578_v45  ;;  %v3179_v54 = vcvt.s32.f32 %v1579_v47  ;;  %v1595_v55 = vunpack.c.3.s8 %v529_v3  ;;  %v5400_v43 = vadd.f32 %v7121_v56, %v5387_v34  ;;  %v7152_v34 = vpop.f32.mrf.mxu1  ;;  %v5427_v45 = vpop.f32.mrf.mxu0 }
 0x24b   : > { %v4327_v30 = vpack.c.bf16 %v3147_v48, %v3146_v31  ;;  %v4335_v44 = vpack.c.bf16 %v3163_v62, %v3162_v52  ;;  %v3194_v59 = vcvt.s32.f32 %v1594_v61  ;;  %v1544_v63 = vunpack.c.0.s8 %v517_v23  ;;  %v535_v61 = vld [vmem:[%s6675_s8 + $0x718] sm:$0xff] }
 0x24c   : > { %v4343_v0 = vpack.c.bf16 %v3179_v54, %v3178_v39  ;;  %v3195_v19 = vcvt.s32.f32 %v1595_v55  ;;  %v7144_v1 = vadd.f32 %v7123_v58, %v5400_v43  ;;  %v1545_v2 = vunpack.c.1.s8 %v517_v23  ;;  %v528_v23 = vld [vmem:[%s6675_s8 + $0x6e0] sm:$0xff] }
 0x24d   : > { %5628 = vmatpush.bf16.msrb.mxu0 %v4327_v30  ;;  %5641 = vmatpush.bf16.msrb.mxu1 %v4335_v44  ;;  %v3144_v4 = vcvt.s32.f32 %v1544_v63  ;;  %v1560_v38 = vunpack.c.0.s8 %v521_v14  ;;  %v1561_v51 = vunpack.c.1.s8 %v521_v14  ;;  %v1576_v6 = vunpack.c.0.s8 %v525_v35  ;;  %v7156_v30 = vld [vmem:[%s6675_s8 + $0x738] sm:$0xff] }
 0x24e   : > { %5654 = vmatpush.bf16.msrb.mxu2 %v4343_v0  ;;  %v4351_v56 = vpack.c.bf16 %v3195_v19, %v3194_v59  ;;  %v3145_v8 = vcvt.s32.f32 %v1545_v2  ;;  %v1577_v46 = vunpack.c.1.s8 %v525_v35  ;;  %v1592_v49 = vunpack.c.0.s8 %v529_v3  ;;  %v7158_v19 = vpop.f32.mrf.mxu2  ;;  %v7160_v2 = vpop.f32.mrf.mxu3 }
 0x24f   : > { %v3160_v58 = vcvt.s32.f32 %v1560_v38  ;;  %v3161_v9 = vcvt.s32.f32 %v1561_v51  ;;  %v3176_v11 = vcvt.s32.f32 %v1576_v6  ;;  %v1593_v12 = vunpack.c.1.s8 %v529_v3 }
 0x250   : > { %5667 = vmatpush.bf16.msrb.mxu3 %v4351_v56  ;;  %v4326_v53 = vpack.c.bf16 %v3145_v8, %v3144_v4  ;;  %v3177_v16 = vcvt.s32.f32 %v1577_v46  ;;  %v3192_v27 = vcvt.s32.f32 %v1592_v49  ;;  %v1542_v42 = vunpack.c.2.s8 %v516_v7 }
 0x251   : > { %v4334_v17 = vpack.c.bf16 %v3161_v9, %v3160_v58  ;;  %v3193_v18 = vcvt.s32.f32 %v1593_v12  ;;  %v1543_v22 = vunpack.c.3.s8 %v516_v7  ;;  %v1558_v60 = vunpack.c.2.s8 %v520_v26  ;;  %v4788_v58 = vld [vmem:[#allocation1 + $0x24] sm:$0xff] }
 0x252   : > { %5629 = vmatpush.bf16.msrb.mxu0 %v4326_v53  ;;  %v4342_v57 = vpack.c.bf16 %v3177_v16, %v3176_v11  ;;  %v3142_v37 = vcvt.s32.f32 %v1542_v42  ;;  %v1559_v24 = vunpack.c.3.s8 %v520_v26  ;;  %v1574_v28 = vunpack.c.2.s8 %v524_v15  ;;  %v5440_v9 = vpop.f32.mrf.mxu1 }
 0x253   : > { %5642 = vmatpush.bf16.msrb.mxu1 %v4334_v17  ;;  %v4350_v14 = vpack.c.bf16 %v3193_v18, %v3192_v27  ;;  %v3143_v32 = vcvt.s32.f32 %v1543_v22  ;;  %v3158_v5 = vcvt.s32.f32 %v1558_v60  ;;  %v1575_v50 = vunpack.c.3.s8 %v524_v15  ;;  %v4789_v18 = vld [vmem:[#allocation1 + $0x2d] sm:$0xff] }
 0x254   : > { %5655 = vmatpush.bf16.msrb.mxu2 %v4342_v57  ;;  %v3159_v35 = vcvt.s32.f32 %v1559_v24  ;;  %v3174_v36 = vcvt.s32.f32 %v1574_v28  ;;  %v1590_v40 = vunpack.c.2.s8 %v528_v23  ;;  %v1591_v10 = vunpack.c.3.s8 %v528_v23 }
 0x255   : > { %5668 = vmatpush.bf16.msrb.mxu3 %v4350_v14  ;;  %v4325_v41 = vpack.c.bf16 %v3143_v32, %v3142_v37  ;;  %v3175_v3 = vcvt.s32.f32 %v1575_v50  ;;  %v1540_v20 = vunpack.c.0.s8 %v516_v7  ;;  %v1541_v21 = vunpack.c.1.s8 %v516_v7  ;;  %v543_v7 = vld [vmem:[%s6675_s8 + $0x758] sm:$0xff]  ;;  %v4790_v37 = vld [vmem:[#allocation1 + $0x36] sm:$0xff] }
 0x256   : > { %v4333_v29 = vpack.c.bf16 %v3159_v35, %v3158_v5  ;;  %v3190_v25 = vcvt.s32.f32 %v1590_v40  ;;  %v3191_v13 = vcvt.s32.f32 %v1591_v10  ;;  %v1556_v31 = vunpack.c.0.s8 %v520_v26  ;;  %v4791_v14 = vld [vmem:[#allocation1 + $0x3f] sm:$0xff] }
 0x257   : > { %5630 = vmatpush.bf16.msrb.mxu0 %v4325_v41  ;;  %v4341_v47 = vpack.c.bf16 %v3175_v3, %v3174_v36  ;;  %v3140_v48 = vcvt.s32.f32 %v1540_v20  ;;  %v3141_v52 = vcvt.s32.f32 %v1541_v21  ;;  %v1557_v62 = vunpack.c.1.s8 %v520_v26  ;;  %v547_v26 = vld [vmem:[%s6675_s8 + $0x778] sm:$0xff]  ;;  %v534_v21 = vld [vmem:[%s6675_s8 + $0x710] sm:$0xff] }
 0x258   : > { %5643 = vmatpush.bf16.msrb.mxu1 %v4333_v29  ;;  %v4349_v39 = vpack.c.bf16 %v3191_v13, %v3190_v25  ;;  %v3156_v54 = vcvt.s32.f32 %v1556_v31  ;;  %v1572_v55 = vunpack.c.0.s8 %v524_v15  ;;  %v1573_v43 = vunpack.c.1.s8 %v524_v15  ;;  %v5453_v29 = vpop.f32.mrf.mxu2  ;;  %v5466_v25 = vpop.f32.mrf.mxu3 }
 0x259   : > { %5656 = vmatpush.bf16.msrb.mxu2 %v4341_v47  ;;  %v4324_v44 = vpack.c.bf16 %v3141_v52, %v3140_v48  ;;  %v3157_v59 = vcvt.s32.f32 %v1557_v62  ;;  %v1588_v63 = vunpack.c.0.s8 %v528_v23  ;;  %v1589_v0 = vunpack.c.1.s8 %v528_v23  ;;  %v538_v48 = vld [vmem:[%s6675_s8 + $0x730] sm:$0xff] }
 0x25a   : > { %5669 = vmatpush.bf16.msrb.mxu3 %v4349_v39  ;;  %v3172_v4 = vcvt.s32.f32 %v1572_v55  ;;  %v3173_v38 = vcvt.s32.f32 %v1573_v43  ;;  %v1618_v51 = vunpack.c.2.s8 %v535_v61  ;;  %v1619_v6 = vunpack.c.3.s8 %v535_v61 }
 0x25b   : > { %5631 = vmatpush.bf16.msrb.mxu0 %v4324_v44  ;;  %v4332_v56 = vpack.c.bf16 %v3157_v59, %v3156_v54  ;;  %v3188_v8 = vcvt.s32.f32 %v1588_v63  ;;  %v3189_v46 = vcvt.s32.f32 %v1589_v0  ;;  %v1634_v49 = vunpack.c.2.s8 %v7156_v30  ;;  %v542_v44 = vld [vmem:[%s6675_s8 + $0x750] sm:$0xff] }
 0x25c   : > { %v4340_v11 = vpack.c.bf16 %v3173_v38, %v3172_v4  ;;  %v3218_v12 = vcvt.s32.f32 %v1618_v51  ;;  %v3219_v15 = vcvt.s32.f32 %v1619_v6  ;;  %v1635_v53 = vunpack.c.3.s8 %v7156_v30  ;;  %v546_v38 = vld [vmem:[%s6675_s8 + $0x770] sm:$0xff] }
 0x25d   : > { %5644 = vmatpush.bf16.msrb.mxu1 %v4332_v56  ;;  %v4348_v16 = vpack.c.bf16 %v3189_v46, %v3188_v8  ;;  %v3234_v27 = vcvt.s32.f32 %v1634_v49  ;;  %v1650_v42 = vunpack.c.2.s8 %v543_v7  ;;  %v1651_v17 = vunpack.c.3.s8 %v543_v7  ;;  %v4716_v8 = vld [vmem:[%s7631_s0 + $0x38] sm:$0xff] }
 0x25e   : > { %5657 = vmatpush.bf16.msrb.mxu2 %v4340_v11  ;;  %v4363_v22 = vpack.c.bf16 %v3219_v15, %v3218_v12  ;;  %v3235_v60 = vcvt.s32.f32 %v1635_v53  ;;  %v1666_v23 = vunpack.c.2.s8 %v547_v26  ;;  %v1667_v57 = vunpack.c.3.s8 %v547_v26  ;;  %5632 = vmatmul.bf16.vlgmr.msrb.gmra.mxu0 %v4788_v58  ;;  %4793 = vst [vmem:[#allocation1] ss:$9 sm:$0xff] %v4716_v8 }
 0x25f   : > { %5670 = vmatpush.bf16.msrb.mxu3 %v4348_v16  ;;  %v3250_v24 = vcvt.s32.f32 %v1650_v42  ;;  %v3251_v28 = vcvt.s32.f32 %v1651_v17  ;;  %v1616_v32 = vunpack.c.0.s8 %v535_v61  ;;  %v1617_v5 = vunpack.c.1.s8 %v535_v61 }
 0x260   : > { %5676 = vmatpush.bf16.msra.mxu0 %v4363_v22  ;;  %v4371_v50 = vpack.c.bf16 %v3235_v60, %v3234_v27  ;;  %v3266_v35 = vcvt.s32.f32 %v1666_v23  ;;  %v3267_v36 = vcvt.s32.f32 %v1667_v57  ;;  %5645 = vmatmul.bf16.vlgmr.msrb.gmra.mxu1 %v4789_v18  ;;  %v1632_v40 = vunpack.c.0.s8 %v7156_v30 }
 0x261   : > { %v4379_v10 = vpack.c.bf16 %v3251_v28, %v3250_v24  ;;  %5658 = vmatmul.bf16.vlgmr.msrb.gmra.mxu2 %v4790_v37  ;;  %v3216_v41 = vcvt.s32.f32 %v1616_v32  ;;  %v3217_v3 = vcvt.s32.f32 %v1617_v5  ;;  %v1633_v20 = vunpack.c.1.s8 %v7156_v30 }
 0x262   : > { %5689 = vmatpush.bf16.msra.mxu1 %v4371_v50  ;;  %v4387_v13 = vpack.c.bf16 %v3267_v36, %v3266_v35  ;;  %5671 = vmatmul.bf16.vlgmr.msrb.gmra.mxu3 %v4791_v14  ;;  %v3232_v31 = vcvt.s32.f32 %v1632_v40  ;;  %v1648_v45 = vunpack.c.0.s8 %v543_v7  ;;  %v1649_v47 = vunpack.c.1.s8 %v543_v7  ;;  %v533_v50 = vld [vmem:[%s6675_s8 + $0x708] sm:$0xff] }
 0x263   : > { %5702 = vmatpush.bf16.msra.mxu2 %v4379_v10  ;;  %v4362_v52 = vpack.c.bf16 %v3217_v3, %v3216_v41  ;;  %v3233_v62 = vcvt.s32.f32 %v1633_v20  ;;  %v1664_v61 = vunpack.c.0.s8 %v547_v26  ;;  %v1665_v39 = vunpack.c.1.s8 %v547_v26  ;;  %v537_v40 = vld [vmem:[%s6675_s8 + $0x728] sm:$0xff] }
 0x264   : > { %5715 = vmatpush.bf16.msra.mxu3 %v4387_v13  ;;  %v3248_v54 = vcvt.s32.f32 %v1648_v45  ;;  %v3249_v55 = vcvt.s32.f32 %v1649_v47  ;;  %v1614_v43 = vunpack.c.2.s8 %v534_v21  ;;  %v1615_v30 = vunpack.c.3.s8 %v534_v21  ;;  %v545_v45 = vld [vmem:[%s6675_s8 + $0x768] sm:$0xff] }
 0x265   : > { %5677 = vmatpush.bf16.msra.mxu0 %v4362_v52  ;;  %v4370_v59 = vpack.c.bf16 %v3233_v62, %v3232_v31  ;;  %v3264_v63 = vcvt.s32.f32 %v1664_v61  ;;  %v3265_v0 = vcvt.s32.f32 %v1665_v39  ;;  %v1630_v4 = vunpack.c.2.s8 %v538_v48 }
 0x266   : > { %v4378_v51 = vpack.c.bf16 %v3249_v55, %v3248_v54  ;;  %v3214_v6 = vcvt.s32.f32 %v1614_v43  ;;  %v3215_v7 = vcvt.s32.f32 %v1615_v30  ;;  %v1631_v56 = vunpack.c.3.s8 %v538_v48 }
 0x267   : > { %5690 = vmatpush.bf16.msra.mxu1 %v4370_v59  ;;  %v4386_v46 = vpack.c.bf16 %v3265_v0, %v3264_v63  ;;  %v3230_v49 = vcvt.s32.f32 %v1630_v4  ;;  %v1646_v26 = vunpack.c.2.s8 %v542_v44  ;;  %v1647_v58 = vunpack.c.3.s8 %v542_v44 }
 0x268   : > { %5703 = vmatpush.bf16.msra.mxu2 %v4378_v51  ;;  %v4361_v9 = vpack.c.bf16 %v3215_v7, %v3214_v6  ;;  %v3231_v11 = vcvt.s32.f32 %v1631_v56  ;;  %v1662_v12 = vunpack.c.2.s8 %v546_v38  ;;  %v1663_v15 = vunpack.c.3.s8 %v546_v38 }
 0x269   : > { %5716 = vmatpush.bf16.msra.mxu3 %v4386_v46  ;;  %v3246_v53 = vcvt.s32.f32 %v1646_v26  ;;  %v3247_v16 = vcvt.s32.f32 %v1647_v58  ;;  %v5426_v27 = vadd.f32 %v7148_v33, %v7144_v1  ;;  %v1612_v42 = vunpack.c.0.s8 %v534_v21 }
 0x26a   : > { %5678 = vmatpush.bf16.msra.mxu0 %v4361_v9  ;;  %v4369_v17 = vpack.c.bf16 %v3231_v11, %v3230_v49  ;;  %v3262_v18 = vcvt.s32.f32 %v1662_v12  ;;  %v3263_v22 = vcvt.s32.f32 %v1663_v15  ;;  %v1613_v60 = vunpack.c.1.s8 %v534_v21  ;;  %v541_v21 = vld [vmem:[%s6675_s8 + $0x748] sm:$0xff]  ;;  %v532_v12 = vld [vmem:[%s6675_s8 + $0x700] sm:$0xff] }
 0x26b   : > { %v4377_v23 = vpack.c.bf16 %v3247_v16, %v3246_v53  ;;  %v3212_v57 = vcvt.s32.f32 %v1612_v42  ;;  %v1628_v37 = vunpack.c.0.s8 %v538_v48  ;;  %v1629_v24 = vunpack.c.1.s8 %v538_v48  ;;  %v7188_v42 = vpop.f32.mrf.mxu0 }
 0x26c   : > { %5691 = vmatpush.bf16.msra.mxu1 %v4369_v17  ;;  %v4385_v28 = vpack.c.bf16 %v3263_v22, %v3262_v18  ;;  %v3213_v14 = vcvt.s32.f32 %v1613_v60  ;;  %v1644_v32 = vunpack.c.0.s8 %v542_v44  ;;  %v1645_v5 = vunpack.c.1.s8 %v542_v44  ;;  %v540_v60 = vld [vmem:[%s6675_s8 + $0x740] sm:$0xff] }
 0x26d   : > { %5704 = vmatpush.bf16.msra.mxu2 %v4377_v23  ;;  %v3228_v1 = vcvt.s32.f32 %v1628_v37  ;;  %v3229_v33 = vcvt.s32.f32 %v1629_v24  ;;  %v1660_v35 = vunpack.c.0.s8 %v546_v38  ;;  %v1661_v36 = vunpack.c.1.s8 %v546_v38 }
 0x26e   : > { %5717 = vmatpush.bf16.msra.mxu3 %v4385_v28  ;;  %v4360_v10 = vpack.c.bf16 %v3213_v14, %v3212_v57  ;;  %v3244_v41 = vcvt.s32.f32 %v1644_v32  ;;  %v3245_v3 = vcvt.s32.f32 %v1645_v5  ;;  %v5439_v20 = vadd.f32 %v7152_v34, %v5426_v27  ;;  %v536_v27 = vld [vmem:[%s6675_s8 + $0x720] sm:$0xff] }
 0x26f   : > { %v4368_v29 = vpack.c.bf16 %v3229_v33, %v3228_v1  ;;  %v3260_v25 = vcvt.s32.f32 %v1660_v35  ;;  %v3261_v13 = vcvt.s32.f32 %v1661_v36  ;;  %v1610_v31 = vunpack.c.2.s8 %v533_v50 }
 0x270   : > { %5679 = vmatpush.bf16.msra.mxu0 %v4360_v10  ;;  %v4376_v47 = vpack.c.bf16 %v3245_v3, %v3244_v41  ;;  %v1611_v48 = vunpack.c.3.s8 %v533_v50  ;;  %v1626_v52 = vunpack.c.2.s8 %v537_v40  ;;  %v1627_v62 = vunpack.c.3.s8 %v537_v40 }
 0x271   : > { %5692 = vmatpush.bf16.msra.mxu1 %v4368_v29  ;;  %v4384_v61 = vpack.c.bf16 %v3261_v13, %v3260_v25  ;;  %v3210_v39 = vcvt.s32.f32 %v1610_v31  ;;  %v1642_v54 = vunpack.c.2.s8 %v541_v21  ;;  %v1643_v55 = vunpack.c.3.s8 %v541_v21 }
 0x272   : > { %5705 = vmatpush.bf16.msra.mxu2 %v4376_v47  ;;  %v3211_v43 = vcvt.s32.f32 %v1611_v48  ;;  %v3226_v30 = vcvt.s32.f32 %v1626_v52  ;;  %v3227_v34 = vcvt.s32.f32 %v1627_v62  ;;  %v1658_v44 = vunpack.c.2.s8 %v545_v45 }
 0x273   : > { %5718 = vmatpush.bf16.msra.mxu3 %v4384_v61  ;;  %v3242_v59 = vcvt.s32.f32 %v1642_v54  ;;  %v3243_v63 = vcvt.s32.f32 %v1643_v55  ;;  %v1659_v0 = vunpack.c.3.s8 %v545_v45  ;;  %v5452_v4 = vadd.f32 %v7158_v19, %v5439_v20  ;;  %v7192_v20 = vpop.f32.mrf.mxu1  ;;  %v5479_v54 = vpop.f32.mrf.mxu0 }
 0x274   : > { %v4359_v38 = vpack.c.bf16 %v3211_v43, %v3210_v39  ;;  %v4367_v51 = vpack.c.bf16 %v3227_v34, %v3226_v30  ;;  %v3258_v6 = vcvt.s32.f32 %v1658_v44  ;;  %v1608_v7 = vunpack.c.0.s8 %v533_v50  ;;  %v551_v44 = vld [vmem:[%s6675_s8 + $0x798] sm:$0xff] }
 0x275   : > { %v4375_v56 = vpack.c.bf16 %v3243_v63, %v3242_v59  ;;  %v3259_v8 = vcvt.s32.f32 %v1659_v0  ;;  %v7184_v46 = vadd.f32 %v7160_v2, %v5452_v4  ;;  %v1609_v49 = vunpack.c.1.s8 %v533_v50  ;;  %v544_v50 = vld [vmem:[%s6675_s8 + $0x760] sm:$0xff] }
 0x276   : > { %5680 = vmatpush.bf16.msra.mxu0 %v4359_v38  ;;  %5693 = vmatpush.bf16.msra.mxu1 %v4367_v51  ;;  %v3208_v26 = vcvt.s32.f32 %v1608_v7  ;;  %v1624_v58 = vunpack.c.0.s8 %v537_v40  ;;  %v1625_v9 = vunpack.c.1.s8 %v537_v40  ;;  %v1640_v11 = vunpack.c.0.s8 %v541_v21  ;;  %v7196_v38 = vld [vmem:[%s6675_s8 + $0x7b8] sm:$0xff] }
 0x277   : > { %5706 = vmatpush.bf16.msra.mxu2 %v4375_v56  ;;  %v4383_v19 = vpack.c.bf16 %v3259_v8, %v3258_v6  ;;  %v3209_v15 = vcvt.s32.f32 %v1609_v49  ;;  %v1641_v53 = vunpack.c.1.s8 %v541_v21  ;;  %v1656_v16 = vunpack.c.0.s8 %v545_v45  ;;  %v7198_v8 = vpop.f32.mrf.mxu2  ;;  %v7200_v49 = vpop.f32.mrf.mxu3 }
 0x278   : > { %v3224_v2 = vcvt.s32.f32 %v1624_v58  ;;  %v3225_v17 = vcvt.s32.f32 %v1625_v9  ;;  %v3240_v18 = vcvt.s32.f32 %v1640_v11  ;;  %v1657_v22 = vunpack.c.1.s8 %v545_v45 }
 0x279   : > { %5719 = vmatpush.bf16.msra.mxu3 %v4383_v19  ;;  %v4358_v23 = vpack.c.bf16 %v3209_v15, %v3208_v26  ;;  %v3241_v57 = vcvt.s32.f32 %v1641_v53  ;;  %v3256_v37 = vcvt.s32.f32 %v1656_v16  ;;  %v1606_v24 = vunpack.c.2.s8 %v532_v12 }
 0x27a   : > { %v4366_v28 = vpack.c.bf16 %v3225_v17, %v3224_v2  ;;  %v3257_v14 = vcvt.s32.f32 %v1657_v22  ;;  %v1607_v32 = vunpack.c.3.s8 %v532_v12  ;;  %v1622_v5 = vunpack.c.2.s8 %v536_v27  ;;  %v4794_v2 = vld [vmem:[#allocation1] sm:$0xff] }
 0x27b   : > { %5681 = vmatpush.bf16.msra.mxu0 %v4358_v23  ;;  %v4374_v1 = vpack.c.bf16 %v3241_v57, %v3240_v18  ;;  %v3206_v33 = vcvt.s32.f32 %v1606_v24  ;;  %v1623_v35 = vunpack.c.3.s8 %v536_v27  ;;  %v1638_v36 = vunpack.c.2.s8 %v540_v60  ;;  %v5492_v17 = vpop.f32.mrf.mxu1 }
 0x27c   : > { %5694 = vmatpush.bf16.msra.mxu1 %v4366_v28  ;;  %v4382_v40 = vpack.c.bf16 %v3257_v14, %v3256_v37  ;;  %v3207_v10 = vcvt.s32.f32 %v1607_v32  ;;  %v3222_v41 = vcvt.s32.f32 %v1622_v5  ;;  %v1639_v3 = vunpack.c.3.s8 %v540_v60  ;;  %v4795_v14 = vld [vmem:[#allocation1 + $0x9] sm:$0xff] }
 0x27d   : > { %5707 = vmatpush.bf16.msra.mxu2 %v4374_v1  ;;  %v3223_v21 = vcvt.s32.f32 %v1623_v35  ;;  %v3238_v29 = vcvt.s32.f32 %v1638_v36  ;;  %v1654_v25 = vunpack.c.2.s8 %v544_v50  ;;  %v1655_v13 = vunpack.c.3.s8 %v544_v50 }
 0x27e   : > { %5720 = vmatpush.bf16.msra.mxu3 %v4382_v40  ;;  %v4357_v31 = vpack.c.bf16 %v3207_v10, %v3206_v33  ;;  %v3239_v45 = vcvt.s32.f32 %v1639_v3  ;;  %v1604_v47 = vunpack.c.0.s8 %v532_v12  ;;  %v1605_v48 = vunpack.c.1.s8 %v532_v12  ;;  %v559_v12 = vld [vmem:[%s6675_s8 + $0x7d8] sm:$0xff]  ;;  %v4796_v33 = vld [vmem:[#allocation1 + $0x12] sm:$0xff] }
 0x27f   : > { %v4365_v52 = vpack.c.bf16 %v3223_v21, %v3222_v41  ;;  %v3254_v62 = vcvt.s32.f32 %v1654_v25  ;;  %v3255_v61 = vcvt.s32.f32 %v1655_v13  ;;  %v1620_v39 = vunpack.c.0.s8 %v536_v27  ;;  %v4797_v40 = vld [vmem:[#allocation1 + $0x1b] sm:$0xff] }
 0x280   : > { %5682 = vmatpush.bf16.msra.mxu0 %v4357_v31  ;;  %v4373_v55 = vpack.c.bf16 %v3239_v45, %v3238_v29  ;;  %v3204_v43 = vcvt.s32.f32 %v1604_v47  ;;  %v3205_v30 = vcvt.s32.f32 %v1605_v48  ;;  %v1621_v34 = vunpack.c.1.s8 %v536_v27  ;;  %v563_v27 = vld [vmem:[%s6675_s8 + $0x7f8] sm:$0xff]  ;;  %v550_v48 = vld [vmem:[%s6675_s8 + $0x790] sm:$0xff] }
 0x281   : > { %5695 = vmatpush.bf16.msra.mxu1 %v4365_v52  ;;  %v4381_v59 = vpack.c.bf16 %v3255_v61, %v3254_v62  ;;  %v3220_v63 = vcvt.s32.f32 %v1620_v39  ;;  %v1636_v0 = vunpack.c.0.s8 %v540_v60  ;;  %v1637_v4 = vunpack.c.1.s8 %v540_v60  ;;  %v5505_v52 = vpop.f32.mrf.mxu2  ;;  %v5518_v62 = vpop.f32.mrf.mxu3 }
 0x282   : > { %5708 = vmatpush.bf16.msra.mxu2 %v4373_v55  ;;  %v4356_v51 = vpack.c.bf16 %v3205_v30, %v3204_v43  ;;  %v3221_v6 = vcvt.s32.f32 %v1621_v34  ;;  %v1652_v7 = vunpack.c.0.s8 %v544_v50  ;;  %v1653_v56 = vunpack.c.1.s8 %v544_v50  ;;  %v554_v43 = vld [vmem:[%s6675_s8 + $0x7b0] sm:$0xff] }
 0x283   : > { %5721 = vmatpush.bf16.msra.mxu3 %v4381_v59  ;;  %v3236_v26 = vcvt.s32.f32 %v1636_v0  ;;  %v3237_v58 = vcvt.s32.f32 %v1637_v4  ;;  %v1682_v9 = vunpack.c.2.s8 %v551_v44  ;;  %v1683_v11 = vunpack.c.3.s8 %v551_v44 }
 0x284   : > { %5683 = vmatpush.bf16.msra.mxu0 %v4356_v51  ;;  %v4364_v19 = vpack.c.bf16 %v3221_v6, %v3220_v63  ;;  %v3252_v15 = vcvt.s32.f32 %v1652_v7  ;;  %v3253_v53 = vcvt.s32.f32 %v1653_v56  ;;  %v1698_v16 = vunpack.c.2.s8 %v7196_v38  ;;  %v558_v51 = vld [vmem:[%s6675_s8 + $0x7d0] sm:$0xff] }
 0x285   : > { %v4372_v18 = vpack.c.bf16 %v3237_v58, %v3236_v26  ;;  %v3282_v22 = vcvt.s32.f32 %v1682_v9  ;;  %v3283_v60 = vcvt.s32.f32 %v1683_v11  ;;  %v1699_v23 = vunpack.c.3.s8 %v7196_v38  ;;  %v562_v58 = vld [vmem:[%s6675_s8 + $0x7f0] sm:$0xff] }
 0x286   : > { %5696 = vmatpush.bf16.msra.mxu1 %v4364_v19  ;;  %v4380_v57 = vpack.c.bf16 %v3253_v53, %v3252_v15  ;;  %v3298_v37 = vcvt.s32.f32 %v1698_v16  ;;  %v1714_v24 = vunpack.c.2.s8 %v559_v12  ;;  %v1715_v28 = vunpack.c.3.s8 %v559_v12 }
 0x287   : > { %5709 = vmatpush.bf16.msra.mxu2 %v4372_v18  ;;  %v4395_v32 = vpack.c.bf16 %v3283_v60, %v3282_v22  ;;  %v3299_v5 = vcvt.s32.f32 %v1699_v23  ;;  %v1730_v50 = vunpack.c.2.s8 %v563_v27  ;;  %v1731_v1 = vunpack.c.3.s8 %v563_v27  ;;  %5684 = vmatmul.bf16.vlgmr.msra.gmra.mxu0 %v4794_v2 }
 0x288   : > { %5722 = vmatpush.bf16.msra.mxu3 %v4380_v57  ;;  %v3314_v35 = vcvt.s32.f32 %v1714_v24  ;;  %v3315_v36 = vcvt.s32.f32 %v1715_v28  ;;  %v1680_v10 = vunpack.c.0.s8 %v551_v44  ;;  %v1681_v41 = vunpack.c.1.s8 %v551_v44 }
 0x289   : > { %5728 = vmatpush.bf16.msrb.mxu0 %v4395_v32  ;;  %v4403_v3 = vpack.c.bf16 %v3299_v5, %v3298_v37  ;;  %v3330_v21 = vcvt.s32.f32 %v1730_v50  ;;  %v3331_v29 = vcvt.s32.f32 %v1731_v1  ;;  %5697 = vmatmul.bf16.vlgmr.msra.gmra.mxu1 %v4795_v14  ;;  %v1696_v25 = vunpack.c.0.s8 %v7196_v38 }
 0x28a   : > { %v4411_v13 = vpack.c.bf16 %v3315_v36, %v3314_v35  ;;  %5710 = vmatmul.bf16.vlgmr.msra.gmra.mxu2 %v4796_v33  ;;  %v3280_v31 = vcvt.s32.f32 %v1680_v10  ;;  %v3281_v45 = vcvt.s32.f32 %v1681_v41  ;;  %v1697_v47 = vunpack.c.1.s8 %v7196_v38  ;;  %v549_v41 = vld [vmem:[%s6675_s8 + $0x788] sm:$0xff] }
 0x28b   : > { %5741 = vmatpush.bf16.msrb.mxu1 %v4403_v3  ;;  %v4419_v61 = vpack.c.bf16 %v3331_v29, %v3330_v21  ;;  %5723 = vmatmul.bf16.vlgmr.msra.gmra.mxu3 %v4797_v40  ;;  %v3296_v39 = vcvt.s32.f32 %v1696_v25  ;;  %v1712_v54 = vunpack.c.0.s8 %v559_v12  ;;  %v1713_v55 = vunpack.c.1.s8 %v559_v12  ;;  %v553_v29 = vld [vmem:[%s6675_s8 + $0x7a8] sm:$0xff] }
 0x28c   : > { %5754 = vmatpush.bf16.msrb.mxu2 %v4411_v13  ;;  %v4394_v30 = vpack.c.bf16 %v3281_v45, %v3280_v31  ;;  %v3297_v34 = vcvt.s32.f32 %v1697_v47  ;;  %v1728_v44 = vunpack.c.0.s8 %v563_v27  ;;  %v1729_v59 = vunpack.c.1.s8 %v563_v27  ;;  %v557_v47 = vld [vmem:[%s6675_s8 + $0x7c8] sm:$0xff] }
 0x28d   : > { %5767 = vmatpush.bf16.msrb.mxu3 %v4419_v61  ;;  %v3312_v63 = vcvt.s32.f32 %v1712_v54  ;;  %v3313_v0 = vcvt.s32.f32 %v1713_v55  ;;  %v1678_v4 = vunpack.c.2.s8 %v550_v48  ;;  %v1679_v38 = vunpack.c.3.s8 %v550_v48 }
 0x28e   : > { %5729 = vmatpush.bf16.msrb.mxu0 %v4394_v30  ;;  %v4402_v6 = vpack.c.bf16 %v3297_v34, %v3296_v39  ;;  %v3328_v7 = vcvt.s32.f32 %v1728_v44  ;;  %v3329_v56 = vcvt.s32.f32 %v1729_v59  ;;  %v1694_v26 = vunpack.c.2.s8 %v554_v43  ;;  %v561_v39 = vld [vmem:[%s6675_s8 + $0x7e8] sm:$0xff] }
 0x28f   : > { %v4410_v9 = vpack.c.bf16 %v3313_v0, %v3312_v63  ;;  %v3278_v11 = vcvt.s32.f32 %v1678_v4  ;;  %v3279_v12 = vcvt.s32.f32 %v1679_v38  ;;  %v1695_v19 = vunpack.c.3.s8 %v554_v43 }
 0x290   : > { %5742 = vmatpush.bf16.msrb.mxu1 %v4402_v6  ;;  %v4418_v15 = vpack.c.bf16 %v3329_v56, %v3328_v7  ;;  %v3294_v53 = vcvt.s32.f32 %v1694_v26  ;;  %v1710_v16 = vunpack.c.2.s8 %v558_v51  ;;  %v1711_v27 = vunpack.c.3.s8 %v558_v51 }
 0x291   : > { %5755 = vmatpush.bf16.msrb.mxu2 %v4410_v9  ;;  %v4393_v2 = vpack.c.bf16 %v3279_v12, %v3278_v11  ;;  %v3295_v17 = vcvt.s32.f32 %v1695_v19  ;;  %v1726_v18 = vunpack.c.2.s8 %v562_v58  ;;  %v1727_v22 = vunpack.c.3.s8 %v562_v58 }
 0x292   : > { %5768 = vmatpush.bf16.msrb.mxu3 %v4418_v15  ;;  %v3310_v60 = vcvt.s32.f32 %v1710_v16  ;;  %v3311_v23 = vcvt.s32.f32 %v1711_v27  ;;  %v5478_v57 = vadd.f32 %v7188_v42, %v7184_v46  ;;  %v1676_v37 = vunpack.c.0.s8 %v550_v48 }
 0x293   : > { %5730 = vmatpush.bf16.msrb.mxu0 %v4393_v2  ;;  %v4401_v24 = vpack.c.bf16 %v3295_v17, %v3294_v53  ;;  %v3326_v28 = vcvt.s32.f32 %v1726_v18  ;;  %v3327_v14 = vcvt.s32.f32 %v1727_v22  ;;  %v1677_v32 = vunpack.c.1.s8 %v550_v48  ;;  %v548_v18 = vld [vmem:[%s6675_s8 + $0x780] sm:$0xff] }
 0x294   : > { %v4409_v5 = vpack.c.bf16 %v3311_v23, %v3310_v60  ;;  %v3276_v50 = vcvt.s32.f32 %v1676_v37  ;;  %v1692_v1 = vunpack.c.0.s8 %v554_v43  ;;  %v1693_v33 = vunpack.c.1.s8 %v554_v43  ;;  %v7225_v37 = vpop.f32.mrf.mxu0 }
 0x295   : > { %5743 = vmatpush.bf16.msrb.mxu1 %v4401_v24  ;;  %v4417_v35 = vpack.c.bf16 %v3327_v14, %v3326_v28  ;;  %v3277_v36 = vcvt.s32.f32 %v1677_v32  ;;  %v1708_v40 = vunpack.c.0.s8 %v558_v51  ;;  %v1709_v10 = vunpack.c.1.s8 %v558_v51  ;;  %v556_v32 = vld [vmem:[%s6675_s8 + $0x7c0] sm:$0xff] }
 0x296   : > { %5756 = vmatpush.bf16.msrb.mxu2 %v4409_v5  ;;  %v3292_v46 = vcvt.s32.f32 %v1692_v1  ;;  %v3293_v42 = vcvt.s32.f32 %v1693_v33  ;;  %v1724_v3 = vunpack.c.0.s8 %v562_v58  ;;  %v1725_v21 = vunpack.c.1.s8 %v562_v58 }
 0x297   : > { %5769 = vmatpush.bf16.msrb.mxu3 %v4417_v35  ;;  %v4392_v25 = vpack.c.bf16 %v3277_v36, %v3276_v50  ;;  %v3308_v13 = vcvt.s32.f32 %v1708_v40  ;;  %v3309_v31 = vcvt.s32.f32 %v1709_v10  ;;  %v5491_v45 = vadd.f32 %v7192_v20, %v5478_v57  ;;  %v552_v57 = vld [vmem:[%s6675_s8 + $0x7a0] sm:$0xff] }
 0x298   : > { %v4400_v48 = vpack.c.bf16 %v3293_v42, %v3292_v46  ;;  %v3324_v52 = vcvt.s32.f32 %v1724_v3  ;;  %v3325_v62 = vcvt.s32.f32 %v1725_v21  ;;  %v1674_v61 = vunpack.c.2.s8 %v549_v41 }
 0x299   : > { %5731 = vmatpush.bf16.msrb.mxu0 %v4392_v25  ;;  %v4408_v54 = vpack.c.bf16 %v3309_v31, %v3308_v13  ;;  %v1675_v55 = vunpack.c.3.s8 %v549_v41  ;;  %v1690_v43 = vunpack.c.2.s8 %v553_v29  ;;  %v1691_v30 = vunpack.c.3.s8 %v553_v29 }
 0x29a   : > { %5744 = vmatpush.bf16.msrb.mxu1 %v4400_v48  ;;  %v4416_v34 = vpack.c.bf16 %v3325_v62, %v3324_v52  ;;  %v3274_v44 = vcvt.s32.f32 %v1674_v61  ;;  %v1706_v59 = vunpack.c.2.s8 %v557_v47  ;;  %v1707_v63 = vunpack.c.3.s8 %v557_v47 }
 0x29b   : > { %5757 = vmatpush.bf16.msrb.mxu2 %v4408_v54  ;;  %v3275_v0 = vcvt.s32.f32 %v1675_v55  ;;  %v3290_v4 = vcvt.s32.f32 %v1690_v43  ;;  %v3291_v20 = vcvt.s32.f32 %v1691_v30  ;;  %v1722_v38 = vunpack.c.2.s8 %v561_v39 }
 0x29c   : > { %5770 = vmatpush.bf16.msrb.mxu3 %v4416_v34  ;;  %v3306_v51 = vcvt.s32.f32 %v1706_v59  ;;  %v3307_v6 = vcvt.s32.f32 %v1707_v63  ;;  %v1723_v7 = vunpack.c.3.s8 %v561_v39  ;;  %v5504_v56 = vadd.f32 %v7198_v8, %v5491_v45  ;;  %v7229_v45 = vpop.f32.mrf.mxu1  ;;  %v5531_v59 = vpop.f32.mrf.mxu0 }
 0x29d   : > { %v4391_v26 = vpack.c.bf16 %v3275_v0, %v3274_v44  ;;  %v4399_v58 = vpack.c.bf16 %v3291_v20, %v3290_v4  ;;  %v3322_v9 = vcvt.s32.f32 %v1722_v38  ;;  %v1672_v11 = vunpack.c.0.s8 %v549_v41  ;;  %v567_v38 = vld [vmem:[%s6675_s8 + $0x818] sm:$0xff] }
 0x29e   : > { %v4407_v12 = vpack.c.bf16 %v3307_v6, %v3306_v51  ;;  %v3323_v19 = vcvt.s32.f32 %v1723_v7  ;;  %v7221_v15 = vadd.f32 %v7200_v49, %v5504_v56  ;;  %v1673_v53 = vunpack.c.1.s8 %v549_v41  ;;  %v560_v41 = vld [vmem:[%s6675_s8 + $0x7e0] sm:$0xff] }
 0x29f   : > { %5732 = vmatpush.bf16.msrb.mxu0 %v4391_v26  ;;  %5745 = vmatpush.bf16.msrb.mxu1 %v4399_v58  ;;  %v3272_v16 = vcvt.s32.f32 %v1672_v11  ;;  %v1688_v27 = vunpack.c.0.s8 %v553_v29  ;;  %v1689_v2 = vunpack.c.1.s8 %v553_v29  ;;  %v1704_v17 = vunpack.c.0.s8 %v557_v47  ;;  %v7233_v26 = vld [vmem:[%s6675_s8 + $0x838] sm:$0xff] }
 0x2a0   : > { %5758 = vmatpush.bf16.msrb.mxu2 %v4407_v12  ;;  %v4415_v8 = vpack.c.bf16 %v3323_v19, %v3322_v9  ;;  %v3273_v22 = vcvt.s32.f32 %v1673_v53  ;;  %v1705_v60 = vunpack.c.1.s8 %v557_v47  ;;  %v1720_v23 = vunpack.c.0.s8 %v561_v39  ;;  %v7235_v19 = vpop.f32.mrf.mxu2  ;;  %v7237_v53 = vpop.f32.mrf.mxu3 }
 0x2a1   : > { %v3288_v49 = vcvt.s32.f32 %v1688_v27  ;;  %v3289_v24 = vcvt.s32.f32 %v1689_v2  ;;  %v3304_v28 = vcvt.s32.f32 %v1704_v17  ;;  %v1721_v14 = vunpack.c.1.s8 %v561_v39 }
 0x2a2   : > { %5771 = vmatpush.bf16.msrb.mxu3 %v4415_v8  ;;  %v4390_v5 = vpack.c.bf16 %v3273_v22, %v3272_v16  ;;  %v3305_v50 = vcvt.s32.f32 %v1705_v60  ;;  %v3320_v1 = vcvt.s32.f32 %v1720_v23  ;;  %v1670_v33 = vunpack.c.2.s8 %v548_v18 }
 0x2a3   : > { %v4398_v35 = vpack.c.bf16 %v3289_v24, %v3288_v49  ;;  %v3321_v36 = vcvt.s32.f32 %v1721_v14  ;;  %v1671_v40 = vunpack.c.3.s8 %v548_v18  ;;  %v1686_v10 = vunpack.c.2.s8 %v552_v57  ;;  %v4798_v49 = vld [vmem:[#allocation1 + $0x24] sm:$0xff] }
 0x2a4   : > { %5733 = vmatpush.bf16.msrb.mxu0 %v4390_v5  ;;  %v4406_v46 = vpack.c.bf16 %v3305_v50, %v3304_v28  ;;  %v3270_v42 = vcvt.s32.f32 %v1670_v33  ;;  %v1687_v3 = vunpack.c.3.s8 %v552_v57  ;;  %v1702_v21 = vunpack.c.2.s8 %v556_v32  ;;  %v5544_v24 = vpop.f32.mrf.mxu1 }
 0x2a5   : > { %5746 = vmatpush.bf16.msrb.mxu1 %v4398_v35  ;;  %v4414_v29 = vpack.c.bf16 %v3321_v36, %v3320_v1  ;;  %v3271_v25 = vcvt.s32.f32 %v1671_v40  ;;  %v3286_v13 = vcvt.s32.f32 %v1686_v10  ;;  %v1703_v31 = vunpack.c.3.s8 %v556_v32  ;;  %v4799_v36 = vld [vmem:[#allocation1 + $0x2d] sm:$0xff] }
 0x2a6   : > { %5759 = vmatpush.bf16.msrb.mxu2 %v4406_v46  ;;  %v3287_v47 = vcvt.s32.f32 %v1687_v3  ;;  %v3302_v48 = vcvt.s32.f32 %v1702_v21  ;;  %v1718_v52 = vunpack.c.2.s8 %v560_v41  ;;  %v1719_v62 = vunpack.c.3.s8 %v560_v41 }
 0x2a7   : > { %5772 = vmatpush.bf16.msrb.mxu3 %v4414_v29  ;;  %v4389_v61 = vpack.c.bf16 %v3271_v25, %v3270_v42  ;;  %v3303_v39 = vcvt.s32.f32 %v1703_v31  ;;  %v1668_v54 = vunpack.c.0.s8 %v548_v18  ;;  %v1669_v55 = vunpack.c.1.s8 %v548_v18  ;;  %v575_v18 = vld [vmem:[%s6675_s8 + $0x858] sm:$0xff]  ;;  %v4800_v42 = vld [vmem:[#allocation1 + $0x36] sm:$0xff] }
 0x2a8   : > { %v4397_v43 = vpack.c.bf16 %v3287_v47, %v3286_v13  ;;  %v3318_v30 = vcvt.s32.f32 %v1718_v52  ;;  %v3319_v34 = vcvt.s32.f32 %v1719_v62  ;;  %v1684_v44 = vunpack.c.0.s8 %v552_v57  ;;  %v4801_v29 = vld [vmem:[#allocation1 + $0x3f] sm:$0xff] }
 0x2a9   : > { %5734 = vmatpush.bf16.msrb.mxu0 %v4389_v61  ;;  %v4405_v63 = vpack.c.bf16 %v3303_v39, %v3302_v48  ;;  %v3268_v0 = vcvt.s32.f32 %v1668_v54  ;;  %v3269_v4 = vcvt.s32.f32 %v1669_v55  ;;  %v1685_v20 = vunpack.c.1.s8 %v552_v57  ;;  %v579_v57 = vld [vmem:[%s6675_s8 + $0x878] sm:$0xff]  ;;  %v566_v55 = vld [vmem:[%s6675_s8 + $0x810] sm:$0xff] }
 0x2aa   : > { %5747 = vmatpush.bf16.msrb.mxu1 %v4397_v43  ;;  %v4413_v51 = vpack.c.bf16 %v3319_v34, %v3318_v30  ;;  %v3284_v6 = vcvt.s32.f32 %v1684_v44  ;;  %v1700_v7 = vunpack.c.0.s8 %v556_v32  ;;  %v1701_v56 = vunpack.c.1.s8 %v556_v32  ;;  %v5557_v43 = vpop.f32.mrf.mxu2  ;;  %v5570_v30 = vpop.f32.mrf.mxu3 }
 0x2ab   : > { %5760 = vmatpush.bf16.msrb.mxu2 %v4405_v63  ;;  %v4388_v58 = vpack.c.bf16 %v3269_v4, %v3268_v0  ;;  %v3285_v9 = vcvt.s32.f32 %v1685_v20  ;;  %v1716_v11 = vunpack.c.0.s8 %v560_v41  ;;  %v1717_v12 = vunpack.c.1.s8 %v560_v41  ;;  %v570_v0 = vld [vmem:[%s6675_s8 + $0x830] sm:$0xff] }
 0x2ac   : > { %5773 = vmatpush.bf16.msrb.mxu3 %v4413_v51  ;;  %v3300_v16 = vcvt.s32.f32 %v1700_v7  ;;  %v3301_v27 = vcvt.s32.f32 %v1701_v56  ;;  %v1746_v2 = vunpack.c.2.s8 %v567_v38  ;;  %v1747_v17 = vunpack.c.3.s8 %v567_v38 }
 0x2ad   : > { %5735 = vmatpush.bf16.msrb.mxu0 %v4388_v58  ;;  %v4396_v8 = vpack.c.bf16 %v3285_v9, %v3284_v6  ;;  %v3316_v22 = vcvt.s32.f32 %v1716_v11  ;;  %v3317_v60 = vcvt.s32.f32 %v1717_v12  ;;  %v1762_v23 = vunpack.c.2.s8 %v7233_v26  ;;  %v574_v58 = vld [vmem:[%s6675_s8 + $0x850] sm:$0xff] }
 0x2ae   : > { %v4404_v28 = vpack.c.bf16 %v3301_v27, %v3300_v16  ;;  %v3346_v14 = vcvt.s32.f32 %v1746_v2  ;;  %v3347_v32 = vcvt.s32.f32 %v1747_v17  ;;  %v1763_v5 = vunpack.c.3.s8 %v7233_v26  ;;  %v578_v27 = vld [vmem:[%s6675_s8 + $0x870] sm:$0xff] }
 0x2af   : > { %5748 = vmatpush.bf16.msrb.mxu1 %v4396_v8  ;;  %v4412_v50 = vpack.c.bf16 %v3317_v60, %v3316_v22  ;;  %v3362_v1 = vcvt.s32.f32 %v1762_v23  ;;  %v1778_v33 = vunpack.c.2.s8 %v575_v18  ;;  %v1779_v35 = vunpack.c.3.s8 %v575_v18  ;;  %v4717_v22 = vld [vmem:[%s7631_s0 + $0x40] sm:$0xff] }
 0x2b0   : > { %5761 = vmatpush.bf16.msrb.mxu2 %v4404_v28  ;;  %v4427_v40 = vpack.c.bf16 %v3347_v32, %v3346_v14  ;;  %v3363_v10 = vcvt.s32.f32 %v1763_v5  ;;  %v1794_v41 = vunpack.c.2.s8 %v579_v57  ;;  %v1795_v46 = vunpack.c.3.s8 %v579_v57  ;;  %5736 = vmatmul.bf16.vlgmr.msrb.gmra.mxu0 %v4798_v49  ;;  %4803 = vst [vmem:[#allocation1] ss:$9 sm:$0xff] %v4717_v22 }
 0x2b1   : > { %5774 = vmatpush.bf16.msrb.mxu3 %v4412_v50  ;;  %v3378_v3 = vcvt.s32.f32 %v1778_v33  ;;  %v3379_v21 = vcvt.s32.f32 %v1779_v35  ;;  %v1744_v25 = vunpack.c.0.s8 %v567_v38  ;;  %v1745_v13 = vunpack.c.1.s8 %v567_v38 }
 0x2b2   : > { %5780 = vmatpush.bf16.msra.mxu0 %v4427_v40  ;;  %v4435_v31 = vpack.c.bf16 %v3363_v10, %v3362_v1  ;;  %v3394_v47 = vcvt.s32.f32 %v1794_v41  ;;  %v3395_v48 = vcvt.s32.f32 %v1795_v46  ;;  %5749 = vmatmul.bf16.vlgmr.msrb.gmra.mxu1 %v4799_v36  ;;  %v1760_v52 = vunpack.c.0.s8 %v7233_v26 }
 0x2b3   : > { %v4443_v62 = vpack.c.bf16 %v3379_v21, %v3378_v3  ;;  %5762 = vmatmul.bf16.vlgmr.msrb.gmra.mxu2 %v4800_v42  ;;  %v3344_v61 = vcvt.s32.f32 %v1744_v25  ;;  %v3345_v39 = vcvt.s32.f32 %v1745_v13  ;;  %v1761_v54 = vunpack.c.1.s8 %v7233_v26 }
 0x2b4   : > { %5793 = vmatpush.bf16.msra.mxu1 %v4435_v31  ;;  %v4451_v34 = vpack.c.bf16 %v3395_v48, %v3394_v47  ;;  %5775 = vmatmul.bf16.vlgmr.msrb.gmra.mxu3 %v4801_v29  ;;  %v3360_v44 = vcvt.s32.f32 %v1760_v52  ;;  %v1776_v59 = vunpack.c.0.s8 %v575_v18  ;;  %v1777_v63 = vunpack.c.1.s8 %v575_v18  ;;  %v565_v31 = vld [vmem:[%s6675_s8 + $0x808] sm:$0xff] }
 0x2b5   : > { %5806 = vmatpush.bf16.msra.mxu2 %v4443_v62  ;;  %v4426_v4 = vpack.c.bf16 %v3345_v39, %v3344_v61  ;;  %v3361_v20 = vcvt.s32.f32 %v1761_v54  ;;  %v1792_v38 = vunpack.c.0.s8 %v579_v57  ;;  %v1793_v51 = vunpack.c.1.s8 %v579_v57  ;;  %v569_v52 = vld [vmem:[%s6675_s8 + $0x828] sm:$0xff] }
 0x2b6   : > { %5819 = vmatpush.bf16.msra.mxu3 %v4451_v34  ;;  %v3376_v6 = vcvt.s32.f32 %v1776_v59  ;;  %v3377_v7 = vcvt.s32.f32 %v1777_v63  ;;  %v1742_v56 = vunpack.c.2.s8 %v566_v55  ;;  %v1743_v26 = vunpack.c.3.s8 %v566_v55  ;;  %v577_v59 = vld [vmem:[%s6675_s8 + $0x868] sm:$0xff] }
 0x2b7   : > { %5781 = vmatpush.bf16.msra.mxu0 %v4426_v4  ;;  %v4434_v9 = vpack.c.bf16 %v3361_v20, %v3360_v44  ;;  %v3392_v11 = vcvt.s32.f32 %v1792_v38  ;;  %v3393_v12 = vcvt.s32.f32 %v1793_v51  ;;  %v1758_v16 = vunpack.c.2.s8 %v570_v0 }
 0x2b8   : > { %v4442_v2 = vpack.c.bf16 %v3377_v7, %v3376_v6  ;;  %v3342_v17 = vcvt.s32.f32 %v1742_v56  ;;  %v3343_v18 = vcvt.s32.f32 %v1743_v26  ;;  %v1759_v8 = vunpack.c.3.s8 %v570_v0 }
 0x2b9   : > { %5794 = vmatpush.bf16.msra.mxu1 %v4434_v9  ;;  %v4450_v60 = vpack.c.bf16 %v3393_v12, %v3392_v11  ;;  %v3358_v23 = vcvt.s32.f32 %v1758_v16  ;;  %v1774_v57 = vunpack.c.2.s8 %v574_v58  ;;  %v1775_v49 = vunpack.c.3.s8 %v574_v58 }
 0x2ba   : > { %5807 = vmatpush.bf16.msra.mxu2 %v4442_v2  ;;  %v4425_v24 = vpack.c.bf16 %v3343_v18, %v3342_v17  ;;  %v3359_v28 = vcvt.s32.f32 %v1759_v8  ;;  %v1790_v14 = vunpack.c.2.s8 %v578_v27  ;;  %v1791_v32 = vunpack.c.3.s8 %v578_v27 }
 0x2bb   : > { %5820 = vmatpush.bf16.msra.mxu3 %v4450_v60  ;;  %v3374_v5 = vcvt.s32.f32 %v1774_v57  ;;  %v3375_v50 = vcvt.s32.f32 %v1775_v49  ;;  %v5530_v1 = vadd.f32 %v7225_v37, %v7221_v15  ;;  %v1740_v33 = vunpack.c.0.s8 %v566_v55 }
 0x2bc   : > { %5782 = vmatpush.bf16.msra.mxu0 %v4425_v24  ;;  %v4433_v35 = vpack.c.bf16 %v3359_v28, %v3358_v23  ;;  %v3390_v36 = vcvt.s32.f32 %v1790_v14  ;;  %v3391_v40 = vcvt.s32.f32 %v1791_v32  ;;  %v1741_v10 = vunpack.c.1.s8 %v566_v55  ;;  %v573_v55 = vld [vmem:[%s6675_s8 + $0x848] sm:$0xff]  ;;  %v564_v14 = vld [vmem:[%s6675_s8 + $0x800] sm:$0xff] }
 0x2bd   : > { %v4441_v41 = vpack.c.bf16 %v3375_v50, %v3374_v5  ;;  %v3340_v46 = vcvt.s32.f32 %v1740_v33  ;;  %v1756_v42 = vunpack.c.0.s8 %v570_v0  ;;  %v1757_v3 = vunpack.c.1.s8 %v570_v0  ;;  %v7265_v33 = vpop.f32.mrf.mxu0 }
 0x2be   : > { %5795 = vmatpush.bf16.msra.mxu1 %v4433_v35  ;;  %v4449_v21 = vpack.c.bf16 %v3391_v40, %v3390_v36  ;;  %v3341_v29 = vcvt.s32.f32 %v1741_v10  ;;  %v1772_v25 = vunpack.c.0.s8 %v574_v58  ;;  %v1773_v13 = vunpack.c.1.s8 %v574_v58  ;;  %v572_v10 = vld [vmem:[%s6675_s8 + $0x840] sm:$0xff] }
 0x2bf   : > { %5808 = vmatpush.bf16.msra.mxu2 %v4441_v41  ;;  %v3356_v15 = vcvt.s32.f32 %v1756_v42  ;;  %v3357_v37 = vcvt.s32.f32 %v1757_v3  ;;  %v1788_v47 = vunpack.c.0.s8 %v578_v27  ;;  %v1789_v48 = vunpack.c.1.s8 %v578_v27 }
 0x2c0   : > { %5821 = vmatpush.bf16.msra.mxu3 %v4449_v21  ;;  %v4424_v62 = vpack.c.bf16 %v3341_v29, %v3340_v46  ;;  %v3372_v61 = vcvt.s32.f32 %v1772_v25  ;;  %v3373_v39 = vcvt.s32.f32 %v1773_v13  ;;  %v5543_v54 = vadd.f32 %v7229_v45, %v5530_v1  ;;  %v568_v1 = vld [vmem:[%s6675_s8 + $0x820] sm:$0xff] }
 0x2c1   : > { %v4432_v43 = vpack.c.bf16 %v3357_v37, %v3356_v15  ;;  %v3388_v30 = vcvt.s32.f32 %v1788_v47  ;;  %v3389_v34 = vcvt.s32.f32 %v1789_v48  ;;  %v1738_v44 = vunpack.c.2.s8 %v565_v31 }
 0x2c2   : > { %5783 = vmatpush.bf16.msra.mxu0 %v4424_v62  ;;  %v4440_v63 = vpack.c.bf16 %v3373_v39, %v3372_v61  ;;  %v1739_v0 = vunpack.c.3.s8 %v565_v31  ;;  %v1754_v4 = vunpack.c.2.s8 %v569_v52  ;;  %v1755_v20 = vunpack.c.3.s8 %v569_v52 }
 0x2c3   : > { %5796 = vmatpush.bf16.msra.mxu1 %v4432_v43  ;;  %v4448_v38 = vpack.c.bf16 %v3389_v34, %v3388_v30  ;;  %v3338_v51 = vcvt.s32.f32 %v1738_v44  ;;  %v1770_v6 = vunpack.c.2.s8 %v573_v55  ;;  %v1771_v7 = vunpack.c.3.s8 %v573_v55 }
 0x2c4   : > { %5809 = vmatpush.bf16.msra.mxu2 %v4440_v63  ;;  %v3339_v56 = vcvt.s32.f32 %v1739_v0  ;;  %v3354_v26 = vcvt.s32.f32 %v1754_v4  ;;  %v3355_v45 = vcvt.s32.f32 %v1755_v20  ;;  %v1786_v58 = vunpack.c.2.s8 %v577_v59 }
 0x2c5   : > { %5822 = vmatpush.bf16.msra.mxu3 %v4448_v38  ;;  %v3370_v9 = vcvt.s32.f32 %v1770_v6  ;;  %v3371_v11 = vcvt.s32.f32 %v1771_v7  ;;  %v1787_v12 = vunpack.c.3.s8 %v577_v59  ;;  %v5556_v16 = vadd.f32 %v7235_v19, %v5543_v54  ;;  %v7269_v54 = vpop.f32.mrf.mxu1  ;;  %v5583_v6 = vpop.f32.mrf.mxu0 }
 0x2c6   : > { %v4423_v27 = vpack.c.bf16 %v3339_v56, %v3338_v51  ;;  %v4431_v2 = vpack.c.bf16 %v3355_v45, %v3354_v26  ;;  %v3386_v17 = vcvt.s32.f32 %v1786_v58  ;;  %v1736_v18 = vunpack.c.0.s8 %v565_v31  ;;  %v583_v58 = vld [vmem:[%s6675_s8 + $0x898] sm:$0xff] }
 0x2c7   : > { %v4439_v8 = vpack.c.bf16 %v3371_v11, %v3370_v9  ;;  %v3387_v22 = vcvt.s32.f32 %v1787_v12  ;;  %v7261_v60 = vadd.f32 %v7237_v53, %v5556_v16  ;;  %v1737_v23 = vunpack.c.1.s8 %v565_v31  ;;  %v576_v31 = vld [vmem:[%s6675_s8 + $0x860] sm:$0xff] }
 0x2c8   : > { %5784 = vmatpush.bf16.msra.mxu0 %v4423_v27  ;;  %5797 = vmatpush.bf16.msra.mxu1 %v4431_v2  ;;  %v3336_v57 = vcvt.s32.f32 %v1736_v18  ;;  %v1752_v49 = vunpack.c.0.s8 %v569_v52  ;;  %v1753_v24 = vunpack.c.1.s8 %v569_v52  ;;  %v1768_v28 = vunpack.c.0.s8 %v573_v55  ;;  %v7273_v27 = vld [vmem:[%s6675_s8 + $0x8b8] sm:$0xff] }
 0x2c9   : > { %5810 = vmatpush.bf16.msra.mxu2 %v4439_v8  ;;  %v4447_v19 = vpack.c.bf16 %v3387_v22, %v3386_v17  ;;  %v3337_v32 = vcvt.s32.f32 %v1737_v23  ;;  %v1769_v5 = vunpack.c.1.s8 %v573_v55  ;;  %v1784_v50 = vunpack.c.0.s8 %v577_v59  ;;  %v7275_v22 = vpop.f32.mrf.mxu2  ;;  %v7277_v23 = vpop.f32.mrf.mxu3 }
 0x2ca   : > { %v3352_v53 = vcvt.s32.f32 %v1752_v49  ;;  %v3353_v35 = vcvt.s32.f32 %v1753_v24  ;;  %v3368_v36 = vcvt.s32.f32 %v1768_v28  ;;  %v1785_v40 = vunpack.c.1.s8 %v577_v59 }
 0x2cb   : > { %5823 = vmatpush.bf16.msra.mxu3 %v4447_v19  ;;  %v4422_v41 = vpack.c.bf16 %v3337_v32, %v3336_v57  ;;  %v3369_v46 = vcvt.s32.f32 %v1769_v5  ;;  %v3384_v42 = vcvt.s32.f32 %v1784_v50  ;;  %v1734_v3 = vunpack.c.2.s8 %v564_v14 }
 0x2cc   : > { %v4430_v21 = vpack.c.bf16 %v3353_v35, %v3352_v53  ;;  %v3385_v29 = vcvt.s32.f32 %v1785_v40  ;;  %v1735_v25 = vunpack.c.3.s8 %v564_v14  ;;  %v1750_v13 = vunpack.c.2.s8 %v568_v1  ;;  %v4804_v53 = vld [vmem:[#allocation1] sm:$0xff] }
 0x2cd   : > { %5785 = vmatpush.bf16.msra.mxu0 %v4422_v41  ;;  %v4438_v15 = vpack.c.bf16 %v3369_v46, %v3368_v36  ;;  %v3334_v37 = vcvt.s32.f32 %v1734_v3  ;;  %v1751_v47 = vunpack.c.3.s8 %v568_v1  ;;  %v1766_v48 = vunpack.c.2.s8 %v572_v10  ;;  %v5596_v35 = vpop.f32.mrf.mxu1 }
 0x2ce   : > { %5798 = vmatpush.bf16.msra.mxu1 %v4430_v21  ;;  %v4446_v52 = vpack.c.bf16 %v3385_v29, %v3384_v42  ;;  %v3335_v62 = vcvt.s32.f32 %v1735_v25  ;;  %v3350_v61 = vcvt.s32.f32 %v1750_v13  ;;  %v1767_v39 = vunpack.c.3.s8 %v572_v10  ;;  %v4805_v29 = vld [vmem:[#allocation1 + $0x9] sm:$0xff] }
 0x2cf   : > { %5811 = vmatpush.bf16.msra.mxu2 %v4438_v15  ;;  %v3351_v55 = vcvt.s32.f32 %v1751_v47  ;;  %v3366_v43 = vcvt.s32.f32 %v1766_v48  ;;  %v1782_v30 = vunpack.c.2.s8 %v576_v31  ;;  %v1783_v34 = vunpack.c.3.s8 %v576_v31 }
 0x2d0   : > { %5824 = vmatpush.bf16.msra.mxu3 %v4446_v52  ;;  %v4421_v44 = vpack.c.bf16 %v3335_v62, %v3334_v37  ;;  %v3367_v59 = vcvt.s32.f32 %v1767_v39  ;;  %v1732_v63 = vunpack.c.0.s8 %v564_v14  ;;  %v1733_v0 = vunpack.c.1.s8 %v564_v14  ;;  %v591_v14 = vld [vmem:[%s6675_s8 + $0x8d8] sm:$0xff]  ;;  %v4806_v37 = vld [vmem:[#allocation1 + $0x12] sm:$0xff] }
 0x2d1   : > { %v4429_v4 = vpack.c.bf16 %v3351_v55, %v3350_v61  ;;  %v3382_v20 = vcvt.s32.f32 %v1782_v30  ;;  %v3383_v38 = vcvt.s32.f32 %v1783_v34  ;;  %v1748_v51 = vunpack.c.0.s8 %v568_v1  ;;  %v4807_v52 = vld [vmem:[#allocation1 + $0x1b] sm:$0xff] }
 0x2d2   : > { %5786 = vmatpush.bf16.msra.mxu0 %v4421_v44  ;;  %v4437_v7 = vpack.c.bf16 %v3367_v59, %v3366_v43  ;;  %v3332_v56 = vcvt.s32.f32 %v1732_v63  ;;  %v3333_v26 = vcvt.s32.f32 %v1733_v0  ;;  %v1749_v45 = vunpack.c.1.s8 %v568_v1  ;;  %v595_v1 = vld [vmem:[%s6675_s8 + $0x8f8] sm:$0xff]  ;;  %v582_v0 = vld [vmem:[%s6675_s8 + $0x890] sm:$0xff] }
 0x2d3   : > { %5799 = vmatpush.bf16.msra.mxu1 %v4429_v4  ;;  %v4445_v9 = vpack.c.bf16 %v3383_v38, %v3382_v20  ;;  %v3348_v11 = vcvt.s32.f32 %v1748_v51  ;;  %v1764_v12 = vunpack.c.0.s8 %v572_v10  ;;  %v1765_v16 = vunpack.c.1.s8 %v572_v10  ;;  %v5609_v4 = vpop.f32.mrf.mxu2  ;;  %v5622_v20 = vpop.f32.mrf.mxu3 }
 0x2d4   : > { %5812 = vmatpush.bf16.msra.mxu2 %v4437_v7  ;;  %v4420_v2 = vpack.c.bf16 %v3333_v26, %v3332_v56  ;;  %v3349_v17 = vcvt.s32.f32 %v1749_v45  ;;  %v1780_v18 = vunpack.c.0.s8 %v576_v31  ;;  %v1781_v8 = vunpack.c.1.s8 %v576_v31  ;;  %v586_v56 = vld [vmem:[%s6675_s8 + $0x8b0] sm:$0xff] }
 0x2d5   : > { %5825 = vmatpush.bf16.msra.mxu3 %v4445_v9  ;;  %v3364_v57 = vcvt.s32.f32 %v1764_v12  ;;  %v3365_v49 = vcvt.s32.f32 %v1765_v16  ;;  %v1810_v24 = vunpack.c.2.s8 %v583_v58  ;;  %v1811_v28 = vunpack.c.3.s8 %v583_v58 }
 0x2d6   : > { %5787 = vmatpush.bf16.msra.mxu0 %v4420_v2  ;;  %v4428_v19 = vpack.c.bf16 %v3349_v17, %v3348_v11  ;;  %v3380_v32 = vcvt.s32.f32 %v1780_v18  ;;  %v3381_v5 = vcvt.s32.f32 %v1781_v8  ;;  %v1826_v50 = vunpack.c.2.s8 %v7273_v27  ;;  %v590_v2 = vld [vmem:[%s6675_s8 + $0x8d0] sm:$0xff] }
 0x2d7   : > { %v4436_v36 = vpack.c.bf16 %v3365_v49, %v3364_v57  ;;  %v3410_v40 = vcvt.s32.f32 %v1810_v24  ;;  %v3411_v10 = vcvt.s32.f32 %v1811_v28  ;;  %v1827_v41 = vunpack.c.3.s8 %v7273_v27  ;;  %v594_v49 = vld [vmem:[%s6675_s8 + $0x8f0] sm:$0xff] }
 0x2d8   : > { %5800 = vmatpush.bf16.msra.mxu1 %v4428_v19  ;;  %v4444_v46 = vpack.c.bf16 %v3381_v5, %v3380_v32  ;;  %v3426_v42 = vcvt.s32.f32 %v1826_v50  ;;  %v1842_v3 = vunpack.c.2.s8 %v591_v14  ;;  %v1843_v21 = vunpack.c.3.s8 %v591_v14 }
 0x2d9   : > { %5813 = vmatpush.bf16.msra.mxu2 %v4436_v36  ;;  %v4459_v25 = vpack.c.bf16 %v3411_v10, %v3410_v40  ;;  %v3427_v13 = vcvt.s32.f32 %v1827_v41  ;;  %v1858_v31 = vunpack.c.2.s8 %v595_v1  ;;  %v1859_v15 = vunpack.c.3.s8 %v595_v1  ;;  %5788 = vmatmul.bf16.vlgmr.msra.gmra.mxu0 %v4804_v53 }
 0x2da   : > { %5826 = vmatpush.bf16.msra.mxu3 %v4444_v46  ;;  %v3442_v47 = vcvt.s32.f32 %v1842_v3  ;;  %v3443_v48 = vcvt.s32.f32 %v1843_v21  ;;  %v1808_v62 = vunpack.c.0.s8 %v583_v58  ;;  %v1809_v61 = vunpack.c.1.s8 %v583_v58 }
 0x2db   : > { %5832 = vmatpush.bf16.msrb.mxu0 %v4459_v25  ;;  %v4467_v39 = vpack.c.bf16 %v3427_v13, %v3426_v42  ;;  %v3458_v55 = vcvt.s32.f32 %v1858_v31  ;;  %v3459_v43 = vcvt.s32.f32 %v1859_v15  ;;  %5801 = vmatmul.bf16.vlgmr.msra.gmra.mxu1 %v4805_v29  ;;  %v1824_v30 = vunpack.c.0.s8 %v7273_v27 }
 0x2dc   : > { %v4475_v34 = vpack.c.bf16 %v3443_v48, %v3442_v47  ;;  %5814 = vmatmul.bf16.vlgmr.msra.gmra.mxu2 %v4806_v37  ;;  %v3408_v44 = vcvt.s32.f32 %v1808_v62  ;;  %v3409_v59 = vcvt.s32.f32 %v1809_v61  ;;  %v1825_v63 = vunpack.c.1.s8 %v7273_v27  ;;  %v581_v61 = vld [vmem:[%s6675_s8 + $0x888] sm:$0xff] }
 0x2dd   : > { %5845 = vmatpush.bf16.msrb.mxu1 %v4467_v39  ;;  %v4483_v38 = vpack.c.bf16 %v3459_v43, %v3458_v55  ;;  %5827 = vmatmul.bf16.vlgmr.msra.gmra.mxu3 %v4807_v52  ;;  %v3424_v51 = vcvt.s32.f32 %v1824_v30  ;;  %v1840_v6 = vunpack.c.0.s8 %v591_v14  ;;  %v1841_v7 = vunpack.c.1.s8 %v591_v14  ;;  %v585_v43 = vld [vmem:[%s6675_s8 + $0x8a8] sm:$0xff] }
 0x2de   : > { %5858 = vmatpush.bf16.msrb.mxu2 %v4475_v34  ;;  %v4458_v26 = vpack.c.bf16 %v3409_v59, %v3408_v44  ;;  %v3425_v45 = vcvt.s32.f32 %v1825_v63  ;;  %v1856_v58 = vunpack.c.0.s8 %v595_v1  ;;  %v1857_v9 = vunpack.c.1.s8 %v595_v1  ;;  %v589_v63 = vld [vmem:[%s6675_s8 + $0x8c8] sm:$0xff] }
 0x2df   : > { %5871 = vmatpush.bf16.msrb.mxu3 %v4483_v38  ;;  %v3440_v11 = vcvt.s32.f32 %v1840_v6  ;;  %v3441_v12 = vcvt.s32.f32 %v1841_v7  ;;  %v1806_v16 = vunpack.c.2.s8 %v582_v0  ;;  %v1807_v27 = vunpack.c.3.s8 %v582_v0 }
 0x2e0   : > { %5833 = vmatpush.bf16.msrb.mxu0 %v4458_v26  ;;  %v4466_v17 = vpack.c.bf16 %v3425_v45, %v3424_v51  ;;  %v3456_v18 = vcvt.s32.f32 %v1856_v58  ;;  %v3457_v8 = vcvt.s32.f32 %v1857_v9  ;;  %v1822_v57 = vunpack.c.2.s8 %v586_v56  ;;  %v593_v51 = vld [vmem:[%s6675_s8 + $0x8e8] sm:$0xff] }
 0x2e1   : > { %v4474_v24 = vpack.c.bf16 %v3441_v12, %v3440_v11  ;;  %v3406_v28 = vcvt.s32.f32 %v1806_v16  ;;  %v3407_v14 = vcvt.s32.f32 %v1807_v27  ;;  %v1823_v19 = vunpack.c.3.s8 %v586_v56 }
 0x2e2   : > { %5846 = vmatpush.bf16.msrb.mxu1 %v4466_v17  ;;  %v4482_v32 = vpack.c.bf16 %v3457_v8, %v3456_v18  ;;  %v3422_v5 = vcvt.s32.f32 %v1822_v57  ;;  %v1838_v50 = vunpack.c.2.s8 %v590_v2  ;;  %v1839_v1 = vunpack.c.3.s8 %v590_v2 }
 0x2e3   : > { %5859 = vmatpush.bf16.msrb.mxu2 %v4474_v24  ;;  %v4457_v53 = vpack.c.bf16 %v3407_v14, %v3406_v28  ;;  %v3423_v35 = vcvt.s32.f32 %v1823_v19  ;;  %v1854_v36 = vunpack.c.2.s8 %v594_v49  ;;  %v1855_v40 = vunpack.c.3.s8 %v594_v49 }
 0x2e4   : > { %5872 = vmatpush.bf16.msrb.mxu3 %v4482_v32  ;;  %v3438_v10 = vcvt.s32.f32 %v1838_v50  ;;  %v3439_v41 = vcvt.s32.f32 %v1839_v1  ;;  %v5582_v46 = vadd.f32 %v7265_v33, %v7261_v60  ;;  %v1804_v42 = vunpack.c.0.s8 %v582_v0 }
 0x2e5   : > { %5834 = vmatpush.bf16.msrb.mxu0 %v4457_v53  ;;  %v4465_v3 = vpack.c.bf16 %v3423_v35, %v3422_v5  ;;  %v3454_v21 = vcvt.s32.f32 %v1854_v36  ;;  %v3455_v29 = vcvt.s32.f32 %v1855_v40  ;;  %v1805_v25 = vunpack.c.1.s8 %v582_v0  ;;  %v580_v36 = vld [vmem:[%s6675_s8 + $0x880] sm:$0xff] }
 0x2e6   : > { %v4473_v13 = vpack.c.bf16 %v3439_v41, %v3438_v10  ;;  %v3404_v31 = vcvt.s32.f32 %v1804_v42  ;;  %v1820_v15 = vunpack.c.0.s8 %v586_v56  ;;  %v1821_v37 = vunpack.c.1.s8 %v586_v56  ;;  %v7302_v42 = vpop.f32.mrf.mxu0 }
 0x2e7   : > { %5847 = vmatpush.bf16.msrb.mxu1 %v4465_v3  ;;  %v4481_v47 = vpack.c.bf16 %v3455_v29, %v3454_v21  ;;  %v3405_v48 = vcvt.s32.f32 %v1805_v25  ;;  %v1836_v52 = vunpack.c.0.s8 %v590_v2  ;;  %v1837_v62 = vunpack.c.1.s8 %v590_v2  ;;  %v588_v25 = vld [vmem:[%s6675_s8 + $0x8c0] sm:$0xff] }
 0x2e8   : > { %5860 = vmatpush.bf16.msrb.mxu2 %v4473_v13  ;;  %v3420_v60 = vcvt.s32.f32 %v1820_v15  ;;  %v3421_v33 = vcvt.s32.f32 %v1821_v37  ;;  %v1852_v39 = vunpack.c.0.s8 %v594_v49  ;;  %v1853_v55 = vunpack.c.1.s8 %v594_v49 }
 0x2e9   : > { %5873 = vmatpush.bf16.msrb.mxu3 %v4481_v47  ;;  %v4456_v30 = vpack.c.bf16 %v3405_v48, %v3404_v31  ;;  %v3436_v34 = vcvt.s32.f32 %v1836_v52  ;;  %v3437_v44 = vcvt.s32.f32 %v1837_v62  ;;  %v5595_v59 = vadd.f32 %v7269_v54, %v5582_v46  ;;  %v584_v46 = vld [vmem:[%s6675_s8 + $0x8a0] sm:$0xff] }
 0x2ea   : > { %v4464_v0 = vpack.c.bf16 %v3421_v33, %v3420_v60  ;;  %v3452_v4 = vcvt.s32.f32 %v1852_v39  ;;  %v3453_v20 = vcvt.s32.f32 %v1853_v55  ;;  %v1802_v38 = vunpack.c.2.s8 %v581_v61 }
 0x2eb   : > { %5835 = vmatpush.bf16.msrb.mxu0 %v4456_v30  ;;  %v4472_v6 = vpack.c.bf16 %v3437_v44, %v3436_v34  ;;  %v1803_v7 = vunpack.c.3.s8 %v581_v61  ;;  %v1818_v56 = vunpack.c.2.s8 %v585_v43  ;;  %v1819_v26 = vunpack.c.3.s8 %v585_v43 }
 0x2ec   : > { %5848 = vmatpush.bf16.msrb.mxu1 %v4464_v0  ;;  %v4480_v45 = vpack.c.bf16 %v3453_v20, %v3452_v4  ;;  %v3402_v58 = vcvt.s32.f32 %v1802_v38  ;;  %v1834_v9 = vunpack.c.2.s8 %v589_v63  ;;  %v1835_v11 = vunpack.c.3.s8 %v589_v63 }
 0x2ed   : > { %5861 = vmatpush.bf16.msrb.mxu2 %v4472_v6  ;;  %v3403_v12 = vcvt.s32.f32 %v1803_v7  ;;  %v3418_v16 = vcvt.s32.f32 %v1818_v56  ;;  %v3419_v54 = vcvt.s32.f32 %v1819_v26  ;;  %v1850_v27 = vunpack.c.2.s8 %v593_v51 }
 0x2ee   : > { %5874 = vmatpush.bf16.msrb.mxu3 %v4480_v45  ;;  %v3434_v2 = vcvt.s32.f32 %v1834_v9  ;;  %v3435_v17 = vcvt.s32.f32 %v1835_v11  ;;  %v1851_v18 = vunpack.c.3.s8 %v593_v51  ;;  %v5608_v8 = vadd.f32 %v7275_v22, %v5595_v59  ;;  %v7306_v59 = vpop.f32.mrf.mxu1  ;;  %v5635_v9 = vpop.f32.mrf.mxu0 }
 0x2ef   : > { %v4455_v57 = vpack.c.bf16 %v3403_v12, %v3402_v58  ;;  %v4463_v49 = vpack.c.bf16 %v3419_v54, %v3418_v16  ;;  %v3450_v24 = vcvt.s32.f32 %v1850_v27  ;;  %v1800_v28 = vunpack.c.0.s8 %v581_v61  ;;  %v599_v27 = vld [vmem:[%s6675_s8 + $0x918] sm:$0xff] }
 0x2f0   : > { %v4471_v14 = vpack.c.bf16 %v3435_v17, %v3434_v2  ;;  %v3451_v19 = vcvt.s32.f32 %v1851_v18  ;;  %v7298_v32 = vadd.f32 %v7277_v23, %v5608_v8  ;;  %v1801_v5 = vunpack.c.1.s8 %v581_v61  ;;  %v592_v61 = vld [vmem:[%s6675_s8 + $0x8e0] sm:$0xff] }
 0x2f1   : > { %5836 = vmatpush.bf16.msrb.mxu0 %v4455_v57  ;;  %5849 = vmatpush.bf16.msrb.mxu1 %v4463_v49  ;;  %v3400_v50 = vcvt.s32.f32 %v1800_v28  ;;  %v1816_v1 = vunpack.c.0.s8 %v585_v43  ;;  %v1817_v53 = vunpack.c.1.s8 %v585_v43  ;;  %v1832_v35 = vunpack.c.0.s8 %v589_v63  ;;  %v7310_v57 = vld [vmem:[%s6675_s8 + $0x938] sm:$0xff] }
 0x2f2   : > { %5862 = vmatpush.bf16.msrb.mxu2 %v4471_v14  ;;  %v4479_v22 = vpack.c.bf16 %v3451_v19, %v3450_v24  ;;  %v3401_v40 = vcvt.s32.f32 %v1801_v5  ;;  %v1833_v10 = vunpack.c.1.s8 %v589_v63  ;;  %v1848_v41 = vunpack.c.0.s8 %v593_v51  ;;  %v7312_v19 = vpop.f32.mrf.mxu2  ;;  %v7314_v5 = vpop.f32.mrf.mxu3 }
 0x2f3   : > { %v3416_v23 = vcvt.s32.f32 %v1816_v1  ;;  %v3417_v3 = vcvt.s32.f32 %v1817_v53  ;;  %v3432_v21 = vcvt.s32.f32 %v1832_v35  ;;  %v1849_v29 = vunpack.c.1.s8 %v593_v51 }
 0x2f4   : > { %5875 = vmatpush.bf16.msrb.mxu3 %v4479_v22  ;;  %v4454_v13 = vpack.c.bf16 %v3401_v40, %v3400_v50  ;;  %v3433_v31 = vcvt.s32.f32 %v1833_v10  ;;  %v3448_v15 = vcvt.s32.f32 %v1848_v41  ;;  %v1798_v37 = vunpack.c.2.s8 %v580_v36 }
 0x2f5   : > { %v4462_v47 = vpack.c.bf16 %v3417_v3, %v3416_v23  ;;  %v3449_v48 = vcvt.s32.f32 %v1849_v29  ;;  %v1799_v52 = vunpack.c.3.s8 %v580_v36  ;;  %v1814_v62 = vunpack.c.2.s8 %v584_v46  ;;  %v4808_v23 = vld [vmem:[#allocation1 + $0x24] sm:$0xff] }
 0x2f6   : > { %5837 = vmatpush.bf16.msrb.mxu0 %v4454_v13  ;;  %v4470_v60 = vpack.c.bf16 %v3433_v31, %v3432_v21  ;;  %v3398_v33 = vcvt.s32.f32 %v1798_v37  ;;  %v1815_v39 = vunpack.c.3.s8 %v584_v46  ;;  %v1830_v55 = vunpack.c.2.s8 %v588_v25  ;;  %v5648_v3 = vpop.f32.mrf.mxu1 }
 0x2f7   : > { %5850 = vmatpush.bf16.msrb.mxu1 %v4462_v47  ;;  %v4478_v43 = vpack.c.bf16 %v3449_v48, %v3448_v15  ;;  %v3399_v30 = vcvt.s32.f32 %v1799_v52  ;;  %v3414_v34 = vcvt.s32.f32 %v1814_v62  ;;  %v1831_v44 = vunpack.c.3.s8 %v588_v25  ;;  %v4809_v48 = vld [vmem:[#allocation1 + $0x2d] sm:$0xff] }
 0x2f8   : > { %5863 = vmatpush.bf16.msrb.mxu2 %v4470_v60  ;;  %v3415_v63 = vcvt.s32.f32 %v1815_v39  ;;  %v3430_v0 = vcvt.s32.f32 %v1830_v55  ;;  %v1846_v4 = vunpack.c.2.s8 %v592_v61  ;;  %v1847_v20 = vunpack.c.3.s8 %v592_v61 }
 0x2f9   : > { %5876 = vmatpush.bf16.msrb.mxu3 %v4478_v43  ;;  %v4453_v38 = vpack.c.bf16 %v3399_v30, %v3398_v33  ;;  %v3431_v51 = vcvt.s32.f32 %v1831_v44  ;;  %v1796_v6 = vunpack.c.0.s8 %v580_v36  ;;  %v1797_v7 = vunpack.c.1.s8 %v580_v36  ;;  %v607_v36 = vld [vmem:[%s6675_s8 + $0x958] sm:$0xff]  ;;  %v4810_v33 = vld [vmem:[#allocation1 + $0x36] sm:$0xff] }
 0x2fa   : > { %v4461_v56 = vpack.c.bf16 %v3415_v63, %v3414_v34  ;;  %v3446_v26 = vcvt.s32.f32 %v1846_v4  ;;  %v3447_v45 = vcvt.s32.f32 %v1847_v20  ;;  %v1812_v58 = vunpack.c.0.s8 %v584_v46  ;;  %v4811_v43 = vld [vmem:[#allocation1 + $0x3f] sm:$0xff] }
 0x2fb   : > { %5838 = vmatpush.bf16.msrb.mxu0 %v4453_v38  ;;  %v4469_v11 = vpack.c.bf16 %v3431_v51, %v3430_v0  ;;  %v3396_v12 = vcvt.s32.f32 %v1796_v6  ;;  %v3397_v16 = vcvt.s32.f32 %v1797_v7  ;;  %v1813_v54 = vunpack.c.1.s8 %v584_v46  ;;  %v611_v46 = vld [vmem:[%s6675_s8 + $0x978] sm:$0xff]  ;;  %v598_v7 = vld [vmem:[%s6675_s8 + $0x910] sm:$0xff] }
 0x2fc   : > { %5851 = vmatpush.bf16.msrb.mxu1 %v4461_v56  ;;  %v4477_v2 = vpack.c.bf16 %v3447_v45, %v3446_v26  ;;  %v3412_v17 = vcvt.s32.f32 %v1812_v58  ;;  %v1828_v18 = vunpack.c.0.s8 %v588_v25  ;;  %v1829_v8 = vunpack.c.1.s8 %v588_v25  ;;  %v5661_v56 = vpop.f32.mrf.mxu2  ;;  %v5674_v26 = vpop.f32.mrf.mxu3 }
 0x2fd   : > { %5864 = vmatpush.bf16.msrb.mxu2 %v4469_v11  ;;  %v4452_v49 = vpack.c.bf16 %v3397_v16, %v3396_v12  ;;  %v3413_v24 = vcvt.s32.f32 %v1813_v54  ;;  %v1844_v28 = vunpack.c.0.s8 %v592_v61  ;;  %v1845_v14 = vunpack.c.1.s8 %v592_v61  ;;  %v602_v12 = vld [vmem:[%s6675_s8 + $0x930] sm:$0xff] }
 0x2fe   : > { %5877 = vmatpush.bf16.msrb.mxu3 %v4477_v2  ;;  %v3428_v50 = vcvt.s32.f32 %v1828_v18  ;;  %v3429_v1 = vcvt.s32.f32 %v1829_v8  ;;  %v1874_v53 = vunpack.c.2.s8 %v599_v27  ;;  %v1875_v35 = vunpack.c.3.s8 %v599_v27 }
 0x2ff   : > { %5839 = vmatpush.bf16.msrb.mxu0 %v4452_v49  ;;  %v4460_v22 = vpack.c.bf16 %v3413_v24, %v3412_v17  ;;  %v3444_v40 = vcvt.s32.f32 %v1844_v28  ;;  %v3445_v10 = vcvt.s32.f32 %v1845_v14  ;;  %v1890_v41 = vunpack.c.2.s8 %v7310_v57  ;;  %v606_v49 = vld [vmem:[%s6675_s8 + $0x950] sm:$0xff] }
 0x300   : > { %v4468_v21 = vpack.c.bf16 %v3429_v1, %v3428_v50  ;;  %v3474_v29 = vcvt.s32.f32 %v1874_v53  ;;  %v3475_v25 = vcvt.s32.f32 %v1875_v35  ;;  %v1891_v13 = vunpack.c.3.s8 %v7310_v57  ;;  %v610_v1 = vld [vmem:[%s6675_s8 + $0x970] sm:$0xff] }
 0x301   : > { %5852 = vmatpush.bf16.msrb.mxu1 %v4460_v22  ;;  %v4476_v31 = vpack.c.bf16 %v3445_v10, %v3444_v40  ;;  %v3490_v15 = vcvt.s32.f32 %v1890_v41  ;;  %v1906_v37 = vunpack.c.2.s8 %v607_v36  ;;  %v1907_v47 = vunpack.c.3.s8 %v607_v36  ;;  %v4718_v40 = vld [vmem:[%s7631_s0 + $0x48] sm:$0xff] }
 0x302   : > { %5865 = vmatpush.bf16.msrb.mxu2 %v4468_v21  ;;  %v4491_v52 = vpack.c.bf16 %v3475_v25, %v3474_v29  ;;  %v3491_v62 = vcvt.s32.f32 %v1891_v13  ;;  %v1922_v61 = vunpack.c.2.s8 %v611_v46  ;;  %v1923_v60 = vunpack.c.3.s8 %v611_v46  ;;  %5840 = vmatmul.bf16.vlgmr.msrb.gmra.mxu0 %v4808_v23  ;;  %4813 = vst [vmem:[#allocation1] ss:$9 sm:$0xff] %v4718_v40 }
 0x303   : > { %5878 = vmatpush.bf16.msrb.mxu3 %v4476_v31  ;;  %v3506_v39 = vcvt.s32.f32 %v1906_v37  ;;  %v3507_v55 = vcvt.s32.f32 %v1907_v47  ;;  %v1872_v30 = vunpack.c.0.s8 %v599_v27  ;;  %v1873_v34 = vunpack.c.1.s8 %v599_v27 }
 0x304   : > { %5884 = vmatpush.bf16.msra.mxu0 %v4491_v52  ;;  %v4499_v44 = vpack.c.bf16 %v3491_v62, %v3490_v15  ;;  %v3522_v63 = vcvt.s32.f32 %v1922_v61  ;;  %v3523_v0 = vcvt.s32.f32 %v1923_v60  ;;  %5853 = vmatmul.bf16.vlgmr.msrb.gmra.mxu1 %v4809_v48  ;;  %v1888_v4 = vunpack.c.0.s8 %v7310_v57 }
 0x305   : > { %v4507_v20 = vpack.c.bf16 %v3507_v55, %v3506_v39  ;;  %5866 = vmatmul.bf16.vlgmr.msrb.gmra.mxu2 %v4810_v33  ;;  %v3472_v38 = vcvt.s32.f32 %v1872_v30  ;;  %v3473_v51 = vcvt.s32.f32 %v1873_v34  ;;  %v1889_v6 = vunpack.c.1.s8 %v7310_v57 }
 0x306   : > { %5897 = vmatpush.bf16.msra.mxu1 %v4499_v44  ;;  %v4515_v45 = vpack.c.bf16 %v3523_v0, %v3522_v63  ;;  %5879 = vmatmul.bf16.vlgmr.msrb.gmra.mxu3 %v4811_v43  ;;  %v3488_v58 = vcvt.s32.f32 %v1888_v4  ;;  %v1904_v9 = vunpack.c.0.s8 %v607_v36  ;;  %v1905_v11 = vunpack.c.1.s8 %v607_v36  ;;  %v597_v44 = vld [vmem:[%s6675_s8 + $0x908] sm:$0xff] }
 0x307   : > { %5910 = vmatpush.bf16.msra.mxu2 %v4507_v20  ;;  %v4490_v16 = vpack.c.bf16 %v3473_v51, %v3472_v38  ;;  %v3489_v54 = vcvt.s32.f32 %v1889_v6  ;;  %v1920_v27 = vunpack.c.0.s8 %v611_v46  ;;  %v1921_v2 = vunpack.c.1.s8 %v611_v46  ;;  %v601_v4 = vld [vmem:[%s6675_s8 + $0x928] sm:$0xff] }
 0x308   : > { %5923 = vmatpush.bf16.msra.mxu3 %v4515_v45  ;;  %v3504_v17 = vcvt.s32.f32 %v1904_v9  ;;  %v3505_v18 = vcvt.s32.f32 %v1905_v11  ;;  %v1870_v8 = vunpack.c.2.s8 %v598_v7  ;;  %v1871_v57 = vunpack.c.3.s8 %v598_v7  ;;  %v609_v9 = vld [vmem:[%s6675_s8 + $0x968] sm:$0xff] }
 0x309   : > { %5885 = vmatpush.bf16.msra.mxu0 %v4490_v16  ;;  %v4498_v24 = vpack.c.bf16 %v3489_v54, %v3488_v58  ;;  %v3520_v28 = vcvt.s32.f32 %v1920_v27  ;;  %v3521_v14 = vcvt.s32.f32 %v1921_v2  ;;  %v1886_v50 = vunpack.c.2.s8 %v602_v12 }
 0x30a   : > { %v4506_v53 = vpack.c.bf16 %v3505_v18, %v3504_v17  ;;  %v3470_v35 = vcvt.s32.f32 %v1870_v8  ;;  %v3471_v36 = vcvt.s32.f32 %v1871_v57  ;;  %v1887_v22 = vunpack.c.3.s8 %v602_v12 }
 0x30b   : > { %5898 = vmatpush.bf16.msra.mxu1 %v4498_v24  ;;  %v4514_v10 = vpack.c.bf16 %v3521_v14, %v3520_v28  ;;  %v3486_v41 = vcvt.s32.f32 %v1886_v50  ;;  %v1902_v46 = vunpack.c.2.s8 %v606_v49  ;;  %v1903_v23 = vunpack.c.3.s8 %v606_v49 }
 0x30c   : > { %5911 = vmatpush.bf16.msra.mxu2 %v4506_v53  ;;  %v4489_v3 = vpack.c.bf16 %v3471_v36, %v3470_v35  ;;  %v3487_v21 = vcvt.s32.f32 %v1887_v22  ;;  %v1918_v29 = vunpack.c.2.s8 %v610_v1  ;;  %v1919_v25 = vunpack.c.3.s8 %v610_v1 }
 0x30d   : > { %5924 = vmatpush.bf16.msra.mxu3 %v4514_v10  ;;  %v3502_v13 = vcvt.s32.f32 %v1902_v46  ;;  %v3503_v31 = vcvt.s32.f32 %v1903_v23  ;;  %v5634_v15 = vadd.f32 %v7302_v42, %v7298_v32  ;;  %v1868_v37 = vunpack.c.0.s8 %v598_v7 }
 0x30e   : > { %5886 = vmatpush.bf16.msra.mxu0 %v4489_v3  ;;  %v4497_v47 = vpack.c.bf16 %v3487_v21, %v3486_v41  ;;  %v3518_v48 = vcvt.s32.f32 %v1918_v29  ;;  %v3519_v52 = vcvt.s32.f32 %v1919_v25  ;;  %v1869_v62 = vunpack.c.1.s8 %v598_v7  ;;  %v605_v7 = vld [vmem:[%s6675_s8 + $0x948] sm:$0xff]  ;;  %v596_v29 = vld [vmem:[%s6675_s8 + $0x900] sm:$0xff] }
 0x30f   : > { %v4505_v61 = vpack.c.bf16 %v3503_v31, %v3502_v13  ;;  %v3468_v60 = vcvt.s32.f32 %v1868_v37  ;;  %v1884_v33 = vunpack.c.0.s8 %v602_v12  ;;  %v1885_v39 = vunpack.c.1.s8 %v602_v12  ;;  %v7342_v37 = vpop.f32.mrf.mxu0 }
 0x310   : > { %5899 = vmatpush.bf16.msra.mxu1 %v4497_v47  ;;  %v4513_v55 = vpack.c.bf16 %v3519_v52, %v3518_v48  ;;  %v3469_v43 = vcvt.s32.f32 %v1869_v62  ;;  %v1900_v30 = vunpack.c.0.s8 %v606_v49  ;;  %v1901_v34 = vunpack.c.1.s8 %v606_v49  ;;  %v604_v62 = vld [vmem:[%s6675_s8 + $0x940] sm:$0xff] }
 0x311   : > { %5912 = vmatpush.bf16.msra.mxu2 %v4505_v61  ;;  %v3484_v32 = vcvt.s32.f32 %v1884_v33  ;;  %v3485_v42 = vcvt.s32.f32 %v1885_v39  ;;  %v1916_v63 = vunpack.c.0.s8 %v610_v1  ;;  %v1917_v0 = vunpack.c.1.s8 %v610_v1 }
 0x312   : > { %5925 = vmatpush.bf16.msra.mxu3 %v4513_v55  ;;  %v4488_v20 = vpack.c.bf16 %v3469_v43, %v3468_v60  ;;  %v3500_v38 = vcvt.s32.f32 %v1900_v30  ;;  %v3501_v51 = vcvt.s32.f32 %v1901_v34  ;;  %v5647_v6 = vadd.f32 %v7306_v59, %v5634_v15  ;;  %v600_v15 = vld [vmem:[%s6675_s8 + $0x920] sm:$0xff] }
 0x313   : > { %v4496_v56 = vpack.c.bf16 %v3485_v42, %v3484_v32  ;;  %v3516_v26 = vcvt.s32.f32 %v1916_v63  ;;  %v3517_v45 = vcvt.s32.f32 %v1917_v0  ;;  %v1866_v58 = vunpack.c.2.s8 %v597_v44 }
 0x314   : > { %5887 = vmatpush.bf16.msra.mxu0 %v4488_v20  ;;  %v4504_v11 = vpack.c.bf16 %v3501_v51, %v3500_v38  ;;  %v1867_v12 = vunpack.c.3.s8 %v597_v44  ;;  %v1882_v16 = vunpack.c.2.s8 %v601_v4  ;;  %v1883_v54 = vunpack.c.3.s8 %v601_v4 }
 0x315   : > { %5900 = vmatpush.bf16.msra.mxu1 %v4496_v56  ;;  %v4512_v27 = vpack.c.bf16 %v3517_v45, %v3516_v26  ;;  %v3466_v2 = vcvt.s32.f32 %v1866_v58  ;;  %v1898_v17 = vunpack.c.2.s8 %v605_v7  ;;  %v1899_v18 = vunpack.c.3.s8 %v605_v7 }
 0x316   : > { %5913 = vmatpush.bf16.msra.mxu2 %v4504_v11  ;;  %v3467_v8 = vcvt.s32.f32 %v1867_v12  ;;  %v3482_v57 = vcvt.s32.f32 %v1882_v16  ;;  %v3483_v59 = vcvt.s32.f32 %v1883_v54  ;;  %v1914_v49 = vunpack.c.2.s8 %v609_v9 }
 0x317   : > { %5926 = vmatpush.bf16.msra.mxu3 %v4512_v27  ;;  %v3498_v24 = vcvt.s32.f32 %v1898_v17  ;;  %v3499_v28 = vcvt.s32.f32 %v1899_v18  ;;  %v1915_v14 = vunpack.c.3.s8 %v609_v9  ;;  %v5660_v50 = vadd.f32 %v7312_v19, %v5647_v6  ;;  %v7346_v6 = vpop.f32.mrf.mxu1  ;;  %v5687_v17 = vpop.f32.mrf.mxu0 }
 0x318   : > { %v4487_v1 = vpack.c.bf16 %v3467_v8, %v3466_v2  ;;  %v4495_v53 = vpack.c.bf16 %v3483_v59, %v3482_v57  ;;  %v3514_v35 = vcvt.s32.f32 %v1914_v49  ;;  %v1864_v36 = vunpack.c.0.s8 %v597_v44  ;;  %v615_v49 = vld [vmem:[%s6675_s8 + $0x998] sm:$0xff] }
 0x319   : > { %v4503_v22 = vpack.c.bf16 %v3499_v28, %v3498_v24  ;;  %v3515_v40 = vcvt.s32.f32 %v1915_v14  ;;  %v7338_v10 = vadd.f32 %v7314_v5, %v5660_v50  ;;  %v1865_v41 = vunpack.c.1.s8 %v597_v44  ;;  %v608_v44 = vld [vmem:[%s6675_s8 + $0x960] sm:$0xff] }
 0x31a   : > { %5888 = vmatpush.bf16.msra.mxu0 %v4487_v1  ;;  %5901 = vmatpush.bf16.msra.mxu1 %v4495_v53  ;;  %v3464_v46 = vcvt.s32.f32 %v1864_v36  ;;  %v1880_v23 = vunpack.c.0.s8 %v601_v4  ;;  %v1881_v3 = vunpack.c.1.s8 %v601_v4  ;;  %v1896_v21 = vunpack.c.0.s8 %v605_v7  ;;  %v7350_v1 = vld [vmem:[%s6675_s8 + $0x9b8] sm:$0xff] }
 0x31b   : > { %5914 = vmatpush.bf16.msra.mxu2 %v4503_v22  ;;  %v4511_v19 = vpack.c.bf16 %v3515_v40, %v3514_v35  ;;  %v3465_v25 = vcvt.s32.f32 %v1865_v41  ;;  %v1897_v13 = vunpack.c.1.s8 %v605_v7  ;;  %v1912_v31 = vunpack.c.0.s8 %v609_v9  ;;  %v7352_v40 = vpop.f32.mrf.mxu2  ;;  %v7354_v41 = vpop.f32.mrf.mxu3 }
 0x31c   : > { %v3480_v5 = vcvt.s32.f32 %v1880_v23  ;;  %v3481_v47 = vcvt.s32.f32 %v1881_v3  ;;  %v3496_v48 = vcvt.s32.f32 %v1896_v21  ;;  %v1913_v52 = vunpack.c.1.s8 %v609_v9 }
 0x31d   : > { %5927 = vmatpush.bf16.msra.mxu3 %v4511_v19  ;;  %v4486_v61 = vpack.c.bf16 %v3465_v25, %v3464_v46  ;;  %v3497_v60 = vcvt.s32.f32 %v1897_v13  ;;  %v3512_v33 = vcvt.s32.f32 %v1912_v31  ;;  %v1862_v39 = vunpack.c.2.s8 %v596_v29 }
 0x31e   : > { %v4494_v55 = vpack.c.bf16 %v3481_v47, %v3480_v5  ;;  %v3513_v43 = vcvt.s32.f32 %v1913_v52  ;;  %v1863_v30 = vunpack.c.3.s8 %v596_v29  ;;  %v1878_v34 = vunpack.c.2.s8 %v600_v15  ;;  %v4814_v5 = vld [vmem:[#allocation1] sm:$0xff] }
 0x31f   : > { %5889 = vmatpush.bf16.msra.mxu0 %v4486_v61  ;;  %v4502_v32 = vpack.c.bf16 %v3497_v60, %v3496_v48  ;;  %v3462_v42 = vcvt.s32.f32 %v1862_v39  ;;  %v1879_v63 = vunpack.c.3.s8 %v600_v15  ;;  %v1894_v0 = vunpack.c.2.s8 %v604_v62  ;;  %v5700_v47 = vpop.f32.mrf.mxu1 }
 0x320   : > { %5902 = vmatpush.bf16.msra.mxu1 %v4494_v55  ;;  %v4510_v4 = vpack.c.bf16 %v3513_v43, %v3512_v33  ;;  %v3463_v20 = vcvt.s32.f32 %v1863_v30  ;;  %v3478_v38 = vcvt.s32.f32 %v1878_v34  ;;  %v1895_v51 = vunpack.c.3.s8 %v604_v62  ;;  %v4815_v43 = vld [vmem:[#allocation1 + $0x9] sm:$0xff] }
 0x321   : > { %5915 = vmatpush.bf16.msra.mxu2 %v4502_v32  ;;  %v3479_v7 = vcvt.s32.f32 %v1879_v63  ;;  %v3494_v56 = vcvt.s32.f32 %v1894_v0  ;;  %v1910_v26 = vunpack.c.2.s8 %v608_v44  ;;  %v1911_v45 = vunpack.c.3.s8 %v608_v44 }
 0x322   : > { %5928 = vmatpush.bf16.msra.mxu3 %v4510_v4  ;;  %v4485_v58 = vpack.c.bf16 %v3463_v20, %v3462_v42  ;;  %v3495_v9 = vcvt.s32.f32 %v1895_v51  ;;  %v1860_v11 = vunpack.c.0.s8 %v596_v29  ;;  %v1861_v12 = vunpack.c.1.s8 %v596_v29  ;;  %v623_v29 = vld [vmem:[%s6675_s8 + $0x9d8] sm:$0xff]  ;;  %v4816_v42 = vld [vmem:[#allocation1 + $0x12] sm:$0xff] }
 0x323   : > { %v4493_v16 = vpack.c.bf16 %v3479_v7, %v3478_v38  ;;  %v3510_v54 = vcvt.s32.f32 %v1910_v26  ;;  %v3511_v27 = vcvt.s32.f32 %v1911_v45  ;;  %v1876_v2 = vunpack.c.0.s8 %v600_v15  ;;  %v4817_v4 = vld [vmem:[#allocation1 + $0x1b] sm:$0xff] }
 0x324   : > { %5890 = vmatpush.bf16.msra.mxu0 %v4485_v58  ;;  %v4501_v18 = vpack.c.bf16 %v3495_v9, %v3494_v56  ;;  %v3460_v8 = vcvt.s32.f32 %v1860_v11  ;;  %v3461_v57 = vcvt.s32.f32 %v1861_v12  ;;  %v1877_v59 = vunpack.c.1.s8 %v600_v15  ;;  %v627_v15 = vld [vmem:[%s6675_s8 + $0x9f8] sm:$0xff]  ;;  %v614_v12 = vld [vmem:[%s6675_s8 + $0x990] sm:$0xff] }
 0x325   : > { %5903 = vmatpush.bf16.msra.mxu1 %v4493_v16  ;;  %v4509_v24 = vpack.c.bf16 %v3511_v27, %v3510_v54  ;;  %v3476_v28 = vcvt.s32.f32 %v1876_v2  ;;  %v1892_v14 = vunpack.c.0.s8 %v604_v62  ;;  %v1893_v50 = vunpack.c.1.s8 %v604_v62  ;;  %v5713_v16 = vpop.f32.mrf.mxu2  ;;  %v5726_v54 = vpop.f32.mrf.mxu3 }
 0x326   : > { %5916 = vmatpush.bf16.msra.mxu2 %v4501_v18  ;;  %v4484_v53 = vpack.c.bf16 %v3461_v57, %v3460_v8  ;;  %v3477_v35 = vcvt.s32.f32 %v1877_v59  ;;  %v1908_v36 = vunpack.c.0.s8 %v608_v44  ;;  %v1909_v22 = vunpack.c.1.s8 %v608_v44  ;;  %v618_v8 = vld [vmem:[%s6675_s8 + $0x9b0] sm:$0xff] }
 0x327   : > { %5929 = vmatpush.bf16.msra.mxu3 %v4509_v24  ;;  %v3492_v46 = vcvt.s32.f32 %v1892_v14  ;;  %v3493_v23 = vcvt.s32.f32 %v1893_v50  ;;  %v1938_v3 = vunpack.c.2.s8 %v615_v49  ;;  %v1939_v21 = vunpack.c.3.s8 %v615_v49 }
 0x328   : > { %5891 = vmatpush.bf16.msra.mxu0 %v4484_v53  ;;  %v4492_v19 = vpack.c.bf16 %v3477_v35, %v3476_v28  ;;  %v3508_v25 = vcvt.s32.f32 %v1908_v36  ;;  %v3509_v13 = vcvt.s32.f32 %v1909_v22  ;;  %v1954_v31 = vunpack.c.2.s8 %v7350_v1  ;;  %v622_v53 = vld [vmem:[%s6675_s8 + $0x9d0] sm:$0xff] }
 0x329   : > { %v4500_v48 = vpack.c.bf16 %v3493_v23, %v3492_v46  ;;  %v3538_v52 = vcvt.s32.f32 %v1938_v3  ;;  %v3539_v62 = vcvt.s32.f32 %v1939_v21  ;;  %v1955_v61 = vunpack.c.3.s8 %v7350_v1  ;;  %v626_v23 = vld [vmem:[%s6675_s8 + $0x9f0] sm:$0xff] }
 0x32a   : > { %5904 = vmatpush.bf16.msra.mxu1 %v4492_v19  ;;  %v4508_v60 = vpack.c.bf16 %v3509_v13, %v3508_v25  ;;  %v3554_v33 = vcvt.s32.f32 %v1954_v31  ;;  %v1970_v39 = vunpack.c.2.s8 %v623_v29  ;;  %v1971_v55 = vunpack.c.3.s8 %v623_v29 }
 0x32b   : > { %5917 = vmatpush.bf16.msra.mxu2 %v4500_v48  ;;  %v4523_v30 = vpack.c.bf16 %v3539_v62, %v3538_v52  ;;  %v3555_v34 = vcvt.s32.f32 %v1955_v61  ;;  %v1986_v44 = vunpack.c.2.s8 %v627_v15  ;;  %v1987_v32 = vunpack.c.3.s8 %v627_v15  ;;  %5892 = vmatmul.bf16.vlgmr.msra.gmra.mxu0 %v4814_v5 }
 0x32c   : > { %5930 = vmatpush.bf16.msra.mxu3 %v4508_v60  ;;  %v3570_v63 = vcvt.s32.f32 %v1970_v39  ;;  %v3571_v0 = vcvt.s32.f32 %v1971_v55  ;;  %v1936_v20 = vunpack.c.0.s8 %v615_v49  ;;  %v1937_v38 = vunpack.c.1.s8 %v615_v49 }
 0x32d   : > { %5936 = vmatpush.bf16.msrb.mxu0 %v4523_v30  ;;  %v4531_v51 = vpack.c.bf16 %v3555_v34, %v3554_v33  ;;  %v3586_v7 = vcvt.s32.f32 %v1986_v44  ;;  %v3587_v56 = vcvt.s32.f32 %v1987_v32  ;;  %5905 = vmatmul.bf16.vlgmr.msra.gmra.mxu1 %v4815_v43  ;;  %v1952_v26 = vunpack.c.0.s8 %v7350_v1 }
 0x32e   : > { %v4539_v45 = vpack.c.bf16 %v3571_v0, %v3570_v63  ;;  %5918 = vmatmul.bf16.vlgmr.msra.gmra.mxu2 %v4816_v42  ;;  %v3536_v58 = vcvt.s32.f32 %v1936_v20  ;;  %v3537_v9 = vcvt.s32.f32 %v1937_v38  ;;  %v1953_v11 = vunpack.c.1.s8 %v7350_v1  ;;  %v613_v38 = vld [vmem:[%s6675_s8 + $0x988] sm:$0xff] }
 0x32f   : > { %5949 = vmatpush.bf16.msrb.mxu1 %v4531_v51  ;;  %v4547_v27 = vpack.c.bf16 %v3587_v56, %v3586_v7  ;;  %5931 = vmatmul.bf16.vlgmr.msra.gmra.mxu3 %v4817_v4  ;;  %v3552_v2 = vcvt.s32.f32 %v1952_v26  ;;  %v1968_v17 = vunpack.c.0.s8 %v623_v29  ;;  %v1969_v18 = vunpack.c.1.s8 %v623_v29  ;;  %v617_v56 = vld [vmem:[%s6675_s8 + $0x9a8] sm:$0xff] }
 0x330   : > { %5962 = vmatpush.bf16.msrb.mxu2 %v4539_v45  ;;  %v4522_v57 = vpack.c.bf16 %v3537_v9, %v3536_v58  ;;  %v3553_v59 = vcvt.s32.f32 %v1953_v11  ;;  %v1984_v49 = vunpack.c.0.s8 %v627_v15  ;;  %v1985_v24 = vunpack.c.1.s8 %v627_v15  ;;  %v621_v11 = vld [vmem:[%s6675_s8 + $0x9c8] sm:$0xff] }
 0x331   : > { %5975 = vmatpush.bf16.msrb.mxu3 %v4547_v27  ;;  %v3568_v28 = vcvt.s32.f32 %v1968_v17  ;;  %v3569_v14 = vcvt.s32.f32 %v1969_v18  ;;  %v1934_v50 = vunpack.c.2.s8 %v614_v12  ;;  %v1935_v1 = vunpack.c.3.s8 %v614_v12 }
 0x332   : > { %5937 = vmatpush.bf16.msrb.mxu0 %v4522_v57  ;;  %v4530_v35 = vpack.c.bf16 %v3553_v59, %v3552_v2  ;;  %v3584_v36 = vcvt.s32.f32 %v1984_v49  ;;  %v3585_v22 = vcvt.s32.f32 %v1985_v24  ;;  %v1950_v46 = vunpack.c.2.s8 %v618_v8  ;;  %v625_v2 = vld [vmem:[%s6675_s8 + $0x9e8] sm:$0xff] }
 0x333   : > { %v4538_v3 = vpack.c.bf16 %v3569_v14, %v3568_v28  ;;  %v3534_v21 = vcvt.s32.f32 %v1934_v50  ;;  %v3535_v29 = vcvt.s32.f32 %v1935_v1  ;;  %v1951_v19 = vunpack.c.3.s8 %v618_v8 }
 0x334   : > { %5950 = vmatpush.bf16.msrb.mxu1 %v4530_v35  ;;  %v4546_v25 = vpack.c.bf16 %v3585_v22, %v3584_v36  ;;  %v3550_v13 = vcvt.s32.f32 %v1950_v46  ;;  %v1966_v31 = vunpack.c.2.s8 %v622_v53  ;;  %v1967_v15 = vunpack.c.3.s8 %v622_v53 }
 0x335   : > { %5963 = vmatpush.bf16.msrb.mxu2 %v4538_v3  ;;  %v4521_v5 = vpack.c.bf16 %v3535_v29, %v3534_v21  ;;  %v3551_v47 = vcvt.s32.f32 %v1951_v19  ;;  %v1982_v48 = vunpack.c.2.s8 %v626_v23  ;;  %v1983_v52 = vunpack.c.3.s8 %v626_v23 }
 0x336   : > { %5976 = vmatpush.bf16.msrb.mxu3 %v4546_v25  ;;  %v3566_v62 = vcvt.s32.f32 %v1966_v31  ;;  %v3567_v61 = vcvt.s32.f32 %v1967_v15  ;;  %v5686_v60 = vadd.f32 %v7342_v37, %v7338_v10  ;;  %v1932_v33 = vunpack.c.0.s8 %v614_v12 }
 0x337   : > { %5938 = vmatpush.bf16.msrb.mxu0 %v4521_v5  ;;  %v4529_v39 = vpack.c.bf16 %v3551_v47, %v3550_v13  ;;  %v3582_v55 = vcvt.s32.f32 %v1982_v48  ;;  %v3583_v43 = vcvt.s32.f32 %v1983_v52  ;;  %v1933_v30 = vunpack.c.1.s8 %v614_v12  ;;  %v612_v48 = vld [vmem:[%s6675_s8 + $0x980] sm:$0xff] }
 0x338   : > { %v4537_v34 = vpack.c.bf16 %v3567_v61, %v3566_v62  ;;  %v3532_v44 = vcvt.s32.f32 %v1932_v33  ;;  %v1948_v32 = vunpack.c.0.s8 %v618_v8  ;;  %v1949_v42 = vunpack.c.1.s8 %v618_v8  ;;  %v7379_v33 = vpop.f32.mrf.mxu0 }
 0x339   : > { %5951 = vmatpush.bf16.msrb.mxu1 %v4529_v39  ;;  %v4545_v63 = vpack.c.bf16 %v3583_v43, %v3582_v55  ;;  %v3533_v0 = vcvt.s32.f32 %v1933_v30  ;;  %v1964_v4 = vunpack.c.0.s8 %v622_v53  ;;  %v1965_v20 = vunpack.c.1.s8 %v622_v53  ;;  %v620_v30 = vld [vmem:[%s6675_s8 + $0x9c0] sm:$0xff] }
 0x33a   : > { %5964 = vmatpush.bf16.msrb.mxu2 %v4537_v34  ;;  %v3548_v10 = vcvt.s32.f32 %v1948_v32  ;;  %v3549_v37 = vcvt.s32.f32 %v1949_v42  ;;  %v1980_v51 = vunpack.c.0.s8 %v626_v23  ;;  %v1981_v7 = vunpack.c.1.s8 %v626_v23 }
 0x33b   : > { %5977 = vmatpush.bf16.msrb.mxu3 %v4545_v63  ;;  %v4520_v26 = vpack.c.bf16 %v3533_v0, %v3532_v44  ;;  %v3564_v45 = vcvt.s32.f32 %v1964_v4  ;;  %v3565_v58 = vcvt.s32.f32 %v1965_v20  ;;  %v5699_v9 = vadd.f32 %v7346_v6, %v5686_v60  ;;  %v616_v60 = vld [vmem:[%s6675_s8 + $0x9a0] sm:$0xff] }
 0x33c   : > { %v4528_v12 = vpack.c.bf16 %v3549_v37, %v3548_v10  ;;  %v3580_v16 = vcvt.s32.f32 %v1980_v51  ;;  %v3581_v54 = vcvt.s32.f32 %v1981_v7  ;;  %v1930_v27 = vunpack.c.2.s8 %v613_v38 }
 0x33d   : > { %5939 = vmatpush.bf16.msrb.mxu0 %v4520_v26  ;;  %v4536_v17 = vpack.c.bf16 %v3565_v58, %v3564_v45  ;;  %v1931_v18 = vunpack.c.3.s8 %v613_v38  ;;  %v1946_v8 = vunpack.c.2.s8 %v617_v56  ;;  %v1947_v57 = vunpack.c.3.s8 %v617_v56 }
 0x33e   : > { %5952 = vmatpush.bf16.msrb.mxu1 %v4528_v12  ;;  %v4544_v59 = vpack.c.bf16 %v3581_v54, %v3580_v16  ;;  %v3530_v49 = vcvt.s32.f32 %v1930_v27  ;;  %v1962_v24 = vunpack.c.2.s8 %v621_v11  ;;  %v1963_v28 = vunpack.c.3.s8 %v621_v11 }
 0x33f   : > { %5965 = vmatpush.bf16.msrb.mxu2 %v4536_v17  ;;  %v3531_v14 = vcvt.s32.f32 %v1931_v18  ;;  %v3546_v50 = vcvt.s32.f32 %v1946_v8  ;;  %v3547_v6 = vcvt.s32.f32 %v1947_v57  ;;  %v1978_v1 = vunpack.c.2.s8 %v625_v2 }
 0x340   : > { %5978 = vmatpush.bf16.msrb.mxu3 %v4544_v59  ;;  %v3562_v53 = vcvt.s32.f32 %v1962_v24  ;;  %v3563_v35 = vcvt.s32.f32 %v1963_v28  ;;  %v1979_v36 = vunpack.c.3.s8 %v625_v2  ;;  %v5712_v22 = vadd.f32 %v7352_v40, %v5699_v9  ;;  %v7383_v9 = vpop.f32.mrf.mxu1  ;;  %v5739_v24 = vpop.f32.mrf.mxu0 }
 0x341   : > { %v4519_v46 = vpack.c.bf16 %v3531_v14, %v3530_v49  ;;  %v4527_v23 = vpack.c.bf16 %v3547_v6, %v3546_v50  ;;  %v3578_v3 = vcvt.s32.f32 %v1978_v1  ;;  %v1928_v21 = vunpack.c.0.s8 %v613_v38  ;;  %v631_v1 = vld [vmem:[%s6675_s8 + $0xa18] sm:$0xff] }
 0x342   : > { %v4535_v29 = vpack.c.bf16 %v3563_v35, %v3562_v53  ;;  %v3579_v19 = vcvt.s32.f32 %v1979_v36  ;;  %v7375_v25 = vadd.f32 %v7354_v41, %v5712_v22  ;;  %v1929_v13 = vunpack.c.1.s8 %v613_v38  ;;  %v624_v38 = vld [vmem:[%s6675_s8 + $0x9e0] sm:$0xff] }
 0x343   : > { %5940 = vmatpush.bf16.msrb.mxu0 %v4519_v46  ;;  %5953 = vmatpush.bf16.msrb.mxu1 %v4527_v23  ;;  %v3528_v31 = vcvt.s32.f32 %v1928_v21  ;;  %v1944_v15 = vunpack.c.0.s8 %v617_v56  ;;  %v1945_v5 = vunpack.c.1.s8 %v617_v56  ;;  %v1960_v47 = vunpack.c.0.s8 %v621_v11  ;;  %v7387_v46 = vld [vmem:[%s6675_s8 + $0xa38] sm:$0xff] }
 0x344   : > { %5966 = vmatpush.bf16.msrb.mxu2 %v4535_v29  ;;  %v4543_v40 = vpack.c.bf16 %v3579_v19, %v3578_v3  ;;  %v3529_v52 = vcvt.s32.f32 %v1929_v13  ;;  %v1961_v62 = vunpack.c.1.s8 %v621_v11  ;;  %v1976_v61 = vunpack.c.0.s8 %v625_v2  ;;  %v7389_v19 = vpop.f32.mrf.mxu2  ;;  %v7391_v13 = vpop.f32.mrf.mxu3 }
 0x345   : > { %v3544_v41 = vcvt.s32.f32 %v1944_v15  ;;  %v3545_v39 = vcvt.s32.f32 %v1945_v5  ;;  %v3560_v55 = vcvt.s32.f32 %v1960_v47  ;;  %v1977_v43 = vunpack.c.1.s8 %v625_v2 }
 0x346   : > { %5979 = vmatpush.bf16.msrb.mxu3 %v4543_v40  ;;  %v4518_v34 = vpack.c.bf16 %v3529_v52, %v3528_v31  ;;  %v3561_v44 = vcvt.s32.f32 %v1961_v62  ;;  %v3576_v32 = vcvt.s32.f32 %v1976_v61  ;;  %v1926_v42 = vunpack.c.2.s8 %v612_v48 }
 0x347   : > { %v4526_v63 = vpack.c.bf16 %v3545_v39, %v3544_v41  ;;  %v3577_v0 = vcvt.s32.f32 %v1977_v43  ;;  %v1927_v4 = vunpack.c.3.s8 %v612_v48  ;;  %v1942_v20 = vunpack.c.2.s8 %v616_v60  ;;  %v4818_v41 = vld [vmem:[#allocation1 + $0x24] sm:$0xff] }
 0x348   : > { %5941 = vmatpush.bf16.msrb.mxu0 %v4518_v34  ;;  %v4534_v10 = vpack.c.bf16 %v3561_v44, %v3560_v55  ;;  %v3526_v37 = vcvt.s32.f32 %v1926_v42  ;;  %v1943_v51 = vunpack.c.3.s8 %v616_v60  ;;  %v1958_v7 = vunpack.c.2.s8 %v620_v30  ;;  %v5752_v39 = vpop.f32.mrf.mxu1 }
 0x349   : > { %5954 = vmatpush.bf16.msrb.mxu1 %v4526_v63  ;;  %v4542_v56 = vpack.c.bf16 %v3577_v0, %v3576_v32  ;;  %v3527_v26 = vcvt.s32.f32 %v1927_v4  ;;  %v3542_v45 = vcvt.s32.f32 %v1942_v20  ;;  %v1959_v58 = vunpack.c.3.s8 %v620_v30  ;;  %v4819_v0 = vld [vmem:[#allocation1 + $0x2d] sm:$0xff] }
 0x34a   : > { %5967 = vmatpush.bf16.msrb.mxu2 %v4534_v10  ;;  %v3543_v11 = vcvt.s32.f32 %v1943_v51  ;;  %v3558_v12 = vcvt.s32.f32 %v1958_v7  ;;  %v1974_v16 = vunpack.c.2.s8 %v624_v38  ;;  %v1975_v54 = vunpack.c.3.s8 %v624_v38 }
 0x34b   : > { %5980 = vmatpush.bf16.msrb.mxu3 %v4542_v56  ;;  %v4517_v27 = vpack.c.bf16 %v3527_v26, %v3526_v37  ;;  %v3559_v2 = vcvt.s32.f32 %v1959_v58  ;;  %v1924_v17 = vunpack.c.0.s8 %v612_v48  ;;  %v1925_v18 = vunpack.c.1.s8 %v612_v48  ;;  %v639_v48 = vld [vmem:[%s6675_s8 + $0xa58] sm:$0xff]  ;;  %v4820_v37 = vld [vmem:[#allocation1 + $0x36] sm:$0xff] }
 0x34c   : > { %v4525_v8 = vpack.c.bf16 %v3543_v11, %v3542_v45  ;;  %v3574_v57 = vcvt.s32.f32 %v1974_v16  ;;  %v3575_v59 = vcvt.s32.f32 %v1975_v54  ;;  %v1940_v49 = vunpack.c.0.s8 %v616_v60  ;;  %v4821_v56 = vld [vmem:[#allocation1 + $0x3f] sm:$0xff] }
 0x34d   : > { %5942 = vmatpush.bf16.msrb.mxu0 %v4517_v27  ;;  %v4533_v28 = vpack.c.bf16 %v3559_v2, %v3558_v12  ;;  %v3524_v14 = vcvt.s32.f32 %v1924_v17  ;;  %v3525_v50 = vcvt.s32.f32 %v1925_v18  ;;  %v1941_v6 = vunpack.c.1.s8 %v616_v60  ;;  %v643_v60 = vld [vmem:[%s6675_s8 + $0xa78] sm:$0xff]  ;;  %v630_v18 = vld [vmem:[%s6675_s8 + $0xa10] sm:$0xff] }
 0x34e   : > { %5955 = vmatpush.bf16.msrb.mxu1 %v4525_v8  ;;  %v4541_v53 = vpack.c.bf16 %v3575_v59, %v3574_v57  ;;  %v3540_v35 = vcvt.s32.f32 %v1940_v49  ;;  %v1956_v36 = vunpack.c.0.s8 %v620_v30  ;;  %v1957_v22 = vunpack.c.1.s8 %v620_v30  ;;  %v5765_v8 = vpop.f32.mrf.mxu2  ;;  %v5778_v57 = vpop.f32.mrf.mxu3 }
 0x34f   : > { %5968 = vmatpush.bf16.msrb.mxu2 %v4533_v28  ;;  %v4516_v23 = vpack.c.bf16 %v3525_v50, %v3524_v14  ;;  %v3541_v3 = vcvt.s32.f32 %v1941_v6  ;;  %v1972_v21 = vunpack.c.0.s8 %v624_v38  ;;  %v1973_v29 = vunpack.c.1.s8 %v624_v38  ;;  %v634_v14 = vld [vmem:[%s6675_s8 + $0xa30] sm:$0xff] }
 0x350   : > { %5981 = vmatpush.bf16.msrb.mxu3 %v4541_v53  ;;  %v3556_v31 = vcvt.s32.f32 %v1956_v36  ;;  %v3557_v15 = vcvt.s32.f32 %v1957_v22  ;;  %v2002_v5 = vunpack.c.2.s8 %v631_v1  ;;  %v2003_v47 = vunpack.c.3.s8 %v631_v1 }
 0x351   : > { %5943 = vmatpush.bf16.msrb.mxu0 %v4516_v23  ;;  %v4524_v40 = vpack.c.bf16 %v3541_v3, %v3540_v35  ;;  %v3572_v52 = vcvt.s32.f32 %v1972_v21  ;;  %v3573_v62 = vcvt.s32.f32 %v1973_v29  ;;  %v2018_v61 = vunpack.c.2.s8 %v7387_v46  ;;  %v638_v23 = vld [vmem:[%s6675_s8 + $0xa50] sm:$0xff] }
 0x352   : > { %v4532_v55 = vpack.c.bf16 %v3557_v15, %v3556_v31  ;;  %v3602_v43 = vcvt.s32.f32 %v2002_v5  ;;  %v3603_v30 = vcvt.s32.f32 %v2003_v47  ;;  %v2019_v34 = vunpack.c.3.s8 %v7387_v46  ;;  %v642_v15 = vld [vmem:[%s6675_s8 + $0xa70] sm:$0xff] }
 0x353   : > { %5956 = vmatpush.bf16.msrb.mxu1 %v4524_v40  ;;  %v4540_v44 = vpack.c.bf16 %v3573_v62, %v3572_v52  ;;  %v3618_v32 = vcvt.s32.f32 %v2018_v61  ;;  %v2034_v42 = vunpack.c.2.s8 %v639_v48  ;;  %v2035_v63 = vunpack.c.3.s8 %v639_v48  ;;  %v4719_v52 = vld [vmem:[%s7631_s0 + $0x50] sm:$0xff] }
 0x354   : > { %5969 = vmatpush.bf16.msrb.mxu2 %v4532_v55  ;;  %v4555_v4 = vpack.c.bf16 %v3603_v30, %v3602_v43  ;;  %v3619_v20 = vcvt.s32.f32 %v2019_v34  ;;  %v2050_v38 = vunpack.c.2.s8 %v643_v60  ;;  %v2051_v10 = vunpack.c.3.s8 %v643_v60  ;;  %5944 = vmatmul.bf16.vlgmr.msrb.gmra.mxu0 %v4818_v41  ;;  %4823 = vst [vmem:[#allocation1] ss:$9 sm:$0xff] %v4719_v52 }
 0x355   : > { %5982 = vmatpush.bf16.msrb.mxu3 %v4540_v44  ;;  %v3634_v51 = vcvt.s32.f32 %v2034_v42  ;;  %v3635_v7 = vcvt.s32.f32 %v2035_v63  ;;  %v2000_v26 = vunpack.c.0.s8 %v631_v1  ;;  %v2001_v45 = vunpack.c.1.s8 %v631_v1 }
 0x356   : > { %5988 = vmatpush.bf16.msra.mxu0 %v4555_v4  ;;  %v4563_v58 = vpack.c.bf16 %v3619_v20, %v3618_v32  ;;  %v3650_v11 = vcvt.s32.f32 %v2050_v38  ;;  %v3651_v12 = vcvt.s32.f32 %v2051_v10  ;;  %5957 = vmatmul.bf16.vlgmr.msrb.gmra.mxu1 %v4819_v0  ;;  %v2016_v16 = vunpack.c.0.s8 %v7387_v46 }
 0x357   : > { %v4571_v54 = vpack.c.bf16 %v3635_v7, %v3634_v51  ;;  %5970 = vmatmul.bf16.vlgmr.msrb.gmra.mxu2 %v4820_v37  ;;  %v3600_v27 = vcvt.s32.f32 %v2000_v26  ;;  %v3601_v2 = vcvt.s32.f32 %v2001_v45  ;;  %v2017_v17 = vunpack.c.1.s8 %v7387_v46 }
 0x358   : > { %6001 = vmatpush.bf16.msra.mxu1 %v4563_v58  ;;  %v4579_v59 = vpack.c.bf16 %v3651_v12, %v3650_v11  ;;  %5983 = vmatmul.bf16.vlgmr.msrb.gmra.mxu3 %v4821_v56  ;;  %v3616_v49 = vcvt.s32.f32 %v2016_v16  ;;  %v2032_v24 = vunpack.c.0.s8 %v639_v48  ;;  %v2033_v28 = vunpack.c.1.s8 %v639_v48  ;;  %v629_v58 = vld [vmem:[%s6675_s8 + $0xa08] sm:$0xff] }
 0x359   : > { %6014 = vmatpush.bf16.msra.mxu2 %v4571_v54  ;;  %v4554_v50 = vpack.c.bf16 %v3601_v2, %v3600_v27  ;;  %v3617_v6 = vcvt.s32.f32 %v2017_v17  ;;  %v2048_v1 = vunpack.c.0.s8 %v643_v60  ;;  %v2049_v53 = vunpack.c.1.s8 %v643_v60  ;;  %v633_v16 = vld [vmem:[%s6675_s8 + $0xa28] sm:$0xff] }
 0x35a   : > { %6027 = vmatpush.bf16.msra.mxu3 %v4579_v59  ;;  %v3632_v35 = vcvt.s32.f32 %v2032_v24  ;;  %v3633_v36 = vcvt.s32.f32 %v2033_v28  ;;  %v1998_v22 = vunpack.c.2.s8 %v630_v18  ;;  %v1999_v46 = vunpack.c.3.s8 %v630_v18  ;;  %v641_v24 = vld [vmem:[%s6675_s8 + $0xa68] sm:$0xff] }
 0x35b   : > { %5989 = vmatpush.bf16.msra.mxu0 %v4554_v50  ;;  %v4562_v3 = vpack.c.bf16 %v3617_v6, %v3616_v49  ;;  %v3648_v21 = vcvt.s32.f32 %v2048_v1  ;;  %v3649_v29 = vcvt.s32.f32 %v2049_v53  ;;  %v2014_v31 = vunpack.c.2.s8 %v634_v14 }
 0x35c   : > { %v4570_v5 = vpack.c.bf16 %v3633_v36, %v3632_v35  ;;  %v3598_v47 = vcvt.s32.f32 %v1998_v22  ;;  %v3599_v48 = vcvt.s32.f32 %v1999_v46  ;;  %v2015_v40 = vunpack.c.3.s8 %v634_v14 }
 0x35d   : > { %6002 = vmatpush.bf16.msra.mxu1 %v4562_v3  ;;  %v4578_v62 = vpack.c.bf16 %v3649_v29, %v3648_v21  ;;  %v3614_v61 = vcvt.s32.f32 %v2014_v31  ;;  %v2030_v60 = vunpack.c.2.s8 %v638_v23  ;;  %v2031_v41 = vunpack.c.3.s8 %v638_v23 }
 0x35e   : > { %6015 = vmatpush.bf16.msra.mxu2 %v4570_v5  ;;  %v4553_v39 = vpack.c.bf16 %v3599_v48, %v3598_v47  ;;  %v3615_v55 = vcvt.s32.f32 %v2015_v40  ;;  %v2046_v43 = vunpack.c.2.s8 %v642_v15  ;;  %v2047_v30 = vunpack.c.3.s8 %v642_v15 }
 0x35f   : > { %6028 = vmatpush.bf16.msra.mxu3 %v4578_v62  ;;  %v3630_v34 = vcvt.s32.f32 %v2030_v60  ;;  %v3631_v44 = vcvt.s32.f32 %v2031_v41  ;;  %v5738_v32 = vadd.f32 %v7379_v33, %v7375_v25  ;;  %v1996_v42 = vunpack.c.0.s8 %v630_v18 }
 0x360   : > { %5990 = vmatpush.bf16.msra.mxu0 %v4553_v39  ;;  %v4561_v63 = vpack.c.bf16 %v3615_v55, %v3614_v61  ;;  %v3646_v0 = vcvt.s32.f32 %v2046_v43  ;;  %v3647_v4 = vcvt.s32.f32 %v2047_v30  ;;  %v1997_v20 = vunpack.c.1.s8 %v630_v18  ;;  %v637_v18 = vld [vmem:[%s6675_s8 + $0xa48] sm:$0xff]  ;;  %v628_v43 = vld [vmem:[%s6675_s8 + $0xa00] sm:$0xff] }
 0x361   : > { %v4569_v38 = vpack.c.bf16 %v3631_v44, %v3630_v34  ;;  %v3596_v10 = vcvt.s32.f32 %v1996_v42  ;;  %v2012_v37 = vunpack.c.0.s8 %v634_v14  ;;  %v2013_v51 = vunpack.c.1.s8 %v634_v14  ;;  %v7419_v42 = vpop.f32.mrf.mxu0 }
 0x362   : > { %6003 = vmatpush.bf16.msra.mxu1 %v4561_v63  ;;  %v4577_v7 = vpack.c.bf16 %v3647_v4, %v3646_v0  ;;  %v3597_v56 = vcvt.s32.f32 %v1997_v20  ;;  %v2028_v26 = vunpack.c.0.s8 %v638_v23  ;;  %v2029_v45 = vunpack.c.1.s8 %v638_v23  ;;  %v636_v20 = vld [vmem:[%s6675_s8 + $0xa40] sm:$0xff] }
 0x363   : > { %6016 = vmatpush.bf16.msra.mxu2 %v4569_v38  ;;  %v3612_v25 = vcvt.s32.f32 %v2012_v37  ;;  %v3613_v33 = vcvt.s32.f32 %v2013_v51  ;;  %v2044_v11 = vunpack.c.0.s8 %v642_v15  ;;  %v2045_v12 = vunpack.c.1.s8 %v642_v15 }
 0x364   : > { %6029 = vmatpush.bf16.msra.mxu3 %v4577_v7  ;;  %v4552_v54 = vpack.c.bf16 %v3597_v56, %v3596_v10  ;;  %v3628_v27 = vcvt.s32.f32 %v2028_v26  ;;  %v3629_v2 = vcvt.s32.f32 %v2029_v45  ;;  %v5751_v17 = vadd.f32 %v7383_v9, %v5738_v32  ;;  %v632_v32 = vld [vmem:[%s6675_s8 + $0xa20] sm:$0xff] }
 0x365   : > { %v4560_v8 = vpack.c.bf16 %v3613_v33, %v3612_v25  ;;  %v3644_v57 = vcvt.s32.f32 %v2044_v11  ;;  %v3645_v59 = vcvt.s32.f32 %v2045_v12  ;;  %v1994_v49 = vunpack.c.2.s8 %v629_v58 }
 0x366   : > { %5991 = vmatpush.bf16.msra.mxu0 %v4552_v54  ;;  %v4568_v28 = vpack.c.bf16 %v3629_v2, %v3628_v27  ;;  %v1995_v14 = vunpack.c.3.s8 %v629_v58  ;;  %v2010_v50 = vunpack.c.2.s8 %v633_v16  ;;  %v2011_v6 = vunpack.c.3.s8 %v633_v16 }
 0x367   : > { %6004 = vmatpush.bf16.msra.mxu1 %v4560_v8  ;;  %v4576_v1 = vpack.c.bf16 %v3645_v59, %v3644_v57  ;;  %v3594_v53 = vcvt.s32.f32 %v1994_v49  ;;  %v2026_v35 = vunpack.c.2.s8 %v637_v18  ;;  %v2027_v36 = vunpack.c.3.s8 %v637_v18 }
 0x368   : > { %6017 = vmatpush.bf16.msra.mxu2 %v4568_v28  ;;  %v3595_v22 = vcvt.s32.f32 %v1995_v14  ;;  %v3610_v46 = vcvt.s32.f32 %v2010_v50  ;;  %v3611_v9 = vcvt.s32.f32 %v2011_v6  ;;  %v2042_v23 = vunpack.c.2.s8 %v641_v24 }
 0x369   : > { %6030 = vmatpush.bf16.msra.mxu3 %v4576_v1  ;;  %v3626_v3 = vcvt.s32.f32 %v2026_v35  ;;  %v3627_v21 = vcvt.s32.f32 %v2027_v36  ;;  %v2043_v29 = vunpack.c.3.s8 %v641_v24  ;;  %v5764_v31 = vadd.f32 %v7389_v19, %v5751_v17  ;;  %v7423_v17 = vpop.f32.mrf.mxu1  ;;  %v5791_v35 = vpop.f32.mrf.mxu0 }
 0x36a   : > { %v4551_v15 = vpack.c.bf16 %v3595_v22, %v3594_v53  ;;  %v4559_v5 = vpack.c.bf16 %v3611_v9, %v3610_v46  ;;  %v3642_v47 = vcvt.s32.f32 %v2042_v23  ;;  %v1992_v48 = vunpack.c.0.s8 %v629_v58  ;;  %v647_v23 = vld [vmem:[%s6675_s8 + $0xa98] sm:$0xff] }
 0x36b   : > { %v4567_v40 = vpack.c.bf16 %v3627_v21, %v3626_v3  ;;  %v3643_v52 = vcvt.s32.f32 %v2043_v29  ;;  %v7415_v62 = vadd.f32 %v7391_v13, %v5764_v31  ;;  %v1993_v61 = vunpack.c.1.s8 %v629_v58  ;;  %v640_v58 = vld [vmem:[%s6675_s8 + $0xa60] sm:$0xff] }
 0x36c   : > { %5992 = vmatpush.bf16.msra.mxu0 %v4551_v15  ;;  %6005 = vmatpush.bf16.msra.mxu1 %v4559_v5  ;;  %v3592_v60 = vcvt.s32.f32 %v1992_v48  ;;  %v2008_v41 = vunpack.c.0.s8 %v633_v16  ;;  %v2009_v39 = vunpack.c.1.s8 %v633_v16  ;;  %v2024_v55 = vunpack.c.0.s8 %v637_v18  ;;  %v7427_v15 = vld [vmem:[%s6675_s8 + $0xab8] sm:$0xff] }
 0x36d   : > { %6018 = vmatpush.bf16.msra.mxu2 %v4567_v40  ;;  %v4575_v19 = vpack.c.bf16 %v3643_v52, %v3642_v47  ;;  %v3593_v30 = vcvt.s32.f32 %v1993_v61  ;;  %v2025_v34 = vunpack.c.1.s8 %v637_v18  ;;  %v2040_v44 = vunpack.c.0.s8 %v641_v24  ;;  %v7429_v52 = vpop.f32.mrf.mxu2  ;;  %v7431_v61 = vpop.f32.mrf.mxu3 }
 0x36e   : > { %v3608_v13 = vcvt.s32.f32 %v2008_v41  ;;  %v3609_v63 = vcvt.s32.f32 %v2009_v39  ;;  %v3624_v0 = vcvt.s32.f32 %v2024_v55  ;;  %v2041_v4 = vunpack.c.1.s8 %v641_v24 }
 0x36f   : > { %6031 = vmatpush.bf16.msra.mxu3 %v4575_v19  ;;  %v4550_v38 = vpack.c.bf16 %v3593_v30, %v3592_v60  ;;  %v3625_v10 = vcvt.s32.f32 %v2025_v34  ;;  %v3640_v37 = vcvt.s32.f32 %v2040_v44  ;;  %v1990_v51 = vunpack.c.2.s8 %v628_v43 }
 0x370   : > { %v4558_v7 = vpack.c.bf16 %v3609_v63, %v3608_v13  ;;  %v3641_v56 = vcvt.s32.f32 %v2041_v4  ;;  %v1991_v26 = vunpack.c.3.s8 %v628_v43  ;;  %v2006_v45 = vunpack.c.2.s8 %v632_v32  ;;  %v4824_v13 = vld [vmem:[#allocation1] sm:$0xff] }
 0x371   : > { %5993 = vmatpush.bf16.msra.mxu0 %v4550_v38  ;;  %v4566_v25 = vpack.c.bf16 %v3625_v10, %v3624_v0  ;;  %v3590_v33 = vcvt.s32.f32 %v1990_v51  ;;  %v2007_v11 = vunpack.c.3.s8 %v632_v32  ;;  %v2022_v12 = vunpack.c.2.s8 %v636_v20  ;;  %v5804_v63 = vpop.f32.mrf.mxu1 }
 0x372   : > { %6006 = vmatpush.bf16.msra.mxu1 %v4558_v7  ;;  %v4574_v16 = vpack.c.bf16 %v3641_v56, %v3640_v37  ;;  %v3591_v54 = vcvt.s32.f32 %v1991_v26  ;;  %v3606_v27 = vcvt.s32.f32 %v2006_v45  ;;  %v2023_v2 = vunpack.c.3.s8 %v636_v20  ;;  %v4825_v56 = vld [vmem:[#allocation1 + $0x9] sm:$0xff] }
 0x373   : > { %6019 = vmatpush.bf16.msra.mxu2 %v4566_v25  ;;  %v3607_v18 = vcvt.s32.f32 %v2007_v11  ;;  %v3622_v8 = vcvt.s32.f32 %v2022_v12  ;;  %v2038_v57 = vunpack.c.2.s8 %v640_v58  ;;  %v2039_v59 = vunpack.c.3.s8 %v640_v58 }
 0x374   : > { %6032 = vmatpush.bf16.msra.mxu3 %v4574_v16  ;;  %v4549_v49 = vpack.c.bf16 %v3591_v54, %v3590_v33  ;;  %v3623_v24 = vcvt.s32.f32 %v2023_v2  ;;  %v1988_v28 = vunpack.c.0.s8 %v628_v43  ;;  %v1989_v14 = vunpack.c.1.s8 %v628_v43  ;;  %v655_v43 = vld [vmem:[%s6675_s8 + $0xad8] sm:$0xff]  ;;  %v4826_v33 = vld [vmem:[#allocation1 + $0x12] sm:$0xff] }
 0x375   : > { %v4557_v50 = vpack.c.bf16 %v3607_v18, %v3606_v27  ;;  %v3638_v6 = vcvt.s32.f32 %v2038_v57  ;;  %v3639_v1 = vcvt.s32.f32 %v2039_v59  ;;  %v2004_v53 = vunpack.c.0.s8 %v632_v32  ;;  %v4827_v16 = vld [vmem:[#allocation1 + $0x1b] sm:$0xff] }
 0x376   : > { %5994 = vmatpush.bf16.msra.mxu0 %v4549_v49  ;;  %v4565_v36 = vpack.c.bf16 %v3623_v24, %v3622_v8  ;;  %v3588_v22 = vcvt.s32.f32 %v1988_v28  ;;  %v3589_v46 = vcvt.s32.f32 %v1989_v14  ;;  %v2005_v9 = vunpack.c.1.s8 %v632_v32  ;;  %v659_v32 = vld [vmem:[%s6675_s8 + $0xaf8] sm:$0xff]  ;;  %v646_v14 = vld [vmem:[%s6675_s8 + $0xa90] sm:$0xff] }
 0x377   : > { %6007 = vmatpush.bf16.msra.mxu1 %v4557_v50  ;;  %v4573_v3 = vpack.c.bf16 %v3639_v1, %v3638_v6  ;;  %v3604_v21 = vcvt.s32.f32 %v2004_v53  ;;  %v2020_v29 = vunpack.c.0.s8 %v636_v20  ;;  %v2021_v31 = vunpack.c.1.s8 %v636_v20  ;;  %v5817_v50 = vpop.f32.mrf.mxu2  ;;  %v5830_v6 = vpop.f32.mrf.mxu3 }
 0x378   : > { %6020 = vmatpush.bf16.msra.mxu2 %v4565_v36  ;;  %v4548_v5 = vpack.c.bf16 %v3589_v46, %v3588_v22  ;;  %v3605_v47 = vcvt.s32.f32 %v2005_v9  ;;  %v2036_v48 = vunpack.c.0.s8 %v640_v58  ;;  %v2037_v40 = vunpack.c.1.s8 %v640_v58  ;;  %v650_v22 = vld [vmem:[%s6675_s8 + $0xab0] sm:$0xff] }
 0x379   : > { %6033 = vmatpush.bf16.msra.mxu3 %v4573_v3  ;;  %v3620_v60 = vcvt.s32.f32 %v2020_v29  ;;  %v3621_v41 = vcvt.s32.f32 %v2021_v31  ;;  %v2066_v39 = vunpack.c.2.s8 %v647_v23  ;;  %v2067_v55 = vunpack.c.3.s8 %v647_v23 }
 0x37a   : > { %5995 = vmatpush.bf16.msra.mxu0 %v4548_v5  ;;  %v4556_v19 = vpack.c.bf16 %v3605_v47, %v3604_v21  ;;  %v3636_v30 = vcvt.s32.f32 %v2036_v48  ;;  %v3637_v34 = vcvt.s32.f32 %v2037_v40  ;;  %v2082_v44 = vunpack.c.2.s8 %v7427_v15  ;;  %v654_v5 = vld [vmem:[%s6675_s8 + $0xad0] sm:$0xff] }
 0x37b   : > { %v4564_v0 = vpack.c.bf16 %v3621_v41, %v3620_v60  ;;  %v3666_v4 = vcvt.s32.f32 %v2066_v39  ;;  %v3667_v20 = vcvt.s32.f32 %v2067_v55  ;;  %v2083_v38 = vunpack.c.3.s8 %v7427_v15  ;;  %v658_v41 = vld [vmem:[%s6675_s8 + $0xaf0] sm:$0xff] }
 0x37c   : > { %6008 = vmatpush.bf16.msra.mxu1 %v4556_v19  ;;  %v4572_v10 = vpack.c.bf16 %v3637_v34, %v3636_v30  ;;  %v3682_v37 = vcvt.s32.f32 %v2082_v44  ;;  %v2098_v51 = vunpack.c.2.s8 %v655_v43  ;;  %v2099_v7 = vunpack.c.3.s8 %v655_v43 }
 0x37d   : > { %6021 = vmatpush.bf16.msra.mxu2 %v4564_v0  ;;  %v4587_v26 = vpack.c.bf16 %v3667_v20, %v3666_v4  ;;  %v3683_v45 = vcvt.s32.f32 %v2083_v38  ;;  %v2114_v58 = vunpack.c.2.s8 %v659_v32  ;;  %v2115_v25 = vunpack.c.3.s8 %v659_v32  ;;  %5996 = vmatmul.bf16.vlgmr.msra.gmra.mxu0 %v4824_v13 }
 0x37e   : > { %6034 = vmatpush.bf16.msra.mxu3 %v4572_v10  ;;  %v3698_v11 = vcvt.s32.f32 %v2098_v51  ;;  %v3699_v12 = vcvt.s32.f32 %v2099_v7  ;;  %v2064_v54 = vunpack.c.0.s8 %v647_v23  ;;  %v2065_v27 = vunpack.c.1.s8 %v647_v23 }
 0x37f   : > { %6040 = vmatpush.bf16.msrb.mxu0 %v4587_v26  ;;  %v4595_v2 = vpack.c.bf16 %v3683_v45, %v3682_v37  ;;  %v3714_v18 = vcvt.s32.f32 %v2114_v58  ;;  %v3715_v8 = vcvt.s32.f32 %v2115_v25  ;;  %6009 = vmatmul.bf16.vlgmr.msra.gmra.mxu1 %v4825_v56  ;;  %v2080_v57 = vunpack.c.0.s8 %v7427_v15 }
 0x380   : > { %v4603_v59 = vpack.c.bf16 %v3699_v12, %v3698_v11  ;;  %6022 = vmatmul.bf16.vlgmr.msra.gmra.mxu2 %v4826_v33  ;;  %v3664_v49 = vcvt.s32.f32 %v2064_v54  ;;  %v3665_v24 = vcvt.s32.f32 %v2065_v27  ;;  %v2081_v28 = vunpack.c.1.s8 %v7427_v15  ;;  %v645_v27 = vld [vmem:[%s6675_s8 + $0xa88] sm:$0xff] }
 0x381   : > { %6053 = vmatpush.bf16.msrb.mxu1 %v4595_v2  ;;  %v4611_v1 = vpack.c.bf16 %v3715_v8, %v3714_v18  ;;  %6035 = vmatmul.bf16.vlgmr.msra.gmra.mxu3 %v4827_v16  ;;  %v3680_v53 = vcvt.s32.f32 %v2080_v57  ;;  %v2096_v35 = vunpack.c.0.s8 %v655_v43  ;;  %v2097_v36 = vunpack.c.1.s8 %v655_v43  ;;  %v649_v8 = vld [vmem:[%s6675_s8 + $0xaa8] sm:$0xff] }
 0x382   : > { %6066 = vmatpush.bf16.msrb.mxu2 %v4603_v59  ;;  %v4586_v46 = vpack.c.bf16 %v3665_v24, %v3664_v49  ;;  %v3681_v9 = vcvt.s32.f32 %v2081_v28  ;;  %v2112_v23 = vunpack.c.0.s8 %v659_v32  ;;  %v2113_v3 = vunpack.c.1.s8 %v659_v32  ;;  %v653_v28 = vld [vmem:[%s6675_s8 + $0xac8] sm:$0xff] }
 0x383   : > { %6079 = vmatpush.bf16.msrb.mxu3 %v4611_v1  ;;  %v3696_v21 = vcvt.s32.f32 %v2096_v35  ;;  %v3697_v29 = vcvt.s32.f32 %v2097_v36  ;;  %v2062_v31 = vunpack.c.2.s8 %v646_v14  ;;  %v2063_v15 = vunpack.c.3.s8 %v646_v14 }
 0x384   : > { %6041 = vmatpush.bf16.msrb.mxu0 %v4586_v46  ;;  %v4594_v47 = vpack.c.bf16 %v3681_v9, %v3680_v53  ;;  %v3712_v48 = vcvt.s32.f32 %v2112_v23  ;;  %v3713_v40 = vcvt.s32.f32 %v2113_v3  ;;  %v2078_v60 = vunpack.c.2.s8 %v650_v22  ;;  %v657_v53 = vld [vmem:[%s6675_s8 + $0xae8] sm:$0xff] }
 0x385   : > { %v4602_v39 = vpack.c.bf16 %v3697_v29, %v3696_v21  ;;  %v3662_v55 = vcvt.s32.f32 %v2062_v31  ;;  %v3663_v43 = vcvt.s32.f32 %v2063_v15  ;;  %v2079_v19 = vunpack.c.3.s8 %v650_v22 }
 0x386   : > { %6054 = vmatpush.bf16.msrb.mxu1 %v4594_v47  ;;  %v4610_v30 = vpack.c.bf16 %v3713_v40, %v3712_v48  ;;  %v3678_v34 = vcvt.s32.f32 %v2078_v60  ;;  %v2094_v44 = vunpack.c.2.s8 %v654_v5  ;;  %v2095_v32 = vunpack.c.3.s8 %v654_v5 }
 0x387   : > { %6067 = vmatpush.bf16.msrb.mxu2 %v4602_v39  ;;  %v4585_v13 = vpack.c.bf16 %v3663_v43, %v3662_v55  ;;  %v3679_v63 = vcvt.s32.f32 %v2079_v19  ;;  %v2110_v0 = vunpack.c.2.s8 %v658_v41  ;;  %v2111_v4 = vunpack.c.3.s8 %v658_v41 }
 0x388   : > { %6080 = vmatpush.bf16.msrb.mxu3 %v4610_v30  ;;  %v3694_v20 = vcvt.s32.f32 %v2094_v44  ;;  %v3695_v38 = vcvt.s32.f32 %v2095_v32  ;;  %v5790_v10 = vadd.f32 %v7419_v42, %v7415_v62  ;;  %v2060_v37 = vunpack.c.0.s8 %v646_v14 }
 0x389   : > { %6042 = vmatpush.bf16.msrb.mxu0 %v4585_v13  ;;  %v4593_v51 = vpack.c.bf16 %v3679_v63, %v3678_v34  ;;  %v3710_v7 = vcvt.s32.f32 %v2110_v0  ;;  %v3711_v56 = vcvt.s32.f32 %v2111_v4  ;;  %v2061_v26 = vunpack.c.1.s8 %v646_v14  ;;  %v644_v0 = vld [vmem:[%s6675_s8 + $0xa80] sm:$0xff] }
 0x38a   : > { %v4601_v45 = vpack.c.bf16 %v3695_v38, %v3694_v20  ;;  %v3660_v58 = vcvt.s32.f32 %v2060_v37  ;;  %v2076_v25 = vunpack.c.0.s8 %v650_v22  ;;  %v2077_v33 = vunpack.c.1.s8 %v650_v22  ;;  %v7456_v37 = vpop.f32.mrf.mxu0 }
 0x38b   : > { %6055 = vmatpush.bf16.msrb.mxu1 %v4593_v51  ;;  %v4609_v11 = vpack.c.bf16 %v3711_v56, %v3710_v7  ;;  %v3661_v12 = vcvt.s32.f32 %v2061_v26  ;;  %v2092_v16 = vunpack.c.0.s8 %v654_v5  ;;  %v2093_v54 = vunpack.c.1.s8 %v654_v5  ;;  %v652_v26 = vld [vmem:[%s6675_s8 + $0xac0] sm:$0xff] }
 0x38c   : > { %6068 = vmatpush.bf16.msrb.mxu2 %v4601_v45  ;;  %v3676_v62 = vcvt.s32.f32 %v2076_v25  ;;  %v3677_v42 = vcvt.s32.f32 %v2077_v33  ;;  %v2108_v2 = vunpack.c.0.s8 %v658_v41  ;;  %v2109_v18 = vunpack.c.1.s8 %v658_v41 }
 0x38d   : > { %6081 = vmatpush.bf16.msrb.mxu3 %v4609_v11  ;;  %v4584_v57 = vpack.c.bf16 %v3661_v12, %v3660_v58  ;;  %v3692_v59 = vcvt.s32.f32 %v2092_v16  ;;  %v3693_v49 = vcvt.s32.f32 %v2093_v54  ;;  %v5803_v24 = vadd.f32 %v7423_v17, %v5790_v10  ;;  %v648_v10 = vld [vmem:[%s6675_s8 + $0xaa0] sm:$0xff] }
 0x38e   : > { %v4592_v14 = vpack.c.bf16 %v3677_v42, %v3676_v62  ;;  %v3708_v50 = vcvt.s32.f32 %v2108_v2  ;;  %v3709_v6 = vcvt.s32.f32 %v2109_v18  ;;  %v2058_v1 = vunpack.c.2.s8 %v645_v27 }
 0x38f   : > { %6043 = vmatpush.bf16.msrb.mxu0 %v4584_v57  ;;  %v4600_v35 = vpack.c.bf16 %v3693_v49, %v3692_v59  ;;  %v2059_v36 = vunpack.c.3.s8 %v645_v27  ;;  %v2074_v22 = vunpack.c.2.s8 %v649_v8  ;;  %v2075_v46 = vunpack.c.3.s8 %v649_v8 }
 0x390   : > { %6056 = vmatpush.bf16.msrb.mxu1 %v4592_v14  ;;  %v4608_v9 = vpack.c.bf16 %v3709_v6, %v3708_v50  ;;  %v3658_v23 = vcvt.s32.f32 %v2058_v1  ;;  %v2090_v3 = vunpack.c.2.s8 %v653_v28  ;;  %v2091_v21 = vunpack.c.3.s8 %v653_v28 }
 0x391   : > { %6069 = vmatpush.bf16.msrb.mxu2 %v4600_v35  ;;  %v3659_v29 = vcvt.s32.f32 %v2059_v36  ;;  %v3674_v31 = vcvt.s32.f32 %v2074_v22  ;;  %v3675_v17 = vcvt.s32.f32 %v2075_v46  ;;  %v2106_v15 = vunpack.c.2.s8 %v657_v53 }
 0x392   : > { %6082 = vmatpush.bf16.msrb.mxu3 %v4608_v9  ;;  %v3690_v5 = vcvt.s32.f32 %v2090_v3  ;;  %v3691_v47 = vcvt.s32.f32 %v2091_v21  ;;  %v2107_v48 = vunpack.c.3.s8 %v657_v53  ;;  %v5816_v40 = vadd.f32 %v7429_v52, %v5803_v24  ;;  %v7460_v24 = vpop.f32.mrf.mxu1  ;;  %v5843_v3 = vpop.f32.mrf.mxu0 }
 0x393   : > { %v4583_v60 = vpack.c.bf16 %v3659_v29, %v3658_v23  ;;  %v4591_v41 = vpack.c.bf16 %v3675_v17, %v3674_v31  ;;  %v3706_v39 = vcvt.s32.f32 %v2106_v15  ;;  %v2056_v55 = vunpack.c.0.s8 %v645_v27  ;;  %v663_v15 = vld [vmem:[%s6675_s8 + $0xb18] sm:$0xff] }
 0x394   : > { %v4599_v43 = vpack.c.bf16 %v3691_v47, %v3690_v5  ;;  %v3707_v19 = vcvt.s32.f32 %v2107_v48  ;;  %v7452_v30 = vadd.f32 %v7431_v61, %v5816_v40  ;;  %v2057_v34 = vunpack.c.1.s8 %v645_v27  ;;  %v656_v27 = vld [vmem:[%s6675_s8 + $0xae0] sm:$0xff] }
 0x395   : > { %6044 = vmatpush.bf16.msrb.mxu0 %v4583_v60  ;;  %6057 = vmatpush.bf16.msrb.mxu1 %v4591_v41  ;;  %v3656_v44 = vcvt.s32.f32 %v2056_v55  ;;  %v2072_v32 = vunpack.c.0.s8 %v649_v8  ;;  %v2073_v13 = vunpack.c.1.s8 %v649_v8  ;;  %v2088_v63 = vunpack.c.0.s8 %v653_v28  ;;  %v7464_v60 = vld [vmem:[%s6675_s8 + $0xb38] sm:$0xff] }
 0x396   : > { %6070 = vmatpush.bf16.msrb.mxu2 %v4599_v43  ;;  %v4607_v52 = vpack.c.bf16 %v3707_v19, %v3706_v39  ;;  %v3657_v4 = vcvt.s32.f32 %v2057_v34  ;;  %v2089_v20 = vunpack.c.1.s8 %v653_v28  ;;  %v2104_v38 = vunpack.c.0.s8 %v657_v53  ;;  %v7466_v19 = vpop.f32.mrf.mxu2  ;;  %v7468_v34 = vpop.f32.mrf.mxu3 }
 0x397   : > { %v3672_v61 = vcvt.s32.f32 %v2072_v32  ;;  %v3673_v51 = vcvt.s32.f32 %v2073_v13  ;;  %v3688_v7 = vcvt.s32.f32 %v2088_v63  ;;  %v2105_v56 = vunpack.c.1.s8 %v657_v53 }
 0x398   : > { %6083 = vmatpush.bf16.msrb.mxu3 %v4607_v52  ;;  %v4582_v45 = vpack.c.bf16 %v3657_v4, %v3656_v44  ;;  %v3689_v58 = vcvt.s32.f32 %v2089_v20  ;;  %v3704_v25 = vcvt.s32.f32 %v2104_v38  ;;  %v2054_v33 = vunpack.c.2.s8 %v644_v0 }
 0x399   : > { %v4590_v11 = vpack.c.bf16 %v3673_v51, %v3672_v61  ;;  %v3705_v12 = vcvt.s32.f32 %v2105_v56  ;;  %v2055_v16 = vunpack.c.3.s8 %v644_v0  ;;  %v2070_v54 = vunpack.c.2.s8 %v648_v10  ;;  %v4828_v61 = vld [vmem:[#allocation1 + $0x24] sm:$0xff] }
 0x39a   : > { %6045 = vmatpush.bf16.msrb.mxu0 %v4582_v45  ;;  %v4598_v62 = vpack.c.bf16 %v3689_v58, %v3688_v7  ;;  %v3654_v42 = vcvt.s32.f32 %v2054_v33  ;;  %v2071_v2 = vunpack.c.3.s8 %v648_v10  ;;  %v2086_v18 = vunpack.c.2.s8 %v652_v26  ;;  %v5856_v51 = vpop.f32.mrf.mxu1 }
 0x39b   : > { %6058 = vmatpush.bf16.msrb.mxu1 %v4590_v11  ;;  %v4606_v8 = vpack.c.bf16 %v3705_v12, %v3704_v25  ;;  %v3655_v57 = vcvt.s32.f32 %v2055_v16  ;;  %v3670_v59 = vcvt.s32.f32 %v2070_v54  ;;  %v2087_v49 = vunpack.c.3.s8 %v652_v26  ;;  %v4829_v12 = vld [vmem:[#allocation1 + $0x2d] sm:$0xff] }
 0x39c   : > { %6071 = vmatpush.bf16.msrb.mxu2 %v4598_v62  ;;  %v3671_v28 = vcvt.s32.f32 %v2071_v2  ;;  %v3686_v14 = vcvt.s32.f32 %v2086_v18  ;;  %v2102_v50 = vunpack.c.2.s8 %v656_v27  ;;  %v2103_v6 = vunpack.c.3.s8 %v656_v27 }
 0x39d   : > { %6084 = vmatpush.bf16.msrb.mxu3 %v4606_v8  ;;  %v4581_v1 = vpack.c.bf16 %v3655_v57, %v3654_v42  ;;  %v3687_v53 = vcvt.s32.f32 %v2087_v49  ;;  %v2052_v35 = vunpack.c.0.s8 %v644_v0  ;;  %v2053_v36 = vunpack.c.1.s8 %v644_v0  ;;  %v671_v0 = vld [vmem:[%s6675_s8 + $0xb58] sm:$0xff]  ;;  %v4830_v42 = vld [vmem:[#allocation1 + $0x36] sm:$0xff] }
 0x39e   : > { %v4589_v22 = vpack.c.bf16 %v3671_v28, %v3670_v59  ;;  %v3702_v46 = vcvt.s32.f32 %v2102_v50  ;;  %v3703_v9 = vcvt.s32.f32 %v2103_v6  ;;  %v2068_v23 = vunpack.c.0.s8 %v648_v10  ;;  %v4831_v8 = vld [vmem:[#allocation1 + $0x3f] sm:$0xff] }
 0x39f   : > { %6046 = vmatpush.bf16.msrb.mxu0 %v4581_v1  ;;  %v4597_v21 = vpack.c.bf16 %v3687_v53, %v3686_v14  ;;  %v3652_v29 = vcvt.s32.f32 %v2052_v35  ;;  %v3653_v31 = vcvt.s32.f32 %v2053_v36  ;;  %v2069_v17 = vunpack.c.1.s8 %v648_v10  ;;  %v675_v10 = vld [vmem:[%s6675_s8 + $0xb78] sm:$0xff]  ;;  %v662_v36 = vld [vmem:[%s6675_s8 + $0xb10] sm:$0xff] }
 0x3a0   : > { %6059 = vmatpush.bf16.msrb.mxu1 %v4589_v22  ;;  %v4605_v5 = vpack.c.bf16 %v3703_v9, %v3702_v46  ;;  %v3668_v47 = vcvt.s32.f32 %v2068_v23  ;;  %v2084_v48 = vunpack.c.0.s8 %v652_v26  ;;  %v2085_v40 = vunpack.c.1.s8 %v652_v26  ;;  %v5869_v22 = vpop.f32.mrf.mxu2  ;;  %v5882_v46 = vpop.f32.mrf.mxu3 }
 0x3a1   : > { %6072 = vmatpush.bf16.msrb.mxu2 %v4597_v21  ;;  %v4580_v41 = vpack.c.bf16 %v3653_v31, %v3652_v29  ;;  %v3669_v39 = vcvt.s32.f32 %v2069_v17  ;;  %v2100_v55 = vunpack.c.0.s8 %v656_v27  ;;  %v2101_v43 = vunpack.c.1.s8 %v656_v27  ;;  %v666_v29 = vld [vmem:[%s6675_s8 + $0xb30] sm:$0xff] }
 0x3a2   : > { %6085 = vmatpush.bf16.msrb.mxu3 %v4605_v5  ;;  %v3684_v44 = vcvt.s32.f32 %v2084_v48  ;;  %v3685_v32 = vcvt.s32.f32 %v2085_v40  ;;  %v2130_v13 = vunpack.c.2.s8 %v663_v15  ;;  %v2131_v63 = vunpack.c.3.s8 %v663_v15 }
 0x3a3   : > { %6047 = vmatpush.bf16.msrb.mxu0 %v4580_v41  ;;  %v4588_v52 = vpack.c.bf16 %v3669_v39, %v3668_v47  ;;  %v3700_v4 = vcvt.s32.f32 %v2100_v55  ;;  %v3701_v20 = vcvt.s32.f32 %v2101_v43  ;;  %v2146_v38 = vunpack.c.2.s8 %v7464_v60  ;;  %v670_v41 = vld [vmem:[%s6675_s8 + $0xb50] sm:$0xff] }
 0x3a4   : > { %v4596_v7 = vpack.c.bf16 %v3685_v32, %v3684_v44  ;;  %v3730_v56 = vcvt.s32.f32 %v2130_v13  ;;  %v3731_v26 = vcvt.s32.f32 %v2131_v63  ;;  %v2147_v45 = vunpack.c.3.s8 %v7464_v60  ;;  %v674_v32 = vld [vmem:[%s6675_s8 + $0xb70] sm:$0xff] }
 0x3a5   : > { %6060 = vmatpush.bf16.msrb.mxu1 %v4588_v52  ;;  %v4604_v58 = vpack.c.bf16 %v3701_v20, %v3700_v4  ;;  %v3746_v25 = vcvt.s32.f32 %v2146_v38  ;;  %v2162_v33 = vunpack.c.2.s8 %v671_v0  ;;  %v2163_v11 = vunpack.c.3.s8 %v671_v0  ;;  %v4720_v4 = vld [vmem:[%s7631_s0 + $0x58] sm:$0xff] }
 0x3a6   : > { %6073 = vmatpush.bf16.msrb.mxu2 %v4596_v7  ;;  %v4619_v16 = vpack.c.bf16 %v3731_v26, %v3730_v56  ;;  %v3747_v54 = vcvt.s32.f32 %v2147_v45  ;;  %v2178_v27 = vunpack.c.2.s8 %v675_v10  ;;  %v2179_v62 = vunpack.c.3.s8 %v675_v10  ;;  %6048 = vmatmul.bf16.vlgmr.msrb.gmra.mxu0 %v4828_v61  ;;  %4833 = vst [vmem:[#allocation1] ss:$9 sm:$0xff] %v4720_v4 }
 0x3a7   : > { %6086 = vmatpush.bf16.msrb.mxu3 %v4604_v58  ;;  %v3762_v2 = vcvt.s32.f32 %v2162_v33  ;;  %v3763_v18 = vcvt.s32.f32 %v2163_v11  ;;  %v2128_v57 = vunpack.c.0.s8 %v663_v15  ;;  %v2129_v59 = vunpack.c.1.s8 %v663_v15 }
 0x3a8   : > { %6092 = vmatpush.bf16.msra.mxu0 %v4619_v16  ;;  %v4627_v49 = vpack.c.bf16 %v3747_v54, %v3746_v25  ;;  %v3778_v28 = vcvt.s32.f32 %v2178_v27  ;;  %v3779_v14 = vcvt.s32.f32 %v2179_v62  ;;  %6061 = vmatmul.bf16.vlgmr.msrb.gmra.mxu1 %v4829_v12  ;;  %v2144_v50 = vunpack.c.0.s8 %v7464_v60 }
 0x3a9   : > { %v4635_v6 = vpack.c.bf16 %v3763_v18, %v3762_v2  ;;  %6074 = vmatmul.bf16.vlgmr.msrb.gmra.mxu2 %v4830_v42  ;;  %v3728_v1 = vcvt.s32.f32 %v2128_v57  ;;  %v3729_v53 = vcvt.s32.f32 %v2129_v59  ;;  %v2145_v35 = vunpack.c.1.s8 %v7464_v60 }
 0x3aa   : > { %6105 = vmatpush.bf16.msra.mxu1 %v4627_v49  ;;  %v4643_v9 = vpack.c.bf16 %v3779_v14, %v3778_v28  ;;  %6087 = vmatmul.bf16.vlgmr.msrb.gmra.mxu3 %v4831_v8  ;;  %v3744_v23 = vcvt.s32.f32 %v2144_v50  ;;  %v2160_v3 = vunpack.c.0.s8 %v671_v0  ;;  %v2161_v21 = vunpack.c.1.s8 %v671_v0  ;;  %v661_v49 = vld [vmem:[%s6675_s8 + $0xb08] sm:$0xff] }
 0x3ab   : > { %6118 = vmatpush.bf16.msra.mxu2 %v4635_v6  ;;  %v4618_v31 = vpack.c.bf16 %v3729_v53, %v3728_v1  ;;  %v3745_v17 = vcvt.s32.f32 %v2145_v35  ;;  %v2176_v15 = vunpack.c.0.s8 %v675_v10  ;;  %v2177_v5 = vunpack.c.1.s8 %v675_v10  ;;  %v665_v50 = vld [vmem:[%s6675_s8 + $0xb28] sm:$0xff] }
 0x3ac   : > { %6131 = vmatpush.bf16.msra.mxu3 %v4643_v9  ;;  %v3760_v47 = vcvt.s32.f32 %v2160_v3  ;;  %v3761_v48 = vcvt.s32.f32 %v2161_v21  ;;  %v2126_v40 = vunpack.c.2.s8 %v662_v36  ;;  %v2127_v60 = vunpack.c.3.s8 %v662_v36  ;;  %v673_v3 = vld [vmem:[%s6675_s8 + $0xb68] sm:$0xff] }
 0x3ad   : > { %6093 = vmatpush.bf16.msra.mxu0 %v4618_v31  ;;  %v4626_v39 = vpack.c.bf16 %v3745_v17, %v3744_v23  ;;  %v3776_v55 = vcvt.s32.f32 %v2176_v15  ;;  %v3777_v43 = vcvt.s32.f32 %v2177_v5  ;;  %v2142_v44 = vunpack.c.2.s8 %v666_v29 }
 0x3ae   : > { %v4634_v13 = vpack.c.bf16 %v3761_v48, %v3760_v47  ;;  %v3726_v63 = vcvt.s32.f32 %v2126_v40  ;;  %v3727_v0 = vcvt.s32.f32 %v2127_v60  ;;  %v2143_v52 = vunpack.c.3.s8 %v666_v29 }
 0x3af   : > { %6106 = vmatpush.bf16.msra.mxu1 %v4626_v39  ;;  %v4642_v20 = vpack.c.bf16 %v3777_v43, %v3776_v55  ;;  %v3742_v38 = vcvt.s32.f32 %v2142_v44  ;;  %v2158_v10 = vunpack.c.2.s8 %v670_v41  ;;  %v2159_v61 = vunpack.c.3.s8 %v670_v41 }
 0x3b0   : > { %6119 = vmatpush.bf16.msra.mxu2 %v4634_v13  ;;  %v4617_v51 = vpack.c.bf16 %v3727_v0, %v3726_v63  ;;  %v3743_v7 = vcvt.s32.f32 %v2143_v52  ;;  %v2174_v56 = vunpack.c.2.s8 %v674_v32  ;;  %v2175_v26 = vunpack.c.3.s8 %v674_v32 }
 0x3b1   : > { %6132 = vmatpush.bf16.msra.mxu3 %v4642_v20  ;;  %v3758_v45 = vcvt.s32.f32 %v2158_v10  ;;  %v3759_v58 = vcvt.s32.f32 %v2159_v61  ;;  %v5842_v25 = vadd.f32 %v7456_v37, %v7452_v30  ;;  %v2124_v33 = vunpack.c.0.s8 %v662_v36 }
 0x3b2   : > { %6094 = vmatpush.bf16.msra.mxu0 %v4617_v51  ;;  %v4625_v11 = vpack.c.bf16 %v3743_v7, %v3742_v38  ;;  %v3774_v12 = vcvt.s32.f32 %v2174_v56  ;;  %v3775_v16 = vcvt.s32.f32 %v2175_v26  ;;  %v2125_v54 = vunpack.c.1.s8 %v662_v36  ;;  %v669_v36 = vld [vmem:[%s6675_s8 + $0xb48] sm:$0xff]  ;;  %v660_v56 = vld [vmem:[%s6675_s8 + $0xb00] sm:$0xff] }
 0x3b3   : > { %v4633_v27 = vpack.c.bf16 %v3759_v58, %v3758_v45  ;;  %v3724_v62 = vcvt.s32.f32 %v2124_v33  ;;  %v2140_v42 = vunpack.c.0.s8 %v666_v29  ;;  %v2141_v2 = vunpack.c.1.s8 %v666_v29  ;;  %v7496_v33 = vpop.f32.mrf.mxu0 }
 0x3b4   : > { %6107 = vmatpush.bf16.msra.mxu1 %v4625_v11  ;;  %v4641_v18 = vpack.c.bf16 %v3775_v16, %v3774_v12  ;;  %v3725_v8 = vcvt.s32.f32 %v2125_v54  ;;  %v2156_v57 = vunpack.c.0.s8 %v670_v41  ;;  %v2157_v59 = vunpack.c.1.s8 %v670_v41  ;;  %v668_v54 = vld [vmem:[%s6675_s8 + $0xb40] sm:$0xff] }
 0x3b5   : > { %6120 = vmatpush.bf16.msra.mxu2 %v4633_v27  ;;  %v3740_v30 = vcvt.s32.f32 %v2140_v42  ;;  %v3741_v37 = vcvt.s32.f32 %v2141_v2  ;;  %v2172_v28 = vunpack.c.0.s8 %v674_v32  ;;  %v2173_v14 = vunpack.c.1.s8 %v674_v32 }
 0x3b6   : > { %6133 = vmatpush.bf16.msra.mxu3 %v4641_v18  ;;  %v4616_v6 = vpack.c.bf16 %v3725_v8, %v3724_v62  ;;  %v3756_v1 = vcvt.s32.f32 %v2156_v57  ;;  %v3757_v53 = vcvt.s32.f32 %v2157_v59  ;;  %v5855_v35 = vadd.f32 %v7460_v24, %v5842_v25  ;;  %v664_v25 = vld [vmem:[%s6675_s8 + $0xb20] sm:$0xff] }
 0x3b7   : > { %v4624_v22 = vpack.c.bf16 %v3741_v37, %v3740_v30  ;;  %v3772_v46 = vcvt.s32.f32 %v2172_v28  ;;  %v3773_v9 = vcvt.s32.f32 %v2173_v14  ;;  %v2122_v23 = vunpack.c.2.s8 %v661_v49 }
 0x3b8   : > { %6095 = vmatpush.bf16.msra.mxu0 %v4616_v6  ;;  %v4632_v21 = vpack.c.bf16 %v3757_v53, %v3756_v1  ;;  %v2123_v29 = vunpack.c.3.s8 %v661_v49  ;;  %v2138_v31 = vunpack.c.2.s8 %v665_v50  ;;  %v2139_v17 = vunpack.c.3.s8 %v665_v50 }
 0x3b9   : > { %6108 = vmatpush.bf16.msra.mxu1 %v4624_v22  ;;  %v4640_v15 = vpack.c.bf16 %v3773_v9, %v3772_v46  ;;  %v3722_v5 = vcvt.s32.f32 %v2122_v23  ;;  %v2154_v47 = vunpack.c.2.s8 %v669_v36  ;;  %v2155_v48 = vunpack.c.3.s8 %v669_v36 }
 0x3ba   : > { %6121 = vmatpush.bf16.msra.mxu2 %v4632_v21  ;;  %v3723_v40 = vcvt.s32.f32 %v2123_v29  ;;  %v3738_v60 = vcvt.s32.f32 %v2138_v31  ;;  %v3739_v24 = vcvt.s32.f32 %v2139_v17  ;;  %v2170_v41 = vunpack.c.2.s8 %v673_v3 }
 0x3bb   : > { %6134 = vmatpush.bf16.msra.mxu3 %v4640_v15  ;;  %v3754_v39 = vcvt.s32.f32 %v2154_v47  ;;  %v3755_v55 = vcvt.s32.f32 %v2155_v48  ;;  %v2171_v43 = vunpack.c.3.s8 %v673_v3  ;;  %v5868_v44 = vadd.f32 %v7466_v19, %v5855_v35  ;;  %v7500_v35 = vpop.f32.mrf.mxu1  ;;  %v5895_v47 = vpop.f32.mrf.mxu0 }
 0x3bc   : > { %v4615_v32 = vpack.c.bf16 %v3723_v40, %v3722_v5  ;;  %v4623_v13 = vpack.c.bf16 %v3739_v24, %v3738_v60  ;;  %v3770_v63 = vcvt.s32.f32 %v2170_v41  ;;  %v2120_v0 = vunpack.c.0.s8 %v661_v49  ;;  %v679_v41 = vld [vmem:[%s6675_s8 + $0xb98] sm:$0xff] }
 0x3bd   : > { %v4631_v52 = vpack.c.bf16 %v3755_v55, %v3754_v39  ;;  %v3771_v4 = vcvt.s32.f32 %v2171_v43  ;;  %v7492_v20 = vadd.f32 %v7468_v34, %v5868_v44  ;;  %v2121_v38 = vunpack.c.1.s8 %v661_v49  ;;  %v672_v49 = vld [vmem:[%s6675_s8 + $0xb60] sm:$0xff] }
 0x3be   : > { %6096 = vmatpush.bf16.msra.mxu0 %v4615_v32  ;;  %6109 = vmatpush.bf16.msra.mxu1 %v4623_v13  ;;  %v3720_v10 = vcvt.s32.f32 %v2120_v0  ;;  %v2136_v61 = vunpack.c.0.s8 %v665_v50  ;;  %v2137_v51 = vunpack.c.1.s8 %v665_v50  ;;  %v2152_v7 = vunpack.c.0.s8 %v669_v36  ;;  %v7504_v32 = vld [vmem:[%s6675_s8 + $0xbb8] sm:$0xff] }
 0x3bf   : > { %6122 = vmatpush.bf16.msra.mxu2 %v4631_v52  ;;  %v4639_v19 = vpack.c.bf16 %v3771_v4, %v3770_v63  ;;  %v3721_v26 = vcvt.s32.f32 %v2121_v38  ;;  %v2153_v45 = vunpack.c.1.s8 %v669_v36  ;;  %v2168_v58 = vunpack.c.0.s8 %v673_v3  ;;  %v7506_v4 = vpop.f32.mrf.mxu2  ;;  %v7508_v38 = vpop.f32.mrf.mxu3 }
 0x3c0   : > { %v3736_v34 = vcvt.s32.f32 %v2136_v61  ;;  %v3737_v11 = vcvt.s32.f32 %v2137_v51  ;;  %v3752_v12 = vcvt.s32.f32 %v2152_v7  ;;  %v2169_v16 = vunpack.c.1.s8 %v673_v3 }
 0x3c1   : > { %6135 = vmatpush.bf16.msra.mxu3 %v4639_v19  ;;  %v4614_v27 = vpack.c.bf16 %v3721_v26, %v3720_v10  ;;  %v3753_v62 = vcvt.s32.f32 %v2153_v45  ;;  %v3768_v42 = vcvt.s32.f32 %v2168_v58  ;;  %v2118_v2 = vunpack.c.2.s8 %v660_v56 }
 0x3c2   : > { %v4622_v18 = vpack.c.bf16 %v3737_v11, %v3736_v34  ;;  %v3769_v8 = vcvt.s32.f32 %v2169_v16  ;;  %v2119_v57 = vunpack.c.3.s8 %v660_v56  ;;  %v2134_v59 = vunpack.c.2.s8 %v664_v25  ;;  %v4834_v34 = vld [vmem:[#allocation1] sm:$0xff] }
 0x3c3   : > { %6097 = vmatpush.bf16.msra.mxu0 %v4614_v27  ;;  %v4630_v30 = vpack.c.bf16 %v3753_v62, %v3752_v12  ;;  %v3718_v37 = vcvt.s32.f32 %v2118_v2  ;;  %v2135_v28 = vunpack.c.3.s8 %v664_v25  ;;  %v2150_v14 = vunpack.c.2.s8 %v668_v54  ;;  %v5908_v11 = vpop.f32.mrf.mxu1 }
 0x3c4   : > { %6110 = vmatpush.bf16.msra.mxu1 %v4622_v18  ;;  %v4638_v50 = vpack.c.bf16 %v3769_v8, %v3768_v42  ;;  %v3719_v6 = vcvt.s32.f32 %v2119_v57  ;;  %v3734_v1 = vcvt.s32.f32 %v2134_v59  ;;  %v2151_v53 = vunpack.c.3.s8 %v668_v54  ;;  %v4835_v8 = vld [vmem:[#allocation1 + $0x9] sm:$0xff] }
 0x3c5   : > { %6123 = vmatpush.bf16.msra.mxu2 %v4630_v30  ;;  %v3735_v36 = vcvt.s32.f32 %v2135_v28  ;;  %v3750_v22 = vcvt.s32.f32 %v2150_v14  ;;  %v2166_v46 = vunpack.c.2.s8 %v672_v49  ;;  %v2167_v9 = vunpack.c.3.s8 %v672_v49 }
 0x3c6   : > { %6136 = vmatpush.bf16.msra.mxu3 %v4638_v50  ;;  %v4613_v23 = vpack.c.bf16 %v3719_v6, %v3718_v37  ;;  %v3751_v3 = vcvt.s32.f32 %v2151_v53  ;;  %v2116_v21 = vunpack.c.0.s8 %v660_v56  ;;  %v2117_v29 = vunpack.c.1.s8 %v660_v56  ;;  %v687_v56 = vld [vmem:[%s6675_s8 + $0xbd8] sm:$0xff]  ;;  %v4836_v37 = vld [vmem:[#allocation1 + $0x12] sm:$0xff] }
 0x3c7   : > { %v4621_v31 = vpack.c.bf16 %v3735_v36, %v3734_v1  ;;  %v3766_v17 = vcvt.s32.f32 %v2166_v46  ;;  %v3767_v15 = vcvt.s32.f32 %v2167_v9  ;;  %v2132_v5 = vunpack.c.0.s8 %v664_v25  ;;  %v4837_v50 = vld [vmem:[#allocation1 + $0x1b] sm:$0xff] }
 0x3c8   : > { %6098 = vmatpush.bf16.msra.mxu0 %v4613_v23  ;;  %v4629_v48 = vpack.c.bf16 %v3751_v3, %v3750_v22  ;;  %v3716_v40 = vcvt.s32.f32 %v2116_v21  ;;  %v3717_v60 = vcvt.s32.f32 %v2117_v29  ;;  %v2133_v24 = vunpack.c.1.s8 %v664_v25  ;;  %v691_v25 = vld [vmem:[%s6675_s8 + $0xbf8] sm:$0xff]  ;;  %v678_v29 = vld [vmem:[%s6675_s8 + $0xb90] sm:$0xff] }
 0x3c9   : > { %6111 = vmatpush.bf16.msra.mxu1 %v4621_v31  ;;  %v4637_v39 = vpack.c.bf16 %v3767_v15, %v3766_v17  ;;  %v3732_v55 = vcvt.s32.f32 %v2132_v5  ;;  %v2148_v43 = vunpack.c.0.s8 %v668_v54  ;;  %v2149_v44 = vunpack.c.1.s8 %v668_v54  ;;  %v5921_v31 = vpop.f32.mrf.mxu2  ;;  %v5934_v17 = vpop.f32.mrf.mxu3 }
 0x3ca   : > { %6124 = vmatpush.bf16.msra.mxu2 %v4629_v48  ;;  %v4612_v13 = vpack.c.bf16 %v3717_v60, %v3716_v40  ;;  %v3733_v63 = vcvt.s32.f32 %v2133_v24  ;;  %v2164_v0 = vunpack.c.0.s8 %v672_v49  ;;  %v2165_v52 = vunpack.c.1.s8 %v672_v49  ;;  %v682_v40 = vld [vmem:[%s6675_s8 + $0xbb0] sm:$0xff] }
 0x3cb   : > { %6137 = vmatpush.bf16.msra.mxu3 %v4637_v39  ;;  %v3748_v10 = vcvt.s32.f32 %v2148_v43  ;;  %v3749_v61 = vcvt.s32.f32 %v2149_v44  ;;  %v2194_v51 = vunpack.c.2.s8 %v679_v41  ;;  %v2195_v7 = vunpack.c.3.s8 %v679_v41 }
 0x3cc   : > { %6099 = vmatpush.bf16.msra.mxu0 %v4612_v13  ;;  %v4620_v19 = vpack.c.bf16 %v3733_v63, %v3732_v55  ;;  %v3764_v26 = vcvt.s32.f32 %v2164_v0  ;;  %v3765_v45 = vcvt.s32.f32 %v2165_v52  ;;  %v2210_v58 = vunpack.c.2.s8 %v7504_v32  ;;  %v686_v13 = vld [vmem:[%s6675_s8 + $0xbd0] sm:$0xff] }
 0x3cd   : > { %v4628_v12 = vpack.c.bf16 %v3749_v61, %v3748_v10  ;;  %v3794_v16 = vcvt.s32.f32 %v2194_v51  ;;  %v3795_v54 = vcvt.s32.f32 %v2195_v7  ;;  %v2211_v27 = vunpack.c.3.s8 %v7504_v32  ;;  %v690_v61 = vld [vmem:[%s6675_s8 + $0xbf0] sm:$0xff] }
 0x3ce   : > { %6112 = vmatpush.bf16.msra.mxu1 %v4620_v19  ;;  %v4636_v62 = vpack.c.bf16 %v3765_v45, %v3764_v26  ;;  %v3810_v42 = vcvt.s32.f32 %v2210_v58  ;;  %v2226_v2 = vunpack.c.2.s8 %v687_v56  ;;  %v2227_v18 = vunpack.c.3.s8 %v687_v56 }
 0x3cf   : > { %6125 = vmatpush.bf16.msra.mxu2 %v4628_v12  ;;  %v4651_v57 = vpack.c.bf16 %v3795_v54, %v3794_v16  ;;  %v3811_v59 = vcvt.s32.f32 %v2211_v27  ;;  %v2242_v49 = vunpack.c.2.s8 %v691_v25  ;;  %v2243_v30 = vunpack.c.3.s8 %v691_v25  ;;  %6100 = vmatmul.bf16.vlgmr.msra.gmra.mxu0 %v4834_v34 }
 0x3d0   : > { %6138 = vmatpush.bf16.msra.mxu3 %v4636_v62  ;;  %v3826_v28 = vcvt.s32.f32 %v2226_v2  ;;  %v3827_v14 = vcvt.s32.f32 %v2227_v18  ;;  %v2192_v6 = vunpack.c.0.s8 %v679_v41  ;;  %v2193_v1 = vunpack.c.1.s8 %v679_v41 }
 0x3d1   : > { %6144 = vmatpush.bf16.msrb.mxu0 %v4651_v57  ;;  %v4659_v53 = vpack.c.bf16 %v3811_v59, %v3810_v42  ;;  %v3842_v36 = vcvt.s32.f32 %v2242_v49  ;;  %v3843_v22 = vcvt.s32.f32 %v2243_v30  ;;  %6113 = vmatmul.bf16.vlgmr.msra.gmra.mxu1 %v4835_v8  ;;  %v2208_v46 = vunpack.c.0.s8 %v7504_v32 }
 0x3d2   : > { %v4667_v9 = vpack.c.bf16 %v3827_v14, %v3826_v28  ;;  %6126 = vmatmul.bf16.vlgmr.msra.gmra.mxu2 %v4836_v37  ;;  %v3792_v23 = vcvt.s32.f32 %v2192_v6  ;;  %v3793_v3 = vcvt.s32.f32 %v2193_v1  ;;  %v2209_v21 = vunpack.c.1.s8 %v7504_v32  ;;  %v677_v1 = vld [vmem:[%s6675_s8 + $0xb88] sm:$0xff] }
 0x3d3   : > { %6157 = vmatpush.bf16.msrb.mxu1 %v4659_v53  ;;  %v4675_v15 = vpack.c.bf16 %v3843_v22, %v3842_v36  ;;  %6139 = vmatmul.bf16.vlgmr.msra.gmra.mxu3 %v4837_v50  ;;  %v3808_v5 = vcvt.s32.f32 %v2208_v46  ;;  %v2224_v47 = vunpack.c.0.s8 %v687_v56  ;;  %v2225_v48 = vunpack.c.1.s8 %v687_v56  ;;  %v681_v22 = vld [vmem:[%s6675_s8 + $0xba8] sm:$0xff] }
 0x3d4   : > { %6170 = vmatpush.bf16.msrb.mxu2 %v4667_v9  ;;  %v4650_v60 = vpack.c.bf16 %v3793_v3, %v3792_v23  ;;  %v3809_v24 = vcvt.s32.f32 %v2209_v21  ;;  %v2240_v41 = vunpack.c.0.s8 %v691_v25  ;;  %v2241_v39 = vunpack.c.1.s8 %v691_v25  ;;  %v685_v21 = vld [vmem:[%s6675_s8 + $0xbc8] sm:$0xff] }
 0x3d5   : > { %6183 = vmatpush.bf16.msrb.mxu3 %v4675_v15  ;;  %v3824_v55 = vcvt.s32.f32 %v2224_v47  ;;  %v3825_v43 = vcvt.s32.f32 %v2225_v48  ;;  %v2190_v44 = vunpack.c.2.s8 %v678_v29  ;;  %v2191_v32 = vunpack.c.3.s8 %v678_v29 }
 0x3d6   : > { %6145 = vmatpush.bf16.msrb.mxu0 %v4650_v60  ;;  %v4658_v63 = vpack.c.bf16 %v3809_v24, %v3808_v5  ;;  %v3840_v0 = vcvt.s32.f32 %v2240_v41  ;;  %v3841_v52 = vcvt.s32.f32 %v2241_v39  ;;  %v2206_v10 = vunpack.c.2.s8 %v682_v40  ;;  %v689_v5 = vld [vmem:[%s6675_s8 + $0xbe8] sm:$0xff] }
 0x3d7   : > { %v4666_v51 = vpack.c.bf16 %v3825_v43, %v3824_v55  ;;  %v3790_v7 = vcvt.s32.f32 %v2190_v44  ;;  %v3791_v56 = vcvt.s32.f32 %v2191_v32  ;;  %v2207_v19 = vunpack.c.3.s8 %v682_v40 }
 0x3d8   : > { %6158 = vmatpush.bf16.msrb.mxu1 %v4658_v63  ;;  %v4674_v26 = vpack.c.bf16 %v3841_v52, %v3840_v0  ;;  %v3806_v45 = vcvt.s32.f32 %v2206_v10  ;;  %v2222_v58 = vunpack.c.2.s8 %v686_v13  ;;  %v2223_v25 = vunpack.c.3.s8 %v686_v13 }
 0x3d9   : > { %6171 = vmatpush.bf16.msrb.mxu2 %v4666_v51  ;;  %v4649_v34 = vpack.c.bf16 %v3791_v56, %v3790_v7  ;;  %v3807_v11 = vcvt.s32.f32 %v2207_v19  ;;  %v2238_v12 = vunpack.c.2.s8 %v690_v61  ;;  %v2239_v16 = vunpack.c.3.s8 %v690_v61 }
 0x3da   : > { %6184 = vmatpush.bf16.msrb.mxu3 %v4674_v26  ;;  %v3822_v54 = vcvt.s32.f32 %v2222_v58  ;;  %v3823_v27 = vcvt.s32.f32 %v2223_v25  ;;  %v5894_v62 = vadd.f32 %v7496_v33, %v7492_v20  ;;  %v2188_v42 = vunpack.c.0.s8 %v678_v29 }
 0x3db   : > { %6146 = vmatpush.bf16.msrb.mxu0 %v4649_v34  ;;  %v4657_v2 = vpack.c.bf16 %v3807_v11, %v3806_v45  ;;  %v3838_v18 = vcvt.s32.f32 %v2238_v12  ;;  %v3839_v8 = vcvt.s32.f32 %v2239_v16  ;;  %v2189_v57 = vunpack.c.1.s8 %v678_v29  ;;  %v676_v12 = vld [vmem:[%s6675_s8 + $0xb80] sm:$0xff] }
 0x3dc   : > { %v4665_v59 = vpack.c.bf16 %v3823_v27, %v3822_v54  ;;  %v3788_v49 = vcvt.s32.f32 %v2188_v42  ;;  %v2204_v30 = vunpack.c.0.s8 %v682_v40  ;;  %v2205_v37 = vunpack.c.1.s8 %v682_v40  ;;  %v7533_v42 = vpop.f32.mrf.mxu0 }
 0x3dd   : > { %6159 = vmatpush.bf16.msrb.mxu1 %v4657_v2  ;;  %v4673_v28 = vpack.c.bf16 %v3839_v8, %v3838_v18  ;;  %v3789_v14 = vcvt.s32.f32 %v2189_v57  ;;  %v2220_v50 = vunpack.c.0.s8 %v686_v13  ;;  %v2221_v6 = vunpack.c.1.s8 %v686_v13  ;;  %v684_v57 = vld [vmem:[%s6675_s8 + $0xbc0] sm:$0xff] }
 0x3de   : > { %6172 = vmatpush.bf16.msrb.mxu2 %v4665_v59  ;;  %v3804_v20 = vcvt.s32.f32 %v2204_v30  ;;  %v3805_v33 = vcvt.s32.f32 %v2205_v37  ;;  %v2236_v53 = vunpack.c.0.s8 %v690_v61  ;;  %v2237_v36 = vunpack.c.1.s8 %v690_v61 }
 0x3df   : > { %6185 = vmatpush.bf16.msrb.mxu3 %v4673_v28  ;;  %v4648_v46 = vpack.c.bf16 %v3789_v14, %v3788_v49  ;;  %v3820_v9 = vcvt.s32.f32 %v2220_v50  ;;  %v3821_v23 = vcvt.s32.f32 %v2221_v6  ;;  %v5907_v3 = vadd.f32 %v7500_v35, %v5894_v62  ;;  %v680_v62 = vld [vmem:[%s6675_s8 + $0xba0] sm:$0xff] }
 0x3e0   : > { %v4656_v29 = vpack.c.bf16 %v3805_v33, %v3804_v20  ;;  %v3836_v31 = vcvt.s32.f32 %v2236_v53  ;;  %v3837_v17 = vcvt.s32.f32 %v2237_v36  ;;  %v2186_v15 = vunpack.c.2.s8 %v677_v1 }
 0x3e1   : > { %6147 = vmatpush.bf16.msrb.mxu0 %v4648_v46  ;;  %v4664_v47 = vpack.c.bf16 %v3821_v23, %v3820_v9  ;;  %v2187_v48 = vunpack.c.3.s8 %v677_v1  ;;  %v2202_v40 = vunpack.c.2.s8 %v681_v22  ;;  %v2203_v60 = vunpack.c.3.s8 %v681_v22 }
 0x3e2   : > { %6160 = vmatpush.bf16.msrb.mxu1 %v4656_v29  ;;  %v4672_v24 = vpack.c.bf16 %v3837_v17, %v3836_v31  ;;  %v3786_v41 = vcvt.s32.f32 %v2186_v15  ;;  %v2218_v39 = vunpack.c.2.s8 %v685_v21  ;;  %v2219_v55 = vunpack.c.3.s8 %v685_v21 }
 0x3e3   : > { %6173 = vmatpush.bf16.msrb.mxu2 %v4664_v47  ;;  %v3787_v43 = vcvt.s32.f32 %v2187_v48  ;;  %v3802_v44 = vcvt.s32.f32 %v2202_v40  ;;  %v3803_v35 = vcvt.s32.f32 %v2203_v60  ;;  %v2234_v32 = vunpack.c.2.s8 %v689_v5 }
 0x3e4   : > { %6186 = vmatpush.bf16.msrb.mxu3 %v4672_v24  ;;  %v3818_v13 = vcvt.s32.f32 %v2218_v39  ;;  %v3819_v63 = vcvt.s32.f32 %v2219_v55  ;;  %v2235_v0 = vunpack.c.3.s8 %v689_v5  ;;  %v5920_v52 = vadd.f32 %v7506_v4, %v5907_v3  ;;  %v7537_v3 = vpop.f32.mrf.mxu1  ;;  %v5947_v39 = vpop.f32.mrf.mxu0 }
 0x3e5   : > { %v4647_v10 = vpack.c.bf16 %v3787_v43, %v3786_v41  ;;  %v4655_v61 = vpack.c.bf16 %v3803_v35, %v3802_v44  ;;  %v3834_v51 = vcvt.s32.f32 %v2234_v32  ;;  %v2184_v7 = vunpack.c.0.s8 %v677_v1  ;;  %v695_v32 = vld [vmem:[%s6675_s8 + $0xc18] sm:$0xff] }
 0x3e6   : > { %v4663_v56 = vpack.c.bf16 %v3819_v63, %v3818_v13  ;;  %v3835_v19 = vcvt.s32.f32 %v2235_v0  ;;  %v7529_v26 = vadd.f32 %v7508_v38, %v5920_v52  ;;  %v2185_v45 = vunpack.c.1.s8 %v677_v1  ;;  %v688_v1 = vld [vmem:[%s6675_s8 + $0xbe0] sm:$0xff] }
 0x3e7   : > { %6148 = vmatpush.bf16.msrb.mxu0 %v4647_v10  ;;  %6161 = vmatpush.bf16.msrb.mxu1 %v4655_v61  ;;  %v3784_v58 = vcvt.s32.f32 %v2184_v7  ;;  %v2200_v25 = vunpack.c.0.s8 %v681_v22  ;;  %v2201_v34 = vunpack.c.1.s8 %v681_v22  ;;  %v2216_v11 = vunpack.c.0.s8 %v685_v21  ;;  %v7541_v10 = vld [vmem:[%s6675_s8 + $0xc38] sm:$0xff] }
 0x3e8   : > { %6174 = vmatpush.bf16.msrb.mxu2 %v4663_v56  ;;  %v4671_v4 = vpack.c.bf16 %v3835_v19, %v3834_v51  ;;  %v3785_v16 = vcvt.s32.f32 %v2185_v45  ;;  %v2217_v54 = vunpack.c.1.s8 %v685_v21  ;;  %v2232_v27 = vunpack.c.0.s8 %v689_v5  ;;  %v7543_v19 = vpop.f32.mrf.mxu2  ;;  %v7545_v45 = vpop.f32.mrf.mxu3 }
 0x3e9   : > { %v3800_v38 = vcvt.s32.f32 %v2200_v25  ;;  %v3801_v2 = vcvt.s32.f32 %v2201_v34  ;;  %v3816_v18 = vcvt.s32.f32 %v2216_v11  ;;  %v2233_v8 = vunpack.c.1.s8 %v689_v5 }
 0x3ea   : > { %6187 = vmatpush.bf16.msrb.mxu3 %v4671_v4  ;;  %v4646_v59 = vpack.c.bf16 %v3785_v16, %v3784_v58  ;;  %v3817_v49 = vcvt.s32.f32 %v2217_v54  ;;  %v3832_v30 = vcvt.s32.f32 %v2232_v27  ;;  %v2182_v37 = vunpack.c.2.s8 %v676_v12 }
 0x3eb   : > { %v4654_v28 = vpack.c.bf16 %v3801_v2, %v3800_v38  ;;  %v3833_v14 = vcvt.s32.f32 %v2233_v8  ;;  %v2183_v50 = vunpack.c.3.s8 %v676_v12  ;;  %v2198_v6 = vunpack.c.2.s8 %v680_v62  ;;  %v4838_v38 = vld [vmem:[#allocation1 + $0x24] sm:$0xff] }
 0x3ec   : > { %6149 = vmatpush.bf16.msrb.mxu0 %v4646_v59  ;;  %v4662_v20 = vpack.c.bf16 %v3817_v49, %v3816_v18  ;;  %v3782_v33 = vcvt.s32.f32 %v2182_v37  ;;  %v2199_v53 = vunpack.c.3.s8 %v680_v62  ;;  %v2214_v36 = vunpack.c.2.s8 %v684_v57  ;;  %v5960_v2 = vpop.f32.mrf.mxu1 }
 0x3ed   : > { %6162 = vmatpush.bf16.msrb.mxu1 %v4654_v28  ;;  %v4670_v22 = vpack.c.bf16 %v3833_v14, %v3832_v30  ;;  %v3783_v46 = vcvt.s32.f32 %v2183_v50  ;;  %v3798_v9 = vcvt.s32.f32 %v2198_v6  ;;  %v2215_v23 = vunpack.c.3.s8 %v684_v57  ;;  %v4839_v14 = vld [vmem:[#allocation1 + $0x2d] sm:$0xff] }
 0x3ee   : > { %6175 = vmatpush.bf16.msrb.mxu2 %v4662_v20  ;;  %v3799_v21 = vcvt.s32.f32 %v2199_v53  ;;  %v3814_v29 = vcvt.s32.f32 %v2214_v36  ;;  %v2230_v31 = vunpack.c.2.s8 %v688_v1  ;;  %v2231_v17 = vunpack.c.3.s8 %v688_v1 }
 0x3ef   : > { %6188 = vmatpush.bf16.msrb.mxu3 %v4670_v22  ;;  %v4645_v15 = vpack.c.bf16 %v3783_v46, %v3782_v33  ;;  %v3815_v5 = vcvt.s32.f32 %v2215_v23  ;;  %v2180_v47 = vunpack.c.0.s8 %v676_v12  ;;  %v2181_v48 = vunpack.c.1.s8 %v676_v12  ;;  %v703_v12 = vld [vmem:[%s6675_s8 + $0xc58] sm:$0xff]  ;;  %v4840_v33 = vld [vmem:[#allocation1 + $0x36] sm:$0xff] }
 0x3f0   : > { %v4653_v40 = vpack.c.bf16 %v3799_v21, %v3798_v9  ;;  %v3830_v60 = vcvt.s32.f32 %v2230_v31  ;;  %v3831_v24 = vcvt.s32.f32 %v2231_v17  ;;  %v2196_v41 = vunpack.c.0.s8 %v680_v62  ;;  %v4841_v22 = vld [vmem:[#allocation1 + $0x3f] sm:$0xff] }
 0x3f1   : > { %6150 = vmatpush.bf16.msrb.mxu0 %v4645_v15  ;;  %v4661_v55 = vpack.c.bf16 %v3815_v5, %v3814_v29  ;;  %v3780_v43 = vcvt.s32.f32 %v2180_v47  ;;  %v3781_v44 = vcvt.s32.f32 %v2181_v48  ;;  %v2197_v35 = vunpack.c.1.s8 %v680_v62  ;;  %v7550_v62 = vld [vmem:[%s6675_s8 + $0xc78] sm:$0xff]  ;;  %v694_v48 = vld [vmem:[%s6675_s8 + $0xc10] sm:$0xff] }
 0x3f2   : > { %6163 = vmatpush.bf16.msrb.mxu1 %v4653_v40  ;;  %v4669_v13 = vpack.c.bf16 %v3831_v24, %v3830_v60  ;;  %v3796_v63 = vcvt.s32.f32 %v2196_v41  ;;  %v2212_v0 = vunpack.c.0.s8 %v684_v57  ;;  %v2213_v52 = vunpack.c.1.s8 %v684_v57  ;;  %v5973_v40 = vpop.f32.mrf.mxu2  ;;  %v5986_v60 = vpop.f32.mrf.mxu3 }
 0x3f3   : > { %6176 = vmatpush.bf16.msrb.mxu2 %v4661_v55  ;;  %v4644_v61 = vpack.c.bf16 %v3781_v44, %v3780_v43  ;;  %v3797_v51 = vcvt.s32.f32 %v2197_v35  ;;  %v2228_v7 = vunpack.c.0.s8 %v688_v1  ;;  %v2229_v56 = vunpack.c.1.s8 %v688_v1  ;;  %v698_v43 = vld [vmem:[%s6675_s8 + $0xc30] sm:$0xff]  ;;  %v4721_v44 = vld [vmem:[%s7631_s0 + $0x60] sm:$0xf] }
 0x3f4   : > { %6189 = vmatpush.bf16.msrb.mxu3 %v4669_v13  ;;  %v3812_v58 = vcvt.s32.f32 %v2212_v0  ;;  %v3813_v25 = vcvt.s32.f32 %v2213_v52  ;;  %v2258_v34 = vunpack.c.2.s8 %v695_v32  ;;  %v2259_v11 = vunpack.c.3.s8 %v695_v32  ;;  %4843 = vst [vmem:[#allocation1] ss:$9 sm:$0xff] %v4721_v44 }
 0x3f5   : > { %6151 = vmatpush.bf16.msrb.mxu0 %v4644_v61  ;;  %v4652_v4 = vpack.c.bf16 %v3797_v51, %v3796_v63  ;;  %v3828_v16 = vcvt.s32.f32 %v2228_v7  ;;  %v3829_v54 = vcvt.s32.f32 %v2229_v56  ;;  %v2274_v27 = vunpack.c.2.s8 %v7541_v10  ;;  %v702_v51 = vld [vmem:[%s6675_s8 + $0xc50] sm:$0xff] }
 0x3f6   : > { %v4660_v18 = vpack.c.bf16 %v3813_v25, %v3812_v58  ;;  %v3858_v8 = vcvt.s32.f32 %v2258_v34  ;;  %v3859_v57 = vcvt.s32.f32 %v2259_v11  ;;  %v2275_v59 = vunpack.c.3.s8 %v7541_v10  ;;  %v706_v34 = vld [vmem:[%s6675_s8 + $0xc70] sm:$0xff] }
 0x3f7   : > { %6164 = vmatpush.bf16.msrb.mxu1 %v4652_v4  ;;  %v4668_v49 = vpack.c.bf16 %v3829_v54, %v3828_v16  ;;  %v3874_v30 = vcvt.s32.f32 %v2274_v27  ;;  %v2290_v37 = vunpack.c.2.s8 %v703_v12  ;;  %v2291_v28 = vunpack.c.3.s8 %v703_v12 }
 0x3f8   : > { %6177 = vmatpush.bf16.msrb.mxu2 %v4660_v18  ;;  %v4683_v50 = vpack.c.bf16 %v3859_v57, %v3858_v8  ;;  %v3875_v6 = vcvt.s32.f32 %v2275_v59  ;;  %v2306_v1 = vunpack.c.2.s8 %v7550_v62  ;;  %v2307_v20 = vunpack.c.3.s8 %v7550_v62  ;;  %6152 = vmatmul.bf16.vlgmr.msrb.gmra.mxu0 %v4838_v38 }
 0x3f9   : > { %6190 = vmatpush.bf16.msrb.mxu3 %v4668_v49  ;;  %v3890_v53 = vcvt.s32.f32 %v2290_v37  ;;  %v3891_v36 = vcvt.s32.f32 %v2291_v28  ;;  %v2256_v46 = vunpack.c.0.s8 %v695_v32  ;;  %v2257_v9 = vunpack.c.1.s8 %v695_v32 }
 0x3fa   : > { %6196 = vmatpush.bf16.msra.mxu0 %v4683_v50  ;;  %v4691_v23 = vpack.c.bf16 %v3875_v6, %v3874_v30  ;;  %v3906_v21 = vcvt.s32.f32 %v2306_v1  ;;  %v3907_v29 = vcvt.s32.f32 %v2307_v20  ;;  %6165 = vmatmul.bf16.vlgmr.msrb.gmra.mxu1 %v4839_v14  ;;  %v2272_v31 = vunpack.c.0.s8 %v7541_v10 }
 0x3fb   : > { %v4699_v17 = vpack.c.bf16 %v3891_v36, %v3890_v53  ;;  %6178 = vmatmul.bf16.vlgmr.msrb.gmra.mxu2 %v4840_v33  ;;  %v3856_v15 = vcvt.s32.f32 %v2256_v46  ;;  %v3857_v5 = vcvt.s32.f32 %v2257_v9  ;;  %v2273_v47 = vunpack.c.1.s8 %v7541_v10  ;;  %v7568_v36 = vpop.f32.mrf.mxu0 }
 0x3fc   : > { %6209 = vmatpush.bf16.msra.mxu1 %v4691_v23  ;;  %v4707_v24 = vpack.c.bf16 %v3907_v29, %v3906_v21  ;;  %6191 = vmatmul.bf16.vlgmr.msrb.gmra.mxu3 %v4841_v22  ;;  %v3872_v41 = vcvt.s32.f32 %v2272_v31  ;;  %v2288_v39 = vunpack.c.0.s8 %v703_v12  ;;  %v2289_v55 = vunpack.c.1.s8 %v703_v12  ;;  %v7570_v22 = vpop.f32.mrf.mxu1  ;;  %v693_v23 = vld [vmem:[%s6675_s8 + $0xc08] sm:$0xff] }
 0x3fd   : > { %6222 = vmatpush.bf16.msra.mxu2 %v4699_v17  ;;  %v4682_v35 = vpack.c.bf16 %v3857_v5, %v3856_v15  ;;  %v3873_v32 = vcvt.s32.f32 %v2273_v47  ;;  %v2304_v13 = vunpack.c.0.s8 %v7550_v62  ;;  %v2305_v63 = vunpack.c.1.s8 %v7550_v62  ;;  %v697_v47 = vld [vmem:[%s6675_s8 + $0xc28] sm:$0xff] }
 0x3fe   : > { %6235 = vmatpush.bf16.msra.mxu3 %v4707_v24  ;;  %v3888_v0 = vcvt.s32.f32 %v2288_v39  ;;  %v3889_v52 = vcvt.s32.f32 %v2289_v55  ;;  %v2254_v10 = vunpack.c.2.s8 %v694_v48  ;;  %v2255_v61 = vunpack.c.3.s8 %v694_v48 }
 0x3ff   : > { %6197 = vmatpush.bf16.msra.mxu0 %v4682_v35  ;;  %v4690_v7 = vpack.c.bf16 %v3873_v32, %v3872_v41  ;;  %v3904_v56 = vcvt.s32.f32 %v2304_v13  ;;  %v3905_v58 = vcvt.s32.f32 %v2305_v63  ;;  %v2270_v25 = vunpack.c.2.s8 %v698_v43  ;;  %v701_v41 = vld [vmem:[%s6675_s8 + $0xc48] sm:$0xff] }
 0x400   : > { %v4698_v11 = vpack.c.bf16 %v3889_v52, %v3888_v0  ;;  %v3854_v12 = vcvt.s32.f32 %v2254_v10  ;;  %v3855_v4 = vcvt.s32.f32 %v2255_v61  ;;  %v2271_v16 = vunpack.c.3.s8 %v698_v43  ;;  %v705_v35 = vld [vmem:[%s6675_s8 + $0xc68] sm:$0xff] }
 0x401   : > { %6210 = vmatpush.bf16.msra.mxu1 %v4690_v7  ;;  %v4706_v54 = vpack.c.bf16 %v3905_v58, %v3904_v56  ;;  %v3870_v27 = vcvt.s32.f32 %v2270_v25  ;;  %v2286_v62 = vunpack.c.2.s8 %v702_v51  ;;  %v2287_v38 = vunpack.c.3.s8 %v702_v51 }
 0x402   : > { %6223 = vmatpush.bf16.msra.mxu2 %v4698_v11  ;;  %v4681_v2 = vpack.c.bf16 %v3855_v4, %v3854_v12  ;;  %v3871_v18 = vcvt.s32.f32 %v2271_v16  ;;  %v2302_v8 = vunpack.c.2.s8 %v706_v34  ;;  %v2303_v57 = vunpack.c.3.s8 %v706_v34 }
 0x403   : > { %6236 = vmatpush.bf16.msra.mxu3 %v4706_v54  ;;  %v3886_v59 = vcvt.s32.f32 %v2286_v62  ;;  %v3887_v49 = vcvt.s32.f32 %v2287_v38  ;;  %v5946_v30 = vadd.f32 %v7533_v42, %v7529_v26  ;;  %v2252_v37 = vunpack.c.0.s8 %v694_v48  ;;  %v7573_v21 = vpop.f32.mrf.mxu2  ;;  %v5999_v4 = vpop.f32.mrf.mxu0 }
 0x404   : > { %6198 = vmatpush.bf16.msra.mxu0 %v4681_v2  ;;  %v4689_v28 = vpack.c.bf16 %v3871_v18, %v3870_v27  ;;  %v3902_v14 = vcvt.s32.f32 %v2302_v8  ;;  %v3903_v50 = vcvt.s32.f32 %v2303_v57  ;;  %v2253_v6 = vunpack.c.1.s8 %v694_v48  ;;  %v7575_v29 = vpop.f32.mrf.mxu3  ;;  %v6012_v16 = vpop.f32.mrf.mxu1 }
 0x405   : > { %v4697_v1 = vpack.c.bf16 %v3887_v49, %v3886_v59  ;;  %v3852_v20 = vcvt.s32.f32 %v2252_v37  ;;  %v2268_v33 = vunpack.c.0.s8 %v698_v43  ;;  %v2269_v53 = vunpack.c.1.s8 %v698_v43 }
 0x406   : > { %6211 = vmatpush.bf16.msra.mxu1 %v4689_v28  ;;  %v4705_v46 = vpack.c.bf16 %v3903_v50, %v3902_v14  ;;  %v3853_v9 = vcvt.s32.f32 %v2253_v6  ;;  %v2284_v26 = vunpack.c.0.s8 %v702_v51  ;;  %v2285_v42 = vunpack.c.1.s8 %v702_v51  ;;  %v692_v14 = vld [vmem:[%s6675_s8 + $0xc00] sm:$0xff] }
 0x407   : > { %6224 = vmatpush.bf16.msra.mxu2 %v4697_v1  ;;  %v3868_v31 = vcvt.s32.f32 %v2268_v33  ;;  %v3869_v17 = vcvt.s32.f32 %v2269_v53  ;;  %v2300_v15 = vunpack.c.0.s8 %v706_v34  ;;  %v2301_v5 = vunpack.c.1.s8 %v706_v34  ;;  %v696_v33 = vld [vmem:[%s6675_s8 + $0xc20] sm:$0xff] }
 0x408   : > { %6237 = vmatpush.bf16.msra.mxu3 %v4705_v46  ;;  %v4680_v48 = vpack.c.bf16 %v3853_v9, %v3852_v20  ;;  %v3884_v40 = vcvt.s32.f32 %v2284_v26  ;;  %v3885_v60 = vcvt.s32.f32 %v2285_v42  ;;  %v5959_v24 = vadd.f32 %v7537_v3, %v5946_v30  ;;  %v700_v26 = vld [vmem:[%s6675_s8 + $0xc40] sm:$0xff] }
 0x409   : > { %v4688_v39 = vpack.c.bf16 %v3869_v17, %v3868_v31  ;;  %v3900_v55 = vcvt.s32.f32 %v2300_v15  ;;  %v3901_v43 = vcvt.s32.f32 %v2301_v5  ;;  %v2250_v44 = vunpack.c.2.s8 %v693_v23 }
 0x40a   : > { %6199 = vmatpush.bf16.msra.mxu0 %v4680_v48  ;;  %v4696_v32 = vpack.c.bf16 %v3885_v60, %v3884_v40  ;;  %v2251_v13 = vunpack.c.3.s8 %v693_v23  ;;  %v2266_v63 = vunpack.c.2.s8 %v697_v47  ;;  %v2267_v0 = vunpack.c.3.s8 %v697_v47  ;;  %v704_v40 = vld [vmem:[%s6675_s8 + $0xc60] sm:$0xff] }
 0x40b   : > { %6212 = vmatpush.bf16.msra.mxu1 %v4688_v39  ;;  %v4704_v52 = vpack.c.bf16 %v3901_v43, %v3900_v55  ;;  %v3850_v10 = vcvt.s32.f32 %v2250_v44  ;;  %v2282_v61 = vunpack.c.2.s8 %v701_v41  ;;  %v2283_v51 = vunpack.c.3.s8 %v701_v41  ;;  %v6025_v2 = vpop.f32.mrf.mxu2 }
 0x40c   : > { %6225 = vmatpush.bf16.msra.mxu2 %v4696_v32  ;;  %v3851_v7 = vcvt.s32.f32 %v2251_v13  ;;  %v3866_v56 = vcvt.s32.f32 %v2266_v63  ;;  %v3867_v3 = vcvt.s32.f32 %v2267_v0  ;;  %v2298_v58 = vunpack.c.2.s8 %v705_v35  ;;  %v6038_v18 = vpop.f32.mrf.mxu3 }
 0x40d   : > { %6238 = vmatpush.bf16.msra.mxu3 %v4704_v52  ;;  %v3882_v25 = vcvt.s32.f32 %v2282_v61  ;;  %v3883_v34 = vcvt.s32.f32 %v2283_v51  ;;  %v2299_v11 = vunpack.c.3.s8 %v705_v35  ;;  %v5972_v12 = vadd.f32 %v7543_v19, %v5959_v24 }
 0x40e   : > { %v4679_v54 = vpack.c.bf16 %v3851_v7, %v3850_v10  ;;  %v4687_v27 = vpack.c.bf16 %v3867_v3, %v3866_v56  ;;  %v3898_v62 = vcvt.s32.f32 %v2298_v58  ;;  %v2248_v38 = vunpack.c.0.s8 %v693_v23 }
 0x40f   : > { %v4695_v8 = vpack.c.bf16 %v3883_v34, %v3882_v25  ;;  %v3899_v57 = vcvt.s32.f32 %v2299_v11  ;;  %v7583_v59 = vadd.f32 %v7545_v45, %v5972_v12  ;;  %v2249_v49 = vunpack.c.1.s8 %v693_v23 }
 0x410   : > { %6200 = vmatpush.bf16.msra.mxu0 %v4679_v54  ;;  %6213 = vmatpush.bf16.msra.mxu1 %v4687_v27  ;;  %v3848_v19 = vcvt.s32.f32 %v2248_v38  ;;  %v2264_v30 = vunpack.c.0.s8 %v697_v47  ;;  %v2265_v37 = vunpack.c.1.s8 %v697_v47  ;;  %v2280_v28 = vunpack.c.0.s8 %v701_v41 }
 0x411   : > { %6226 = vmatpush.bf16.msra.mxu2 %v4695_v8  ;;  %v4703_v50 = vpack.c.bf16 %v3899_v57, %v3898_v62  ;;  %v3849_v6 = vcvt.s32.f32 %v2249_v49  ;;  %v2281_v1 = vunpack.c.1.s8 %v701_v41  ;;  %v2296_v20 = vunpack.c.0.s8 %v705_v35 }
 0x412   : > { %v3864_v53 = vcvt.s32.f32 %v2264_v30  ;;  %v3865_v46 = vcvt.s32.f32 %v2265_v37  ;;  %v3880_v45 = vcvt.s32.f32 %v2280_v28  ;;  %v2297_v9 = vunpack.c.1.s8 %v705_v35  ;;  %v4844_v28 = vld [vmem:[#allocation1] sm:$0xff] }
 0x413   : > { %6239 = vmatpush.bf16.msra.mxu3 %v4703_v50  ;;  %v4678_v42 = vpack.c.bf16 %v3849_v6, %v3848_v19  ;;  %v3881_v23 = vcvt.s32.f32 %v2281_v1  ;;  %v3896_v31 = vcvt.s32.f32 %v2296_v20  ;;  %v2246_v17 = vunpack.c.2.s8 %v692_v14  ;;  %v4845_v1 = vld [vmem:[#allocation1 + $0x9] sm:$0xff]  ;;  %v4846_v20 = vld [vmem:[#allocation1 + $0x12] sm:$0xff] }
 0x414   : > { %v4686_v15 = vpack.c.bf16 %v3865_v46, %v3864_v53  ;;  %v3897_v5 = vcvt.s32.f32 %v2297_v9  ;;  %v2247_v47 = vunpack.c.3.s8 %v692_v14  ;;  %v2262_v48 = vunpack.c.2.s8 %v696_v33 }
 0x415   : > { %6201 = vmatpush.bf16.msra.mxu0 %v4678_v42  ;;  %v4694_v60 = vpack.c.bf16 %v3881_v23, %v3880_v45  ;;  %v3846_v24 = vcvt.s32.f32 %v2246_v17  ;;  %v2263_v41 = vunpack.c.3.s8 %v696_v33  ;;  %v2278_v39 = vunpack.c.2.s8 %v700_v26 }
 0x416   : > { %6214 = vmatpush.bf16.msra.mxu1 %v4686_v15  ;;  %v4702_v55 = vpack.c.bf16 %v3897_v5, %v3896_v31  ;;  %v3847_v43 = vcvt.s32.f32 %v2247_v47  ;;  %v3862_v44 = vcvt.s32.f32 %v2262_v48  ;;  %v2279_v35 = vunpack.c.3.s8 %v700_v26 }
 0x417   : > { %6227 = vmatpush.bf16.msra.mxu2 %v4694_v60  ;;  %v3863_v32 = vcvt.s32.f32 %v2263_v41  ;;  %v3878_v13 = vcvt.s32.f32 %v2278_v39  ;;  %v2294_v63 = vunpack.c.2.s8 %v704_v40  ;;  %v2295_v0 = vunpack.c.3.s8 %v704_v40 }
 0x418   : > { %6240 = vmatpush.bf16.msra.mxu3 %v4702_v55  ;;  %v4677_v52 = vpack.c.bf16 %v3847_v43, %v3846_v24  ;;  %v3879_v10 = vcvt.s32.f32 %v2279_v35  ;;  %v2244_v61 = vunpack.c.0.s8 %v692_v14  ;;  %v2245_v51 = vunpack.c.1.s8 %v692_v14 }
 0x419   : > { %v4685_v7 = vpack.c.bf16 %v3863_v32, %v3862_v44  ;;  %v3894_v56 = vcvt.s32.f32 %v2294_v63  ;;  %v3895_v3 = vcvt.s32.f32 %v2295_v0  ;;  %v2260_v58 = vunpack.c.0.s8 %v696_v33 }
 0x41a   : > { %6202 = vmatpush.bf16.msra.mxu0 %v4677_v52  ;;  %v4693_v25 = vpack.c.bf16 %v3879_v10, %v3878_v13  ;;  %v3844_v34 = vcvt.s32.f32 %v2244_v61  ;;  %v3845_v11 = vcvt.s32.f32 %v2245_v51  ;;  %v2261_v12 = vunpack.c.1.s8 %v696_v33 }
 0x41b   : > { %6215 = vmatpush.bf16.msra.mxu1 %v4685_v7  ;;  %v4701_v4 = vpack.c.bf16 %v3895_v3, %v3894_v56  ;;  %v3860_v16 = vcvt.s32.f32 %v2260_v58  ;;  %v2276_v54 = vunpack.c.0.s8 %v700_v26  ;;  %v2277_v27 = vunpack.c.1.s8 %v700_v26 }
 0x41c   : > { %6228 = vmatpush.bf16.msra.mxu2 %v4693_v25  ;;  %v4676_v62 = vpack.c.bf16 %v3845_v11, %v3844_v34  ;;  %v3861_v38 = vcvt.s32.f32 %v2261_v12  ;;  %v2292_v2 = vunpack.c.0.s8 %v704_v40  ;;  %v2293_v18 = vunpack.c.1.s8 %v704_v40 }
 0x41d   : > { %6241 = vmatpush.bf16.msra.mxu3 %v4701_v4  ;;  %v3876_v8 = vcvt.s32.f32 %v2276_v54  ;;  %v3877_v57 = vcvt.s32.f32 %v2277_v27  ;;  %v5998_v49 = vadd.f32 %v7568_v36, %v7583_v59  ;;  %v4847_v36 = vld [vmem:[#allocation1 + $0x1b] sm:$0xff]  ;;  %v6578_v10 = vmov 0.0  }
 0x41e   : > { %6203 = vmatpush.bf16.msra.mxu0 %v4676_v62  ;;  %v4684_v19 = vpack.c.bf16 %v3861_v38, %v3860_v16  ;;  %v3892_v30 = vcvt.s32.f32 %v2292_v2  ;;  %v3893_v37 = vcvt.s32.f32 %v2293_v18  ;;  %307 = vst [vmem:[%s302_s27] sm:$0x3] %v6578_v10 }
 0x41f   : > { %v4692_v14 = vpack.c.bf16 %v3877_v57, %v3876_v8  ;;  %v6011_v50 = vadd.f32 %v7570_v22, %v5998_v49  ;;  %v6458_v49 = vld [vmem:[%s254_s7] ss:$0 sm:$0xff] }
 0x420   : > { %6216 = vmatpush.bf16.msra.mxu1 %v4684_v19  ;;  %v4700_v6 = vpack.c.bf16 %v3893_v37, %v3892_v30  ;;  %v6459_v19 = vld [vmem:[%s298_s28] ss:$0 sm:$0xff] }
 0x421   : > { %6229 = vmatpush.bf16.msra.mxu2 %v4692_v14  ;;  %6204 = vmatmul.bf16.vlgmr.msra.gmra.mxu0 %v4844_v28  ;;  %v6024_v33 = vadd.f32 %v7573_v21, %v6011_v50 }
 0x422   : > { %6242 = vmatpush.bf16.msra.mxu3 %v4700_v6 }
 0x423   : > { %6217 = vmatmul.bf16.vlgmr.msra.gmra.mxu1 %v4845_v1  ;;  %v6037_v59 = vadd.f32 %v7575_v29, %v6024_v33  ;;  %v6049_v53 = vpop.f32.mrf.mxu0 }
 0x424   : > { %6230 = vmatmul.bf16.vlgmr.msra.gmra.mxu2 %v4846_v20 }
 0x425   : > { %6243 = vmatmul.bf16.vlgmr.msra.gmra.mxu3 %v4847_v36  ;;  %v6050_v46 = vadd.f32 %v6049_v53, %v6037_v59  ;;  %v6062_v22 = vpop.f32.mrf.mxu1  ;;  %v4708_v38 = vld [vmem:[%s302_s27] sm:$0x3] }
 0x427   : > { %v6063_v45 = vadd.f32 %v6062_v22, %v6050_v46 }
 0x42b   : > { %v6051_v21 = vpop.f32.mrf.mxu0 }
 0x42c   : > { %v6075_v9 = vpop.f32.mrf.mxu2 }
 0x42d   : > { %v6076_v26 = vadd.f32 %v6075_v9, %v6063_v45  ;;  %v6088_v42 = vpop.f32.mrf.mxu3  ;;  %v6064_v23 = vpop.f32.mrf.mxu1 }
 0x42f   : > { %v6089_v31 = vadd.f32 %v6088_v42, %v6076_v26 }
 0x434   : > { %v6077_v29 = vpop.f32.mrf.mxu2 }
 0x435   : > { %v6090_v17 = vpop.f32.mrf.mxu3 }
 0x44c   : > { %v6101_v15 = vpop.f32.mrf.mxu0 }
 0x44d   : > { %v6102_v5 = vadd.f32 %v6101_v15, %v6089_v31 }
 0x44e   : > { %v6114_v47 = vpop.f32.mrf.mxu1 }
 0x44f   : > { %v6115_v48 = vadd.f32 %v6114_v47, %v6102_v5 }
 0x454   : > { %v6103_v40 = vpop.f32.mrf.mxu0 }
 0x455   : > { %v6127_v60 = vpop.f32.mrf.mxu2 }
 0x456   : > { %v6128_v24 = vadd.f32 %v6127_v60, %v6115_v48  ;;  %v6140_v41 = vpop.f32.mrf.mxu3  ;;  %v6116_v39 = vpop.f32.mrf.mxu1 }
 0x458   : > { %v6141_v55 = vadd.f32 %v6140_v41, %v6128_v24 }
 0x45d   : > { %v6129_v43 = vpop.f32.mrf.mxu2 }
 0x45e   : > { %v6142_v44 = vpop.f32.mrf.mxu3 }
 0x475   : > { %v6153_v35 = vpop.f32.mrf.mxu0 }
 0x476   : > { %v6154_v7 = vadd.f32 %v6153_v35, %v6141_v55 }
 0x477   : > { %v6166_v32 = vpop.f32.mrf.mxu1 }
 0x478   : > { %v6167_v56 = vadd.f32 %v6166_v32, %v6154_v7 }
 0x47d   : > { %v6155_v13 = vpop.f32.mrf.mxu0 }
 0x47e   : > { %v6179_v63 = vpop.f32.mrf.mxu2 }
 0x47f   : > { %v6192_v0 = vpop.f32.mrf.mxu3  ;;  %v6168_v52 = vpop.f32.mrf.mxu1  ;;  %v6180_v3 = vadd.f32 %v6179_v63, %v6167_v56 }
 0x481   : > { %v6193_v25 = vadd.f32 %v6192_v0, %v6180_v3 }
 0x486   : > { %v6181_v61 = vpop.f32.mrf.mxu2 }
 0x487   : > { %v6194_v51 = vpop.f32.mrf.mxu3 }
 0x49e   : > { %v6205_v58 = vpop.f32.mrf.mxu0 }
 0x49f   : > { %v6206_v11 = vadd.f32 %v6205_v58, %v6193_v25 }
 0x4a0   : > { %v6218_v34 = vpop.f32.mrf.mxu1 }
 0x4a1   : > { %v6219_v12 = vadd.f32 %v6218_v34, %v6206_v11 }
 0x4a6   : > { %v6207_v4 = vpop.f32.mrf.mxu0 }
 0x4a7   : > { %v6231_v16 = vpop.f32.mrf.mxu2 }
 0x4a8   : > { %v6232_v54 = vadd.f32 %v6231_v16, %v6219_v12  ;;  %v6244_v27 = vpop.f32.mrf.mxu3  ;;  %v6220_v62 = vpop.f32.mrf.mxu1 }
 0x4aa   : > { %v6245_v2 = vadd.f32 %v6244_v27, %v6232_v54 }
 0x4ac   : > { %v6248_v18 = vadd.f32 %v6245_v2, %v4708_v38 }
 0x4ae   : > { %6249 = vst [vmem:[%s302_s27] sm:$0x3] %v6248_v18 }
 0x4af   : > { %v6233_v8 = vpop.f32.mrf.mxu2 }
 0x4b0   : > { %v6246_v57 = vpop.f32.mrf.mxu3 }
 0x4b5   : > { %v6253_v30 = vld [vmem:[%s302_s27] sm:$0x3] }
 0x4b6   : > { %v6258_v37 = vmul.f32 %v6458_v49, %v6253_v30 }
 0x4b8   : > { %v6263_v28 = vadd.f32 %v6459_v19, %v6258_v37 }
 0x4ba   : > { %v6264_v14 = vmax.f32 %v6263_v28, 0.0 }
 0x4bc   : > { %6265 = vst [vmem:[%s302_s27] sm:$0x3] %v6264_v14 }
 0x4bd PF: > { %s20_s20 = sadd.s32 1, %s6574_s20   ;;  %s7638_s15 = smov %s6558_s16 }
 0x4be   : > { %p17_p0 = scmp.ge.s32.totalorder %s20_s20, 7   ;;  %s7639_s16 = smov %s6562_s17 }
 0x4bf   : > { %s7640_s17 = smov %s6649_s26  ;;  %s7641_s18 = smov %s6570_s19 }
 0x4c0   : > { %s7642_s19 = smov %s7644_s22  ;;  %19 = sbr.rel (!%p17_p0) target bundleno = 6 (0x6), region = 103 }
 0x4c5   :  { %6285 = vsyncpa [#allocation3], 1 }
 0x4c6   :  { %6287 = vsyncpa [#allocation3 + $0x1], 1 }
 0x4c7   :  { %6288 = vsyncpa [#allocation5], 1 }
 0x4c8   :  { %6290 = vsyncpa [#allocation5 + $0x1], 1 }

</bundles_post_ra>
